<compile_context>
chip_gen: v7x
topology: tpu7x:2x2x1
jax: 0.10.0
libtpu: 0.0.40
codegen_flags: <defaults>
</compile_context>

<pallas_src>
import functools

import jax
import jax.numpy as jnp
from jax import lax
from jax.experimental import pallas as pl
from jax.experimental.pallas import tpu as pltpu


def _maxpool2x2(y, w_pre):
    """2x2 / stride-2 max pool on a (B*Hp*Wp, C) f32 value laid out row-major
    over (batch, row, col).  Uses only leading-dim reshapes + pairwise VPU max
    (no 5-D intermediates, no minor-dim reshapes)."""
    m, c = y.shape
    y = y.reshape(m // 2, 2, c)
    y = jnp.maximum(y[:, 0], y[:, 1])                  # pool adjacent columns
    r = m // 2
    y = y.reshape(r // w_pre, 2, w_pre // 2, c)
    y = jnp.maximum(y[:, 0], y[:, 1])                  # pool adjacent rows
    return y.reshape(r // 2, c)                        # (B*Hp/2*Wp/2, C)


def _convnet_kernel(x1_ref, w1_ref, wr_ref, scale_ref, bias_ref, o_ref,
                    pad2, pad3, pad4, *, B, H, W):
    """Fused 4-block Convnet forward for a block of B images.

    x1_ref:    (B*H*W, K1p)   layer-1 im2col'd input (bf16, K padded to 32)
    w1_ref:    (K1p, C)       layer-1 weight (bf16)
    wr_ref:    (3, 9*C, C)    layer 2-4 weights, tap-major rows (bf16)
    scale_ref: (4, C)         folded BN scale per layer (f32)
    bias_ref:  (4, C)         folded BN bias per layer (f32)
    o_ref:     (B, C) if H/16*W/16 == 1 else (B, Hf*Wf, C)       (f32)
    pad2/3/4:  (B, Hc+2, Wc+2, C) VMEM scratch, zero-padded layer inputs (bf16)
    """
    C = wr_ref.shape[-1]

    # ---- Block 1: one (B*H*W, K1p) @ (K1p, C) MXU matmul over the whole batch block ----
    acc = jnp.dot(x1_ref[...], w1_ref[...], preferred_element_type=jnp.float32)
    y = jnp.maximum(acc * scale_ref[0:1, :] + bias_ref[0:1, :], 0.0)
    y = _maxpool2x2(y, W)                              # (B*H/2*W/2, C) f32

    # ---- Blocks 2..4: border-only zero + interior store + 9 accumulated tap matmuls ----
    pads = (pad2, pad3, pad4)
    Hc, Wc = H // 2, W // 2
    for l in range(3):
        p = pads[l]
        # Clear only the 1-pixel border; the interior is fully overwritten below.
        # Done every grid step so megacore (per-core scratch) stays correct.
        zrow = jnp.zeros((B, 1, Wc + 2, C), dtype=p.dtype)
        zcol = jnp.zeros((B, Hc, 1, C), dtype=p.dtype)
        p[:, 0:1, :, :] = zrow
        p[:, Hc + 1:Hc + 2, :, :] = zrow
        p[:, 1:Hc + 1, 0:1, :] = zcol
        p[:, 1:Hc + 1, Wc + 1:Wc + 2, :] = zcol
        # Interior <- previous pooled activation (bf16 MXU operand).
        p[:, 1:Hc + 1, 1:Wc + 1, :] = y.reshape(B, Hc, Wc, C).astype(p.dtype)

        # Conv as 9 shifted tap matmuls accumulated in f32 (no im2col scratch,
        # no masked 64-lane im2col stores).  Weight rows are tap-major, so tap
        # k uses rows [k*C, (k+1)*C).
        M = B * Hc * Wc
        acc = None
        for dy in range(3):
            for dx in range(3):
                k = dy * 3 + dx
                tap = p[:, dy:dy + Hc, dx:dx + Wc, :].reshape(M, C)
                part = jnp.dot(tap, wr_ref[l, k * C:(k + 1) * C, :],
                               preferred_element_type=jnp.float32)
                acc = part if acc is None else acc + part

        y = jnp.maximum(acc * scale_ref[l + 1:l + 2, :]
                        + bias_ref[l + 1:l + 2, :], 0.0)
        y = _maxpool2x2(y, Wc)                         # (B*Hc/2*Wc/2, C)
        Hc, Wc = Hc // 2, Wc // 2

    Hf, Wf = Hc, Wc
    if Hf * Wf == 1:
        # NCHW flatten of (B, C, 1, 1) is just (B, C): flat, lane-dense store.
        o_ref[...] = y
    else:
        # TODO(synk): fold the NCHW transpose into the kernel for Hf*Wf > 1 too.
        o_ref[...] = y.reshape(B, Hf * Wf, C)


@jax.jit
def convnet_pallas(x_nchw, params):
    """Full Convnet forward (eval mode). Input NCHW; output (N, C * H/16 * W/16)."""
    eps = 1e-5
    N, Cin, H, W = x_nchw.shape
    C = params[0]["w"].shape[-1]
    assert H % 16 == 0 and W % 16 == 0, "need 4 rounds of 2x2 pooling"
    assert all(q["w"].shape[-1] == C for q in params)
    assert C % 8 == 0

    # Batch blocking: fold B_blk images into each grid step (big matmul M).
    # At H=W=16 per-image VMEM scratch is only ~O(100 KB), so 8 images always
    # fit comfortably; shrink B_blk for much larger H/W (v7x has 64 MiB VMEM).
    B_blk = N if N <= 8 else 8
    G = -(-N // B_blk)                                 # ceil(N / B_blk)
    N_pad = G * B_blk
    if N_pad != N:
        x_nchw = jnp.pad(x_nchw, ((0, N_pad - N), (0, 0), (0, 0), (0, 0)))

    # --- layer-1 im2col in the wrapper (Cin=3 would starve the MXU K dim) ---
    # TODO(synk): for large H/W on v5e, build this in-kernel from the raw NHWC
    # block to avoid the ~5x HBM inflation of the 9-tap + pad-to-32 layout.
    x = jnp.transpose(x_nchw, (0, 2, 3, 1))                     # NHWC
    xp = jnp.pad(x, ((0, 0), (1, 1), (1, 1), (0, 0)))
    cols = jnp.concatenate(
        [xp[:, dy:dy + H, dx:dx + W, :] for dy in range(3) for dx in range(3)],
        axis=-1)                                                # (Np, H, W, 9*Cin)
    K1 = 9 * Cin
    K1p = ((K1 + 31) // 32) * 32                                # pad contraction dim
    x1 = jnp.pad(cols.reshape(N_pad * H * W, K1),
                 ((0, 0), (0, K1p - K1))).astype(jnp.bfloat16)  # (Np*H*W, K1p)

    # --- fold conv bias + BatchNorm running stats into one scale/bias ---
    scales, biases = [], []
    for q in params:
        s = q["gamma"] / jnp.sqrt(q["var"] + eps)
        scales.append(s)
        biases.append((q["b"] - q["mean"]) * s + q["beta"])
    scales = jnp.stack(scales).astype(jnp.float32)              # (4, C)
    biases = jnp.stack(biases).astype(jnp.float32)              # (4, C)

    # --- weights: (3,3,Cin,Cout) -> (9*Cin, Cout), bf16 for the MXU ---
    w1 = jnp.pad(params[0]["w"].reshape(K1, C),
                 ((0, K1p - K1), (0, 0))).astype(jnp.bfloat16)   # (K1p, C)
    wr = jnp.stack([params[i]["w"].reshape(9 * C, C)
                    for i in range(1, 4)]).astype(jnp.bfloat16)  # (3, 9C, C)

    Hf, Wf = H // 16, W // 16
    flat_out = (Hf * Wf == 1)
    if flat_out:
        out_shape = jax.ShapeDtypeStruct((N_pad, C), jnp.float32)
        out_spec = pl.BlockSpec((B_blk, C), lambda n: (n, 0))
    else:
        out_shape = jax.ShapeDtypeStruct((N_pad, Hf * Wf, C), jnp.float32)
        out_spec = pl.BlockSpec((B_blk, Hf * Wf, C), lambda n: (n, 0, 0))

    kernel = functools.partial(_convnet_kernel, B=B_blk, H=H, W=W)
    out = pl.pallas_call(
        kernel,
        out_shape=out_shape,
        grid=(G,),
        in_specs=[
            pl.BlockSpec((B_blk * H * W, K1p), lambda n: (n, 0)),
            # Grid-invariant operands.  TODO(synk): pipeline_mode=pl.Buffered(1)
            # to drop their second pipeline buffer once VMEM headroom matters.
            pl.BlockSpec((K1p, C), lambda n: (0, 0)),
            pl.BlockSpec((3, 9 * C, C), lambda n: (0, 0, 0)),
            pl.BlockSpec((4, C), lambda n: (0, 0)),
            pl.BlockSpec((4, C), lambda n: (0, 0)),
        ],
        out_specs=out_spec,
        scratch_shapes=[
            pltpu.VMEM((B_blk, H // 2 + 2, W // 2 + 2, C), jnp.bfloat16),  # pad2
            pltpu.VMEM((B_blk, H // 4 + 2, W // 4 + 2, C), jnp.bfloat16),  # pad3
            pltpu.VMEM((B_blk, H // 8 + 2, W // 8 + 2, C), jnp.bfloat16),  # pad4
        ],
        compiler_params=pltpu.CompilerParams(
            dimension_semantics=("parallel",),          # batch-block axis
            vmem_limit_bytes=32 * 1024 * 1024),
    )(x1, w1, wr, scales, biases)

    out = out[:N]
    if flat_out:
        return out                                      # (N, C) == NCHW flatten
    # PyTorch x.view(N, -1) flattens in NCHW order.
    return jnp.transpose(out, (0, 2, 1)).reshape(N, -1)


def convnet_ref(x_nchw, params, matmul_dtype=jnp.float32):
    """Pure-JAX/XLA reference with identical math; `matmul_dtype` controls the
    conv-operand precision (bf16 mirrors the kernel's MXU inputs)."""
    eps = 1e-5
    x = jnp.transpose(x_nchw, (0, 2, 3, 1))                     # NHWC
    for q in params:
        y = lax.conv_general_dilated(
            x.astype(matmul_dtype), q["w"].astype(matmul_dtype),
            window_strides=(1, 1), padding=((1, 1), (1, 1)),
            dimension_numbers=("NHWC", "HWIO", "NHWC"),
            preferred_element_type=jnp.float32)
        s = q["gamma"] / jnp.sqrt(q["var"] + eps)
        y = y * s + ((q["b"] - q["mean"]) * s + q["beta"])
        y = jnp.maximum(y, 0.0)
        x = lax.reduce_window(y, -jnp.inf, lax.max,
                              (1, 2, 2, 1), (1, 2, 2, 1), "VALID")
    x = jnp.transpose(x, (0, 3, 1, 2))
    return x.reshape(x.shape[0], -1)


def init_params(key, in_channel=3, hid_channel=64, out_channel=64):
    chans = [in_channel, hid_channel, hid_channel, hid_channel, out_channel]
    params = []
    for i in range(4):
        cin, cout = chans[i], chans[i + 1]
        key, kw, kb, kg, kbe, km, kv = jax.random.split(key, 7)
        params.append(dict(
            w=jax.random.normal(kw, (3, 3, cin, cout), jnp.float32) * 0.1,
            b=jax.random.normal(kb, (cout,), jnp.float32) * 0.1,
            gamma=jax.random.uniform(kg, (cout,), jnp.float32, 0.5, 1.5),
            beta=jax.random.normal(kbe, (cout,), jnp.float32) * 0.1,
            mean=jax.random.normal(km, (cout,), jnp.float32) * 0.1,
            var=jax.random.uniform(kv, (cout,), jnp.float32, 0.5, 1.5),
        ))
    return params


if __name__ == "__main__":
    key = jax.random.PRNGKey(0)
    key, kx = jax.random.split(key)

    # batch=2, in_channel=3, spatial=16 -> output (2, 64) after 4 pools.
    x = jax.random.normal(kx, (2, 3, 16, 16), jnp.float32)
    params = init_params(key)

    out = jax.block_until_ready(convnet_pallas(x, params))
    assert out.shape == (2, 64), out.shape

    # Matched-precision reference (bf16 matmul operands, f32 accumulate/BN).
    ref_bf16 = jax.block_until_ready(convnet_ref(x, params, jnp.bfloat16))
    assert jnp.allclose(out, ref_bf16, atol=1e-2, rtol=1e-2), \
        "mismatch vs matched-precision reference"

    # Full-f32 reference: loose tolerance accounts for the intentional bf16
    # quantization of the matmul operands inside the kernel.
    ref_f32 = jax.block_until_ready(convnet_ref(x, params, jnp.float32))
    assert jnp.allclose(out, ref_f32, atol=1e-1, rtol=1e-1), \
        "mismatch vs f32 reference"

    print("KERNEL_OK")
</pallas_src>

<mosaic_0001>
module attributes {stable_mosaic.version = 11 : i64} {
  func.func @_convnet_kernel(%arg0: i32, %arg1: memref<512x32xbf16, #tpu.memory_space<vmem>>, %arg2: memref<32x64xbf16, #tpu.memory_space<vmem>>, %arg3: memref<3x576x64xbf16, #tpu.memory_space<vmem>>, %arg4: memref<4x64xf32, #tpu.memory_space<vmem>>, %arg5: memref<4x64xf32, #tpu.memory_space<vmem>>, %arg6: memref<2x64xf32, #tpu.memory_space<vmem>>, %arg7: memref<2x10x10x64xbf16, #tpu.memory_space<vmem>>, %arg8: memref<2x6x6x64xbf16, #tpu.memory_space<vmem>>, %arg9: memref<2x4x4x64xbf16, #tpu.memory_space<vmem>>) attributes {dimension_semantics = [#tpu.dimension_semantics<parallel>], iteration_bounds = array<i64: 1>, scalar_prefetch = 0 : i64, scratch_operands = 3 : i64, tpu.core_type = #tpu.core_type<tc>, window_params = [{transform_indices = @transform_0, window_bounds = array<i64: 512, 32>}, {pipeline_mode = #tpu.pipeline_mode<synchronous>, transform_indices = @transform_1, window_bounds = array<i64: 32, 64>}, {pipeline_mode = #tpu.pipeline_mode<synchronous>, transform_indices = @transform_2, window_bounds = array<i64: 3, 576, 64>}, {pipeline_mode = #tpu.pipeline_mode<synchronous>, transform_indices = @transform_3, window_bounds = array<i64: 4, 64>}, {pipeline_mode = #tpu.pipeline_mode<synchronous>, transform_indices = @transform_4, window_bounds = array<i64: 4, 64>}, {transform_indices = @transform_5, window_bounds = array<i64: 2, 64>}]} {
    %c0 = arith.constant 0 : index
    %c0_0 = arith.constant 0 : index
    %0 = vector.load %arg1[%c0, %c0_0] : memref<512x32xbf16, #tpu.memory_space<vmem>>, vector<512x32xbf16>
    %c0_1 = arith.constant 0 : index
    %c0_2 = arith.constant 0 : index
    %1 = vector.load %arg2[%c0_1, %c0_2] : memref<32x64xbf16, #tpu.memory_space<vmem>>, vector<32x64xbf16>
    %cst = arith.constant dense<0.000000e+00> : vector<512x64xf32>
    %2 = tpu.matmul %0, %1, %cst {dimension_numbers = #tpu.dot_dimension_numbers<[1], [0], [0], [1], [0, 0, 1, 1], [], []>} : vector<512x32xbf16>, vector<32x64xbf16>, vector<512x64xf32> -> vector<512x64xf32>
    %c0_3 = arith.constant 0 : index
    %c0_4 = arith.constant 0 : index
    %3 = vector.load %arg4[%c0_3, %c0_4] : memref<4x64xf32, #tpu.memory_space<vmem>>, vector<1x64xf32>
    %4 = vector.broadcast %3 : vector<1x64xf32> to vector<512x64xf32>
    %5 = arith.mulf %2, %4 : vector<512x64xf32>
    %c0_5 = arith.constant 0 : index
    %c0_6 = arith.constant 0 : index
    %6 = vector.load %arg5[%c0_5, %c0_6] : memref<4x64xf32, #tpu.memory_space<vmem>>, vector<1x64xf32>
    %7 = vector.broadcast %6 : vector<1x64xf32> to vector<512x64xf32>
    %8 = arith.addf %5, %7 : vector<512x64xf32>
    %cst_7 = arith.constant 0.000000e+00 : f32
    %9 = vector.broadcast %cst_7 : f32 to vector<512x64xf32>
    %10 = arith.maximumf %8, %9 : vector<512x64xf32>
    %11 = vector.shape_cast %10 : vector<512x64xf32> to vector<256x2x64xf32>
    %12 = vector.extract_strided_slice %11 {offsets = [0, 0, 0], sizes = [256, 1, 64], strides = [1, 1, 1]} : vector<256x2x64xf32> to vector<256x1x64xf32>
    %13 = vector.shape_cast %12 : vector<256x1x64xf32> to vector<256x64xf32>
    %14 = vector.extract_strided_slice %11 {offsets = [0, 1, 0], sizes = [256, 1, 64], strides = [1, 1, 1]} : vector<256x2x64xf32> to vector<256x1x64xf32>
    %15 = vector.shape_cast %14 : vector<256x1x64xf32> to vector<256x64xf32>
    %16 = arith.maximumf %13, %15 : vector<256x64xf32>
    %17 = vector.shape_cast %16 : vector<256x64xf32> to vector<16x2x8x64xf32>
    %18 = vector.extract_strided_slice %17 {offsets = [0, 0, 0, 0], sizes = [16, 1, 8, 64], strides = [1, 1, 1, 1]} : vector<16x2x8x64xf32> to vector<16x1x8x64xf32>
    %19 = vector.shape_cast %18 : vector<16x1x8x64xf32> to vector<16x8x64xf32>
    %20 = vector.extract_strided_slice %17 {offsets = [0, 1, 0, 0], sizes = [16, 1, 8, 64], strides = [1, 1, 1, 1]} : vector<16x2x8x64xf32> to vector<16x1x8x64xf32>
    %21 = vector.shape_cast %20 : vector<16x1x8x64xf32> to vector<16x8x64xf32>
    %22 = arith.maximumf %19, %21 : vector<16x8x64xf32>
    %23 = vector.shape_cast %22 : vector<16x8x64xf32> to vector<128x64xf32>
    %cst_8 = arith.constant 0.000000e+00 : bf16
    %24 = vector.broadcast %cst_8 : bf16 to vector<2x1x10x64xbf16>
    %cst_9 = arith.constant 0.000000e+00 : bf16
    %25 = vector.broadcast %cst_9 : bf16 to vector<2x8x1x64xbf16>
    %c0_10 = arith.constant 0 : index
    %c0_11 = arith.constant 0 : index
    %c0_12 = arith.constant 0 : index
    %c0_13 = arith.constant 0 : index
    %26 = vector.load %arg7[%c0_10, %c0_11, %c0_12, %c0_13] : memref<2x10x10x64xbf16, #tpu.memory_space<vmem>>, vector<2x1x10x64xbf16>
    tpu.vector_store %arg7[%c0_10, %c0_11, %c0_12, %c0_13], %24 {strides = array<i32>} : memref<2x10x10x64xbf16, #tpu.memory_space<vmem>>, vector<2x1x10x64xbf16>,
    %c0_14 = arith.constant 0 : index
    %c9 = arith.constant 9 : index
    %c0_15 = arith.constant 0 : index
    %c0_16 = arith.constant 0 : index
    %27 = vector.load %arg7[%c0_14, %c9, %c0_15, %c0_16] : memref<2x10x10x64xbf16, #tpu.memory_space<vmem>>, vector<2x1x10x64xbf16>
    tpu.vector_store %arg7[%c0_14, %c9, %c0_15, %c0_16], %24 {strides = array<i32>} : memref<2x10x10x64xbf16, #tpu.memory_space<vmem>>, vector<2x1x10x64xbf16>,
    %c0_17 = arith.constant 0 : index
    %c1 = arith.constant 1 : index
    %c0_18 = arith.constant 0 : index
    %c0_19 = arith.constant 0 : index
    %28 = vector.load %arg7[%c0_17, %c1, %c0_18, %c0_19] : memref<2x10x10x64xbf16, #tpu.memory_space<vmem>>, vector<2x8x1x64xbf16>
    tpu.vector_store %arg7[%c0_17, %c1, %c0_18, %c0_19], %25 {strides = array<i32>} : memref<2x10x10x64xbf16, #tpu.memory_space<vmem>>, vector<2x8x1x64xbf16>,
    %c0_20 = arith.constant 0 : index
    %c1_21 = arith.constant 1 : index
    %c9_22 = arith.constant 9 : index
    %c0_23 = arith.constant 0 : index
    %29 = vector.load %arg7[%c0_20, %c1_21, %c9_22, %c0_23] : memref<2x10x10x64xbf16, #tpu.memory_space<vmem>>, vector<2x8x1x64xbf16>
    tpu.vector_store %arg7[%c0_20, %c1_21, %c9_22, %c0_23], %25 {strides = array<i32>} : memref<2x10x10x64xbf16, #tpu.memory_space<vmem>>, vector<2x8x1x64xbf16>,
    %30 = vector.shape_cast %23 : vector<128x64xf32> to vector<2x8x8x64xf32>
    %31 = arith.truncf %30 : vector<2x8x8x64xf32> to vector<2x8x8x64xbf16>
    %c0_24 = arith.constant 0 : index
    %c1_25 = arith.constant 1 : index
    %c1_26 = arith.constant 1 : index
    %c0_27 = arith.constant 0 : index
    %32 = vector.load %arg7[%c0_24, %c1_25, %c1_26, %c0_27] : memref<2x10x10x64xbf16, #tpu.memory_space<vmem>>, vector<2x8x8x64xbf16>
    tpu.vector_store %arg7[%c0_24, %c1_25, %c1_26, %c0_27], %31 {strides = array<i32>} : memref<2x10x10x64xbf16, #tpu.memory_space<vmem>>, vector<2x8x8x64xbf16>,
    %c0_28 = arith.constant 0 : index
    %c0_29 = arith.constant 0 : index
    %c0_30 = arith.constant 0 : index
    %c0_31 = arith.constant 0 : index
    %33 = vector.load %arg7[%c0_28, %c0_29, %c0_30, %c0_31] : memref<2x10x10x64xbf16, #tpu.memory_space<vmem>>, vector<2x8x8x64xbf16>
    %34 = vector.shape_cast %33 : vector<2x8x8x64xbf16> to vector<128x64xbf16>
    %c0_32 = arith.constant 0 : index
    %c0_33 = arith.constant 0 : index
    %c0_34 = arith.constant 0 : index
    %35 = vector.load %arg3[%c0_32, %c0_33, %c0_34] : memref<3x576x64xbf16, #tpu.memory_space<vmem>>, vector<1x64x64xbf16>
    %36 = vector.shape_cast %35 : vector<1x64x64xbf16> to vector<64x64xbf16>
    %cst_35 = arith.constant dense<0.000000e+00> : vector<128x64xf32>
    %37 = tpu.matmul %34, %36, %cst_35 {dimension_numbers = #tpu.dot_dimension_numbers<[1], [0], [0], [1], [0, 0, 1, 1], [], []>} : vector<128x64xbf16>, vector<64x64xbf16>, vector<128x64xf32> -> vector<128x64xf32>
    %c0_36 = arith.constant 0 : index
    %c0_37 = arith.constant 0 : index
    %c1_38 = arith.constant 1 : index
    %c0_39 = arith.constant 0 : index
    %38 = vector.load %arg7[%c0_36, %c0_37, %c1_38, %c0_39] : memref<2x10x10x64xbf16, #tpu.memory_space<vmem>>, vector<2x8x8x64xbf16>
    %39 = vector.shape_cast %38 : vector<2x8x8x64xbf16> to vector<128x64xbf16>
    %c0_40 = arith.constant 0 : index
    %c64 = arith.constant 64 : index
    %c0_41 = arith.constant 0 : index
    %40 = vector.load %arg3[%c0_40, %c64, %c0_41] : memref<3x576x64xbf16, #tpu.memory_space<vmem>>, vector<1x64x64xbf16>
    %41 = vector.shape_cast %40 : vector<1x64x64xbf16> to vector<64x64xbf16>
    %cst_42 = arith.constant dense<0.000000e+00> : vector<128x64xf32>
    %42 = tpu.matmul %39, %41, %cst_42 {dimension_numbers = #tpu.dot_dimension_numbers<[1], [0], [0], [1], [0, 0, 1, 1], [], []>} : vector<128x64xbf16>, vector<64x64xbf16>, vector<128x64xf32> -> vector<128x64xf32>
    %43 = arith.addf %37, %42 : vector<128x64xf32>
    %c0_43 = arith.constant 0 : index
    %c0_44 = arith.constant 0 : index
    %c2 = arith.constant 2 : index
    %c0_45 = arith.constant 0 : index
    %44 = vector.load %arg7[%c0_43, %c0_44, %c2, %c0_45] : memref<2x10x10x64xbf16, #tpu.memory_space<vmem>>, vector<2x8x8x64xbf16>
    %45 = vector.shape_cast %44 : vector<2x8x8x64xbf16> to vector<128x64xbf16>
    %c0_46 = arith.constant 0 : index
    %c128 = arith.constant 128 : index
    %c0_47 = arith.constant 0 : index
    %46 = vector.load %arg3[%c0_46, %c128, %c0_47] : memref<3x576x64xbf16, #tpu.memory_space<vmem>>, vector<1x64x64xbf16>
    %47 = vector.shape_cast %46 : vector<1x64x64xbf16> to vector<64x64xbf16>
    %cst_48 = arith.constant dense<0.000000e+00> : vector<128x64xf32>
    %48 = tpu.matmul %45, %47, %cst_48 {dimension_numbers = #tpu.dot_dimension_numbers<[1], [0], [0], [1], [0, 0, 1, 1], [], []>} : vector<128x64xbf16>, vector<64x64xbf16>, vector<128x64xf32> -> vector<128x64xf32>
    %49 = arith.addf %43, %48 : vector<128x64xf32>
    %c0_49 = arith.constant 0 : index
    %c1_50 = arith.constant 1 : index
    %c0_51 = arith.constant 0 : index
    %c0_52 = arith.constant 0 : index
    %50 = vector.load %arg7[%c0_49, %c1_50, %c0_51, %c0_52] : memref<2x10x10x64xbf16, #tpu.memory_space<vmem>>, vector<2x8x8x64xbf16>
    %51 = vector.shape_cast %50 : vector<2x8x8x64xbf16> to vector<128x64xbf16>
    %c0_53 = arith.constant 0 : index
    %c192 = arith.constant 192 : index
    %c0_54 = arith.constant 0 : index
    %52 = vector.load %arg3[%c0_53, %c192, %c0_54] : memref<3x576x64xbf16, #tpu.memory_space<vmem>>, vector<1x64x64xbf16>
    %53 = vector.shape_cast %52 : vector<1x64x64xbf16> to vector<64x64xbf16>
    %cst_55 = arith.constant dense<0.000000e+00> : vector<128x64xf32>
    %54 = tpu.matmul %51, %53, %cst_55 {dimension_numbers = #tpu.dot_dimension_numbers<[1], [0], [0], [1], [0, 0, 1, 1], [], []>} : vector<128x64xbf16>, vector<64x64xbf16>, vector<128x64xf32> -> vector<128x64xf32>
    %55 = arith.addf %49, %54 : vector<128x64xf32>
    %c0_56 = arith.constant 0 : index
    %c1_57 = arith.constant 1 : index
    %c1_58 = arith.constant 1 : index
    %c0_59 = arith.constant 0 : index
    %56 = vector.load %arg7[%c0_56, %c1_57, %c1_58, %c0_59] : memref<2x10x10x64xbf16, #tpu.memory_space<vmem>>, vector<2x8x8x64xbf16>
    %57 = vector.shape_cast %56 : vector<2x8x8x64xbf16> to vector<128x64xbf16>
    %c0_60 = arith.constant 0 : index
    %c256 = arith.constant 256 : index
    %c0_61 = arith.constant 0 : index
    %58 = vector.load %arg3[%c0_60, %c256, %c0_61] : memref<3x576x64xbf16, #tpu.memory_space<vmem>>, vector<1x64x64xbf16>
    %59 = vector.shape_cast %58 : vector<1x64x64xbf16> to vector<64x64xbf16>
    %cst_62 = arith.constant dense<0.000000e+00> : vector<128x64xf32>
    %60 = tpu.matmul %57, %59, %cst_62 {dimension_numbers = #tpu.dot_dimension_numbers<[1], [0], [0], [1], [0, 0, 1, 1], [], []>} : vector<128x64xbf16>, vector<64x64xbf16>, vector<128x64xf32> -> vector<128x64xf32>
    %61 = arith.addf %55, %60 : vector<128x64xf32>
    %c0_63 = arith.constant 0 : index
    %c1_64 = arith.constant 1 : index
    %c2_65 = arith.constant 2 : index
    %c0_66 = arith.constant 0 : index
    %62 = vector.load %arg7[%c0_63, %c1_64, %c2_65, %c0_66] : memref<2x10x10x64xbf16, #tpu.memory_space<vmem>>, vector<2x8x8x64xbf16>
    %63 = vector.shape_cast %62 : vector<2x8x8x64xbf16> to vector<128x64xbf16>
    %c0_67 = arith.constant 0 : index
    %c320 = arith.constant 320 : index
    %c0_68 = arith.constant 0 : index
    %64 = vector.load %arg3[%c0_67, %c320, %c0_68] : memref<3x576x64xbf16, #tpu.memory_space<vmem>>, vector<1x64x64xbf16>
    %65 = vector.shape_cast %64 : vector<1x64x64xbf16> to vector<64x64xbf16>
    %cst_69 = arith.constant dense<0.000000e+00> : vector<128x64xf32>
    %66 = tpu.matmul %63, %65, %cst_69 {dimension_numbers = #tpu.dot_dimension_numbers<[1], [0], [0], [1], [0, 0, 1, 1], [], []>} : vector<128x64xbf16>, vector<64x64xbf16>, vector<128x64xf32> -> vector<128x64xf32>
    %67 = arith.addf %61, %66 : vector<128x64xf32>
    %c0_70 = arith.constant 0 : index
    %c2_71 = arith.constant 2 : index
    %c0_72 = arith.constant 0 : index
    %c0_73 = arith.constant 0 : index
    %68 = vector.load %arg7[%c0_70, %c2_71, %c0_72, %c0_73] : memref<2x10x10x64xbf16, #tpu.memory_space<vmem>>, vector<2x8x8x64xbf16>
    %69 = vector.shape_cast %68 : vector<2x8x8x64xbf16> to vector<128x64xbf16>
    %c0_74 = arith.constant 0 : index
    %c384 = arith.constant 384 : index
    %c0_75 = arith.constant 0 : index
    %70 = vector.load %arg3[%c0_74, %c384, %c0_75] : memref<3x576x64xbf16, #tpu.memory_space<vmem>>, vector<1x64x64xbf16>
    %71 = vector.shape_cast %70 : vector<1x64x64xbf16> to vector<64x64xbf16>
    %cst_76 = arith.constant dense<0.000000e+00> : vector<128x64xf32>
    %72 = tpu.matmul %69, %71, %cst_76 {dimension_numbers = #tpu.dot_dimension_numbers<[1], [0], [0], [1], [0, 0, 1, 1], [], []>} : vector<128x64xbf16>, vector<64x64xbf16>, vector<128x64xf32> -> vector<128x64xf32>
    %73 = arith.addf %67, %72 : vector<128x64xf32>
    %c0_77 = arith.constant 0 : index
    %c2_78 = arith.constant 2 : index
    %c1_79 = arith.constant 1 : index
    %c0_80 = arith.constant 0 : index
    %74 = vector.load %arg7[%c0_77, %c2_78, %c1_79, %c0_80] : memref<2x10x10x64xbf16, #tpu.memory_space<vmem>>, vector<2x8x8x64xbf16>
    %75 = vector.shape_cast %74 : vector<2x8x8x64xbf16> to vector<128x64xbf16>
    %c0_81 = arith.constant 0 : index
    %c448 = arith.constant 448 : index
    %c0_82 = arith.constant 0 : index
    %76 = vector.load %arg3[%c0_81, %c448, %c0_82] : memref<3x576x64xbf16, #tpu.memory_space<vmem>>, vector<1x64x64xbf16>
    %77 = vector.shape_cast %76 : vector<1x64x64xbf16> to vector<64x64xbf16>
    %cst_83 = arith.constant dense<0.000000e+00> : vector<128x64xf32>
    %78 = tpu.matmul %75, %77, %cst_83 {dimension_numbers = #tpu.dot_dimension_numbers<[1], [0], [0], [1], [0, 0, 1, 1], [], []>} : vector<128x64xbf16>, vector<64x64xbf16>, vector<128x64xf32> -> vector<128x64xf32>
    %79 = arith.addf %73, %78 : vector<128x64xf32>
    %c0_84 = arith.constant 0 : index
    %c2_85 = arith.constant 2 : index
    %c2_86 = arith.constant 2 : index
    %c0_87 = arith.constant 0 : index
    %80 = vector.load %arg7[%c0_84, %c2_85, %c2_86, %c0_87] : memref<2x10x10x64xbf16, #tpu.memory_space<vmem>>, vector<2x8x8x64xbf16>
    %81 = vector.shape_cast %80 : vector<2x8x8x64xbf16> to vector<128x64xbf16>
    %c0_88 = arith.constant 0 : index
    %c512 = arith.constant 512 : index
    %c0_89 = arith.constant 0 : index
    %82 = vector.load %arg3[%c0_88, %c512, %c0_89] : memref<3x576x64xbf16, #tpu.memory_space<vmem>>, vector<1x64x64xbf16>
    %83 = vector.shape_cast %82 : vector<1x64x64xbf16> to vector<64x64xbf16>
    %cst_90 = arith.constant dense<0.000000e+00> : vector<128x64xf32>
    %84 = tpu.matmul %81, %83, %cst_90 {dimension_numbers = #tpu.dot_dimension_numbers<[1], [0], [0], [1], [0, 0, 1, 1], [], []>} : vector<128x64xbf16>, vector<64x64xbf16>, vector<128x64xf32> -> vector<128x64xf32>
    %85 = arith.addf %79, %84 : vector<128x64xf32>
    %c1_91 = arith.constant 1 : index
    %c0_92 = arith.constant 0 : index
    %86 = vector.load %arg4[%c1_91, %c0_92] : memref<4x64xf32, #tpu.memory_space<vmem>>, vector<1x64xf32>
    %87 = vector.broadcast %86 : vector<1x64xf32> to vector<128x64xf32>
    %88 = arith.mulf %85, %87 : vector<128x64xf32>
    %c1_93 = arith.constant 1 : index
    %c0_94 = arith.constant 0 : index
    %89 = vector.load %arg5[%c1_93, %c0_94] : memref<4x64xf32, #tpu.memory_space<vmem>>, vector<1x64xf32>
    %90 = vector.broadcast %89 : vector<1x64xf32> to vector<128x64xf32>
    %91 = arith.addf %88, %90 : vector<128x64xf32>
    %cst_95 = arith.constant 0.000000e+00 : f32
    %92 = vector.broadcast %cst_95 : f32 to vector<128x64xf32>
    %93 = arith.maximumf %91, %92 : vector<128x64xf32>
    %94 = vector.shape_cast %93 : vector<128x64xf32> to vector<64x2x64xf32>
    %95 = vector.extract_strided_slice %94 {offsets = [0, 0, 0], sizes = [64, 1, 64], strides = [1, 1, 1]} : vector<64x2x64xf32> to vector<64x1x64xf32>
    %96 = vector.shape_cast %95 : vector<64x1x64xf32> to vector<64x64xf32>
    %97 = vector.extract_strided_slice %94 {offsets = [0, 1, 0], sizes = [64, 1, 64], strides = [1, 1, 1]} : vector<64x2x64xf32> to vector<64x1x64xf32>
    %98 = vector.shape_cast %97 : vector<64x1x64xf32> to vector<64x64xf32>
    %99 = arith.maximumf %96, %98 : vector<64x64xf32>
    %100 = vector.shape_cast %99 : vector<64x64xf32> to vector<8x2x4x64xf32>
    %101 = vector.extract_strided_slice %100 {offsets = [0, 0, 0, 0], sizes = [8, 1, 4, 64], strides = [1, 1, 1, 1]} : vector<8x2x4x64xf32> to vector<8x1x4x64xf32>
    %102 = vector.shape_cast %101 : vector<8x1x4x64xf32> to vector<8x4x64xf32>
    %103 = vector.extract_strided_slice %100 {offsets = [0, 1, 0, 0], sizes = [8, 1, 4, 64], strides = [1, 1, 1, 1]} : vector<8x2x4x64xf32> to vector<8x1x4x64xf32>
    %104 = vector.shape_cast %103 : vector<8x1x4x64xf32> to vector<8x4x64xf32>
    %105 = arith.maximumf %102, %104 : vector<8x4x64xf32>
    %106 = vector.shape_cast %105 : vector<8x4x64xf32> to vector<32x64xf32>
    %cst_96 = arith.constant 0.000000e+00 : bf16
    %107 = vector.broadcast %cst_96 : bf16 to vector<2x1x6x64xbf16>
    %cst_97 = arith.constant 0.000000e+00 : bf16
    %108 = vector.broadcast %cst_97 : bf16 to vector<2x4x1x64xbf16>
    %c0_98 = arith.constant 0 : index
    %c0_99 = arith.constant 0 : index
    %c0_100 = arith.constant 0 : index
    %c0_101 = arith.constant 0 : index
    %109 = vector.load %arg8[%c0_98, %c0_99, %c0_100, %c0_101] : memref<2x6x6x64xbf16, #tpu.memory_space<vmem>>, vector<2x1x6x64xbf16>
    tpu.vector_store %arg8[%c0_98, %c0_99, %c0_100, %c0_101], %107 {strides = array<i32>} : memref<2x6x6x64xbf16, #tpu.memory_space<vmem>>, vector<2x1x6x64xbf16>,
    %c0_102 = arith.constant 0 : index
    %c5 = arith.constant 5 : index
    %c0_103 = arith.constant 0 : index
    %c0_104 = arith.constant 0 : index
    %110 = vector.load %arg8[%c0_102, %c5, %c0_103, %c0_104] : memref<2x6x6x64xbf16, #tpu.memory_space<vmem>>, vector<2x1x6x64xbf16>
    tpu.vector_store %arg8[%c0_102, %c5, %c0_103, %c0_104], %107 {strides = array<i32>} : memref<2x6x6x64xbf16, #tpu.memory_space<vmem>>, vector<2x1x6x64xbf16>,
    %c0_105 = arith.constant 0 : index
    %c1_106 = arith.constant 1 : index
    %c0_107 = arith.constant 0 : index
    %c0_108 = arith.constant 0 : index
    %111 = vector.load %arg8[%c0_105, %c1_106, %c0_107, %c0_108] : memref<2x6x6x64xbf16, #tpu.memory_space<vmem>>, vector<2x4x1x64xbf16>
    tpu.vector_store %arg8[%c0_105, %c1_106, %c0_107, %c0_108], %108 {strides = array<i32>} : memref<2x6x6x64xbf16, #tpu.memory_space<vmem>>, vector<2x4x1x64xbf16>,
    %c0_109 = arith.constant 0 : index
    %c1_110 = arith.constant 1 : index
    %c5_111 = arith.constant 5 : index
    %c0_112 = arith.constant 0 : index
    %112 = vector.load %arg8[%c0_109, %c1_110, %c5_111, %c0_112] : memref<2x6x6x64xbf16, #tpu.memory_space<vmem>>, vector<2x4x1x64xbf16>
    tpu.vector_store %arg8[%c0_109, %c1_110, %c5_111, %c0_112], %108 {strides = array<i32>} : memref<2x6x6x64xbf16, #tpu.memory_space<vmem>>, vector<2x4x1x64xbf16>,
    %113 = vector.shape_cast %106 : vector<32x64xf32> to vector<2x4x4x64xf32>
    %114 = arith.truncf %113 : vector<2x4x4x64xf32> to vector<2x4x4x64xbf16>
    %c0_113 = arith.constant 0 : index
    %c1_114 = arith.constant 1 : index
    %c1_115 = arith.constant 1 : index
    %c0_116 = arith.constant 0 : index
    %115 = vector.load %arg8[%c0_113, %c1_114, %c1_115, %c0_116] : memref<2x6x6x64xbf16, #tpu.memory_space<vmem>>, vector<2x4x4x64xbf16>
    tpu.vector_store %arg8[%c0_113, %c1_114, %c1_115, %c0_116], %114 {strides = array<i32>} : memref<2x6x6x64xbf16, #tpu.memory_space<vmem>>, vector<2x4x4x64xbf16>,
    %c0_117 = arith.constant 0 : index
    %c0_118 = arith.constant 0 : index
    %c0_119 = arith.constant 0 : index
    %c0_120 = arith.constant 0 : index
    %116 = vector.load %arg8[%c0_117, %c0_118, %c0_119, %c0_120] : memref<2x6x6x64xbf16, #tpu.memory_space<vmem>>, vector<2x4x4x64xbf16>
    %117 = vector.shape_cast %116 : vector<2x4x4x64xbf16> to vector<32x64xbf16>
    %c1_121 = arith.constant 1 : index
    %c0_122 = arith.constant 0 : index
    %c0_123 = arith.constant 0 : index
    %118 = vector.load %arg3[%c1_121, %c0_122, %c0_123] : memref<3x576x64xbf16, #tpu.memory_space<vmem>>, vector<1x64x64xbf16>
    %119 = vector.shape_cast %118 : vector<1x64x64xbf16> to vector<64x64xbf16>
    %cst_124 = arith.constant dense<0.000000e+00> : vector<32x64xf32>
    %120 = tpu.matmul %117, %119, %cst_124 {dimension_numbers = #tpu.dot_dimension_numbers<[1], [0], [0], [1], [0, 0, 1, 1], [], []>} : vector<32x64xbf16>, vector<64x64xbf16>, vector<32x64xf32> -> vector<32x64xf32>
    %c0_125 = arith.constant 0 : index
    %c0_126 = arith.constant 0 : index
    %c1_127 = arith.constant 1 : index
    %c0_128 = arith.constant 0 : index
    %121 = vector.load %arg8[%c0_125, %c0_126, %c1_127, %c0_128] : memref<2x6x6x64xbf16, #tpu.memory_space<vmem>>, vector<2x4x4x64xbf16>
    %122 = vector.shape_cast %121 : vector<2x4x4x64xbf16> to vector<32x64xbf16>
    %c1_129 = arith.constant 1 : index
    %c64_130 = arith.constant 64 : index
    %c0_131 = arith.constant 0 : index
    %123 = vector.load %arg3[%c1_129, %c64_130, %c0_131] : memref<3x576x64xbf16, #tpu.memory_space<vmem>>, vector<1x64x64xbf16>
    %124 = vector.shape_cast %123 : vector<1x64x64xbf16> to vector<64x64xbf16>
    %cst_132 = arith.constant dense<0.000000e+00> : vector<32x64xf32>
    %125 = tpu.matmul %122, %124, %cst_132 {dimension_numbers = #tpu.dot_dimension_numbers<[1], [0], [0], [1], [0, 0, 1, 1], [], []>} : vector<32x64xbf16>, vector<64x64xbf16>, vector<32x64xf32> -> vector<32x64xf32>
    %126 = arith.addf %120, %125 : vector<32x64xf32>
    %c0_133 = arith.constant 0 : index
    %c0_134 = arith.constant 0 : index
    %c2_135 = arith.constant 2 : index
    %c0_136 = arith.constant 0 : index
    %127 = vector.load %arg8[%c0_133, %c0_134, %c2_135, %c0_136] : memref<2x6x6x64xbf16, #tpu.memory_space<vmem>>, vector<2x4x4x64xbf16>
    %128 = vector.shape_cast %127 : vector<2x4x4x64xbf16> to vector<32x64xbf16>
    %c1_137 = arith.constant 1 : index
    %c128_138 = arith.constant 128 : index
    %c0_139 = arith.constant 0 : index
    %129 = vector.load %arg3[%c1_137, %c128_138, %c0_139] : memref<3x576x64xbf16, #tpu.memory_space<vmem>>, vector<1x64x64xbf16>
    %130 = vector.shape_cast %129 : vector<1x64x64xbf16> to vector<64x64xbf16>
    %cst_140 = arith.constant dense<0.000000e+00> : vector<32x64xf32>
    %131 = tpu.matmul %128, %130, %cst_140 {dimension_numbers = #tpu.dot_dimension_numbers<[1], [0], [0], [1], [0, 0, 1, 1], [], []>} : vector<32x64xbf16>, vector<64x64xbf16>, vector<32x64xf32> -> vector<32x64xf32>
    %132 = arith.addf %126, %131 : vector<32x64xf32>
    %c0_141 = arith.constant 0 : index
    %c1_142 = arith.constant 1 : index
    %c0_143 = arith.constant 0 : index
    %c0_144 = arith.constant 0 : index
    %133 = vector.load %arg8[%c0_141, %c1_142, %c0_143, %c0_144] : memref<2x6x6x64xbf16, #tpu.memory_space<vmem>>, vector<2x4x4x64xbf16>
    %134 = vector.shape_cast %133 : vector<2x4x4x64xbf16> to vector<32x64xbf16>
    %c1_145 = arith.constant 1 : index
    %c192_146 = arith.constant 192 : index
    %c0_147 = arith.constant 0 : index
    %135 = vector.load %arg3[%c1_145, %c192_146, %c0_147] : memref<3x576x64xbf16, #tpu.memory_space<vmem>>, vector<1x64x64xbf16>
    %136 = vector.shape_cast %135 : vector<1x64x64xbf16> to vector<64x64xbf16>
    %cst_148 = arith.constant dense<0.000000e+00> : vector<32x64xf32>
    %137 = tpu.matmul %134, %136, %cst_148 {dimension_numbers = #tpu.dot_dimension_numbers<[1], [0], [0], [1], [0, 0, 1, 1], [], []>} : vector<32x64xbf16>, vector<64x64xbf16>, vector<32x64xf32> -> vector<32x64xf32>
    %138 = arith.addf %132, %137 : vector<32x64xf32>
    %c0_149 = arith.constant 0 : index
    %c1_150 = arith.constant 1 : index
    %c1_151 = arith.constant 1 : index
    %c0_152 = arith.constant 0 : index
    %139 = vector.load %arg8[%c0_149, %c1_150, %c1_151, %c0_152] : memref<2x6x6x64xbf16, #tpu.memory_space<vmem>>, vector<2x4x4x64xbf16>
    %140 = vector.shape_cast %139 : vector<2x4x4x64xbf16> to vector<32x64xbf16>
    %c1_153 = arith.constant 1 : index
    %c256_154 = arith.constant 256 : index
    %c0_155 = arith.constant 0 : index
    %141 = vector.load %arg3[%c1_153, %c256_154, %c0_155] : memref<3x576x64xbf16, #tpu.memory_space<vmem>>, vector<1x64x64xbf16>
    %142 = vector.shape_cast %141 : vector<1x64x64xbf16> to vector<64x64xbf16>
    %cst_156 = arith.constant dense<0.000000e+00> : vector<32x64xf32>
    %143 = tpu.matmul %140, %142, %cst_156 {dimension_numbers = #tpu.dot_dimension_numbers<[1], [0], [0], [1], [0, 0, 1, 1], [], []>} : vector<32x64xbf16>, vector<64x64xbf16>, vector<32x64xf32> -> vector<32x64xf32>
    %144 = arith.addf %138, %143 : vector<32x64xf32>
    %c0_157 = arith.constant 0 : index
    %c1_158 = arith.constant 1 : index
    %c2_159 = arith.constant 2 : index
    %c0_160 = arith.constant 0 : index
    %145 = vector.load %arg8[%c0_157, %c1_158, %c2_159, %c0_160] : memref<2x6x6x64xbf16, #tpu.memory_space<vmem>>, vector<2x4x4x64xbf16>
    %146 = vector.shape_cast %145 : vector<2x4x4x64xbf16> to vector<32x64xbf16>
    %c1_161 = arith.constant 1 : index
    %c320_162 = arith.constant 320 : index
    %c0_163 = arith.constant 0 : index
    %147 = vector.load %arg3[%c1_161, %c320_162, %c0_163] : memref<3x576x64xbf16, #tpu.memory_space<vmem>>, vector<1x64x64xbf16>
    %148 = vector.shape_cast %147 : vector<1x64x64xbf16> to vector<64x64xbf16>
    %cst_164 = arith.constant dense<0.000000e+00> : vector<32x64xf32>
    %149 = tpu.matmul %146, %148, %cst_164 {dimension_numbers = #tpu.dot_dimension_numbers<[1], [0], [0], [1], [0, 0, 1, 1], [], []>} : vector<32x64xbf16>, vector<64x64xbf16>, vector<32x64xf32> -> vector<32x64xf32>
    %150 = arith.addf %144, %149 : vector<32x64xf32>
    %c0_165 = arith.constant 0 : index
    %c2_166 = arith.constant 2 : index
    %c0_167 = arith.constant 0 : index
    %c0_168 = arith.constant 0 : index
    %151 = vector.load %arg8[%c0_165, %c2_166, %c0_167, %c0_168] : memref<2x6x6x64xbf16, #tpu.memory_space<vmem>>, vector<2x4x4x64xbf16>
    %152 = vector.shape_cast %151 : vector<2x4x4x64xbf16> to vector<32x64xbf16>
    %c1_169 = arith.constant 1 : index
    %c384_170 = arith.constant 384 : index
    %c0_171 = arith.constant 0 : index
    %153 = vector.load %arg3[%c1_169, %c384_170, %c0_171] : memref<3x576x64xbf16, #tpu.memory_space<vmem>>, vector<1x64x64xbf16>
    %154 = vector.shape_cast %153 : vector<1x64x64xbf16> to vector<64x64xbf16>
    %cst_172 = arith.constant dense<0.000000e+00> : vector<32x64xf32>
    %155 = tpu.matmul %152, %154, %cst_172 {dimension_numbers = #tpu.dot_dimension_numbers<[1], [0], [0], [1], [0, 0, 1, 1], [], []>} : vector<32x64xbf16>, vector<64x64xbf16>, vector<32x64xf32> -> vector<32x64xf32>
    %156 = arith.addf %150, %155 : vector<32x64xf32>
    %c0_173 = arith.constant 0 : index
    %c2_174 = arith.constant 2 : index
    %c1_175 = arith.constant 1 : index
    %c0_176 = arith.constant 0 : index
    %157 = vector.load %arg8[%c0_173, %c2_174, %c1_175, %c0_176] : memref<2x6x6x64xbf16, #tpu.memory_space<vmem>>, vector<2x4x4x64xbf16>
    %158 = vector.shape_cast %157 : vector<2x4x4x64xbf16> to vector<32x64xbf16>
    %c1_177 = arith.constant 1 : index
    %c448_178 = arith.constant 448 : index
    %c0_179 = arith.constant 0 : index
    %159 = vector.load %arg3[%c1_177, %c448_178, %c0_179] : memref<3x576x64xbf16, #tpu.memory_space<vmem>>, vector<1x64x64xbf16>
    %160 = vector.shape_cast %159 : vector<1x64x64xbf16> to vector<64x64xbf16>
    %cst_180 = arith.constant dense<0.000000e+00> : vector<32x64xf32>
    %161 = tpu.matmul %158, %160, %cst_180 {dimension_numbers = #tpu.dot_dimension_numbers<[1], [0], [0], [1], [0, 0, 1, 1], [], []>} : vector<32x64xbf16>, vector<64x64xbf16>, vector<32x64xf32> -> vector<32x64xf32>
    %162 = arith.addf %156, %161 : vector<32x64xf32>
    %c0_181 = arith.constant 0 : index
    %c2_182 = arith.constant 2 : index
    %c2_183 = arith.constant 2 : index
    %c0_184 = arith.constant 0 : index
    %163 = vector.load %arg8[%c0_181, %c2_182, %c2_183, %c0_184] : memref<2x6x6x64xbf16, #tpu.memory_space<vmem>>, vector<2x4x4x64xbf16>
    %164 = vector.shape_cast %163 : vector<2x4x4x64xbf16> to vector<32x64xbf16>
    %c1_185 = arith.constant 1 : index
    %c512_186 = arith.constant 512 : index
    %c0_187 = arith.constant 0 : index
    %165 = vector.load %arg3[%c1_185, %c512_186, %c0_187] : memref<3x576x64xbf16, #tpu.memory_space<vmem>>, vector<1x64x64xbf16>
    %166 = vector.shape_cast %165 : vector<1x64x64xbf16> to vector<64x64xbf16>
    %cst_188 = arith.constant dense<0.000000e+00> : vector<32x64xf32>
    %167 = tpu.matmul %164, %166, %cst_188 {dimension_numbers = #tpu.dot_dimension_numbers<[1], [0], [0], [1], [0, 0, 1, 1], [], []>} : vector<32x64xbf16>, vector<64x64xbf16>, vector<32x64xf32> -> vector<32x64xf32>
    %168 = arith.addf %162, %167 : vector<32x64xf32>
    %c2_189 = arith.constant 2 : index
    %c0_190 = arith.constant 0 : index
    %169 = vector.load %arg4[%c2_189, %c0_190] : memref<4x64xf32, #tpu.memory_space<vmem>>, vector<1x64xf32>
    %170 = vector.broadcast %169 : vector<1x64xf32> to vector<32x64xf32>
    %171 = arith.mulf %168, %170 : vector<32x64xf32>
    %c2_191 = arith.constant 2 : index
    %c0_192 = arith.constant 0 : index
    %172 = vector.load %arg5[%c2_191, %c0_192] : memref<4x64xf32, #tpu.memory_space<vmem>>, vector<1x64xf32>
    %173 = vector.broadcast %172 : vector<1x64xf32> to vector<32x64xf32>
    %174 = arith.addf %171, %173 : vector<32x64xf32>
    %cst_193 = arith.constant 0.000000e+00 : f32
    %175 = vector.broadcast %cst_193 : f32 to vector<32x64xf32>
    %176 = arith.maximumf %174, %175 : vector<32x64xf32>
    %177 = vector.shape_cast %176 : vector<32x64xf32> to vector<16x2x64xf32>
    %178 = vector.extract_strided_slice %177 {offsets = [0, 0, 0], sizes = [16, 1, 64], strides = [1, 1, 1]} : vector<16x2x64xf32> to vector<16x1x64xf32>
    %179 = vector.shape_cast %178 : vector<16x1x64xf32> to vector<16x64xf32>
    %180 = vector.extract_strided_slice %177 {offsets = [0, 1, 0], sizes = [16, 1, 64], strides = [1, 1, 1]} : vector<16x2x64xf32> to vector<16x1x64xf32>
    %181 = vector.shape_cast %180 : vector<16x1x64xf32> to vector<16x64xf32>
    %182 = arith.maximumf %179, %181 : vector<16x64xf32>
    %183 = vector.shape_cast %182 : vector<16x64xf32> to vector<4x2x2x64xf32>
    %184 = vector.extract_strided_slice %183 {offsets = [0, 0, 0, 0], sizes = [4, 1, 2, 64], strides = [1, 1, 1, 1]} : vector<4x2x2x64xf32> to vector<4x1x2x64xf32>
    %185 = vector.shape_cast %184 : vector<4x1x2x64xf32> to vector<4x2x64xf32>
    %186 = vector.extract_strided_slice %183 {offsets = [0, 1, 0, 0], sizes = [4, 1, 2, 64], strides = [1, 1, 1, 1]} : vector<4x2x2x64xf32> to vector<4x1x2x64xf32>
    %187 = vector.shape_cast %186 : vector<4x1x2x64xf32> to vector<4x2x64xf32>
    %188 = arith.maximumf %185, %187 : vector<4x2x64xf32>
    %189 = vector.shape_cast %188 : vector<4x2x64xf32> to vector<8x64xf32>
    %cst_194 = arith.constant 0.000000e+00 : bf16
    %190 = vector.broadcast %cst_194 : bf16 to vector<2x1x4x64xbf16>
    %cst_195 = arith.constant 0.000000e+00 : bf16
    %191 = vector.broadcast %cst_195 : bf16 to vector<2x2x1x64xbf16>
    %c0_196 = arith.constant 0 : index
    %c0_197 = arith.constant 0 : index
    %c0_198 = arith.constant 0 : index
    %c0_199 = arith.constant 0 : index
    %192 = vector.load %arg9[%c0_196, %c0_197, %c0_198, %c0_199] : memref<2x4x4x64xbf16, #tpu.memory_space<vmem>>, vector<2x1x4x64xbf16>
    tpu.vector_store %arg9[%c0_196, %c0_197, %c0_198, %c0_199], %190 {strides = array<i32>} : memref<2x4x4x64xbf16, #tpu.memory_space<vmem>>, vector<2x1x4x64xbf16>,
    %c0_200 = arith.constant 0 : index
    %c3 = arith.constant 3 : index
    %c0_201 = arith.constant 0 : index
    %c0_202 = arith.constant 0 : index
    %193 = vector.load %arg9[%c0_200, %c3, %c0_201, %c0_202] : memref<2x4x4x64xbf16, #tpu.memory_space<vmem>>, vector<2x1x4x64xbf16>
    tpu.vector_store %arg9[%c0_200, %c3, %c0_201, %c0_202], %190 {strides = array<i32>} : memref<2x4x4x64xbf16, #tpu.memory_space<vmem>>, vector<2x1x4x64xbf16>,
    %c0_203 = arith.constant 0 : index
    %c1_204 = arith.constant 1 : index
    %c0_205 = arith.constant 0 : index
    %c0_206 = arith.constant 0 : index
    %194 = vector.load %arg9[%c0_203, %c1_204, %c0_205, %c0_206] : memref<2x4x4x64xbf16, #tpu.memory_space<vmem>>, vector<2x2x1x64xbf16>
    tpu.vector_store %arg9[%c0_203, %c1_204, %c0_205, %c0_206], %191 {strides = array<i32>} : memref<2x4x4x64xbf16, #tpu.memory_space<vmem>>, vector<2x2x1x64xbf16>,
    %c0_207 = arith.constant 0 : index
    %c1_208 = arith.constant 1 : index
    %c3_209 = arith.constant 3 : index
    %c0_210 = arith.constant 0 : index
    %195 = vector.load %arg9[%c0_207, %c1_208, %c3_209, %c0_210] : memref<2x4x4x64xbf16, #tpu.memory_space<vmem>>, vector<2x2x1x64xbf16>
    tpu.vector_store %arg9[%c0_207, %c1_208, %c3_209, %c0_210], %191 {strides = array<i32>} : memref<2x4x4x64xbf16, #tpu.memory_space<vmem>>, vector<2x2x1x64xbf16>,
    %196 = vector.shape_cast %189 : vector<8x64xf32> to vector<2x2x2x64xf32>
    %197 = arith.truncf %196 : vector<2x2x2x64xf32> to vector<2x2x2x64xbf16>
    %c0_211 = arith.constant 0 : index
    %c1_212 = arith.constant 1 : index
    %c1_213 = arith.constant 1 : index
    %c0_214 = arith.constant 0 : index
    %198 = vector.load %arg9[%c0_211, %c1_212, %c1_213, %c0_214] : memref<2x4x4x64xbf16, #tpu.memory_space<vmem>>, vector<2x2x2x64xbf16>
    tpu.vector_store %arg9[%c0_211, %c1_212, %c1_213, %c0_214], %197 {strides = array<i32>} : memref<2x4x4x64xbf16, #tpu.memory_space<vmem>>, vector<2x2x2x64xbf16>,
    %c0_215 = arith.constant 0 : index
    %c0_216 = arith.constant 0 : index
    %c0_217 = arith.constant 0 : index
    %c0_218 = arith.constant 0 : index
    %199 = vector.load %arg9[%c0_215, %c0_216, %c0_217, %c0_218] : memref<2x4x4x64xbf16, #tpu.memory_space<vmem>>, vector<2x2x2x64xbf16>
    %200 = vector.shape_cast %199 : vector<2x2x2x64xbf16> to vector<8x64xbf16>
    %c2_219 = arith.constant 2 : index
    %c0_220 = arith.constant 0 : index
    %c0_221 = arith.constant 0 : index
    %201 = vector.load %arg3[%c2_219, %c0_220, %c0_221] : memref<3x576x64xbf16, #tpu.memory_space<vmem>>, vector<1x64x64xbf16>
    %202 = vector.shape_cast %201 : vector<1x64x64xbf16> to vector<64x64xbf16>
    %cst_222 = arith.constant dense<0.000000e+00> : vector<8x64xf32>
    %203 = tpu.matmul %200, %202, %cst_222 {dimension_numbers = #tpu.dot_dimension_numbers<[1], [0], [0], [1], [0, 0, 1, 1], [], []>} : vector<8x64xbf16>, vector<64x64xbf16>, vector<8x64xf32> -> vector<8x64xf32>
    %c0_223 = arith.constant 0 : index
    %c0_224 = arith.constant 0 : index
    %c1_225 = arith.constant 1 : index
    %c0_226 = arith.constant 0 : index
    %204 = vector.load %arg9[%c0_223, %c0_224, %c1_225, %c0_226] : memref<2x4x4x64xbf16, #tpu.memory_space<vmem>>, vector<2x2x2x64xbf16>
    %205 = vector.shape_cast %204 : vector<2x2x2x64xbf16> to vector<8x64xbf16>
    %c2_227 = arith.constant 2 : index
    %c64_228 = arith.constant 64 : index
    %c0_229 = arith.constant 0 : index
    %206 = vector.load %arg3[%c2_227, %c64_228, %c0_229] : memref<3x576x64xbf16, #tpu.memory_space<vmem>>, vector<1x64x64xbf16>
    %207 = vector.shape_cast %206 : vector<1x64x64xbf16> to vector<64x64xbf16>
    %cst_230 = arith.constant dense<0.000000e+00> : vector<8x64xf32>
    %208 = tpu.matmul %205, %207, %cst_230 {dimension_numbers = #tpu.dot_dimension_numbers<[1], [0], [0], [1], [0, 0, 1, 1], [], []>} : vector<8x64xbf16>, vector<64x64xbf16>, vector<8x64xf32> -> vector<8x64xf32>
    %209 = arith.addf %203, %208 : vector<8x64xf32>
    %c0_231 = arith.constant 0 : index
    %c0_232 = arith.constant 0 : index
    %c2_233 = arith.constant 2 : index
    %c0_234 = arith.constant 0 : index
    %210 = vector.load %arg9[%c0_231, %c0_232, %c2_233, %c0_234] : memref<2x4x4x64xbf16, #tpu.memory_space<vmem>>, vector<2x2x2x64xbf16>
    %211 = vector.shape_cast %210 : vector<2x2x2x64xbf16> to vector<8x64xbf16>
    %c2_235 = arith.constant 2 : index
    %c128_236 = arith.constant 128 : index
    %c0_237 = arith.constant 0 : index
    %212 = vector.load %arg3[%c2_235, %c128_236, %c0_237] : memref<3x576x64xbf16, #tpu.memory_space<vmem>>, vector<1x64x64xbf16>
    %213 = vector.shape_cast %212 : vector<1x64x64xbf16> to vector<64x64xbf16>
    %cst_238 = arith.constant dense<0.000000e+00> : vector<8x64xf32>
    %214 = tpu.matmul %211, %213, %cst_238 {dimension_numbers = #tpu.dot_dimension_numbers<[1], [0], [0], [1], [0, 0, 1, 1], [], []>} : vector<8x64xbf16>, vector<64x64xbf16>, vector<8x64xf32> -> vector<8x64xf32>
    %215 = arith.addf %209, %214 : vector<8x64xf32>
    %c0_239 = arith.constant 0 : index
    %c1_240 = arith.constant 1 : index
    %c0_241 = arith.constant 0 : index
    %c0_242 = arith.constant 0 : index
    %216 = vector.load %arg9[%c0_239, %c1_240, %c0_241, %c0_242] : memref<2x4x4x64xbf16, #tpu.memory_space<vmem>>, vector<2x2x2x64xbf16>
    %217 = vector.shape_cast %216 : vector<2x2x2x64xbf16> to vector<8x64xbf16>
    %c2_243 = arith.constant 2 : index
    %c192_244 = arith.constant 192 : index
    %c0_245 = arith.constant 0 : index
    %218 = vector.load %arg3[%c2_243, %c192_244, %c0_245] : memref<3x576x64xbf16, #tpu.memory_space<vmem>>, vector<1x64x64xbf16>
    %219 = vector.shape_cast %218 : vector<1x64x64xbf16> to vector<64x64xbf16>
    %cst_246 = arith.constant dense<0.000000e+00> : vector<8x64xf32>
    %220 = tpu.matmul %217, %219, %cst_246 {dimension_numbers = #tpu.dot_dimension_numbers<[1], [0], [0], [1], [0, 0, 1, 1], [], []>} : vector<8x64xbf16>, vector<64x64xbf16>, vector<8x64xf32> -> vector<8x64xf32>
    %221 = arith.addf %215, %220 : vector<8x64xf32>
    %c0_247 = arith.constant 0 : index
    %c1_248 = arith.constant 1 : index
    %c1_249 = arith.constant 1 : index
    %c0_250 = arith.constant 0 : index
    %222 = vector.load %arg9[%c0_247, %c1_248, %c1_249, %c0_250] : memref<2x4x4x64xbf16, #tpu.memory_space<vmem>>, vector<2x2x2x64xbf16>
    %223 = vector.shape_cast %222 : vector<2x2x2x64xbf16> to vector<8x64xbf16>
    %c2_251 = arith.constant 2 : index
    %c256_252 = arith.constant 256 : index
    %c0_253 = arith.constant 0 : index
    %224 = vector.load %arg3[%c2_251, %c256_252, %c0_253] : memref<3x576x64xbf16, #tpu.memory_space<vmem>>, vector<1x64x64xbf16>
    %225 = vector.shape_cast %224 : vector<1x64x64xbf16> to vector<64x64xbf16>
    %cst_254 = arith.constant dense<0.000000e+00> : vector<8x64xf32>
    %226 = tpu.matmul %223, %225, %cst_254 {dimension_numbers = #tpu.dot_dimension_numbers<[1], [0], [0], [1], [0, 0, 1, 1], [], []>} : vector<8x64xbf16>, vector<64x64xbf16>, vector<8x64xf32> -> vector<8x64xf32>
    %227 = arith.addf %221, %226 : vector<8x64xf32>
    %c0_255 = arith.constant 0 : index
    %c1_256 = arith.constant 1 : index
    %c2_257 = arith.constant 2 : index
    %c0_258 = arith.constant 0 : index
    %228 = vector.load %arg9[%c0_255, %c1_256, %c2_257, %c0_258] : memref<2x4x4x64xbf16, #tpu.memory_space<vmem>>, vector<2x2x2x64xbf16>
    %229 = vector.shape_cast %228 : vector<2x2x2x64xbf16> to vector<8x64xbf16>
    %c2_259 = arith.constant 2 : index
    %c320_260 = arith.constant 320 : index
    %c0_261 = arith.constant 0 : index
    %230 = vector.load %arg3[%c2_259, %c320_260, %c0_261] : memref<3x576x64xbf16, #tpu.memory_space<vmem>>, vector<1x64x64xbf16>
    %231 = vector.shape_cast %230 : vector<1x64x64xbf16> to vector<64x64xbf16>
    %cst_262 = arith.constant dense<0.000000e+00> : vector<8x64xf32>
    %232 = tpu.matmul %229, %231, %cst_262 {dimension_numbers = #tpu.dot_dimension_numbers<[1], [0], [0], [1], [0, 0, 1, 1], [], []>} : vector<8x64xbf16>, vector<64x64xbf16>, vector<8x64xf32> -> vector<8x64xf32>
    %233 = arith.addf %227, %232 : vector<8x64xf32>
    %c0_263 = arith.constant 0 : index
    %c2_264 = arith.constant 2 : index
    %c0_265 = arith.constant 0 : index
    %c0_266 = arith.constant 0 : index
    %234 = vector.load %arg9[%c0_263, %c2_264, %c0_265, %c0_266] : memref<2x4x4x64xbf16, #tpu.memory_space<vmem>>, vector<2x2x2x64xbf16>
    %235 = vector.shape_cast %234 : vector<2x2x2x64xbf16> to vector<8x64xbf16>
    %c2_267 = arith.constant 2 : index
    %c384_268 = arith.constant 384 : index
    %c0_269 = arith.constant 0 : index
    %236 = vector.load %arg3[%c2_267, %c384_268, %c0_269] : memref<3x576x64xbf16, #tpu.memory_space<vmem>>, vector<1x64x64xbf16>
    %237 = vector.shape_cast %236 : vector<1x64x64xbf16> to vector<64x64xbf16>
    %cst_270 = arith.constant dense<0.000000e+00> : vector<8x64xf32>
    %238 = tpu.matmul %235, %237, %cst_270 {dimension_numbers = #tpu.dot_dimension_numbers<[1], [0], [0], [1], [0, 0, 1, 1], [], []>} : vector<8x64xbf16>, vector<64x64xbf16>, vector<8x64xf32> -> vector<8x64xf32>
    %239 = arith.addf %233, %238 : vector<8x64xf32>
    %c0_271 = arith.constant 0 : index
    %c2_272 = arith.constant 2 : index
    %c1_273 = arith.constant 1 : index
    %c0_274 = arith.constant 0 : index
    %240 = vector.load %arg9[%c0_271, %c2_272, %c1_273, %c0_274] : memref<2x4x4x64xbf16, #tpu.memory_space<vmem>>, vector<2x2x2x64xbf16>
    %241 = vector.shape_cast %240 : vector<2x2x2x64xbf16> to vector<8x64xbf16>
    %c2_275 = arith.constant 2 : index
    %c448_276 = arith.constant 448 : index
    %c0_277 = arith.constant 0 : index
    %242 = vector.load %arg3[%c2_275, %c448_276, %c0_277] : memref<3x576x64xbf16, #tpu.memory_space<vmem>>, vector<1x64x64xbf16>
    %243 = vector.shape_cast %242 : vector<1x64x64xbf16> to vector<64x64xbf16>
    %cst_278 = arith.constant dense<0.000000e+00> : vector<8x64xf32>
    %244 = tpu.matmul %241, %243, %cst_278 {dimension_numbers = #tpu.dot_dimension_numbers<[1], [0], [0], [1], [0, 0, 1, 1], [], []>} : vector<8x64xbf16>, vector<64x64xbf16>, vector<8x64xf32> -> vector<8x64xf32>
    %245 = arith.addf %239, %244 : vector<8x64xf32>
    %c0_279 = arith.constant 0 : index
    %c2_280 = arith.constant 2 : index
    %c2_281 = arith.constant 2 : index
    %c0_282 = arith.constant 0 : index
    %246 = vector.load %arg9[%c0_279, %c2_280, %c2_281, %c0_282] : memref<2x4x4x64xbf16, #tpu.memory_space<vmem>>, vector<2x2x2x64xbf16>
    %247 = vector.shape_cast %246 : vector<2x2x2x64xbf16> to vector<8x64xbf16>
    %c2_283 = arith.constant 2 : index
    %c512_284 = arith.constant 512 : index
    %c0_285 = arith.constant 0 : index
    %248 = vector.load %arg3[%c2_283, %c512_284, %c0_285] : memref<3x576x64xbf16, #tpu.memory_space<vmem>>, vector<1x64x64xbf16>
    %249 = vector.shape_cast %248 : vector<1x64x64xbf16> to vector<64x64xbf16>
    %cst_286 = arith.constant dense<0.000000e+00> : vector<8x64xf32>
    %250 = tpu.matmul %247, %249, %cst_286 {dimension_numbers = #tpu.dot_dimension_numbers<[1], [0], [0], [1], [0, 0, 1, 1], [], []>} : vector<8x64xbf16>, vector<64x64xbf16>, vector<8x64xf32> -> vector<8x64xf32>
    %251 = arith.addf %245, %250 : vector<8x64xf32>
    %c3_287 = arith.constant 3 : index
    %c0_288 = arith.constant 0 : index
    %252 = vector.load %arg4[%c3_287, %c0_288] : memref<4x64xf32, #tpu.memory_space<vmem>>, vector<1x64xf32>
    %253 = vector.broadcast %252 : vector<1x64xf32> to vector<8x64xf32>
    %254 = arith.mulf %251, %253 : vector<8x64xf32>
    %c3_289 = arith.constant 3 : index
    %c0_290 = arith.constant 0 : index
    %255 = vector.load %arg5[%c3_289, %c0_290] : memref<4x64xf32, #tpu.memory_space<vmem>>, vector<1x64xf32>
    %256 = vector.broadcast %255 : vector<1x64xf32> to vector<8x64xf32>
    %257 = arith.addf %254, %256 : vector<8x64xf32>
    %cst_291 = arith.constant 0.000000e+00 : f32
    %258 = vector.broadcast %cst_291 : f32 to vector<8x64xf32>
    %259 = arith.maximumf %257, %258 : vector<8x64xf32>
    %260 = vector.shape_cast %259 : vector<8x64xf32> to vector<4x2x64xf32>
    %261 = vector.extract_strided_slice %260 {offsets = [0, 0, 0], sizes = [4, 1, 64], strides = [1, 1, 1]} : vector<4x2x64xf32> to vector<4x1x64xf32>
    %262 = vector.shape_cast %261 : vector<4x1x64xf32> to vector<4x64xf32>
    %263 = vector.extract_strided_slice %260 {offsets = [0, 1, 0], sizes = [4, 1, 64], strides = [1, 1, 1]} : vector<4x2x64xf32> to vector<4x1x64xf32>
    %264 = vector.shape_cast %263 : vector<4x1x64xf32> to vector<4x64xf32>
    %265 = arith.maximumf %262, %264 : vector<4x64xf32>
    %266 = vector.shape_cast %265 : vector<4x64xf32> to vector<2x2x1x64xf32>
    %267 = vector.extract_strided_slice %266 {offsets = [0, 0, 0, 0], sizes = [2, 1, 1, 64], strides = [1, 1, 1, 1]} : vector<2x2x1x64xf32> to vector<2x1x1x64xf32>
    %268 = vector.shape_cast %267 : vector<2x1x1x64xf32> to vector<2x1x64xf32>
    %269 = vector.extract_strided_slice %266 {offsets = [0, 1, 0, 0], sizes = [2, 1, 1, 64], strides = [1, 1, 1, 1]} : vector<2x2x1x64xf32> to vector<2x1x1x64xf32>
    %270 = vector.shape_cast %269 : vector<2x1x1x64xf32> to vector<2x1x64xf32>
    %271 = arith.maximumf %268, %270 : vector<2x1x64xf32>
    %272 = vector.shape_cast %271 : vector<2x1x64xf32> to vector<2x64xf32>
    %c0_292 = arith.constant 0 : index
    %c0_293 = arith.constant 0 : index
    %273 = vector.load %arg6[%c0_292, %c0_293] : memref<2x64xf32, #tpu.memory_space<vmem>>, vector<2x64xf32>
    tpu.vector_store %arg6[%c0_292, %c0_293], %272 {strides = array<i32>} : memref<2x64xf32, #tpu.memory_space<vmem>>, vector<2x64xf32>,
    return
  }
  func.func @transform_0(%arg0: i32) -> (i32, i32) {
    %c0_i32 = arith.constant 0 : i32
    %c0_i32_0 = arith.constant 0 : i32
    return %arg0, %c0_i32 : i32, i32
  }
  func.func @transform_1(%arg0: i32) -> (i32, i32) {
    %c0_i32 = arith.constant 0 : i32
    %c0_i32_0 = arith.constant 0 : i32
    %c0_i32_1 = arith.constant 0 : i32
    return %c0_i32, %c0_i32_0 : i32, i32
  }
  func.func @transform_2(%arg0: i32) -> (i32, i32, i32) {
    %c0_i32 = arith.constant 0 : i32
    %c0_i32_0 = arith.constant 0 : i32
    %c0_i32_1 = arith.constant 0 : i32
    %c0_i32_2 = arith.constant 0 : i32
    return %c0_i32, %c0_i32_0, %c0_i32_1 : i32, i32, i32
  }
  func.func @transform_3(%arg0: i32) -> (i32, i32) {
    %c0_i32 = arith.constant 0 : i32
    %c0_i32_0 = arith.constant 0 : i32
    %c0_i32_1 = arith.constant 0 : i32
    return %c0_i32, %c0_i32_0 : i32, i32
  }
  func.func @transform_4(%arg0: i32) -> (i32, i32) {
    %c0_i32 = arith.constant 0 : i32
    %c0_i32_0 = arith.constant 0 : i32
    %c0_i32_1 = arith.constant 0 : i32
    return %c0_i32, %c0_i32_0 : i32, i32
  }
  func.func @transform_5(%arg0: i32) -> (i32, i32) {
    %c0_i32 = arith.constant 0 : i32
    %c0_i32_0 = arith.constant 0 : i32
    return %arg0, %c0_i32 : i32, i32
  }
}

</mosaic_0001>

<bundles_post_ra>
// kernel: convnet_pallas.1
= control target key start
LH: loop header
LB: loop body
LE: loop exit
PB: predicated region body
PF: predicated region fallthrough
CT: control target
= control target key end

     0   :  { %vm262_vm0 = vcmask 261120   ;;  %s17499_s0 = inlined_call_operand.vmem [shape: bf16[512,32], index: 0, kind: input, shape index: {}]   ;;  %s17500_s1 = inlined_call_operand.vmem [shape: bf16[32,64], index: 1, kind: input, shape index: {}]   ;;  %s17501_s2 = inlined_call_operand.vmem [shape: bf16[3,576,64], index: 2, kind: input, shape index: {}]   ;;  %s17502_s3 = inlined_call_operand.vmem [shape: f32[4,64], index: 3, kind: input, shape index: {}]   ;;  %s17503_s4 = inlined_call_operand.vmem [shape: f32[4,64], index: 4, kind: input, shape index: {}]   ;;  %s17504_s5 = inlined_call_operand.hbm [shape: f32[2,64], index: 5, kind: output, shape index: {}]  }
   0x1   :  { %v14620_v0 = vld [vmem:[%s17500_s1] sm:$0xff]   ;;  %v14621_v1 = vld [vmem:[%s17500_s1 + $0x8] sm:$0xff]   ;;  %v14625_v4 = vld [vmem:[%s17499_s0 + $0x90] sm:$0xff]  }
   0x2   :  { %13918 = vmatprep.subr.bf16.mxu0 %v14620_v0  ;;  %v14622_v2 = vld [vmem:[%s17499_s0] sm:$0xff]   ;;  %14418 = vmatprep.subr.bf16.mxu1 %v14620_v0  ;;  %v14623_v3 = vld [vmem:[%s17499_s0 + $0x8] sm:$0xff]   ;;  %v14624_v5 = vld [vmem:[%s17499_s0 + $0x10] sm:$0xff]  }
   0x3   :  { %13919 = vmatpush3.bf16.msra.mxu0 %v14620_v0  ;;  %14420 = vmatpush3.bf16.msra.mxu1 %v14620_v0  ;;  %v14627_v6 = vld [vmem:[%s17499_s0 + $0x98] sm:$0xff]   ;;  %v14629_v7 = vld [vmem:[%s17499_s0 + $0xa0] sm:$0xff]   ;;  %v14631_v10 = vld [vmem:[%s17499_s0 + $0xa8] sm:$0xff]  }
   0x4   :  { %13920 = vmatprep.subr.bf16.mxu0 %v14621_v1  ;;  %13922 = vmatprep.mubr.msk.bf16.mxu0 %vm262_vm0, %v14622_v2  ;;  %v14626_v8 = vld [vmem:[%s17499_s0 + $0x18] sm:$0xff]   ;;  %v14628_v9 = vld [vmem:[%s17499_s0 + $0x20] sm:$0xff]   ;;  %v14633_v11 = vld [vmem:[%s17499_s0 + $0xb0] sm:$0xff]  }
   0x5   :  { %14419 = vmatprep.subr.bf16.mxu1 %v14621_v1  ;;  %13958 = vmatprep.mubr.msk.bf16.mxu1 %vm262_vm0, %v14625_v4  ;;  %v14630_v12 = vld [vmem:[%s17499_s0 + $0x28] sm:$0xff]   ;;  %v14632_v13 = vld [vmem:[%s17499_s0 + $0x30] sm:$0xff]   ;;  %v14635_v14 = vld [vmem:[%s17499_s0 + $0xb8] sm:$0xff]  }
   0x6   :  { %v14637_v15 = vld [vmem:[%s17499_s0 + $0xc0] sm:$0xff]   ;;  %v14634_v16 = vld [vmem:[%s17499_s0 + $0x38] sm:$0xff]   ;;  %v14639_v18 = vld [vmem:[%s17499_s0 + $0xc8] sm:$0xff]  }
   0x7   :  { %13921 = vmatpush3.bf16.msra.mxu0 %v14621_v1  ;;  %14421 = vmatpush3.bf16.msra.mxu1 %v14621_v1  ;;  %v14636_v17 = vld [vmem:[%s17499_s0 + $0x40] sm:$0xff]   ;;  %v14641_v19 = vld [vmem:[%s17499_s0 + $0xd0] sm:$0xff]   ;;  %v14638_v20 = vld [vmem:[%s17499_s0 + $0x48] sm:$0xff]  }
   0x8   :  { %v14643_v21 = vld [vmem:[%s17499_s0 + $0xd8] sm:$0xff]   ;;  %v14640_v22 = vld [vmem:[%s17499_s0 + $0x50] sm:$0xff]   ;;  %v14645_v23 = vld [vmem:[%s17499_s0 + $0xe0] sm:$0xff]  }
   0x9   :  { %v14642_v24 = vld [vmem:[%s17499_s0 + $0x58] sm:$0xff]   ;;  %v14647_v25 = vld [vmem:[%s17499_s0 + $0xe8] sm:$0xff]   ;;  %v14644_v26 = vld [vmem:[%s17499_s0 + $0x60] sm:$0xff]  }
   0xa   :  { %13923 = vmatmul.mubr.msk.bf16.vlgmr.msra.gmra.mrb[0].mxu0 %vm262_vm0, %v14623_v3  ;;  %13959 = vmatmul.mubr.msk.bf16.vlgmr.msra.gmra.mrb[0].mxu1 %vm262_vm0, %v14627_v6  ;;  %v14649_v27 = vld [vmem:[%s17499_s0 + $0xf0] sm:$0xff]   ;;  %v14646_v28 = vld [vmem:[%s17499_s0 + $0x68] sm:$0xff]   ;;  %v14651_v29 = vld [vmem:[%s17499_s0 + $0xf8] sm:$0xff]  }
   0xb   :  { %13926 = vmatprep.mubr.msk.bf16.mxu0 %vm262_vm0, %v14624_v5  ;;  %13962 = vmatprep.mubr.msk.bf16.mxu1 %vm262_vm0, %v14629_v7  ;;  %v14648_v30 = vld [vmem:[%s17499_s0 + $0x70] sm:$0xff]   ;;  %v14650_v31 = vld [vmem:[%s17499_s0 + $0x78] sm:$0xff]   ;;  %v14652_v32 = vld [vmem:[%s17499_s0 + $0x80] sm:$0xff]  }
   0xc   :  { %v14653_v33 = vld [vmem:[%s17499_s0 + $0x88] sm:$0xff]  }
  0x12   :  { %13927 = vmatmul.mubr.msk.bf16.gmra.mrb[4].mxu0 %vm262_vm0, %v14626_v8  ;;  %13963 = vmatmul.mubr.msk.bf16.gmra.mrb[4].mxu1 %vm262_vm0, %v14631_v10 }
  0x13   :  { %13930 = vmatprep.mubr.msk.bf16.mxu0 %vm262_vm0, %v14628_v9  ;;  %13966 = vmatprep.mubr.msk.bf16.mxu1 %vm262_vm0, %v14633_v11 }
  0x1a   :  { %13931 = vmatmul.mubr.msk.bf16.gmra.mrb[8].mxu0 %vm262_vm0, %v14630_v12  ;;  %13967 = vmatmul.mubr.msk.bf16.gmra.mrb[8].mxu1 %vm262_vm0, %v14635_v14 }
  0x1b   :  { %13934 = vmatprep.mubr.msk.bf16.mxu0 %vm262_vm0, %v14632_v13  ;;  %13970 = vmatprep.mubr.msk.bf16.mxu1 %vm262_vm0, %v14637_v15 }
  0x22   :  { %13935 = vmatmul.mubr.msk.bf16.gmra.mrb[12].mxu0 %vm262_vm0, %v14634_v16  ;;  %13971 = vmatmul.mubr.msk.bf16.gmra.mrb[12].mxu1 %vm262_vm0, %v14639_v18 }
  0x23   :  { %13938 = vmatprep.mubr.msk.bf16.mxu0 %vm262_vm0, %v14636_v17  ;;  %13974 = vmatprep.mubr.msk.bf16.mxu1 %vm262_vm0, %v14641_v19 }
  0x2a   :  { %13939 = vmatmul.mubr.msk.bf16.gmra.mrb[16].mxu0 %vm262_vm0, %v14638_v20  ;;  %13975 = vmatmul.mubr.msk.bf16.gmra.mrb[16].mxu1 %vm262_vm0, %v14643_v21 }
  0x2b   :  { %13942 = vmatprep.mubr.msk.bf16.mxu0 %vm262_vm0, %v14640_v22  ;;  %13978 = vmatprep.mubr.msk.bf16.mxu1 %vm262_vm0, %v14645_v23 }
  0x32   :  { %13943 = vmatmul.mubr.msk.bf16.gmra.mrb[20].mxu0 %vm262_vm0, %v14642_v24  ;;  %13979 = vmatmul.mubr.msk.bf16.gmra.mrb[20].mxu1 %vm262_vm0, %v14647_v25 }
  0x33   :  { %13946 = vmatprep.mubr.msk.bf16.mxu0 %vm262_vm0, %v14644_v26  ;;  %13982 = vmatprep.mubr.msk.bf16.mxu1 %vm262_vm0, %v14649_v27 }
  0x3a   :  { %13947 = vmatmul.mubr.msk.bf16.gmra.mrb[24].mxu0 %vm262_vm0, %v14646_v28  ;;  %13983 = vmatmul.mubr.msk.bf16.gmra.mrb[24].mxu1 %vm262_vm0, %v14651_v29 }
  0x3b   :  { %13950 = vmatprep.mubr.msk.bf16.mxu0 %vm262_vm0, %v14648_v30 }
  0x42   :  { %13951 = vmatmul.mubr.msk.bf16.gmra.mrb[28].mxu0 %vm262_vm0, %v14650_v31 }
  0x43   :  { %13954 = vmatprep.mubr.msk.bf16.mxu0 %vm262_vm0, %v14652_v32 }
  0x4a   :  { %13955 = vmatmul.mubr.msk.bf16.gmra.mrb[32].mxu0 %vm262_vm0, %v14653_v33 }
  0x4b   :  { %10 = vsyncpa [#allocation6], 0  ;;  %vm3412_vm1 = vcmask 516096   ;;  %vm3473_vm2 = vsmask.f32 7938  ;;  %v918_v54 = vlaneseq  ;;  %vm4165_vm6 = vcmask 1042434  }
  0x4c   :  { %vm15017_vm3 = vmand %vm3412_vm1, %vm3473_vm2  ;;  %v3475_v35 = vld [vmem:[#allocation2 + $0xc] sm:$0x1]  ;;  %vm3423_vm4 = vsmask.f32 256  ;;  %v3425_v37 = vld [vmem:[#allocation2 + $0x8] sm:$0x1] }
  0x4d   :  { %v3476_v36 = vsel %vm15017_vm3, 0, %v3475_v35  ;;  %vm15025_vm5 = vmand %vm3412_vm1, %vm3423_vm4  ;;  %v3478_v40 = vld [vmem:[#allocation2 + $0x14] sm:$0x1]  ;;  %v3428_v42 = vld [vmem:[#allocation2 + $0x10] sm:$0x1]  ;;  %v15048_v57 = vshrl.u32 %v918_v54, 7 }
  0x4e   :  { %3477 = vst [vmem:[#allocation2 + $0xc] sm:$0x1] %v3476_v36  ;;  %v3426_v39 = vsel %vm15025_vm5, 0, %v3425_v37  ;;  %v3479_v41 = vsel %vm15017_vm3, 0, %v3478_v40  ;;  %v3429_v43 = vsel %vm15025_vm5, 0, %v3428_v42  ;;  %vm4168_vm7 = vcmask 1043459  }
  0x4f   :  { %3427 = vst [vmem:[#allocation2 + $0x8] sm:$0x1] %v3426_v39  ;;  %3480 = vst [vmem:[#allocation2 + $0x14] sm:$0x1] %v3479_v41  ;;  %v3452_v44 = vld [vmem:[#allocation2 + $0x60] sm:$0x1] }
  0x50   :  { %3430 = vst [vmem:[#allocation2 + $0x10] sm:$0x1] %v3429_v43  ;;  %v3502_v45 = vld [vmem:[#allocation2 + $0x64] sm:$0x1]  ;;  %v3453_v46 = vsel %vm15025_vm5, 0, %v3452_v44  ;;  %17511 = vst [vmem:[#allocation8_spill] sm:$0xff] %v15048_v57 }
  0x51   :  { %v3503_v47 = vsel %vm15017_vm3, 0, %v3502_v45  ;;  %3454 = vst [vmem:[#allocation2 + $0x60] sm:$0x1] %v3453_v46  ;;  %v3481_v48 = vld [vmem:[#allocation2 + $0x1c] sm:$0x1]  ;;  %vm4171_vm8 = vcmask 1044484  }
  0x52   :  { %3504 = vst [vmem:[#allocation2 + $0x64] sm:$0x1] %v3503_v47  ;;  %v3482_v49 = vsel %vm15017_vm3, 0, %v3481_v48  ;;  %v3431_v50 = vld [vmem:[#allocation2 + $0x18] sm:$0x1]  ;;  %vm4174_vm9 = vcmask 1045509  }
  0x53   :  { %3483 = vst [vmem:[#allocation2 + $0x1c] sm:$0x1] %v3482_v49  ;;  %v3432_v51 = vsel %vm15025_vm5, 0, %v3431_v50  ;;  %v14845_v52 = vmov 1983009808   ;;  %vm4177_vm10 = vcmask 1046534  }
  0x54   :  { %v916_v53 = vunpack.c.l.s4 %v14845_v52  ;;  %3433 = vst [vmem:[#allocation2 + $0x18] sm:$0x1] %v3432_v51  ;;  %v15046_v55 = vld [vmem:[%s17502_s3] ss:$0 sm:$0xff]  ;;  %v3455_v1 = vld [vmem:[#allocation2 + $0x68] sm:$0x1] }
  0x55   :  { %v15053_v59 = vld [vmem:[%s17503_s4] ss:$0 sm:$0xff]  ;;  %v3456_v7 = vsel %vm15025_vm5, 0, %v3455_v1  ;;  %vm3410_vm11 = vcmask 519168   ;;  %vm4180_vm12 = vcmask 1047559   ;;  %v14762_v38 = vld [vmem:[%s17501_s2 + $0x268] sm:$0xff]  }
  0x56   :  { %v917_v56 = vunpack.c.0.s8 %v916_v53  ;;  %3457 = vst [vmem:[#allocation2 + $0x68] sm:$0x1] %v3456_v7  ;;  %vm15162_vm13 = vmand %vm3410_vm11, %vm3473_vm2  ;;  %vm4579_vm14 = vsmask.f32 3328  ;;  %vm4580_vm15 = vsmask.f32 7440 }
  0x57   :  { %vm15716_vm0 = vmor %vm4579_vm14, %vm4580_vm15  ;;  %vm5217_vm2 = vcmask 1042432   ;;  %vm8425_vm15 = vsmask.f32 2306 }
  0x58   :  { %v15058_v2 = vsub.s32 %v917_v56, %v15048_v57 }
  0xdd   :  { %v13924_v58 = vpop.f32.mrb[0].mxu0  ;;  %v13960_v60 = vpop.f32.mrb[0].mxu1 }
  0xde   :  { %v655_v61 = vmul.f32 %v13924_v58, %v15046_v55  ;;  %v393_v62 = vpop.f32.mrb[1].mxu0  ;;  %v691_v63 = vmul.f32 %v13960_v60, %v15046_v55  ;;  %v537_v0 = vpop.f32.mrb[1].mxu1 }
  0xdf   :  { %v653_v3 = vmul.f32 %v15046_v55, %v393_v62  ;;  %v13925_v4 = vpop.f32.mrb[2].mxu0  ;;  %v689_v5 = vmul.f32 %v15046_v55, %v537_v0  ;;  %v13961_v6 = vpop.f32.mrb[2].mxu1 }
  0xe0   :  { %v724_v8 = vadd.f32 %v15053_v59, %v655_v61  ;;  %v656_v9 = vmul.f32 %v13925_v4, %v15046_v55  ;;  %v396_v10 = vpop.f32.mrb[3].mxu0  ;;  %v760_v11 = vadd.f32 %v15053_v59, %v691_v63  ;;  %v692_v12 = vmul.f32 %v13961_v6, %v15046_v55  ;;  %v540_v13 = vpop.f32.mrb[3].mxu1 }
  0xe1   :  { %v722_v14 = vadd.f32 %v15053_v59, %v653_v3  ;;  %v654_v15 = vmul.f32 %v15046_v55, %v396_v10  ;;  %v758_v16 = vadd.f32 %v15053_v59, %v689_v5  ;;  %v690_v17 = vmul.f32 %v15046_v55, %v540_v13 }
  0xe2   :  { %v788_v18 = vmax.f32 %v724_v8, 0.0  ;;  %v725_v19 = vadd.f32 %v15053_v59, %v656_v9  ;;  %v15073_v20 = vmax.f32 %v760_v11, 0.0  ;;  %v15076_v21 = vadd.f32 %v15053_v59, %v692_v12 }
  0xe3   :  { %v786_v22 = vmax.f32 %v722_v14, 0.0  ;;  %v723_v23 = vadd.f32 %v15053_v59, %v654_v15  ;;  %v15079_v24 = vmax.f32 %v758_v16, 0.0  ;;  %v15082_v25 = vadd.f32 %v15053_v59, %v690_v17 }
  0xe4   :  { %v948_v26 = vcombine.high %v788_v18, %v788_v18  ;;  %v955_v27 = vrot.slane %v788_v18, %v15058_v2  ;;  %v789_v28 = vmax.f32 %v725_v19, 0.0  ;;  %v1560_v29 = vcombine.high %v15073_v20, %v15073_v20 }
  0xe5   :  { %v914_v30 = vcombine.high %v786_v22, %v786_v22  ;;  %v921_v31 = vrot.slane %v786_v22, %v15058_v2  ;;  %v15088_v32 = vmax.f32 %v723_v23, 0.0  ;;  %v15090_v33 = vpop.f32.mrb[4].mxu0  ;;  %v15094_v35 = vrot.slane %v15073_v20, %v15058_v2  ;;  %v15096_v36 = vpop.f32.mrb[4].mxu1 }
  0xe6   :  { %v962_v37 = vrot.slane %v948_v26, %v15058_v2  ;;  %v963_v39 = vcombine.high %v955_v27, %v955_v27  ;;  %v12402_v40 = vrot.slane %v955_v27, 9  ;;  %v965_v41 = vcombine.high %v789_v28, %v789_v28  ;;  %v409_v42 = vpop.f32.mrb[5].mxu0  ;;  %v15099_v43 = vpop.f32.mrb[5].mxu1 }
  0xe7   :  { %v928_v44 = vrot.slane %v914_v30, %v15058_v2  ;;  %v929_v45 = vcombine.high %v921_v31, %v921_v31  ;;  %v12394_v46 = vrot.slane %v921_v31, 9  ;;  %v972_v47 = vrot.slane %v789_v28, %v15058_v2  ;;  %v13929_v48 = vpop.f32.mrb[6].mxu0  ;;  %v15103_v49 = vpop.f32.mrb[6].mxu1 }
  0xe8   :  { %v964_v50 = vcombine.high %v962_v37, %v962_v37  ;;  %v12403_v51 = vrot.slane %v963_v39, 9  ;;  %v12404_v52 = vrot.slane %v962_v37, 9  ;;  %v3034_v53 = vmax.f32 %v955_v27, %v12402_v40  ;;  %v15105_v54 = vpop.f32.mrb[7].mxu0  ;;  %v15107_v56 = vpop.f32.mrb[7].mxu1 }
  0xe9   :  { %v930_v58 = vcombine.high %v928_v44, %v928_v44  ;;  %v12395_v60 = vrot.slane %v929_v45, 9  ;;  %v12396_v61 = vrot.slane %v928_v44, 9  ;;  %v3026_v62 = vmax.f32 %v921_v31, %v12394_v46 }
  0xea   :  { %v12405_v63 = vrot.slane %v964_v50, 9  ;;  %v3035_v0 = vmax.f32 %v963_v39, %v12403_v51  ;;  %v3036_v1 = vmax.f32 %v962_v37, %v12404_v52  ;;  %v979_v3 = vrot.slane %v965_v41, %v15058_v2 }
  0xeb   :  { %v12397_v4 = vrot.slane %v930_v58, 9  ;;  %v3027_v5 = vmax.f32 %v929_v45, %v12395_v60  ;;  %v3028_v6 = vmax.f32 %v928_v44, %v12396_v61  ;;  %v3282_v7 = vmax.f32 %v3026_v62, %v3034_v53 }
  0xec   :  { %v3037_v8 = vmax.f32 %v964_v50, %v12405_v63  ;;  %v980_v9 = vcombine.high %v972_v47, %v972_v47  ;;  %v981_v10 = vcombine.high %v979_v3, %v979_v3  ;;  %v12406_v11 = vrot.slane %v972_v47, 9 }
  0xed   :  { %v3029_v12 = vmax.f32 %v930_v58, %v12397_v4  ;;  %v3283_v13 = vmax.f32 %v3027_v5, %v3035_v0  ;;  %v3284_v14 = vmax.f32 %v3028_v6, %v3036_v1  ;;  %v13501_v15 = vpack.c.bf16 %v3282_v7, %v3282_v7  ;;  %v15110_v16 = vpop.f32.mrb[8].mxu0  ;;  %v15112_v17 = vpop.f32.mrb[8].mxu1 }
  0xee   :  { %v12407_v18 = vrot.slane %v980_v9, 9  ;;  %v12408_v19 = vrot.slane %v979_v3, 9  ;;  %v12409_v22 = vrot.slane %v981_v10, 9  ;;  %v3038_v23 = vmax.f32 %v972_v47, %v12406_v11  ;;  %v15114_v26 = vpop.f32.mrb[9].mxu0  ;;  %v15116_v27 = vpop.f32.mrb[9].mxu1 }
  0xef   :  { %v3285_v28 = vmax.f32 %v3029_v12, %v3037_v8  ;;  %v13502_v30 = vpack.c.bf16 %v3283_v13, %v3283_v13  ;;  %v13503_v31 = vpack.c.bf16 %v3284_v14, %v3284_v14  ;;  %v4035_v37 = vunpack.c.l.b16 %v13501_v15  ;;  %v15118_v39 = vpop.f32.mrb[10].mxu0 }
  0xf0   :  { %v3039_v40 = vmax.f32 %v980_v9, %v12407_v18  ;;  %v3040_v41 = vmax.f32 %v979_v3, %v12408_v19  ;;  %v3041_v44 = vmax.f32 %v981_v10, %v12409_v22  ;;  %v931_v45 = vcombine.high %v15088_v32, %v15088_v32  ;;  %v15122_v46 = vpop.f32.mrb[11].mxu0 }
  0xf1   :  { %v13504_v50 = vpack.c.bf16 %v3285_v28, %v3285_v28  ;;  %v4036_v47 = vunpack.c.l.b16 %v13502_v30  ;;  %v4037_v51 = vunpack.c.l.b16 %v13503_v31  ;;  %v4163_v52 = vrot.slane %v4035_v37, 7 }
  0xf2   :  { %v938_v53 = vrot.slane %v15088_v32, %v15058_v2  ;;  %v945_v58 = vrot.slane %v931_v45, %v15058_v2  ;;  %v659_v60 = vmul.f32 %v15090_v33, %v15046_v55  ;;  %v657_v61 = vmul.f32 %v15046_v55, %v409_v42  ;;  %v15145_v45 = vpop.f32.mrb[10].mxu1 }
  0xf3   :  { %v4038_v62 = vunpack.c.l.b16 %v13504_v50  ;;  %v4164_v63 = vrot.slane %v4036_v47, 6  ;;  %v4167_v0 = vrot.slane %v4037_v51, 5  ;;  %v660_v1 = vmul.f32 %v13929_v48, %v15046_v55 }
  0xf4   :  { %v946_v3 = vcombine.high %v938_v53, %v938_v53  ;;  %v947_v4 = vcombine.high %v945_v58, %v945_v58  ;;  %v12398_v5 = vrot.slane %v938_v53, 9  ;;  %v12400_v6 = vrot.slane %v945_v58, 9 }
  0xf5   :  { %v4166_v7 = vsel %vm4165_vm6, %v4164_v63, %v4163_v52  ;;  %v4170_v8 = vrot.slane %v4038_v62, 4  ;;  %v728_v32 = vadd.f32 %v15053_v59, %v659_v60  ;;  %v726_v9 = vadd.f32 %v15053_v59, %v657_v61  ;;  %v15134_v33 = vpop.f32.mrb[12].mxu0 }
  0xf6   :  { %v4169_v42 = vsel %vm4168_vm7, %v4167_v0, %v4166_v7  ;;  %v12399_v10 = vrot.slane %v946_v3, 9  ;;  %v12401_v11 = vrot.slane %v947_v4, 9  ;;  %v3030_v12 = vmax.f32 %v938_v53, %v12398_v5  ;;  %v15137_v48 = vpop.f32.mrb[13].mxu0 }
  0xf7   :  { %v3032_v13 = vmax.f32 %v945_v58, %v12400_v6  ;;  %v4172_v14 = vsel %vm4171_vm8, %v4170_v8, %v4169_v42  ;;  %v792_v15 = vmax.f32 %v728_v32, 0.0  ;;  %v790_v18 = vmax.f32 %v726_v9, 0.0  ;;  %v15140_v19 = vpop.f32.mrb[14].mxu0 }
  0xf8   :  { %v3031_v22 = vmax.f32 %v946_v3, %v12399_v10  ;;  %v3033_v28 = vmax.f32 %v947_v4, %v12401_v11  ;;  %v3286_v30 = vmax.f32 %v3030_v12, %v3038_v23  ;;  %v729_v31 = vadd.f32 %v15053_v59, %v660_v1  ;;  %v15143_v37 = vpop.f32.mrb[15].mxu0  ;;  %v4446_v23 = vld [vmem:[#allocation2 + $0xc] sm:$0x1]  ;;  %v15153_v10 = vpop.f32.mrb[11].mxu1 }
  0xf9   :  { %v3288_v50 = vmax.f32 %v3032_v13, %v3040_v41  ;;  %v1016_v47 = vcombine.high %v792_v15, %v792_v15  ;;  %v1023_v51 = vrot.slane %v792_v15, %v15058_v2  ;;  %v982_v52 = vcombine.high %v790_v18, %v790_v18 }
  0xfa   :  { %v3287_v53 = vmax.f32 %v3031_v22, %v3039_v40  ;;  %v3289_v58 = vmax.f32 %v3033_v28, %v3041_v44  ;;  %v13505_v60 = vpack.c.bf16 %v3286_v30, %v3286_v30  ;;  %v989_v61 = vrot.slane %v790_v18, %v15058_v2 }
  0xfb   :  { %v13507_v62 = vpack.c.bf16 %v3288_v50, %v3288_v50  ;;  %v1030_v63 = vrot.slane %v1016_v47, %v15058_v2  ;;  %v1031_v0 = vcombine.high %v1023_v51, %v1023_v51  ;;  %v12418_v1 = vrot.slane %v1023_v51, 9 }
  0xfc   :  { %v13506_v3 = vpack.c.bf16 %v3287_v53, %v3287_v53  ;;  %v4039_v4 = vunpack.c.l.b16 %v13505_v60  ;;  %v13629_v5 = vpack.c.bf16 %v3289_v58, %v3289_v58  ;;  %v996_v41 = vrot.slane %v982_v52, %v15058_v2 }
  0xfd   :  { %v4041_v6 = vunpack.c.l.b16 %v13507_v62  ;;  %v1032_v7 = vcombine.high %v1030_v63, %v1030_v63  ;;  %v12419_v8 = vrot.slane %v1031_v0, 9  ;;  %v12420_v32 = vrot.slane %v1030_v63, 9 }
  0xfe   :  { %v4040_v40 = vunpack.c.l.b16 %v13506_v3  ;;  %v4173_v44 = vrot.slane %v4039_v4, 3  ;;  %v4447_v9 = vsel %vm15025_vm5, %v13629_v5, %v4446_v23  ;;  %v3050_v42 = vmax.f32 %v1023_v51, %v12418_v1 }
  0xff   :  { %v4179_v11 = vrot.slane %v4041_v6, 1  ;;  %4448 = vst [vmem:[#allocation2 + $0xc] sm:$0x1] %v4447_v9  ;;  %v12421_v12 = vrot.slane %v1032_v7, 9  ;;  %v3051_v13 = vmax.f32 %v1031_v0, %v12419_v8  ;;  %v3052_v15 = vmax.f32 %v1030_v63, %v12420_v32  ;;  %v4443_v63 = vld [vmem:[#allocation2 + $0x8] sm:$0xf] }
 0x100   :  { %v4175_v18 = vsel %vm4174_vm9, %v4173_v44, %v4172_v14  ;;  %v4176_v22 = vrot.slane %v4040_v40, 2  ;;  %v997_v28 = vcombine.high %v989_v61, %v989_v61  ;;  %v998_v30 = vcombine.high %v996_v41, %v996_v41 }
 0x101   :  { %v3053_v50 = vmax.f32 %v1032_v7, %v12421_v12  ;;  %v12410_v47 = vrot.slane %v989_v61, 9  ;;  %v12412_v52 = vrot.slane %v996_v41, 9  ;;  %v793_v53 = vmax.f32 %v729_v31, 0.0 }
 0x102   :  { %v4178_v58 = vsel %vm4177_vm10, %v4176_v22, %v4175_v18  ;;  %v12411_v60 = vrot.slane %v997_v28, 9  ;;  %v12413_v51 = vrot.slane %v998_v30, 9  ;;  %v658_v62 = vmul.f32 %v15046_v55, %v15105_v54 }
 0x103   :  { %v4181_v23 = vsel %vm4180_vm12, %v4179_v11, %v4178_v58  ;;  %v3042_v0 = vmax.f32 %v989_v61, %v12410_v47  ;;  %v3044_v1 = vmax.f32 %v996_v41, %v12412_v52  ;;  %v1033_v3 = vcombine.high %v793_v53, %v793_v53  ;;  %v15171_v61 = vpop.f32.mrb[16].mxu0 }
 0x104   :  { %v4377_v31 = vpack.c.b16 %v4181_v23, %v4181_v23  ;;  %v3043_v4 = vmax.f32 %v997_v28, %v12411_v60  ;;  %v3045_v5 = vmax.f32 %v998_v30, %v12413_v51  ;;  %v1040_v6 = vrot.slane %v793_v53, %v15058_v2 }
 0x105   :  { %v3290_v7 = vmax.f32 %v3042_v0, %v3050_v42  ;;  %v3292_v8 = vmax.f32 %v3044_v1, %v3052_v15  ;;  %v1047_v54 = vrot.slane %v1033_v3, %v15058_v2  ;;  %v727_v32 = vadd.f32 %v15053_v59, %v658_v62  ;;  %v15173_v62 = vpop.f32.mrb[12].mxu1 }
 0x106   :  { %v4444_v40 = vsel %vm15162_vm13, %v4377_v31, %v4443_v63  ;;  %v3291_v44 = vmax.f32 %v3043_v4, %v3051_v13  ;;  %v3293_v9 = vmax.f32 %v3045_v5, %v3053_v50  ;;  %v1048_v11 = vcombine.high %v1040_v6, %v1040_v6 }
 0x107   :  { %4445 = vst [vmem:[#allocation2 + $0x8] sm:$0xf] %v4444_v40  ;;  %v13509_v41 = vpack.c.bf16 %v3290_v7, %v3290_v7  ;;  %v13511_v12 = vpack.c.bf16 %v3292_v8, %v3292_v8  ;;  %v1049_v18 = vcombine.high %v1047_v54, %v1047_v54  ;;  %v12422_v22 = vrot.slane %v1040_v6, 9 }
 0x108   :  { %v13510_v28 = vpack.c.bf16 %v3291_v44, %v3291_v44  ;;  %v13512_v42 = vpack.c.bf16 %v3293_v9, %v3293_v9  ;;  %v12423_v15 = vrot.slane %v1048_v11, 9  ;;  %v12424_v30 = vrot.slane %v1047_v54, 9 }
 0x109   :  { %v4043_v47 = vunpack.c.l.b16 %v13509_v41  ;;  %v4045_v52 = vunpack.c.l.b16 %v13511_v12  ;;  %v12425_v53 = vrot.slane %v1049_v18, 9  ;;  %v3054_v58 = vmax.f32 %v1040_v6, %v12422_v22 }
 0x10a   :  { %v4044_v60 = vunpack.c.l.b16 %v13510_v28  ;;  %v4046_v51 = vunpack.c.l.b16 %v13512_v42  ;;  %v3055_v13 = vmax.f32 %v1048_v11, %v12423_v15  ;;  %v3056_v50 = vmax.f32 %v1047_v54, %v12424_v30  ;;  %v15190_v42 = vpop.f32.mrb[17].mxu0 }
 0x10b   :  { %v4182_v23 = vrot.slane %v4043_v47, 7  ;;  %v4185_v63 = vrot.slane %v4045_v52, 5  ;;  %v3057_v0 = vmax.f32 %v1049_v18, %v12425_v53  ;;  %v791_v1 = vmax.f32 %v727_v32, 0.0  ;;  %17514 = vst [vmem:[#allocation9_spill] sm:$0xff] %v15190_v42  ;;  %v15195_v42 = vpop.f32.mrb[13].mxu1 }
 0x10c   :  { %v4183_v3 = vrot.slane %v4044_v60, 6  ;;  %v4187_v31 = vrot.slane %v4046_v51, 4  ;;  %v1574_v4 = vrot.slane %v1560_v29, %v15058_v2  ;;  %v1575_v5 = vcombine.high %v15094_v35, %v15094_v35 }
 0x10d   :  { %v999_v6 = vcombine.high %v791_v1, %v791_v1  ;;  %v1006_v7 = vrot.slane %v791_v1, %v15058_v2  ;;  %v12546_v8 = vrot.slane %v15094_v35, 9  ;;  %v1526_v54 = vcombine.high %v15079_v24, %v15079_v24 }
 0x10e   :  { %v4184_v32 = vsel %vm4165_vm6, %v4183_v3, %v4182_v23  ;;  %v1576_v40 = vcombine.high %v1574_v4, %v1574_v4  ;;  %v12547_v44 = vrot.slane %v1575_v5, 9  ;;  %v12548_v9 = vrot.slane %v1574_v4, 9 }
 0x10f   :  { %v4186_v11 = vsel %vm4168_vm7, %v4185_v63, %v4184_v32  ;;  %v1013_v20 = vrot.slane %v999_v6, %v15058_v2  ;;  %v1014_v29 = vcombine.high %v1006_v7, %v1006_v7  ;;  %v12414_v41 = vrot.slane %v1006_v7, 9 }
 0x110   :  { %v4188_v12 = vsel %vm4171_vm8, %v4187_v31, %v4186_v11  ;;  %v12549_v18 = vrot.slane %v1576_v40, 9  ;;  %v3178_v22 = vmax.f32 %v15094_v35, %v12546_v8  ;;  %v3179_v28 = vmax.f32 %v1575_v5, %v12547_v44 }
 0x111   :  { %v1015_v15 = vcombine.high %v1013_v20, %v1013_v20  ;;  %v12415_v30 = vrot.slane %v1014_v29, 9  ;;  %v12416_v47 = vrot.slane %v1013_v20, 9  ;;  %v3046_v52 = vmax.f32 %v1006_v7, %v12414_v41 }
 0x112   :  { %v3180_v53 = vmax.f32 %v1574_v4, %v12548_v9  ;;  %v3181_v60 = vmax.f32 %v1576_v40, %v12549_v18  ;;  %v1533_v51 = vrot.slane %v15079_v24, %v15058_v2  ;;  %v1540_v23 = vrot.slane %v1526_v54, %v15058_v2 }
 0x113   :  { %v12417_v63 = vrot.slane %v1015_v15, 9  ;;  %v3047_v1 = vmax.f32 %v1014_v29, %v12415_v30  ;;  %v3048_v3 = vmax.f32 %v1013_v20, %v12416_v47  ;;  %v3294_v31 = vmax.f32 %v3046_v52, %v3054_v58  ;;  %v4452_v20 = vld [vmem:[#allocation2 + $0x14] sm:$0x1] }
 0x114   :  { %v1541_v6 = vcombine.high %v1533_v51, %v1533_v51  ;;  %v1542_v35 = vcombine.high %v1540_v23, %v1540_v23  ;;  %v12538_v5 = vrot.slane %v1533_v51, 9  ;;  %v12540_v8 = vrot.slane %v1540_v23, 9 }
 0x115   :  { %v3049_v32 = vmax.f32 %v1015_v15, %v12417_v63  ;;  %v3295_v44 = vmax.f32 %v3047_v1, %v3055_v13  ;;  %v3296_v11 = vmax.f32 %v3048_v3, %v3056_v50  ;;  %v13513_v57 = vpack.c.bf16 %v3294_v31, %v3294_v31  ;;  %v15197_v63 = vpop.f32.mrb[18].mxu0 }
 0x116   :  { %v12539_v7 = vrot.slane %v1541_v6, 9  ;;  %v12541_v4 = vrot.slane %v1542_v35, 9  ;;  %v3170_v40 = vmax.f32 %v1533_v51, %v12538_v5  ;;  %v3172_v9 = vmax.f32 %v1540_v23, %v12540_v8 }
 0x117   :  { %v3297_v41 = vmax.f32 %v3049_v32, %v3057_v0  ;;  %v13514_v24 = vpack.c.bf16 %v3295_v44, %v3295_v44  ;;  %v13515_v18 = vpack.c.bf16 %v3296_v11, %v3296_v11  ;;  %v4047_v54 = vunpack.c.l.b16 %v13513_v57  ;;  %v4449_v44 = vld [vmem:[#allocation2 + $0x10] sm:$0xf] }
 0x118   :  { %v3171_v58 = vmax.f32 %v1541_v6, %v12539_v7  ;;  %v3173_v29 = vmax.f32 %v1542_v35, %v12541_v4  ;;  %v3354_v30 = vmax.f32 %v3170_v40, %v3178_v22  ;;  %v3356_v47 = vmax.f32 %v3172_v9, %v3180_v53 }
 0x119   :  { %v4048_v52 = vunpack.c.l.b16 %v13514_v24  ;;  %v4049_v15 = vunpack.c.l.b16 %v13515_v18  ;;  %v4189_v13 = vrot.slane %v4047_v54, 3  ;;  %v13630_v50 = vpack.c.bf16 %v3297_v41, %v3297_v41 }
 0x11a   :  { %v3355_v1 = vmax.f32 %v3171_v58, %v3179_v28  ;;  %v3357_v51 = vmax.f32 %v3173_v29, %v3181_v60  ;;  %v13573_v23 = vpack.c.bf16 %v3354_v30, %v3354_v30  ;;  %v13575_v0 = vpack.c.bf16 %v3356_v47, %v3356_v47 }
 0x11b   :  { %v4190_v3 = vsel %vm4174_vm9, %v4189_v13, %v4188_v12  ;;  %v4191_v57 = vrot.slane %v4048_v52, 2  ;;  %v4193_v31 = vrot.slane %v4049_v15, 1  ;;  %v4453_v6 = vsel %vm15025_vm5, %v13630_v50, %v4452_v20 }
 0x11c   :  { %4454 = vst [vmem:[#allocation2 + $0x14] sm:$0x1] %v4453_v6  ;;  %v13574_v22 = vpack.c.bf16 %v3355_v1, %v3355_v1  ;;  %v13576_v53 = vpack.c.bf16 %v3357_v51, %v3357_v51  ;;  %v4107_v35 = vunpack.c.l.b16 %v13573_v23  ;;  %v4109_v5 = vunpack.c.l.b16 %v13575_v0 }
 0x11d   :  { %v4192_v8 = vsel %vm4177_vm10, %v4191_v57, %v4190_v3  ;;  %v825_v32 = vmax.f32 %v15076_v21, 0.0  ;;  %v823_v28 = vmax.f32 %v15082_v25, 0.0  ;;  %v663_v60 = vmul.f32 %v15110_v16, %v15046_v55 }
 0x11e   :  { %v4194_v12 = vsel %vm4180_vm12, %v4193_v31, %v4192_v8  ;;  %v4108_v11 = vunpack.c.l.b16 %v13574_v22  ;;  %v4110_v7 = vunpack.c.l.b16 %v13576_v53  ;;  %v4286_v4 = vrot.slane %v4107_v35, 7 }
 0x11f   :  { %v4379_v40 = vpack.c.b16 %v4194_v12, %v4194_v12  ;;  %v4289_v9 = vrot.slane %v4109_v5, 5  ;;  %v1577_v41 = vcombine.high %v825_v32, %v825_v32  ;;  %v1584_v24 = vrot.slane %v825_v32, %v15058_v2 }
 0x120   :  { %v4287_v18 = vrot.slane %v4108_v11, 6  ;;  %v4291_v54 = vrot.slane %v4110_v7, 4  ;;  %v1543_v20 = vcombine.high %v823_v28, %v823_v28  ;;  %v1550_v21 = vrot.slane %v823_v28, %v15058_v2 }
 0x121   :  { %v4450_v25 = vsel %vm15162_vm13, %v4379_v40, %v4449_v44  ;;  %v1591_v16 = vrot.slane %v1577_v41, %v15058_v2  ;;  %v1592_v58 = vcombine.high %v1584_v24, %v1584_v24  ;;  %v12550_v29 = vrot.slane %v1584_v24, 9  ;;  %v15222_v41 = vpop.f32.mrb[19].mxu0 }
 0x122   :  { %4451 = vst [vmem:[#allocation2 + $0x10] sm:$0xf] %v4450_v25  ;;  %v4288_v30 = vsel %vm4165_vm6, %v4287_v18, %v4286_v4  ;;  %v1557_v47 = vrot.slane %v1543_v20, %v15058_v2  ;;  %v1558_v52 = vcombine.high %v1550_v21, %v1550_v21  ;;  %v12542_v15 = vrot.slane %v1550_v21, 9 }
 0x123   :  { %v4290_v13 = vsel %vm4168_vm7, %v4289_v9, %v4288_v30  ;;  %v1593_v50 = vcombine.high %v1591_v16, %v1591_v16  ;;  %v12551_v1 = vrot.slane %v1592_v58, 9  ;;  %v12552_v51 = vrot.slane %v1591_v16, 9 }
 0x124   :  { %v3182_v23 = vmax.f32 %v1584_v24, %v12550_v29  ;;  %v1559_v0 = vcombine.high %v1557_v47, %v1557_v47  ;;  %v12543_v3 = vrot.slane %v1558_v52, 9  ;;  %v12544_v57 = vrot.slane %v1557_v47, 9 }
 0x125   :  { %v12553_v31 = vrot.slane %v1593_v50, 9  ;;  %v3183_v6 = vmax.f32 %v1592_v58, %v12551_v1  ;;  %v3184_v22 = vmax.f32 %v1591_v16, %v12552_v51  ;;  %v3174_v53 = vmax.f32 %v1550_v21, %v12542_v15  ;;  %v4500_v58 = vld [vmem:[#allocation2 + $0x64] sm:$0x1] }
 0x126   :  { %v12545_v35 = vrot.slane %v1559_v0, 9  ;;  %v3175_v5 = vmax.f32 %v1558_v52, %v12543_v3  ;;  %v3176_v8 = vmax.f32 %v1557_v47, %v12544_v57  ;;  %v4292_v32 = vsel %vm4171_vm8, %v4291_v54, %v4290_v13  ;;  %v15229_v47 = vpop.f32.mrb[14].mxu1 }
 0x127   :  { %v3185_v28 = vmax.f32 %v1593_v50, %v12553_v31  ;;  %v3358_v12 = vmax.f32 %v3174_v53, %v3182_v23  ;;  %v732_v44 = vadd.f32 %v15053_v59, %v663_v60  ;;  %v695_v11 = vmul.f32 %v15096_v36, %v15046_v55 }
 0x128   :  { %v3177_v7 = vmax.f32 %v1559_v0, %v12545_v35  ;;  %v3359_v4 = vmax.f32 %v3175_v5, %v3183_v6  ;;  %v3360_v40 = vmax.f32 %v3176_v8, %v3184_v22  ;;  %v661_v9 = vmul.f32 %v15046_v55, %v15114_v26 }
 0x129   :  { %v13577_v24 = vpack.c.bf16 %v3358_v12, %v3358_v12  ;;  %v796_v18 = vmax.f32 %v732_v44, 0.0  ;;  %v764_v20 = vadd.f32 %v15053_v59, %v695_v11  ;;  %v693_v54 = vmul.f32 %v15046_v55, %v15099_v43  ;;  %v4497_v11 = vld [vmem:[#allocation2 + $0x60] sm:$0xf] }
 0x12a   :  { %v3361_v21 = vmax.f32 %v3177_v7, %v3185_v28  ;;  %v13578_v60 = vpack.c.bf16 %v3359_v4, %v3359_v4  ;;  %v13579_v25 = vpack.c.bf16 %v3360_v40, %v3360_v40  ;;  %v730_v36 = vadd.f32 %v15053_v59, %v661_v9 }
 0x12b   :  { %v4111_v16 = vunpack.c.l.b16 %v13577_v24  ;;  %v1084_v29 = vcombine.high %v796_v18, %v796_v18  ;;  %v1091_v30 = vrot.slane %v796_v18, %v15058_v2  ;;  %v828_v26 = vmax.f32 %v764_v20, 0.0 }
 0x12c   :  { %v4112_v52 = vunpack.c.l.b16 %v13578_v60  ;;  %v4113_v15 = vunpack.c.l.b16 %v13579_v25  ;;  %v13638_v13 = vpack.c.bf16 %v3361_v21, %v3361_v21  ;;  %v794_v50 = vmax.f32 %v730_v36, 0.0  ;;  %v15240_v36 = vpop.f32.mrb[15].mxu1 }
 0x12d   :  { %v4293_v1 = vrot.slane %v4111_v16, 3  ;;  %v1098_v43 = vrot.slane %v1084_v29, %v15058_v2  ;;  %v1099_v51 = vcombine.high %v1091_v30, %v1091_v30  ;;  %v12434_v23 = vrot.slane %v1091_v30, 9 }
 0x12e   :  { %v4295_v0 = vrot.slane %v4112_v52, 2  ;;  %v4297_v3 = vrot.slane %v4113_v15, 1  ;;  %v4501_v57 = vsel %vm15025_vm5, %v13638_v13, %v4500_v58  ;;  %v1628_v31 = vcombine.high %v828_v26, %v828_v26 }
 0x12f   :  { %v4294_v6 = vsel %vm4174_vm9, %v4293_v1, %v4292_v32  ;;  %4502 = vst [vmem:[#allocation2 + $0x64] sm:$0x1] %v4501_v57  ;;  %v1100_v22 = vcombine.high %v1098_v43, %v1098_v43  ;;  %v12435_v53 = vrot.slane %v1099_v51, 9  ;;  %v12436_v35 = vrot.slane %v1098_v43, 9 }
 0x130   :  { %v4296_v5 = vsel %vm4177_vm10, %v4295_v0, %v4294_v6  ;;  %v3066_v8 = vmax.f32 %v1091_v30, %v12434_v23  ;;  %v1635_v28 = vrot.slane %v828_v26, %v15058_v2  ;;  %v1642_v12 = vrot.slane %v1628_v31, %v15058_v2 }
 0x131   :  { %v4298_v44 = vsel %vm4180_vm12, %v4297_v3, %v4296_v5  ;;  %v12437_v7 = vrot.slane %v1100_v22, 9  ;;  %v3067_v4 = vmax.f32 %v1099_v51, %v12435_v53  ;;  %v3068_v40 = vmax.f32 %v1098_v43, %v12436_v35 }
 0x132   :  { %v4395_v9 = vpack.c.b16 %v4298_v44, %v4298_v44  ;;  %v1643_v24 = vcombine.high %v1635_v28, %v1635_v28  ;;  %v1644_v32 = vcombine.high %v1642_v12, %v1642_v12  ;;  %v12562_v18 = vrot.slane %v1635_v28, 9 }
 0x133   :  { %v3069_v20 = vmax.f32 %v1100_v22, %v12437_v7  ;;  %v12564_v21 = vrot.slane %v1642_v12, 9  ;;  %v1050_v60 = vcombine.high %v794_v50, %v794_v50  ;;  %v1057_v25 = vrot.slane %v794_v50, %v15058_v2  ;;  %v15257_v7 = vpop.f32.mrb[20].mxu0 }
 0x134   :  { %v4498_v16 = vsel %vm15162_vm13, %v4395_v9, %v4497_v11  ;;  %v12563_v58 = vrot.slane %v1643_v24, 9  ;;  %v12565_v29 = vrot.slane %v1644_v32, 9  ;;  %v3194_v30 = vmax.f32 %v1635_v28, %v12562_v18 }
 0x135   :  { %4499 = vst [vmem:[#allocation2 + $0x60] sm:$0xf] %v4498_v16  ;;  %v3196_v26 = vmax.f32 %v1642_v12, %v12564_v21  ;;  %v1064_v52 = vrot.slane %v1050_v60, %v15058_v2  ;;  %v1065_v15 = vcombine.high %v1057_v25, %v1057_v25  ;;  %v12426_v13 = vrot.slane %v1057_v25, 9 }
 0x136   :  { %v3195_v1 = vmax.f32 %v1643_v24, %v12563_v58  ;;  %v3197_v43 = vmax.f32 %v1644_v32, %v12565_v29  ;;  %v762_v51 = vadd.f32 %v15053_v59, %v693_v54  ;;  %v664_v50 = vmul.f32 %v15118_v39, %v15046_v55 }
 0x137   :  { %v1066_v23 = vcombine.high %v1064_v52, %v1064_v52  ;;  %v12427_v0 = vrot.slane %v1065_v15, 9  ;;  %v12428_v3 = vrot.slane %v1064_v52, 9  ;;  %v3058_v57 = vmax.f32 %v1057_v25, %v12426_v13 }
 0x138   :  { %v826_v31 = vmax.f32 %v762_v51, 0.0  ;;  %v733_v6 = vadd.f32 %v15053_v59, %v664_v50  ;;  %v662_v22 = vmul.f32 %v15046_v55, %v15122_v46  ;;  %v15253_v53 = vmul.f32 %v15103_v49, %v15046_v55 }
 0x139   :  { %v12429_v35 = vrot.slane %v1066_v23, 9  ;;  %v3059_v5 = vmax.f32 %v1065_v15, %v12427_v0  ;;  %v3060_v54 = vmax.f32 %v1064_v52, %v12428_v3  ;;  %v3298_v28 = vmax.f32 %v3058_v57, %v3066_v8 }
 0x13a   :  { %v1594_v12 = vcombine.high %v826_v31, %v826_v31  ;;  %v1601_v39 = vrot.slane %v826_v31, %v15058_v2  ;;  %v797_v44 = vmax.f32 %v733_v6, 0.0  ;;  %v731_v11 = vadd.f32 %v15053_v59, %v662_v22  ;;  %v15260_v31 = vpop.f32.mrb[16].mxu1 }
 0x13b   :  { %v3061_v9 = vmax.f32 %v1066_v23, %v12429_v35  ;;  %v3299_v24 = vmax.f32 %v3059_v5, %v3067_v4  ;;  %v3300_v32 = vmax.f32 %v3060_v54, %v3068_v40  ;;  %v13517_v46 = vpack.c.bf16 %v3298_v28, %v3298_v28 }
 0x13c   :  { %v1608_v18 = vrot.slane %v1594_v12, %v15058_v2  ;;  %v1609_v49 = vcombine.high %v1601_v39, %v1601_v39  ;;  %v12554_v21 = vrot.slane %v1601_v39, 9  ;;  %v1101_v60 = vcombine.high %v797_v44, %v797_v44 }
 0x13d   :  { %v3301_v25 = vmax.f32 %v3061_v9, %v3069_v20  ;;  %v13518_v16 = vpack.c.bf16 %v3299_v24, %v3299_v24  ;;  %v13519_v8 = vpack.c.bf16 %v3300_v32, %v3300_v32  ;;  %v4051_v58 = vunpack.c.l.b16 %v13517_v46 }
 0x13e   :  { %v1610_v29 = vcombine.high %v1608_v18, %v1608_v18  ;;  %v12555_v52 = vrot.slane %v1609_v49, 9  ;;  %v12556_v15 = vrot.slane %v1608_v18, 9  ;;  %v3186_v13 = vmax.f32 %v1601_v39, %v12554_v21 }
 0x13f   :  { %v13520_v51 = vpack.c.bf16 %v3301_v25, %v3301_v25  ;;  %v4052_v50 = vunpack.c.l.b16 %v13518_v16  ;;  %v4053_v0 = vunpack.c.l.b16 %v13519_v8  ;;  %v4195_v23 = vrot.slane %v4051_v58, 7 }
 0x140   :  { %v12557_v4 = vrot.slane %v1610_v29, 9  ;;  %v3187_v40 = vmax.f32 %v1609_v49, %v12555_v52  ;;  %v3188_v3 = vmax.f32 %v1608_v18, %v12556_v15  ;;  %v3362_v57 = vmax.f32 %v3186_v13, %v3194_v30 }
 0x141   :  { %v4054_v6 = vunpack.c.l.b16 %v13520_v51  ;;  %v4196_v22 = vrot.slane %v4052_v50, 6  ;;  %v4198_v20 = vrot.slane %v4053_v0, 5  ;;  %v1108_v35 = vrot.slane %v797_v44, %v15058_v2  ;;  %v3505_v51 = vld [vmem:[#allocation2 + $0x6c] sm:$0x1] }
 0x142   :  { %v3189_v5 = vmax.f32 %v1610_v29, %v12557_v4  ;;  %v3363_v54 = vmax.f32 %v3187_v40, %v3195_v1  ;;  %v3364_v28 = vmax.f32 %v3188_v3, %v3196_v26  ;;  %v13581_v12 = vpack.c.bf16 %v3362_v57, %v3362_v57  ;;  %v15266_v29 = vpop.f32.mrb[21].mxu0 }
 0x143   :  { %v4197_v39 = vsel %vm4165_vm6, %v4196_v22, %v4195_v23  ;;  %v4200_v9 = vrot.slane %v4054_v6, 4  ;;  %v1115_v24 = vrot.slane %v1101_v60, %v15058_v2  ;;  %v1116_v32 = vcombine.high %v1108_v35, %v1108_v35 }
 0x144   :  { %v4199_v46 = vsel %vm4168_vm7, %v4198_v20, %v4197_v39  ;;  %v3365_v30 = vmax.f32 %v3189_v5, %v3197_v43  ;;  %v13582_v18 = vpack.c.bf16 %v3363_v54, %v3363_v54  ;;  %v13583_v49 = vpack.c.bf16 %v3364_v28, %v3364_v28  ;;  %v15278_v5 = vpop.f32.mrb[17].mxu1 }
 0x145   :  { %v4115_v21 = vunpack.c.l.b16 %v13581_v12  ;;  %v1117_v25 = vcombine.high %v1115_v24, %v1115_v24  ;;  %v12438_v16 = vrot.slane %v1108_v35, 9  ;;  %v12439_v8 = vrot.slane %v1116_v32, 9 }
 0x146   :  { %v13584_v44 = vpack.c.bf16 %v3365_v30, %v3365_v30  ;;  %v4116_v58 = vunpack.c.l.b16 %v13582_v18  ;;  %v4117_v1 = vunpack.c.l.b16 %v13583_v49  ;;  %v12440_v26 = vrot.slane %v1115_v24, 9  ;;  %v15300_v49 = vld [vmem:[%s17503_s4] ss:$0 sm:$0xff] }
 0x147   :  { %v4299_v52 = vrot.slane %v4115_v21, 7  ;;  %v12441_v15 = vrot.slane %v1117_v25, 9  ;;  %v3070_v13 = vmax.f32 %v1108_v35, %v12438_v16  ;;  %v3071_v60 = vmax.f32 %v1116_v32, %v12439_v8 }
 0x148   :  { %v4118_v50 = vunpack.c.l.b16 %v13584_v44  ;;  %v4300_v0 = vrot.slane %v4116_v58, 6  ;;  %v4302_v43 = vrot.slane %v4117_v1, 5  ;;  %v3072_v23 = vmax.f32 %v1115_v24, %v12440_v26  ;;  %v15304_v44 = vpop.f32.mrb[22].mxu0 }
 0x149   :  { %v3073_v4 = vmax.f32 %v1117_v25, %v12441_v15  ;;  %v795_v40 = vmax.f32 %v731_v11, 0.0  ;;  %v15269_v3 = vsel %vm4171_vm8, %v4200_v9, %v4199_v46  ;;  %v765_v57 = vadd.f32 %v15053_v59, %v15253_v53 }
 0x14a   :  { %v4301_v6 = vsel %vm4165_vm6, %v4300_v0, %v4299_v52  ;;  %v4304_v22 = vrot.slane %v4118_v50, 4  ;;  %v694_v20 = vmul.f32 %v15046_v55, %v15107_v56  ;;  %v3506_v35 = vsel %vm15017_vm3, 0, %v3505_v51  ;;  %v15289_v55 = vld [vmem:[%s17502_s3] ss:$0 sm:$0xff] }
 0x14b   :  { %v4303_v54 = vsel %vm4168_vm7, %v4302_v43, %v4301_v6  ;;  %v1067_v11 = vcombine.high %v795_v40, %v795_v40  ;;  %v1074_v28 = vrot.slane %v795_v40, %v15058_v2  ;;  %v829_v12 = vmax.f32 %v765_v57, 0.0  ;;  %3507 = vst [vmem:[#allocation2 + $0x6c] sm:$0x1] %v3506_v35 }
 0x14c   :  { %v763_v53 = vadd.f32 %v15053_v59, %v694_v20  ;;  %v15284_v39 = vsel %vm4171_vm8, %v4304_v22, %v4303_v54  ;;  %v667_v56 = vmul.f32 %v15289_v55, %v15134_v33  ;;  %v699_v9 = vmul.f32 %v15289_v55, %v15112_v17 }
 0x14d   :  { %v1081_v24 = vrot.slane %v1067_v11, %v15058_v2  ;;  %v1082_v32 = vcombine.high %v1074_v28, %v1074_v28  ;;  %v12430_v46 = vrot.slane %v1074_v28, 9  ;;  %v1645_v30 = vcombine.high %v829_v12, %v829_v12 }
 0x14e   :  { %v1652_v59 = vrot.slane %v829_v12, %v15058_v2  ;;  %v827_v18 = vmax.f32 %v763_v53, 0.0  ;;  %v736_v21 = vadd.f32 %v15300_v49, %v667_v56  ;;  %v768_v33 = vadd.f32 %v15300_v49, %v699_v9 }
 0x14f   :  { %v1083_v25 = vcombine.high %v1081_v24, %v1081_v24  ;;  %v12431_v16 = vrot.slane %v1082_v32, 9  ;;  %v12432_v17 = vrot.slane %v1081_v24, 9  ;;  %v3062_v8 = vmax.f32 %v1074_v28, %v12430_v46 }
 0x150   :  { %v1659_v58 = vrot.slane %v1645_v30, %v15058_v2  ;;  %v1660_v1 = vcombine.high %v1652_v59, %v1652_v59  ;;  %v12566_v26 = vrot.slane %v1652_v59, 9  ;;  %v1611_v52 = vcombine.high %v827_v18, %v827_v18 }
 0x151   :  { %v12433_v15 = vrot.slane %v1083_v25, 9  ;;  %v3063_v51 = vmax.f32 %v1082_v32, %v12431_v16  ;;  %v3064_v50 = vmax.f32 %v1081_v24, %v12432_v17  ;;  %v3302_v0 = vmax.f32 %v3062_v8, %v3070_v13  ;;  %v4458_v32 = vld [vmem:[#allocation2 + $0x1c] sm:$0x1] }
 0x152   :  { %v1661_v43 = vcombine.high %v1659_v58, %v1659_v58  ;;  %v12567_v40 = vrot.slane %v1660_v1, 9  ;;  %v12568_v57 = vrot.slane %v1659_v58, 9  ;;  %v3198_v6 = vmax.f32 %v1652_v59, %v12566_v26 }
 0x153   :  { %v3065_v22 = vmax.f32 %v1083_v25, %v12433_v15  ;;  %v3303_v20 = vmax.f32 %v3063_v51, %v3071_v60  ;;  %v3304_v35 = vmax.f32 %v3064_v50, %v3072_v23  ;;  %v13521_v54 = vpack.c.bf16 %v3302_v0, %v3302_v0 }
 0x154   :  { %v12569_v11 = vrot.slane %v1661_v43, 9  ;;  %v3199_v28 = vmax.f32 %v1660_v1, %v12567_v40  ;;  %v3200_v12 = vmax.f32 %v1659_v58, %v12568_v57  ;;  %v1618_v53 = vrot.slane %v827_v18, %v15058_v2  ;;  %v15313_v40 = vpop.f32.mrb[23].mxu0 }
 0x155   :  { %v3305_v56 = vmax.f32 %v3065_v22, %v3073_v4  ;;  %v13522_v9 = vpack.c.bf16 %v3303_v20, %v3303_v20  ;;  %v13523_v46 = vpack.c.bf16 %v3304_v35, %v3304_v35  ;;  %v4055_v30 = vunpack.c.l.b16 %v13521_v54  ;;  %v4455_v54 = vld [vmem:[#allocation2 + $0x18] sm:$0xf] }
 0x156   :  { %v3201_v24 = vmax.f32 %v1661_v43, %v12569_v11  ;;  %v1625_v13 = vrot.slane %v1611_v52, %v15058_v2  ;;  %v1626_v16 = vcombine.high %v1618_v53, %v1618_v53  ;;  %v12558_v17 = vrot.slane %v1618_v53, 9 }
 0x157   :  { %v4056_v59 = vunpack.c.l.b16 %v13522_v9  ;;  %v4057_v25 = vunpack.c.l.b16 %v13523_v46  ;;  %v4202_v60 = vrot.slane %v4055_v30, 3  ;;  %v13631_v23 = vpack.c.bf16 %v3305_v56, %v3305_v56 }
 0x158   :  { %v1627_v8 = vcombine.high %v1625_v13, %v1625_v13  ;;  %v12559_v26 = vrot.slane %v1626_v16, 9  ;;  %v12560_v1 = vrot.slane %v1625_v13, 9  ;;  %v3190_v58 = vmax.f32 %v1618_v53, %v12558_v17 }
 0x159   :  { %v4203_v4 = vsel %vm4174_vm9, %v4202_v60, %v15269_v3  ;;  %v4204_v18 = vrot.slane %v4056_v59, 2  ;;  %v4206_v15 = vrot.slane %v4057_v25, 1  ;;  %v4459_v51 = vsel %vm15025_vm5, %v13631_v23, %v4458_v32 }
 0x15a   :  { %4460 = vst [vmem:[#allocation2 + $0x1c] sm:$0x1] %v4459_v51  ;;  %v12561_v52 = vrot.slane %v1627_v8, 9  ;;  %v3191_v50 = vmax.f32 %v1626_v16, %v12559_v26  ;;  %v3192_v0 = vmax.f32 %v1625_v13, %v12560_v1  ;;  %v3366_v43 = vmax.f32 %v3190_v58, %v3198_v6  ;;  %v15325_v51 = vpop.f32.mrb[18].mxu1 }
 0x15b   :  { %v4205_v57 = vsel %vm4177_vm10, %v4204_v18, %v4203_v4  ;;  %v800_v22 = vmax.f32 %v736_v21, 0.0  ;;  %v832_v20 = vmax.f32 %v768_v33, 0.0  ;;  %v665_v35 = vmul.f32 %v15289_v55, %v15137_v48  ;;  %v4506_v48 = vld [vmem:[#allocation2 + $0x6c] sm:$0x1] }
 0x15c   :  { %v4207_v3 = vsel %vm4180_vm12, %v4206_v15, %v4205_v57  ;;  %v3193_v11 = vmax.f32 %v1627_v8, %v12561_v52  ;;  %v3367_v53 = vmax.f32 %v3191_v50, %v3199_v28  ;;  %v3368_v56 = vmax.f32 %v3192_v0, %v3200_v12 }
 0x15d   :  { %v4381_v9 = vpack.c.b16 %v4207_v3, %v4207_v3  ;;  %v13585_v46 = vpack.c.bf16 %v3366_v43, %v3366_v43  ;;  %v1152_v30 = vcombine.high %v800_v22, %v800_v22  ;;  %v1159_v6 = vrot.slane %v800_v22, %v15058_v2 }
 0x15e   :  { %v3369_v32 = vmax.f32 %v3193_v11, %v3201_v24  ;;  %v13586_v13 = vpack.c.bf16 %v3367_v53, %v3367_v53  ;;  %v13587_v16 = vpack.c.bf16 %v3368_v56, %v3368_v56  ;;  %v1696_v17 = vcombine.high %v832_v20, %v832_v20  ;;  %v4503_v53 = vld [vmem:[#allocation2 + $0x68] sm:$0xf] }
 0x15f   :  { %v4456_v21 = vsel %vm15162_vm13, %v4381_v9, %v4455_v54  ;;  %v4119_v33 = vunpack.c.l.b16 %v13585_v46  ;;  %v1166_v59 = vrot.slane %v1152_v30, %v15058_v2  ;;  %v1167_v25 = vcombine.high %v1159_v6, %v1159_v6 }
 0x160   :  { %4457 = vst [vmem:[#allocation2 + $0x18] sm:$0xf] %v4456_v21  ;;  %v4120_v28 = vunpack.c.l.b16 %v13586_v13  ;;  %v4121_v12 = vunpack.c.l.b16 %v13587_v16  ;;  %v13639_v60 = vpack.c.bf16 %v3369_v32, %v3369_v32  ;;  %v12450_v23 = vrot.slane %v1159_v6, 9  ;;  %v15338_v13 = vpop.f32.mrb[19].mxu1 }
 0x161   :  { %v4306_v8 = vrot.slane %v4119_v33, 3  ;;  %v1168_v26 = vcombine.high %v1166_v59, %v1166_v59  ;;  %v12451_v1 = vrot.slane %v1167_v25, 9  ;;  %v12452_v24 = vrot.slane %v1166_v59, 9  ;;  %17515 = vst [vmem:[#allocation10_spill] sm:$0xff] %v15338_v13 }
 0x162   :  { %v4308_v58 = vrot.slane %v4120_v28, 2  ;;  %v4310_v4 = vrot.slane %v4121_v12, 1  ;;  %v4507_v18 = vsel %vm15025_vm5, %v13639_v60, %v4506_v48  ;;  %v3082_v15 = vmax.f32 %v1159_v6, %v12450_v23 }
 0x163   :  { %v4307_v52 = vsel %vm4174_vm9, %v4306_v8, %v15284_v39  ;;  %4508 = vst [vmem:[#allocation2 + $0x6c] sm:$0x1] %v4507_v18  ;;  %v12453_v50 = vrot.slane %v1168_v26, 9  ;;  %v3083_v0 = vmax.f32 %v1167_v25, %v12451_v1  ;;  %v3084_v43 = vmax.f32 %v1166_v59, %v12452_v24 }
 0x164   :  { %v4309_v57 = vsel %vm4177_vm10, %v4308_v58, %v4307_v52  ;;  %v1703_v22 = vrot.slane %v832_v20, %v15058_v2  ;;  %v1710_v3 = vrot.slane %v1696_v17, %v15058_v2  ;;  %v734_v54 = vadd.f32 %v15300_v49, %v665_v35 }
 0x165   :  { %v4311_v11 = vsel %vm4180_vm12, %v4310_v4, %v4309_v57  ;;  %v3085_v56 = vmax.f32 %v1168_v26, %v12453_v50  ;;  %v697_v9 = vmul.f32 %v15289_v55, %v15116_v27  ;;  %v668_v39 = vmul.f32 %v15289_v55, %v15140_v19  ;;  %v14654_v4 = vld [vmem:[%s17501_s2 + $0x20] sm:$0xff]  }
 0x166   :  { %v4397_v46 = vpack.c.b16 %v4311_v11, %v4311_v11  ;;  %v1711_v30 = vcombine.high %v1703_v22, %v1703_v22  ;;  %v1712_v6 = vcombine.high %v1710_v3, %v1710_v3  ;;  %v12578_v32 = vrot.slane %v1703_v22, 9  ;;  %13986 = vmatprep.subr.bf16.mxu1 %v14654_v4 }
 0x167   :  { %v12580_v20 = vrot.slane %v1710_v3, 9  ;;  %v798_v16 = vmax.f32 %v734_v54, 0.0  ;;  %v766_v35 = vadd.f32 %v15300_v49, %v697_v9  ;;  %v737_v17 = vadd.f32 %v15300_v49, %v668_v39  ;;  %13987 = vmatpush3.bf16.msra.mxu1 %v14654_v4 }
 0x168   :  { %v4504_v21 = vsel %vm15162_vm13, %v4397_v46, %v4503_v53  ;;  %v12579_v33 = vrot.slane %v1711_v30, 9  ;;  %v12581_v27 = vrot.slane %v1712_v6, 9  ;;  %v3210_v48 = vmax.f32 %v1703_v22, %v12578_v32  ;;  %v15362_v46 = vpop.f32.mrb[24].mxu0 }
 0x169   :  { %4505 = vst [vmem:[#allocation2 + $0x68] sm:$0xf] %v4504_v21  ;;  %v3212_v19 = vmax.f32 %v1710_v3, %v12580_v20  ;;  %v1118_v59 = vcombine.high %v798_v16, %v798_v16  ;;  %v1125_v25 = vrot.slane %v798_v16, %v15058_v2  ;;  %v830_v28 = vmax.f32 %v766_v35, 0.0  ;;  %17516 = vst [vmem:[#allocation11_spill] sm:$0xff] %v15362_v46 }
 0x16a   :  { %v3211_v12 = vmax.f32 %v1711_v30, %v12579_v33  ;;  %v3213_v60 = vmax.f32 %v1712_v6, %v12581_v27  ;;  %v801_v23 = vmax.f32 %v737_v17, 0.0  ;;  %v666_v8 = vmul.f32 %v15289_v55, %v15143_v37 }
 0x16b   :  { %v1132_v26 = vrot.slane %v1118_v59, %v15058_v2  ;;  %v1133_v1 = vcombine.high %v1125_v25, %v1125_v25  ;;  %v12442_v24 = vrot.slane %v1125_v25, 9  ;;  %v1662_v58 = vcombine.high %v830_v28, %v830_v28 }
 0x16c   :  { %v1669_v18 = vrot.slane %v830_v28, %v15058_v2  ;;  %v1169_v52 = vcombine.high %v801_v23, %v801_v23  ;;  %v15353_v50 = vrot.slane %v801_v23, %v15058_v2  ;;  %v15356_v57 = vadd.f32 %v15300_v49, %v666_v8 }
 0x16d   :  { %v1134_v22 = vcombine.high %v1132_v26, %v1132_v26  ;;  %v12443_v37 = vrot.slane %v1133_v1, 9  ;;  %v12444_v3 = vrot.slane %v1132_v26, 9  ;;  %v3074_v54 = vmax.f32 %v1125_v25, %v12442_v24 }
 0x16e   :  { %v1676_v11 = vrot.slane %v1662_v58, %v15058_v2  ;;  %v1677_v53 = vcombine.high %v1669_v18, %v1669_v18  ;;  %v12570_v9 = vrot.slane %v1669_v18, 9  ;;  %v15360_v39 = vrot.slane %v1169_v52, %v15058_v2 }
 0x16f   :  { %v12445_v30 = vrot.slane %v1134_v22, 9  ;;  %v3075_v6 = vmax.f32 %v1133_v1, %v12443_v37  ;;  %v3076_v32 = vmax.f32 %v1132_v26, %v12444_v3  ;;  %v3306_v20 = vmax.f32 %v3074_v54, %v3082_v15  ;;  %v15364_v37 = vpop.f32.mrb[20].mxu1 }
 0x170   :  { %v1678_v16 = vcombine.high %v1676_v11, %v1676_v11  ;;  %v12571_v35 = vrot.slane %v1677_v53, 9  ;;  %v12572_v17 = vrot.slane %v1676_v11, 9  ;;  %v3202_v21 = vmax.f32 %v1669_v18, %v12570_v9 }
 0x171   :  { %v3077_v33 = vmax.f32 %v1134_v22, %v12445_v30  ;;  %v3307_v27 = vmax.f32 %v3075_v6, %v3083_v0  ;;  %v3308_v59 = vmax.f32 %v3076_v32, %v3084_v43  ;;  %v13525_v25 = vpack.c.bf16 %v3306_v20, %v3306_v20 }
 0x172   :  { %v12573_v28 = vrot.slane %v1678_v16, 9  ;;  %v3203_v23 = vmax.f32 %v1677_v53, %v12571_v35  ;;  %v3204_v8 = vmax.f32 %v1676_v11, %v12572_v17  ;;  %v3370_v24 = vmax.f32 %v3202_v21, %v3210_v48 }
 0x173   :  { %v3309_v58 = vmax.f32 %v3077_v33, %v3085_v56  ;;  %v13526_v4 = vpack.c.bf16 %v3307_v27, %v3307_v27  ;;  %v13527_v52 = vpack.c.bf16 %v3308_v59, %v3308_v59  ;;  %v4059_v46 = vunpack.c.l.b16 %v13525_v25  ;;  %v3484_v27 = vld [vmem:[#allocation2 + $0x24] sm:$0x1]  ;;  %v15373_v59 = vpop.f32.mrb[25].mxu0 }
 0x174   :  { %v3205_v13 = vmax.f32 %v1678_v16, %v12573_v28  ;;  %v3371_v1 = vmax.f32 %v3203_v23, %v3211_v12  ;;  %v3372_v26 = vmax.f32 %v3204_v8, %v3212_v19  ;;  %v13589_v15 = vpack.c.bf16 %v3370_v24, %v3370_v24  ;;  %v3458_v24 = vld [vmem:[#allocation2 + $0x70] sm:$0x1] }
 0x175   :  { %v13528_v3 = vpack.c.bf16 %v3309_v58, %v3309_v58  ;;  %v4060_v18 = vunpack.c.l.b16 %v13526_v4  ;;  %v4061_v22 = vunpack.c.l.b16 %v13527_v52  ;;  %v4208_v0 = vrot.slane %v4059_v46, 7 }
 0x176   :  { %v3373_v43 = vmax.f32 %v3205_v13, %v3213_v60  ;;  %v13590_v54 = vpack.c.bf16 %v3371_v1, %v3371_v1  ;;  %v13591_v9 = vpack.c.bf16 %v3372_v26, %v3372_v26  ;;  %v4123_v53 = vunpack.c.l.b16 %v13589_v15  ;;  %v3434_v60 = vld [vmem:[#allocation2 + $0x20] sm:$0x1]  ;;  %v3508_v26 = vld [vmem:[#allocation2 + $0x74] sm:$0x1] }
 0x177   :  { %v4062_v11 = vunpack.c.l.b16 %v13528_v3  ;;  %v4209_v48 = vrot.slane %v4060_v18, 6  ;;  %v4211_v56 = vrot.slane %v4061_v22, 5  ;;  %v1184_v30 = vcombine.high %v15353_v50, %v15353_v50 }
 0x178   :  { %v13592_v6 = vpack.c.bf16 %v3373_v43, %v3373_v43  ;;  %v4124_v12 = vunpack.c.l.b16 %v13590_v54  ;;  %v4125_v19 = vunpack.c.l.b16 %v13591_v9  ;;  %v4312_v32 = vrot.slane %v4123_v53, 7 }
 0x179   :  { %v4210_v20 = vsel %vm4165_vm6, %v4209_v48, %v4208_v0  ;;  %v4213_v16 = vrot.slane %v4062_v11, 4  ;;  %v1185_v46 = vcombine.high %v15360_v39, %v15360_v39  ;;  %v12454_v13 = vrot.slane %v15353_v50, 9  ;;  %v15383_v0 = vpop.f32.mrb[21].mxu1 }
 0x17a   :  { %v4212_v35 = vsel %vm4168_vm7, %v4211_v56, %v4210_v20  ;;  %v4126_v17 = vunpack.c.l.b16 %v13592_v6  ;;  %v4313_v21 = vrot.slane %v4124_v12, 6  ;;  %v4315_v33 = vrot.slane %v4125_v19, 5 }
 0x17b   :  { %v12455_v25 = vrot.slane %v1184_v30, 9  ;;  %v12456_v28 = vrot.slane %v15360_v39, 9  ;;  %v12457_v23 = vrot.slane %v1185_v46, 9  ;;  %v3086_v8 = vmax.f32 %v15353_v50, %v12454_v13 }
 0x17c   :  { %v4314_v58 = vsel %vm4165_vm6, %v4313_v21, %v4312_v32  ;;  %v4317_v4 = vrot.slane %v4126_v17, 4  ;;  %v799_v52 = vmax.f32 %v15356_v57, 0.0  ;;  %v3435_v1 = vsel %vm15025_vm5, 0, %v3434_v60  ;;  %v15409_v21 = vpop.f32.mrb[26].mxu0 }
 0x17d   :  { %v4316_v15 = vsel %vm4168_vm7, %v4315_v33, %v4314_v58  ;;  %v3087_v3 = vmax.f32 %v1184_v30, %v12455_v25  ;;  %v3088_v18 = vmax.f32 %v15360_v39, %v12456_v28  ;;  %v3089_v22 = vmax.f32 %v1185_v46, %v12457_v23  ;;  %3436 = vst [vmem:[#allocation2 + $0x20] sm:$0x1] %v3435_v1 }
 0x17e   :  { %v1135_v50 = vcombine.high %v799_v52, %v799_v52  ;;  %v1142_v43 = vrot.slane %v799_v52, %v15058_v2  ;;  %v3485_v54 = vsel %vm15017_vm3, 0, %v3484_v27  ;;  %v4214_v57 = vsel %vm4171_vm8, %v4213_v16, %v4212_v35 }
 0x17f   :  { %3486 = vst [vmem:[#allocation2 + $0x24] sm:$0x1] %v3485_v54  ;;  %v700_v9 = vmul.f32 %v15289_v55, %v15145_v45  ;;  %v698_v53 = vmul.f32 %v15289_v55, %v15153_v10  ;;  %v3459_v39 = vsel %vm15025_vm5, 0, %v3458_v24  ;;  %v3509_v11 = vsel %vm15017_vm3, 0, %v3508_v26 }
 0x180   :  { %v1149_v48 = vrot.slane %v1135_v50, %v15058_v2  ;;  %v1150_v56 = vcombine.high %v1142_v43, %v1142_v43  ;;  %v12446_v30 = vrot.slane %v1142_v43, 9  ;;  %3460 = vst [vmem:[#allocation2 + $0x70] sm:$0x1] %v3459_v39  ;;  %3510 = vst [vmem:[#allocation2 + $0x74] sm:$0x1] %v3509_v11  ;;  %v15399_v6 = vsel %vm4171_vm8, %v4317_v4, %v4316_v15 }
 0x181   :  { %v769_v45 = vadd.f32 %v15300_v49, %v700_v9  ;;  %v767_v12 = vadd.f32 %v15300_v49, %v698_v53  ;;  %v671_v10 = vmul.f32 %v15289_v55, %v15171_v61  ;;  %v703_v19 = vmul.f32 %v15289_v55, %v15173_v62 }
 0x182   :  { %v1151_v32 = vcombine.high %v1149_v48, %v1149_v48  ;;  %v12447_v20 = vrot.slane %v1150_v56, 9  ;;  %v12448_v16 = vrot.slane %v1149_v48, 9  ;;  %v3078_v46 = vmax.f32 %v1142_v43, %v12446_v30 }
 0x183   :  { %v833_v13 = vmax.f32 %v769_v45, 0.0  ;;  %v831_v60 = vmax.f32 %v767_v12, 0.0  ;;  %v740_v35 = vadd.f32 %v15300_v49, %v671_v10  ;;  %v772_v17 = vadd.f32 %v15300_v49, %v703_v19 }
 0x184   :  { %v12449_v33 = vrot.slane %v1151_v32, 9  ;;  %v3079_v27 = vmax.f32 %v1150_v56, %v12447_v20  ;;  %v3080_v25 = vmax.f32 %v1149_v48, %v12448_v16  ;;  %v3310_v28 = vmax.f32 %v3078_v46, %v3086_v8 }
 0x185   :  { %v1713_v61 = vcombine.high %v833_v13, %v833_v13  ;;  %v1720_v23 = vrot.slane %v833_v13, %v15058_v2  ;;  %v1679_v62 = vcombine.high %v831_v60, %v831_v60  ;;  %v1686_v24 = vrot.slane %v831_v60, %v15058_v2 }
 0x186   :  { %v3081_v58 = vmax.f32 %v1151_v32, %v12449_v33  ;;  %v3311_v4 = vmax.f32 %v3079_v27, %v3087_v3  ;;  %v3312_v52 = vmax.f32 %v3080_v25, %v3088_v18  ;;  %v13529_v1 = vpack.c.bf16 %v3310_v28, %v3310_v28  ;;  %v4464_v39 = vld [vmem:[#allocation2 + $0x24] sm:$0x1] }
 0x187   :  { %v1727_v26 = vrot.slane %v1713_v61, %v15058_v2  ;;  %v1728_v15 = vcombine.high %v1720_v23, %v1720_v23  ;;  %v12582_v50 = vrot.slane %v1720_v23, 9  ;;  %v1693_v43 = vrot.slane %v1679_v62, %v15058_v2 }
 0x188   :  { %v3313_v54 = vmax.f32 %v3081_v58, %v3089_v22  ;;  %v13530_v9 = vpack.c.bf16 %v3311_v4, %v3311_v4  ;;  %v13531_v53 = vpack.c.bf16 %v3312_v52, %v3312_v52  ;;  %v4063_v8 = vunpack.c.l.b16 %v13529_v1  ;;  %v15419_v58 = vpop.f32.mrb[27].mxu0 }
 0x189   :  { %v1729_v11 = vcombine.high %v1727_v26, %v1727_v26  ;;  %v12583_v48 = vrot.slane %v1728_v15, 9  ;;  %v12584_v56 = vrot.slane %v1727_v26, 9  ;;  %v3214_v30 = vmax.f32 %v1720_v23, %v12582_v50 }
 0x18a   :  { %v4064_v45 = vunpack.c.l.b16 %v13530_v9  ;;  %v4065_v12 = vunpack.c.l.b16 %v13531_v53  ;;  %v4215_v3 = vrot.slane %v4063_v8, 3  ;;  %v13632_v18 = vpack.c.bf16 %v3313_v54, %v3313_v54 }
 0x18b   :  { %v12585_v10 = vrot.slane %v1729_v11, 9  ;;  %v3215_v19 = vmax.f32 %v1728_v15, %v12583_v48  ;;  %v3216_v32 = vmax.f32 %v1727_v26, %v12584_v56  ;;  %v1694_v20 = vcombine.high %v1686_v24, %v1686_v24 }
 0x18c   :  { %v4216_v16 = vsel %vm4174_vm9, %v4215_v3, %v4214_v57  ;;  %v4217_v46 = vrot.slane %v4064_v45, 2  ;;  %v4219_v22 = vrot.slane %v4065_v12, 1  ;;  %v4465_v13 = vsel %vm15025_vm5, %v13632_v18, %v4464_v39  ;;  %v4461_v57 = vld [vmem:[#allocation2 + $0x20] sm:$0xf]  ;;  %v4512_v18 = vld [vmem:[#allocation2 + $0x74] sm:$0x1] }
 0x18d   :  { %4466 = vst [vmem:[#allocation2 + $0x24] sm:$0x1] %v4465_v13  ;;  %v3217_v60 = vmax.f32 %v1729_v11, %v12585_v10  ;;  %v1695_v33 = vcombine.high %v1693_v43, %v1693_v43  ;;  %v12574_v27 = vrot.slane %v1686_v24, 9  ;;  %v12575_v25 = vrot.slane %v1694_v20, 9 }
 0x18e   :  { %v4218_v28 = vsel %vm4177_vm10, %v4217_v46, %v4216_v16  ;;  %v12576_v61 = vrot.slane %v1693_v43, 9  ;;  %v804_v23 = vmax.f32 %v740_v35, 0.0  ;;  %v836_v62 = vmax.f32 %v772_v17, 0.0 }
 0x18f   :  { %v4220_v4 = vsel %vm4180_vm12, %v4219_v22, %v4218_v28  ;;  %v12577_v52 = vrot.slane %v1695_v33, 9  ;;  %v3206_v1 = vmax.f32 %v1686_v24, %v12574_v27  ;;  %v3207_v26 = vmax.f32 %v1694_v20, %v12575_v25 }
 0x190   :  { %v4383_v15 = vpack.c.b16 %v4220_v4, %v4220_v4  ;;  %v3208_v50 = vmax.f32 %v1693_v43, %v12576_v61  ;;  %v1220_v54 = vcombine.high %v804_v23, %v804_v23  ;;  %v1227_v9 = vrot.slane %v804_v23, %v15058_v2  ;;  %v15435_v23 = vpop.f32.mrb[22].mxu1 }
 0x191   :  { %v3209_v53 = vmax.f32 %v1695_v33, %v12577_v52  ;;  %v3374_v8 = vmax.f32 %v3206_v1, %v3214_v30  ;;  %v3375_v39 = vmax.f32 %v3207_v26, %v3215_v19  ;;  %v1764_v11 = vcombine.high %v836_v62, %v836_v62  ;;  %v17517_v1 = vld [vmem:[#allocation9_spill] sm:$0xff] }
 0x192   :  { %v4462_v35 = vsel %vm15162_vm13, %v4383_v15, %v4461_v57  ;;  %v3376_v17 = vmax.f32 %v3208_v50, %v3216_v32  ;;  %v1234_v48 = vrot.slane %v1220_v54, %v15058_v2  ;;  %v1235_v56 = vcombine.high %v1227_v9, %v1227_v9 }
 0x193   :  { %4463 = vst [vmem:[#allocation2 + $0x20] sm:$0xf] %v4462_v35  ;;  %v3377_v45 = vmax.f32 %v3209_v53, %v3217_v60  ;;  %v13593_v24 = vpack.c.bf16 %v3374_v8, %v3374_v8  ;;  %v13594_v12 = vpack.c.bf16 %v3375_v39, %v3375_v39  ;;  %v12466_v3 = vrot.slane %v1227_v9, 9 }
 0x194   :  { %v13595_v43 = vpack.c.bf16 %v3376_v17, %v3376_v17  ;;  %v1236_v10 = vcombine.high %v1234_v48, %v1234_v48  ;;  %v12467_v20 = vrot.slane %v1235_v56, 9  ;;  %v12468_v16 = vrot.slane %v1234_v48, 9 }
 0x195   :  { %v4127_v30 = vunpack.c.l.b16 %v13593_v24  ;;  %v4128_v19 = vunpack.c.l.b16 %v13594_v12  ;;  %v13640_v46 = vpack.c.bf16 %v3377_v45, %v3377_v45  ;;  %v15426_v22 = vmax.f32 %v1227_v9, %v12466_v3 }
 0x196   :  { %v4129_v13 = vunpack.c.l.b16 %v13595_v43  ;;  %v12469_v32 = vrot.slane %v1236_v10, 9  ;;  %v15428_v33 = vmax.f32 %v1235_v56, %v12467_v20  ;;  %v15430_v27 = vmax.f32 %v1234_v48, %v12468_v16 }
 0x197   :  { %v4319_v60 = vrot.slane %v4127_v30, 3  ;;  %v4321_v25 = vrot.slane %v4128_v19, 2  ;;  %v4513_v28 = vsel %vm15025_vm5, %v13640_v46, %v4512_v18  ;;  %v1771_v61 = vrot.slane %v836_v62, %v15058_v2 }
 0x198   :  { %v4323_v4 = vrot.slane %v4129_v13, 1  ;;  %4514 = vst [vmem:[#allocation2 + $0x74] sm:$0x1] %v4513_v28  ;;  %v15437_v57 = vmax.f32 %v1236_v10, %v12469_v32  ;;  %v1778_v52 = vrot.slane %v1764_v11, %v15058_v2  ;;  %v669_v26 = vmul.f32 %v15289_v55, %v17517_v1  ;;  %v4509_v11 = vld [vmem:[#allocation2 + $0x70] sm:$0xf] }
 0x199   :  { %v4320_v15 = vsel %vm4174_vm9, %v4319_v60, %v15399_v6  ;;  %v1779_v50 = vcombine.high %v1771_v61, %v1771_v61  ;;  %v12594_v54 = vrot.slane %v1771_v61, 9  ;;  %v701_v9 = vmul.f32 %v15289_v55, %v15195_v42  ;;  %v3437_v10 = vld [vmem:[#allocation2 + $0x28] sm:$0x1] }
 0x19a   :  { %v4322_v62 = vsel %vm4177_vm10, %v4321_v25, %v4320_v15  ;;  %v1780_v53 = vcombine.high %v1778_v52, %v1778_v52  ;;  %v12596_v8 = vrot.slane %v1778_v52, 9  ;;  %v738_v39 = vadd.f32 %v15300_v49, %v669_v26 }
 0x19b   :  { %v4324_v35 = vsel %vm4180_vm12, %v4323_v4, %v4322_v62  ;;  %v12595_v17 = vrot.slane %v1779_v50, 9  ;;  %v3226_v48 = vmax.f32 %v1771_v61, %v12594_v54  ;;  %v770_v56 = vadd.f32 %v15300_v49, %v701_v9 }
 0x19c   :  { %v4399_v45 = vpack.c.b16 %v4324_v35, %v4324_v35  ;;  %v12597_v6 = vrot.slane %v1780_v53, 9  ;;  %v3228_v24 = vmax.f32 %v1778_v52, %v12596_v8  ;;  %v802_v12 = vmax.f32 %v738_v39, 0.0 }
 0x19d   :  { %v3227_v3 = vmax.f32 %v1779_v50, %v12595_v17  ;;  %v834_v43 = vmax.f32 %v770_v56, 0.0  ;;  %v672_v42 = vmul.f32 %v15289_v55, %v15197_v63  ;;  %v670_v18 = vmul.f32 %v15289_v55, %v15222_v41 }
 0x19e   :  { %v4510_v20 = vsel %vm15162_vm13, %v4399_v45, %v4509_v11  ;;  %v3229_v16 = vmax.f32 %v1780_v53, %v12597_v6  ;;  %v1186_v30 = vcombine.high %v802_v12, %v802_v12  ;;  %v1193_v19 = vrot.slane %v802_v12, %v15058_v2 }
 0x19f   :  { %4511 = vst [vmem:[#allocation2 + $0x70] sm:$0xf] %v4510_v20  ;;  %v1730_v46 = vcombine.high %v834_v43, %v834_v43  ;;  %v1737_v13 = vrot.slane %v834_v43, %v15058_v2  ;;  %v741_v32 = vadd.f32 %v15300_v49, %v672_v42  ;;  %v739_v60 = vadd.f32 %v15300_v49, %v670_v18 }
 0x1a0   :  { %v1200_v63 = vrot.slane %v1186_v30, %v15058_v2  ;;  %v1201_v25 = vcombine.high %v1193_v19, %v1193_v19  ;;  %v12458_v41 = vrot.slane %v1193_v19, 9  ;;  %v3438_v28 = vsel %vm15025_vm5, 0, %v3437_v10 }
 0x1a1   :  { %v1744_v61 = vrot.slane %v1730_v46, %v15058_v2  ;;  %v1745_v4 = vcombine.high %v1737_v13, %v1737_v13  ;;  %v12586_v52 = vrot.slane %v1737_v13, 9  ;;  %v805_v1 = vmax.f32 %v741_v32, 0.0  ;;  %3439 = vst [vmem:[#allocation2 + $0x28] sm:$0x1] %v3438_v28 }
 0x1a2   :  { %v1202_v26 = vcombine.high %v1200_v63, %v1200_v63  ;;  %v12459_v15 = vrot.slane %v1201_v25, 9  ;;  %v12460_v50 = vrot.slane %v1200_v63, 9  ;;  %v3090_v54 = vmax.f32 %v1193_v19, %v12458_v41 }
 0x1a3   :  { %v1746_v9 = vcombine.high %v1744_v61, %v1744_v61  ;;  %v12587_v62 = vrot.slane %v1745_v4, 9  ;;  %v12588_v53 = vrot.slane %v1744_v61, 9  ;;  %v3218_v8 = vmax.f32 %v1737_v13, %v12586_v52 }
 0x1a4   :  { %v12461_v39 = vrot.slane %v1202_v26, 9  ;;  %v3091_v35 = vmax.f32 %v1201_v25, %v12459_v15  ;;  %v3092_v11 = vmax.f32 %v1200_v63, %v12460_v50  ;;  %v3314_v17 = vmax.f32 %v3090_v54, %v15426_v22 }
 0x1a5   :  { %v12589_v56 = vrot.slane %v1746_v9, 9  ;;  %v3219_v45 = vmax.f32 %v1745_v4, %v12587_v62  ;;  %v3220_v6 = vmax.f32 %v1744_v61, %v12588_v53  ;;  %v3378_v12 = vmax.f32 %v3218_v8, %v3226_v48 }
 0x1a6   :  { %v3093_v43 = vmax.f32 %v1202_v26, %v12461_v39  ;;  %v3315_v42 = vmax.f32 %v3091_v35, %v15428_v33  ;;  %v3316_v18 = vmax.f32 %v3092_v11, %v15430_v27  ;;  %v13533_v10 = vpack.c.bf16 %v3314_v17, %v3314_v17  ;;  %v3487_v17 = vld [vmem:[#allocation2 + $0x2c] sm:$0x1] }
 0x1a7   :  { %v3221_v20 = vmax.f32 %v1746_v9, %v12589_v56  ;;  %v3379_v30 = vmax.f32 %v3219_v45, %v3227_v3  ;;  %v3380_v19 = vmax.f32 %v3220_v6, %v3228_v24  ;;  %v13597_v46 = vpack.c.bf16 %v3378_v12, %v3378_v12 }
 0x1a8   :  { %v3317_v13 = vmax.f32 %v3093_v43, %v15437_v57  ;;  %v13534_v32 = vpack.c.bf16 %v3315_v42, %v3315_v42  ;;  %v13535_v63 = vpack.c.bf16 %v3316_v18, %v3316_v18  ;;  %v4067_v25 = vunpack.c.l.b16 %v13533_v10 }
 0x1a9   :  { %v3381_v22 = vmax.f32 %v3221_v20, %v3229_v16  ;;  %v13598_v41 = vpack.c.bf16 %v3379_v30, %v3379_v30  ;;  %v13599_v28 = vpack.c.bf16 %v3380_v19, %v3380_v19  ;;  %v4131_v61 = vunpack.c.l.b16 %v13597_v46 }
 0x1aa   :  { %v13536_v48 = vpack.c.bf16 %v3317_v13, %v3317_v13  ;;  %v4068_v4 = vunpack.c.l.b16 %v13534_v32  ;;  %v4069_v52 = vunpack.c.l.b16 %v13535_v63  ;;  %v4221_v33 = vrot.slane %v4067_v25, 7 }
 0x1ab   :  { %v13600_v26 = vpack.c.bf16 %v3381_v22, %v3381_v22  ;;  %v4132_v27 = vunpack.c.l.b16 %v13598_v41  ;;  %v4133_v15 = vunpack.c.l.b16 %v13599_v28  ;;  %v4325_v50 = vrot.slane %v4131_v61, 7  ;;  %v3511_v61 = vld [vmem:[#allocation2 + $0x7c] sm:$0x1] }
 0x1ac   :  { %v4070_v3 = vunpack.c.l.b16 %v13536_v48  ;;  %v4222_v24 = vrot.slane %v4068_v4, 6  ;;  %v4224_v54 = vrot.slane %v4069_v52, 5  ;;  %v1237_v9 = vcombine.high %v805_v1, %v805_v1 }
 0x1ad   :  { %v4134_v57 = vunpack.c.l.b16 %v13600_v26  ;;  %v4326_v62 = vrot.slane %v4132_v27, 6  ;;  %v4328_v53 = vrot.slane %v4133_v15, 5  ;;  %v1244_v16 = vrot.slane %v805_v1, %v15058_v2 }
 0x1ae   :  { %v4223_v8 = vsel %vm4165_vm6, %v4222_v24, %v4221_v33  ;;  %v4226_v39 = vrot.slane %v4070_v3, 4  ;;  %v1251_v35 = vrot.slane %v1237_v9, %v15058_v2  ;;  %v803_v11 = vmax.f32 %v739_v60, 0.0  ;;  %v3461_v60 = vld [vmem:[#allocation2 + $0x78] sm:$0x1]  ;;  %v15485_v3 = vpop.f32.mrb[23].mxu1 }
 0x1af   :  { %v4225_v56 = vsel %vm4168_vm7, %v4224_v54, %v4223_v8  ;;  %v4327_v45 = vsel %vm4165_vm6, %v4326_v62, %v4325_v50  ;;  %v4330_v6 = vrot.slane %v4134_v57, 4  ;;  %v1252_v12 = vcombine.high %v1244_v16, %v1244_v16 }
 0x1b0   :  { %v4329_v43 = vsel %vm4168_vm7, %v4328_v53, %v4327_v45  ;;  %v1253_v42 = vcombine.high %v1251_v35, %v1251_v35  ;;  %v12470_v18 = vrot.slane %v1244_v16, 9  ;;  %v12472_v10 = vrot.slane %v1251_v35, 9 }
 0x1b1   :  { %v12471_v20 = vrot.slane %v1252_v12, 9  ;;  %v1203_v1 = vcombine.high %v803_v11, %v803_v11  ;;  %v1210_v30 = vrot.slane %v803_v11, %v15058_v2  ;;  %v3488_v19 = vsel %vm15017_vm3, 0, %v3487_v17 }
 0x1b2   :  { %v12473_v46 = vrot.slane %v1253_v42, 9  ;;  %v3102_v13 = vmax.f32 %v1244_v16, %v12470_v18  ;;  %v3104_v32 = vmax.f32 %v1251_v35, %v12472_v10  ;;  %3489 = vst [vmem:[#allocation2 + $0x2c] sm:$0x1] %v3488_v19  ;;  %v4227_v63 = vsel %vm4171_vm8, %v4226_v39, %v4225_v56  ;;  %v14655_v16 = vld [vmem:[%s17501_s2 + $0x28] sm:$0xff]  }
 0x1b3   :  { %v3103_v25 = vmax.f32 %v1252_v12, %v12471_v20  ;;  %v1217_v22 = vrot.slane %v1203_v1, %v15058_v2  ;;  %v1218_v41 = vcombine.high %v1210_v30, %v1210_v30  ;;  %v12462_v28 = vrot.slane %v1210_v30, 9  ;;  %v15503_v12 = vpop.f32.mrb[24].mxu1  ;;  %13988 = vmatprep.subr.bf16.mxu1 %v14655_v16 }
 0x1b4   :  { %v3105_v48 = vmax.f32 %v1253_v42, %v12473_v46  ;;  %v704_v4 = vmul.f32 %v15289_v55, %v15229_v47  ;;  %v702_v52 = vmul.f32 %v15289_v55, %v15240_v36  ;;  %v3462_v33 = vsel %vm15025_vm5, 0, %v3461_v60  ;;  %13989 = vmatpush3.bf16.msra.mxu1 %v14655_v16 }
 0x1b5   :  { %v1219_v26 = vcombine.high %v1217_v22, %v1217_v22  ;;  %v12463_v27 = vrot.slane %v1218_v41, 9  ;;  %v12464_v15 = vrot.slane %v1217_v22, 9  ;;  %v3094_v50 = vmax.f32 %v1210_v30, %v12462_v28  ;;  %3463 = vst [vmem:[#allocation2 + $0x78] sm:$0x1] %v3462_v33 }
 0x1b6   :  { %v773_v24 = vadd.f32 %v15300_v49, %v704_v4  ;;  %v771_v54 = vadd.f32 %v15300_v49, %v702_v52  ;;  %v3512_v47 = vsel %vm15017_vm3, 0, %v3511_v61  ;;  %v15492_v9 = vsel %vm4171_vm8, %v4330_v6, %v4329_v43  ;;  %v15501_v6 = vpop.f32.mrb[28].mxu0 }
 0x1b7   :  { %v12465_v36 = vrot.slane %v1219_v26, 9  ;;  %v3095_v57 = vmax.f32 %v1218_v41, %v12463_v27  ;;  %v3096_v62 = vmax.f32 %v1217_v22, %v12464_v15  ;;  %v3318_v53 = vmax.f32 %v3094_v50, %v3102_v13  ;;  %3513 = vst [vmem:[#allocation2 + $0x7c] sm:$0x1] %v3512_v47  ;;  %v15507_v20 = vpop.f32.mrb[29].mxu0 }
 0x1b8   :  { %v837_v8 = vmax.f32 %v773_v24, 0.0  ;;  %v835_v39 = vmax.f32 %v771_v54, 0.0  ;;  %v675_v49 = vmul.f32 %v15289_v55, %v15257_v7  ;;  %v707_v35 = vmul.f32 %v15289_v55, %v15260_v31  ;;  %v15509_v7 = vpop.f32.mrb[25].mxu1 }
 0x1b9   :  { %v3097_v11 = vmax.f32 %v1219_v26, %v12465_v36  ;;  %v3319_v17 = vmax.f32 %v3095_v57, %v3103_v25  ;;  %v3320_v56 = vmax.f32 %v3096_v62, %v3104_v32  ;;  %v13537_v45 = vpack.c.bf16 %v3318_v53, %v3318_v53  ;;  %v4470_v19 = vld [vmem:[#allocation2 + $0x2c] sm:$0x1]  ;;  %v15516_v36 = vpop.f32.mrb[30].mxu0 }
 0x1ba   :  { %v1781_v43 = vcombine.high %v837_v8, %v837_v8  ;;  %v1788_v42 = vrot.slane %v837_v8, %v15058_v2  ;;  %v1747_v18 = vcombine.high %v835_v39, %v835_v39  ;;  %v1754_v10 = vrot.slane %v835_v39, %v15058_v2 }
 0x1bb   :  { %v3321_v31 = vmax.f32 %v3097_v11, %v3105_v48  ;;  %v13538_v55 = vpack.c.bf16 %v3319_v17, %v3319_v17  ;;  %v13539_v1 = vpack.c.bf16 %v3320_v56, %v3320_v56  ;;  %v4071_v30 = vunpack.c.l.b16 %v13537_v45  ;;  %v15523_v17 = vld [vmem:[%s17503_s4] ss:$0 sm:$0xff] }
 0x1bc   :  { %v1795_v60 = vrot.slane %v1781_v43, %v15058_v2  ;;  %v1796_v46 = vcombine.high %v1788_v42, %v1788_v42  ;;  %v12598_v13 = vrot.slane %v1788_v42, 9  ;;  %v1761_v32 = vrot.slane %v1747_v18, %v15058_v2 }
 0x1bd   :  { %v4072_v25 = vunpack.c.l.b16 %v13538_v55  ;;  %v4073_v22 = vunpack.c.l.b16 %v13539_v1  ;;  %v4228_v41 = vrot.slane %v4071_v30, 3  ;;  %v13633_v28 = vpack.c.bf16 %v3321_v31, %v3321_v31  ;;  %v15530_v30 = vld [vmem:[%s17502_s3] ss:$0 sm:$0xff] }
 0x1be   :  { %v1797_v61 = vcombine.high %v1795_v60, %v1795_v60  ;;  %v12599_v4 = vrot.slane %v1796_v46, 9  ;;  %v12600_v52 = vrot.slane %v1795_v60, 9  ;;  %v3230_v33 = vmax.f32 %v1788_v42, %v12598_v13 }
 0x1bf   :  { %v4229_v48 = vsel %vm4174_vm9, %v4228_v41, %v4227_v63  ;;  %v4230_v26 = vrot.slane %v4072_v25, 2  ;;  %v4232_v27 = vrot.slane %v4073_v22, 1  ;;  %v4471_v15 = vsel %vm15025_vm5, %v13633_v28, %v4470_v19  ;;  %v4467_v63 = vld [vmem:[#allocation2 + $0x28] sm:$0xf] }
 0x1c0   :  { %4472 = vst [vmem:[#allocation2 + $0x2c] sm:$0x1] %v4471_v15  ;;  %v12601_v50 = vrot.slane %v1797_v61, 9  ;;  %v3231_v24 = vmax.f32 %v1796_v46, %v12599_v4  ;;  %v3232_v54 = vmax.f32 %v1795_v60, %v12600_v52  ;;  %v1762_v47 = vcombine.high %v1754_v10, %v1754_v10  ;;  %v4518_v52 = vld [vmem:[#allocation2 + $0x7c] sm:$0x1] }
 0x1c1   :  { %v4231_v57 = vsel %vm4177_vm10, %v4230_v26, %v4229_v48  ;;  %v1763_v62 = vcombine.high %v1761_v32, %v1761_v32  ;;  %v12590_v53 = vrot.slane %v1754_v10, 9  ;;  %v12592_v16 = vrot.slane %v1761_v32, 9 }
 0x1c2   :  { %v4233_v8 = vsel %vm4180_vm12, %v4232_v27, %v4231_v57  ;;  %v3233_v39 = vmax.f32 %v1797_v61, %v12601_v50  ;;  %v12591_v11 = vrot.slane %v1762_v47, 9  ;;  %v744_v56 = vadd.f32 %v15523_v17, %v675_v49 }
 0x1c3   :  { %v4385_v45 = vpack.c.b16 %v4233_v8, %v4233_v8  ;;  %v12593_v43 = vrot.slane %v1763_v62, 9  ;;  %v3222_v42 = vmax.f32 %v1754_v10, %v12590_v53  ;;  %v3224_v18 = vmax.f32 %v1761_v32, %v12592_v16 }
 0x1c4   :  { %v3223_v31 = vmax.f32 %v1762_v47, %v12591_v11  ;;  %v808_v55 = vmax.f32 %v744_v56, 0.0  ;;  %v776_v1 = vadd.f32 %v15523_v17, %v707_v35  ;;  %v673_v19 = vmul.f32 %v15530_v30, %v15266_v29 }
 0x1c5   :  { %v4468_v60 = vsel %vm15162_vm13, %v4385_v45, %v4467_v63  ;;  %v3225_v49 = vmax.f32 %v1763_v62, %v12593_v43  ;;  %v3382_v46 = vmax.f32 %v3222_v42, %v3230_v33  ;;  %v3384_v13 = vmax.f32 %v3224_v18, %v3232_v54  ;;  %v15539_v62 = vpop.f32.mrb[31].mxu0 }
 0x1c6   :  { %4469 = vst [vmem:[#allocation2 + $0x28] sm:$0xf] %v4468_v60  ;;  %v3383_v10 = vmax.f32 %v3223_v31, %v3231_v24  ;;  %v1288_v32 = vcombine.high %v808_v55, %v808_v55  ;;  %v1295_v25 = vrot.slane %v808_v55, %v15058_v2  ;;  %v840_v35 = vmax.f32 %v776_v1, 0.0 }
 0x1c7   :  { %v3385_v22 = vmax.f32 %v3225_v49, %v3233_v39  ;;  %v13601_v41 = vpack.c.bf16 %v3382_v46, %v3382_v46  ;;  %v13603_v28 = vpack.c.bf16 %v3384_v13, %v3384_v13  ;;  %v742_v61 = vadd.f32 %v15523_v17, %v673_v19  ;;  %v4515_v46 = vld [vmem:[#allocation2 + $0x78] sm:$0xf] }
 0x1c8   :  { %v13602_v4 = vpack.c.bf16 %v3383_v10, %v3383_v10  ;;  %v1302_v29 = vrot.slane %v1288_v32, %v15058_v2  ;;  %v1303_v48 = vcombine.high %v1295_v25, %v1295_v25  ;;  %v12482_v26 = vrot.slane %v1295_v25, 9 }
 0x1c9   :  { %v4135_v27 = vunpack.c.l.b16 %v13601_v41  ;;  %v4137_v33 = vunpack.c.l.b16 %v13603_v28  ;;  %v13641_v15 = vpack.c.bf16 %v3385_v22, %v3385_v22  ;;  %v1832_v50 = vcombine.high %v840_v35, %v840_v35  ;;  %v15554_v41 = vpop.f32.mrb[26].mxu1 }
 0x1ca   :  { %v4136_v24 = vunpack.c.l.b16 %v13602_v4  ;;  %v1304_v54 = vcombine.high %v1302_v29, %v1302_v29  ;;  %v12483_v47 = vrot.slane %v1303_v48, 9  ;;  %v12484_v57 = vrot.slane %v1302_v29, 9 }
 0x1cb   :  { %v4332_v53 = vrot.slane %v4135_v27, 3  ;;  %v4336_v16 = vrot.slane %v4137_v33, 1  ;;  %v4519_v8 = vsel %vm15025_vm5, %v13641_v15, %v4518_v52  ;;  %v3114_v63 = vmax.f32 %v1295_v25, %v12482_v26 }
 0x1cc   :  { %v4334_v39 = vrot.slane %v4136_v24, 2  ;;  %4520 = vst [vmem:[#allocation2 + $0x7c] sm:$0x1] %v4519_v8  ;;  %v12485_v11 = vrot.slane %v1304_v54, 9  ;;  %v3115_v56 = vmax.f32 %v1303_v48, %v12483_v47  ;;  %v3116_v45 = vmax.f32 %v1302_v29, %v12484_v57 }
 0x1cd   :  { %v4333_v43 = vsel %vm4174_vm9, %v4332_v53, %v15492_v9  ;;  %v1839_v42 = vrot.slane %v840_v35, %v15058_v2  ;;  %v1846_v18 = vrot.slane %v1832_v50, %v15058_v2  ;;  %v806_v31 = vmax.f32 %v742_v61, 0.0  ;;  %v15564_v53 = vpop.f32.mrb[27].mxu1 }
 0x1ce   :  { %v4335_v55 = vsel %vm4177_vm10, %v4334_v39, %v4333_v43  ;;  %v3117_v1 = vmax.f32 %v1304_v54, %v12485_v11  ;;  %v705_v19 = vmul.f32 %v15530_v30, %v15278_v5  ;;  %v676_v60 = vmul.f32 %v15530_v30, %v15304_v44  ;;  %v14656_v44 = vld [vmem:[%s17501_s2 + $0x30] sm:$0xff]  }
 0x1cf   :  { %v4337_v49 = vsel %vm4180_vm12, %v4336_v16, %v4335_v55  ;;  %v1847_v13 = vcombine.high %v1839_v42, %v1839_v42  ;;  %v1848_v10 = vcombine.high %v1846_v18, %v1846_v18  ;;  %v12610_v9 = vrot.slane %v1839_v42, 9  ;;  %13990 = vmatprep.subr.bf16.mxu1 %v14656_v44 }
 0x1d0   :  { %v4401_v32 = vpack.c.b16 %v4337_v49, %v4337_v49  ;;  %v12612_v25 = vrot.slane %v1846_v18, 9  ;;  %v1254_v35 = vcombine.high %v806_v31, %v806_v31  ;;  %v1261_v22 = vrot.slane %v806_v31, %v15058_v2  ;;  %13991 = vmatpush3.bf16.msra.mxu1 %v14656_v44 }
 0x1d1   :  { %v12611_v28 = vrot.slane %v1847_v13, 9  ;;  %v12613_v61 = vrot.slane %v1848_v10, 9  ;;  %v3242_v4 = vmax.f32 %v1839_v42, %v12610_v9  ;;  %v774_v5 = vadd.f32 %v15523_v17, %v705_v19 }
 0x1d2   :  { %v4516_v52 = vsel %vm15162_vm13, %v4401_v32, %v4515_v46  ;;  %v3244_v29 = vmax.f32 %v1846_v18, %v12612_v25  ;;  %v1268_v48 = vrot.slane %v1254_v35, %v15058_v2  ;;  %v1269_v26 = vcombine.high %v1261_v22, %v1261_v22 }
 0x1d3   :  { %4517 = vst [vmem:[#allocation2 + $0x78] sm:$0xf] %v4516_v52  ;;  %v3243_v27 = vmax.f32 %v1847_v13, %v12611_v28  ;;  %v3245_v33 = vmax.f32 %v1848_v10, %v12613_v61  ;;  %v12474_v15 = vrot.slane %v1261_v22, 9  ;;  %v838_v50 = vmax.f32 %v774_v5, 0.0 }
 0x1d4   :  { %v1270_v24 = vcombine.high %v1268_v48, %v1268_v48  ;;  %v12475_v54 = vrot.slane %v1269_v26, 9  ;;  %v12476_v47 = vrot.slane %v1268_v48, 9  ;;  %v745_v57 = vadd.f32 %v15523_v17, %v676_v60 }
 0x1d5   :  { %v3106_v16 = vmax.f32 %v1261_v22, %v12474_v15  ;;  %v1798_v8 = vcombine.high %v838_v50, %v838_v50  ;;  %v1805_v39 = vrot.slane %v838_v50, %v15058_v2  ;;  %v15569_v11 = vmul.f32 %v15530_v30, %v15313_v40 }
 0x1d6   :  { %v12477_v43 = vrot.slane %v1270_v24, 9  ;;  %v3107_v42 = vmax.f32 %v1269_v26, %v12475_v54  ;;  %v3108_v18 = vmax.f32 %v1268_v48, %v12476_v47  ;;  %v809_v31 = vmax.f32 %v745_v57, 0.0  ;;  %v15572_v57 = vpop.f32.mrb[32].mxu0 }
 0x1d7   :  { %v3322_v55 = vmax.f32 %v3106_v16, %v3114_v63  ;;  %v1812_v19 = vrot.slane %v1798_v8, %v15058_v2  ;;  %v1813_v49 = vcombine.high %v1805_v39, %v1805_v39  ;;  %v12602_v60 = vrot.slane %v1805_v39, 9 }
 0x1d8   :  { %v3109_v46 = vmax.f32 %v1270_v24, %v12477_v43  ;;  %v3323_v13 = vmax.f32 %v3107_v42, %v3115_v56  ;;  %v3324_v10 = vmax.f32 %v3108_v18, %v3116_v45  ;;  %v1305_v9 = vcombine.high %v809_v31, %v809_v31 }
 0x1d9   :  { %v13541_v32 = vpack.c.bf16 %v3322_v55, %v3322_v55  ;;  %v1814_v25 = vcombine.high %v1812_v19, %v1812_v19  ;;  %v12603_v35 = vrot.slane %v1813_v49, 9  ;;  %v12604_v22 = vrot.slane %v1812_v19, 9 }
 0x1da   :  { %v3325_v28 = vmax.f32 %v3109_v46, %v3117_v1  ;;  %v13542_v40 = vpack.c.bf16 %v3323_v13, %v3323_v13  ;;  %v13543_v61 = vpack.c.bf16 %v3324_v10, %v3324_v10  ;;  %v3234_v5 = vmax.f32 %v1805_v39, %v12602_v60  ;;  %v14657_v10 = vld [vmem:[%s17501_s2 + $0x38] sm:$0xff]  }
 0x1db   :  { %v4075_v44 = vunpack.c.l.b16 %v13541_v32  ;;  %v12605_v52 = vrot.slane %v1814_v25, 9  ;;  %v3235_v48 = vmax.f32 %v1813_v49, %v12603_v35  ;;  %v3236_v63 = vmax.f32 %v1812_v19, %v12604_v22  ;;  %13992 = vmatprep.subr.bf16.mxu1 %v14657_v10 }
 0x1dc   :  { %v13544_v26 = vpack.c.bf16 %v3325_v28, %v3325_v28  ;;  %v4076_v15 = vunpack.c.l.b16 %v13542_v40  ;;  %v4077_v50 = vunpack.c.l.b16 %v13543_v61  ;;  %v3386_v54 = vmax.f32 %v3234_v5, %v3242_v4  ;;  %13993 = vmatpush3.bf16.msra.mxu1 %v14657_v10 }
 0x1dd   :  { %v4234_v24 = vrot.slane %v4075_v44, 7  ;;  %v3237_v56 = vmax.f32 %v1814_v25, %v12605_v52  ;;  %v3387_v45 = vmax.f32 %v3235_v48, %v3243_v27  ;;  %v3388_v47 = vmax.f32 %v3236_v63, %v3244_v29  ;;  %v3490_v48 = vld [vmem:[#allocation2 + $0x34] sm:$0x1]  ;;  %v15583_v63 = vpop.f32.mrb[33].mxu0 }
 0x1de   :  { %v4078_v16 = vunpack.c.l.b16 %v13544_v26  ;;  %v4235_v8 = vrot.slane %v4076_v15, 6  ;;  %v4237_v1 = vrot.slane %v4077_v50, 5  ;;  %v13605_v43 = vpack.c.bf16 %v3386_v54, %v3386_v54 }
 0x1df   :  { %v3389_v42 = vmax.f32 %v3237_v56, %v3245_v33  ;;  %v13606_v39 = vpack.c.bf16 %v3387_v45, %v3387_v45  ;;  %v13607_v18 = vpack.c.bf16 %v3388_v47, %v3388_v47  ;;  %v1312_v55 = vrot.slane %v809_v31, %v15058_v2  ;;  %v3440_v31 = vld [vmem:[#allocation2 + $0x30] sm:$0x1]  ;;  %v3514_v56 = vld [vmem:[#allocation2 + $0x84] sm:$0x1] }
 0x1e0   :  { %v4236_v19 = vsel %vm4165_vm6, %v4235_v8, %v4234_v24  ;;  %v4239_v49 = vrot.slane %v4078_v16, 4  ;;  %v4139_v60 = vunpack.c.l.b16 %v13605_v43  ;;  %v1319_v4 = vrot.slane %v1305_v9, %v15058_v2  ;;  %v3464_v24 = vld [vmem:[#allocation2 + $0x80] sm:$0x1] }
 0x1e1   :  { %v4238_v27 = vsel %vm4168_vm7, %v4237_v1, %v4236_v19  ;;  %v13608_v29 = vpack.c.bf16 %v3389_v42, %v3389_v42  ;;  %v4140_v46 = vunpack.c.l.b16 %v13606_v39  ;;  %v4141_v13 = vunpack.c.l.b16 %v13607_v18  ;;  %v17518_v42 = vld [vmem:[#allocation10_spill] sm:$0xff] }
 0x1e2   :  { %v4338_v33 = vrot.slane %v4139_v60, 7  ;;  %v1320_v32 = vcombine.high %v1312_v55, %v1312_v55  ;;  %v1321_v25 = vcombine.high %v1319_v4, %v1319_v4  ;;  %v12486_v35 = vrot.slane %v1312_v55, 9 }
 0x1e3   :  { %v4142_v22 = vunpack.c.l.b16 %v13608_v29  ;;  %v4339_v28 = vrot.slane %v4140_v46, 6  ;;  %v4341_v40 = vrot.slane %v4141_v13, 5  ;;  %v12488_v61 = vrot.slane %v1319_v4, 9  ;;  %v15610_v46 = vpop.f32.mrb[34].mxu0 }
 0x1e4   :  { %v12487_v9 = vrot.slane %v1320_v32, 9  ;;  %v12489_v5 = vrot.slane %v1321_v25, 9  ;;  %v3118_v44 = vmax.f32 %v1312_v55, %v12486_v35  ;;  %v743_v52 = vadd.f32 %v15523_v17, %v15569_v11 }
 0x1e5   :  { %v4340_v26 = vsel %vm4165_vm6, %v4339_v28, %v4338_v33  ;;  %v4343_v15 = vrot.slane %v4142_v22, 4  ;;  %v3120_v50 = vmax.f32 %v1319_v4, %v12488_v61  ;;  %v3441_v54 = vsel %vm15025_vm5, 0, %v3440_v31 }
 0x1e6   :  { %v4342_v45 = vsel %vm4168_vm7, %v4341_v40, %v4340_v26  ;;  %v3119_v47 = vmax.f32 %v1320_v32, %v12487_v9  ;;  %v3121_v16 = vmax.f32 %v1321_v25, %v12489_v5  ;;  %v807_v8 = vmax.f32 %v743_v52, 0.0  ;;  %3442 = vst [vmem:[#allocation2 + $0x30] sm:$0x1] %v3441_v54 }
 0x1e7   :  { %v3491_v11 = vsel %vm15017_vm3, 0, %v3490_v48  ;;  %v15592_v1 = vsel %vm4171_vm8, %v4239_v49, %v4238_v27  ;;  %v708_v43 = vmul.f32 %v15530_v30, %v15325_v51  ;;  %v706_v39 = vmul.f32 %v15530_v30, %v17518_v42  ;;  %v17519_v27 = vld [vmem:[#allocation11_spill] sm:$0xff] }
 0x1e8   :  { %v1271_v18 = vcombine.high %v807_v8, %v807_v8  ;;  %v1278_v55 = vrot.slane %v807_v8, %v15058_v2  ;;  %3492 = vst [vmem:[#allocation2 + $0x34] sm:$0x1] %v3491_v11  ;;  %v3465_v19 = vsel %vm15025_vm5, 0, %v3464_v24  ;;  %v3515_v60 = vsel %vm15017_vm3, 0, %v3514_v56  ;;  %v15622_v11 = vpop.f32.mrb[35].mxu0 }
 0x1e9   :  { %v777_v4 = vadd.f32 %v15523_v17, %v708_v43  ;;  %v775_v49 = vadd.f32 %v15523_v17, %v706_v39  ;;  %3466 = vst [vmem:[#allocation2 + $0x80] sm:$0x1] %v3465_v19  ;;  %3516 = vst [vmem:[#allocation2 + $0x84] sm:$0x1] %v3515_v60  ;;  %v15606_v51 = vsel %vm4171_vm8, %v4343_v15, %v4342_v45 }
 0x1ea   :  { %v679_v29 = vmul.f32 %v15530_v30, %v17519_v27  ;;  %v1285_v13 = vrot.slane %v1271_v18, %v15058_v2  ;;  %v1286_v10 = vcombine.high %v1278_v55, %v1278_v55  ;;  %v12478_v33 = vrot.slane %v1278_v55, 9 }
 0x1eb   :  { %v711_v32 = vmul.f32 %v15530_v30, %v15364_v37  ;;  %v841_v25 = vmax.f32 %v777_v4, 0.0  ;;  %v839_v35 = vmax.f32 %v775_v49, 0.0  ;;  %v677_v22 = vmul.f32 %v15530_v30, %v15373_v59 }
 0x1ec   :  { %v748_v31 = vadd.f32 %v15523_v17, %v679_v29  ;;  %v1287_v28 = vcombine.high %v1285_v13, %v1285_v13  ;;  %v12479_v40 = vrot.slane %v1286_v10, 9  ;;  %v12480_v61 = vrot.slane %v1285_v13, 9 }
 0x1ed   :  { %v3110_v9 = vmax.f32 %v1278_v55, %v12478_v33  ;;  %v1849_v5 = vcombine.high %v841_v25, %v841_v25  ;;  %v1856_v52 = vrot.slane %v841_v25, %v15058_v2  ;;  %v1815_v48 = vcombine.high %v839_v35, %v839_v35 }
 0x1ee   :  { %v1822_v26 = vrot.slane %v839_v35, %v15058_v2  ;;  %v12481_v15 = vrot.slane %v1287_v28, 9  ;;  %v3111_v54 = vmax.f32 %v1286_v10, %v12479_v40  ;;  %v3112_v37 = vmax.f32 %v1285_v13, %v12480_v61 }
 0x1ef   :  { %v3326_v24 = vmax.f32 %v3110_v9, %v3118_v44  ;;  %v1863_v56 = vrot.slane %v1849_v5, %v15058_v2  ;;  %v1864_v45 = vcombine.high %v1856_v52, %v1856_v52  ;;  %v12614_v8 = vrot.slane %v1856_v52, 9  ;;  %v4476_v13 = vld [vmem:[#allocation2 + $0x34] sm:$0x1] }
 0x1f0   :  { %v1829_v59 = vrot.slane %v1815_v48, %v15058_v2  ;;  %v3113_v43 = vmax.f32 %v1287_v28, %v12481_v15  ;;  %v3327_v42 = vmax.f32 %v3111_v54, %v3119_v47  ;;  %v3328_v39 = vmax.f32 %v3112_v37, %v3120_v50 }
 0x1f1   :  { %v13545_v18 = vpack.c.bf16 %v3326_v24, %v3326_v24  ;;  %v1865_v55 = vcombine.high %v1863_v56, %v1863_v56  ;;  %v12615_v19 = vrot.slane %v1864_v45, 9  ;;  %v12616_v60 = vrot.slane %v1863_v56, 9 }
 0x1f2   :  { %v3246_v4 = vmax.f32 %v1856_v52, %v12614_v8  ;;  %v3329_v49 = vmax.f32 %v3113_v43, %v3121_v16  ;;  %v13546_v27 = vpack.c.bf16 %v3327_v42, %v3327_v42  ;;  %v13547_v29 = vpack.c.bf16 %v3328_v39, %v3328_v39 }
 0x1f3   :  { %v4079_v44 = vunpack.c.l.b16 %v13545_v18  ;;  %v12617_v10 = vrot.slane %v1865_v55, 9  ;;  %v3247_v33 = vmax.f32 %v1864_v45, %v12615_v19  ;;  %v3248_v25 = vmax.f32 %v1863_v56, %v12616_v60 }
 0x1f4   :  { %v1830_v35 = vcombine.high %v1822_v26, %v1822_v26  ;;  %v4080_v40 = vunpack.c.l.b16 %v13546_v27  ;;  %v4081_v61 = vunpack.c.l.b16 %v13547_v29  ;;  %v13634_v28 = vpack.c.bf16 %v3329_v49, %v3329_v49 }
 0x1f5   :  { %v4241_v9 = vrot.slane %v4079_v44, 3  ;;  %v3249_v47 = vmax.f32 %v1865_v55, %v12617_v10  ;;  %v1831_v50 = vcombine.high %v1829_v59, %v1829_v59  ;;  %v12606_v5 = vrot.slane %v1822_v26, 9 }
 0x1f6   :  { %v12607_v48 = vrot.slane %v1830_v35, 9  ;;  %v4243_v16 = vrot.slane %v4080_v40, 2  ;;  %v4245_v15 = vrot.slane %v4081_v61, 1  ;;  %v4477_v54 = vsel %vm15025_vm5, %v13634_v28, %v4476_v13 }
 0x1f7   :  { %v4242_v52 = vsel %vm4174_vm9, %v4241_v9, %v15592_v1  ;;  %4478 = vst [vmem:[#allocation2 + $0x34] sm:$0x1] %v4477_v54  ;;  %v12608_v37 = vrot.slane %v1829_v59, 9  ;;  %v12609_v24 = vrot.slane %v1831_v50, 9  ;;  %v3238_v56 = vmax.f32 %v1822_v26, %v12606_v5  ;;  %v4473_v1 = vld [vmem:[#allocation2 + $0x30] sm:$0xf] }
 0x1f8   :  { %v3239_v45 = vmax.f32 %v1830_v35, %v12607_v48  ;;  %v4244_v8 = vsel %vm4177_vm10, %v4243_v16, %v4242_v52  ;;  %v812_v43 = vmax.f32 %v748_v31, 0.0  ;;  %v780_v42 = vadd.f32 %v15523_v17, %v711_v32 }
 0x1f9   :  { %v746_v39 = vadd.f32 %v15523_v17, %v677_v22  ;;  %v4246_v18 = vsel %vm4180_vm12, %v4245_v15, %v4244_v8  ;;  %v3240_v55 = vmax.f32 %v1829_v59, %v12608_v37  ;;  %v3241_v19 = vmax.f32 %v1831_v50, %v12609_v24  ;;  %v4524_v22 = vld [vmem:[#allocation2 + $0x84] sm:$0x1] }
 0x1fa   :  { %v3390_v60 = vmax.f32 %v3238_v56, %v3246_v4  ;;  %v4387_v49 = vpack.c.b16 %v4246_v18, %v4246_v18  ;;  %v3391_v27 = vmax.f32 %v3239_v45, %v3247_v33  ;;  %v1356_v29 = vcombine.high %v812_v43, %v812_v43 }
 0x1fb   :  { %v1363_v44 = vrot.slane %v812_v43, %v15058_v2  ;;  %v3392_v26 = vmax.f32 %v3240_v55, %v3248_v25  ;;  %v3393_v13 = vmax.f32 %v3241_v19, %v3249_v47  ;;  %v844_v35 = vmax.f32 %v780_v42, 0.0 }
 0x1fc   :  { %v13609_v10 = vpack.c.bf16 %v3390_v60, %v3390_v60  ;;  %v4474_v32 = vsel %vm15162_vm13, %v4387_v49, %v4473_v1  ;;  %v13610_v31 = vpack.c.bf16 %v3391_v27, %v3391_v27  ;;  %v1370_v40 = vrot.slane %v1356_v29, %v15058_v2  ;;  %v4521_v60 = vld [vmem:[#allocation2 + $0x80] sm:$0xf] }
 0x1fd   :  { %v1371_v61 = vcombine.high %v1363_v44, %v1363_v44  ;;  %4475 = vst [vmem:[#allocation2 + $0x30] sm:$0xf] %v4474_v32  ;;  %v13611_v59 = vpack.c.bf16 %v3392_v26, %v3392_v26  ;;  %v13642_v9 = vpack.c.bf16 %v3393_v13, %v3393_v13  ;;  %v12498_v33 = vrot.slane %v1363_v44, 9 }
 0x1fe   :  { %v4143_v4 = vunpack.c.l.b16 %v13609_v10  ;;  %v4144_v28 = vunpack.c.l.b16 %v13610_v31  ;;  %v1372_v50 = vcombine.high %v1370_v40, %v1370_v40  ;;  %v12500_v25 = vrot.slane %v1370_v40, 9 }
 0x1ff   :  { %v12499_v5 = vrot.slane %v1371_v61, 9  ;;  %v4145_v47 = vunpack.c.l.b16 %v13611_v59  ;;  %v4525_v52 = vsel %vm15025_vm5, %v13642_v9, %v4524_v22  ;;  %v3130_v16 = vmax.f32 %v1363_v44, %v12498_v33 }
 0x200   :  { %v4345_v48 = vrot.slane %v4143_v4, 3  ;;  %v4347_v15 = vrot.slane %v4144_v28, 2  ;;  %4526 = vst [vmem:[#allocation2 + $0x84] sm:$0x1] %v4525_v52  ;;  %v12501_v54 = vrot.slane %v1372_v50, 9  ;;  %v3132_v24 = vmax.f32 %v1370_v40, %v12500_v25 }
 0x201   :  { %v3131_v37 = vmax.f32 %v1371_v61, %v12499_v5  ;;  %v4349_v45 = vrot.slane %v4145_v47, 1  ;;  %v1900_v8 = vcombine.high %v844_v35, %v844_v35  ;;  %v1907_v43 = vrot.slane %v844_v35, %v15058_v2 }
 0x202   :  { %v4346_v56 = vsel %vm4174_vm9, %v4345_v48, %v15606_v51  ;;  %v3133_v18 = vmax.f32 %v1372_v50, %v12501_v54  ;;  %v810_v1 = vmax.f32 %v746_v39, 0.0  ;;  %v709_v55 = vmul.f32 %v15530_v30, %v15383_v0 }
 0x203   :  { %v4348_v42 = vsel %vm4177_vm10, %v4347_v15, %v4346_v56  ;;  %v1914_v49 = vrot.slane %v1900_v8, %v15058_v2  ;;  %v1915_v27 = vcombine.high %v1907_v43, %v1907_v43  ;;  %v12626_v29 = vrot.slane %v1907_v43, 9 }
 0x204   :  { %v4350_v19 = vsel %vm4180_vm12, %v4349_v45, %v4348_v42  ;;  %v1322_v51 = vcombine.high %v810_v1, %v810_v1  ;;  %v1329_v26 = vrot.slane %v810_v1, %v15058_v2  ;;  %v778_v13 = vadd.f32 %v15523_v17, %v709_v55 }
 0x205   :  { %v4403_v44 = vpack.c.b16 %v4350_v19, %v4350_v19  ;;  %v1916_v10 = vcombine.high %v1914_v49, %v1914_v49  ;;  %v12627_v35 = vrot.slane %v1915_v27, 9  ;;  %v12628_v32 = vrot.slane %v1914_v49, 9 }
 0x206   :  { %v3258_v39 = vmax.f32 %v1907_v43, %v12626_v29  ;;  %v1336_v31 = vrot.slane %v1322_v51, %v15058_v2  ;;  %v1337_v22 = vcombine.high %v1329_v26, %v1329_v26  ;;  %v12490_v40 = vrot.slane %v1329_v26, 9 }
 0x207   :  { %v4522_v0 = vsel %vm15162_vm13, %v4403_v44, %v4521_v60  ;;  %v12629_v61 = vrot.slane %v1916_v10, 9  ;;  %v3259_v59 = vmax.f32 %v1915_v27, %v12627_v35  ;;  %v3260_v4 = vmax.f32 %v1914_v49, %v12628_v32 }
 0x208   :  { %4523 = vst [vmem:[#allocation2 + $0x80] sm:$0xf] %v4522_v0  ;;  %v842_v9 = vmax.f32 %v778_v13, 0.0  ;;  %v1338_v33 = vcombine.high %v1336_v31, %v1336_v31  ;;  %v12491_v28 = vrot.slane %v1337_v22, 9  ;;  %v12492_v50 = vrot.slane %v1336_v31, 9 }
 0x209   :  { %v3122_v5 = vmax.f32 %v1329_v26, %v12490_v40  ;;  %v3261_v25 = vmax.f32 %v1916_v10, %v12629_v61  ;;  %v680_v52 = vmul.f32 %v15530_v30, %v15409_v21 }
 0x20a   :  { %v1866_v47 = vcombine.high %v842_v9, %v842_v9  ;;  %v1873_v48 = vrot.slane %v842_v9, %v15058_v2  ;;  %v12493_v15 = vrot.slane %v1338_v33, 9  ;;  %v3123_v54 = vmax.f32 %v1337_v22, %v12491_v28 }
 0x20b   :  { %v3124_v56 = vmax.f32 %v1336_v31, %v12492_v50  ;;  %v3330_v45 = vmax.f32 %v3122_v5, %v3130_v16  ;;  %v749_v1 = vadd.f32 %v15523_v17, %v680_v52 }
 0x20c   :  { %v1880_v8 = vrot.slane %v1866_v47, %v15058_v2  ;;  %v1881_v43 = vcombine.high %v1873_v48, %v1873_v48  ;;  %v12618_v42 = vrot.slane %v1873_v48, 9  ;;  %v3125_v55 = vmax.f32 %v1338_v33, %v12493_v15 }
 0x20d   :  { %v3331_v19 = vmax.f32 %v3123_v54, %v3131_v37  ;;  %v3332_v60 = vmax.f32 %v3124_v56, %v3132_v24  ;;  %v13549_v49 = vpack.c.bf16 %v3330_v45, %v3330_v45  ;;  %v813_v47 = vmax.f32 %v749_v1, 0.0 }
 0x20e   :  { %v1882_v27 = vcombine.high %v1880_v8, %v1880_v8  ;;  %v12619_v29 = vrot.slane %v1881_v43, 9  ;;  %v12620_v44 = vrot.slane %v1880_v8, 9  ;;  %v3250_v51 = vmax.f32 %v1873_v48, %v12618_v42 }
 0x20f   :  { %v3333_v26 = vmax.f32 %v3125_v55, %v3133_v18  ;;  %v13550_v21 = vpack.c.bf16 %v3331_v19, %v3331_v19  ;;  %v13551_v13 = vpack.c.bf16 %v3332_v60, %v3332_v60  ;;  %v4083_v10 = vunpack.c.l.b16 %v13549_v49 }
 0x210   :  { %v12621_v35 = vrot.slane %v1882_v27, 9  ;;  %v3251_v16 = vmax.f32 %v1881_v43, %v12619_v29  ;;  %v3252_v32 = vmax.f32 %v1880_v8, %v12620_v44  ;;  %v3394_v0 = vmax.f32 %v3250_v51, %v3258_v39 }
 0x211   :  { %v13552_v31 = vpack.c.bf16 %v3333_v26, %v3333_v26  ;;  %v4084_v22 = vunpack.c.l.b16 %v13550_v21  ;;  %v4085_v40 = vunpack.c.l.b16 %v13551_v13  ;;  %v4247_v61 = vrot.slane %v4083_v10, 7  ;;  %v3493_v21 = vld [vmem:[#allocation2 + $0x3c] sm:$0x1] }
 0x212   :  { %v3253_v9 = vmax.f32 %v1882_v27, %v12621_v35  ;;  %v3395_v37 = vmax.f32 %v3251_v16, %v3259_v59  ;;  %v3396_v24 = vmax.f32 %v3252_v32, %v3260_v4  ;;  %v13613_v33 = vpack.c.bf16 %v3394_v0, %v3394_v0 }
 0x213   :  { %v4086_v28 = vunpack.c.l.b16 %v13552_v31  ;;  %v4248_v50 = vrot.slane %v4084_v22, 6  ;;  %v4250_v5 = vrot.slane %v4085_v40, 5  ;;  %v1373_v39 = vcombine.high %v813_v47, %v813_v47  ;;  %v14658_v22 = vld [vmem:[%s17501_s2] sm:$0xff]  }
 0x214   :  { %v3397_v18 = vmax.f32 %v3253_v9, %v3261_v25  ;;  %v13614_v48 = vpack.c.bf16 %v3395_v37, %v3395_v37  ;;  %v13615_v52 = vpack.c.bf16 %v3396_v24, %v3396_v24  ;;  %v4147_v15 = vunpack.c.l.b16 %v13613_v33  ;;  %v3443_v25 = vld [vmem:[#allocation2 + $0x38] sm:$0x1]  ;;  %v4564_v24 = vld [vmem:[#allocation2 + $0xc] sm:$0x1]  ;;  %14010 = vmatprep.subr.bf16.mxu1 %v14658_v22 }
 0x215   :  { %v4249_v54 = vsel %vm4165_vm6, %v4248_v50, %v4247_v61  ;;  %v4252_v56 = vrot.slane %v4086_v28, 4  ;;  %v1380_v45 = vrot.slane %v813_v47, %v15058_v2  ;;  %v1387_v55 = vrot.slane %v1373_v39, %v15058_v2 }
 0x216   :  { %v4251_v8 = vsel %vm4168_vm7, %v4250_v5, %v4249_v54  ;;  %v13616_v43 = vpack.c.bf16 %v3397_v18, %v3397_v18  ;;  %v4148_v59 = vunpack.c.l.b16 %v13614_v48  ;;  %v4149_v4 = vunpack.c.l.b16 %v13615_v52 }
 0x217   :  { %v4351_v42 = vrot.slane %v4147_v15, 7  ;;  %v1388_v19 = vcombine.high %v1380_v45, %v1380_v45  ;;  %v12502_v1 = vrot.slane %v1380_v45, 9  ;;  %v678_v29 = vmul.f32 %v15530_v30, %v15419_v58  ;;  %v4540_v58 = vld [vmem:[#allocation2 + $0x8] sm:$0xf] }
 0x218   :  { %v15660_v60 = vunpack.c.l.b16 %v13616_v43  ;;  %v4352_v49 = vrot.slane %v4148_v59, 6  ;;  %v4354_v27 = vrot.slane %v4149_v4, 5  ;;  %v1389_v44 = vcombine.high %v1387_v55, %v1387_v55 }
 0x219   :  { %v12503_v51 = vrot.slane %v1388_v19, 9  ;;  %v12504_v26 = vrot.slane %v1387_v55, 9  ;;  %v747_v10 = vadd.f32 %v15523_v17, %v678_v29  ;;  %v3444_v35 = vsel %vm15025_vm5, 0, %v3443_v25 }
 0x21a   :  { %v4353_v13 = vsel %vm4165_vm6, %v4352_v49, %v4351_v42  ;;  %v4356_v32 = vrot.slane %v15660_v60, 4  ;;  %v12505_v0 = vrot.slane %v1389_v44, 9  ;;  %v3134_v31 = vmax.f32 %v1380_v45, %v12502_v1  ;;  %3445 = vst [vmem:[#allocation2 + $0x38] sm:$0x1] %v3444_v35  ;;  %v15749_v60 = vld [vmem:[%s17503_s4] ss:$0 sm:$0xff] }
 0x21b   :  { %v15669_v16 = vsel %vm4168_vm7, %v4354_v27, %v4353_v13  ;;  %v811_v40 = vmax.f32 %v747_v10, 0.0  ;;  %v3494_v61 = vsel %vm15017_vm3, 0, %v3493_v21  ;;  %v15678_v9 = vsel %vm4171_vm8, %v4252_v56, %v4251_v8 }
 0x21c   :  { %v712_v37 = vmul.f32 %v15530_v30, %v15435_v23  ;;  %v3135_v33 = vmax.f32 %v1388_v19, %v12503_v51  ;;  %v3136_v28 = vmax.f32 %v1387_v55, %v12504_v26  ;;  %v3137_v50 = vmax.f32 %v1389_v44, %v12505_v0  ;;  %3495 = vst [vmem:[#allocation2 + $0x3c] sm:$0x1] %v3494_v61 }
 0x21d   :  { %v1339_v5 = vcombine.high %v811_v40, %v811_v40  ;;  %v1346_v47 = vrot.slane %v811_v40, %v15058_v2  ;;  %v14846_v48 = vmov 0   ;;  %v4597_v52 = vshrl.u32 %v4540_v58, 16 }
 0x21e   :  { %v781_v18 = vadd.f32 %v15523_v17, %v712_v37  ;;  %3411 = vst.msk [vmem:[#allocation2] sm:$0xf] %vm3410_vm11, %v14846_v48  ;;  %3414 = vst.msk [vmem:[#allocation2 + $0x50] sm:$0xf] %vm3410_vm11, %v14846_v48  ;;  %v4600_v23 = vshll.u32 %v4540_v58, 16  ;;  %v4606_v15 = vshll.u32 %v4564_v24, 16  ;;  %v710_v54 = vmul.f32 %v15530_v30, %v15485_v3 }
 0x21f   :  { %3413 = vst.msk [vmem:[#allocation2 + $0x4] sm:$0x1] %vm3412_vm1, %v14846_v48  ;;  %3415 = vst.msk [vmem:[#allocation2 + $0x54] sm:$0x1] %vm3412_vm1, %v14846_v48  ;;  %v1353_v56 = vrot.slane %v1339_v5, %v15058_v2  ;;  %v1354_v39 = vcombine.high %v1346_v47, %v1346_v47  ;;  %v12494_v45 = vrot.slane %v1346_v47, 9  ;;  %v4599_v43 = vrot.slane %v4597_v52, 4 }
 0x220   :  { %3417 = vst.msk [vmem:[#allocation2 + $0x48] sm:$0xf] %vm3410_vm11, %v14846_v48  ;;  %3419 = vst.msk [vmem:[#allocation2 + $0x98] sm:$0xf] %vm3410_vm11, %v14846_v48  ;;  %v845_v8 = vmax.f32 %v781_v18, 0.0  ;;  %v4602_v59 = vrot.slane %v4600_v23, 5  ;;  %v779_v42 = vadd.f32 %v15523_v17, %v710_v54 }
 0x221   :  { %3418 = vst.msk [vmem:[#allocation2 + $0x4c] sm:$0x1] %vm3412_vm1, %v14846_v48  ;;  %3420 = vst.msk [vmem:[#allocation2 + $0x9c] sm:$0x1] %vm3412_vm1, %v14846_v48  ;;  %v15703_v4 = vrot.slane %v4606_v15, 5  ;;  %v1355_v55 = vcombine.high %v1353_v56, %v1353_v56  ;;  %v12495_v19 = vrot.slane %v1354_v39, 9  ;;  %v3126_v25 = vmax.f32 %v1346_v47, %v12494_v45 }
 0x222   :  { %v12496_v1 = vrot.slane %v1353_v56, 9  ;;  %v1917_v49 = vcombine.high %v845_v8, %v845_v8  ;;  %v1924_v27 = vrot.slane %v845_v8, %v15058_v2  ;;  %v4603_v29 = vor.u32 %v4602_v59, %v4599_v43 }
 0x223   :  { %v843_v3 = vmax.f32 %v779_v42, 0.0  ;;  %v12497_v44 = vrot.slane %v1355_v55, 9  ;;  %v3127_v51 = vmax.f32 %v1354_v39, %v12495_v19  ;;  %v3334_v21 = vmax.f32 %v3126_v25, %v3134_v31  ;;  %v4482_v15 = vld [vmem:[#allocation2 + $0x3c] sm:$0x1] }
 0x224   :  { %v3128_v26 = vmax.f32 %v1353_v56, %v12496_v1  ;;  %v1931_v13 = vrot.slane %v1917_v49, %v15058_v2  ;;  %v1932_v10 = vcombine.high %v1924_v27, %v1924_v27  ;;  %v12630_v35 = vrot.slane %v1924_v27, 9  ;;  %v3517_v49 = vld [vmem:[#allocation2 + $0x8c] sm:$0x1] }
 0x225   :  { %v15708_v0 = vrot.slane %v4603_v29, 4  ;;  %v3129_v17 = vmax.f32 %v1355_v55, %v12497_v44  ;;  %v3335_v58 = vmax.f32 %v3127_v51, %v3135_v33  ;;  %v13553_v40 = vpack.c.bf16 %v3334_v21, %v3334_v21  ;;  %v4539_v61 = vld [vmem:[#allocation2] sm:$0xf] }
 0x226   :  { %v3336_v22 = vmax.f32 %v3128_v26, %v3136_v28  ;;  %v1933_v37 = vcombine.high %v1931_v13, %v1931_v13  ;;  %v12631_v24 = vrot.slane %v1932_v10, 9  ;;  %v12632_v5 = vrot.slane %v1931_v13, 9  ;;  %v4563_v59 = vld [vmem:[#allocation2 + $0x4] sm:$0x1]  ;;  %v15946_v14 = vld [vmem:[#allocation2 + $0x54] sm:$0x1] }
 0x227   :  { %v15710_v47 = vmax.f32 %v1924_v27, %v12630_v35  ;;  %v3337_v18 = vmax.f32 %v3129_v17, %v3137_v50  ;;  %v13554_v52 = vpack.c.bf16 %v3335_v58, %v3335_v58  ;;  %v4087_v31 = vunpack.c.l.b16 %v13553_v40  ;;  %v3467_v50 = vld [vmem:[#allocation2 + $0x88] sm:$0x1]  ;;  %v4479_v40 = vld [vmem:[#allocation2 + $0x38] sm:$0xf] }
 0x228   :  { %v13555_v23 = vpack.c.bf16 %v3336_v22, %v3336_v22  ;;  %v12633_v54 = vrot.slane %v1933_v37, 9  ;;  %v15712_v56 = vmax.f32 %v1932_v10, %v12631_v24  ;;  %v3264_v39 = vmax.f32 %v1931_v13, %v12632_v5 }
 0x229   :  { %v4583_v45 = vshrl.u32 %v4539_v61, 16  ;;  %v4088_v8 = vunpack.c.l.b16 %v13554_v52  ;;  %v4254_v28 = vrot.slane %v4087_v31, 3  ;;  %v13635_v43 = vpack.c.bf16 %v3337_v18, %v3337_v18 }
 0x22a   :  { %v4089_v33 = vunpack.c.l.b16 %v13555_v23  ;;  %v3265_v55 = vmax.f32 %v1933_v37, %v12633_v54  ;;  %v4586_v1 = vshll.u32 %v4539_v61, 16  ;;  %v4592_v25 = vshll.u32 %v4563_v59, 16 }
 0x22b   :  { %v4585_v19 = vrot.slane %v4583_v45, 4  ;;  %vm4862_vm1 = vcmask 523264   ;;  %v4255_v27 = vsel %vm4174_vm9, %v4254_v28, %v15678_v9  ;;  %v4256_v29 = vrot.slane %v4088_v8, 2 }
 0x22c   :  { %v4258_v44 = vrot.slane %v4089_v33, 1  ;;  %v4483_v51 = vsel %vm15025_vm5, %v13635_v43, %v4482_v15  ;;  %v4588_v26 = vrot.slane %v4586_v1, 5  ;;  %v4594_v21 = vrot.slane %v4592_v25, 5  ;;  %v15759_v1 = vld [vmem:[%s17502_s3] ss:$0 sm:$0xff] }
 0x22d   :  { %4484 = vst [vmem:[#allocation2 + $0x3c] sm:$0x1] %v4483_v51  ;;  %v4609_v13 = vsel %vm15716_vm0, %v15708_v0, %v15703_v4  ;;  %v1883_v10 = vcombine.high %v843_v3, %v843_v3  ;;  %v4257_v35 = vsel %vm4177_vm10, %v4256_v29, %v4255_v27  ;;  %v1890_v17 = vrot.slane %v843_v3, %v15058_v2 }
 0x22e   :  { %v3468_v9 = vsel %vm15025_vm5, 0, %v3467_v50  ;;  %v3518_v58 = vsel %vm15017_vm3, 0, %v3517_v49  ;;  %v4259_v22 = vsel %vm4180_vm12, %v4258_v44, %v4257_v35  ;;  %v4589_v61 = vor.u32 %v4588_v26, %v4585_v19 }
 0x22f   :  { %v1897_v37 = vrot.slane %v1883_v10, %v15058_v2  ;;  %3469 = vst [vmem:[#allocation2 + $0x88] sm:$0x1] %v3468_v9  ;;  %3519 = vst [vmem:[#allocation2 + $0x8c] sm:$0x1] %v3518_v58  ;;  %v4357_v4 = vsel %vm4171_vm8, %v4356_v32, %v15669_v16  ;;  %v4389_v3 = vpack.c.b16 %v4259_v22, %v4259_v22  ;;  %v12622_v24 = vrot.slane %v1890_v17, 9 }
 0x230   :  { %v1898_v0 = vcombine.high %v1890_v17, %v1890_v17  ;;  %v683_v5 = vmul.f32 %v15530_v30, %v15501_v6  ;;  %v4590_v18 = vrot.slane %v4589_v61, 4  ;;  %v715_v31 = vmul.f32 %v15530_v30, %v15503_v12 }
 0x231   :  { %v1899_v52 = vcombine.high %v1897_v37, %v1897_v37  ;;  %v12624_v23 = vrot.slane %v1897_v37, 9  ;;  %v4480_v15 = vsel %vm15162_vm13, %v4389_v3, %v4479_v40  ;;  %v3254_v45 = vmax.f32 %v1890_v17, %v12622_v24 }
 0x232   :  { %v12623_v54 = vrot.slane %v1898_v0, 9  ;;  %v752_v16 = vadd.f32 %v15749_v60, %v683_v5  ;;  %4481 = vst [vmem:[#allocation2 + $0x38] sm:$0xf] %v4480_v15  ;;  %v4595_v6 = vsel %vm15716_vm0, %v4590_v18, %v4594_v21  ;;  %v784_v12 = vadd.f32 %v15749_v60, %v715_v31 }
 0x233   :  { %v12625_v32 = vrot.slane %v1899_v52, 9  ;;  %v3256_v8 = vmax.f32 %v1897_v37, %v12624_v23  ;;  %v12794_v30 = vcombine.low %v4595_v6, %v4609_v13  ;;  %v3398_v28 = vmax.f32 %v3254_v45, %v15710_v47 }
 0x234   :  { %v3255_v33 = vmax.f32 %v1898_v0, %v12623_v54  ;;  %v816_v43 = vmax.f32 %v752_v16, 0.0  ;;  %v848_v19 = vmax.f32 %v784_v12, 0.0  ;;  %v681_v25 = vmul.f32 %v15759_v1, %v15507_v20 }
 0x235   :  { %v3257_v59 = vmax.f32 %v1899_v52, %v12625_v32  ;;  %v3400_v50 = vmax.f32 %v3256_v8, %v3264_v39  ;;  %13994 = vmatprep.mubr.msk.bf16.mxu1 %vm4862_vm1, %v12794_v30  ;;  %v13617_v27 = vpack.c.bf16 %v3398_v28, %v3398_v28  ;;  %vm8134_vm11 = vcmask 518144  }
 0x236   :  { %v3399_v49 = vmax.f32 %v3255_v33, %v15712_v56  ;;  %v1424_v29 = vcombine.high %v816_v43, %v816_v43  ;;  %v1431_v47 = vrot.slane %v816_v43, %v15058_v2  ;;  %v1968_v39 = vcombine.high %v848_v19, %v848_v19  ;;  %v4530_v10 = vld [vmem:[#allocation2 + $0x8c] sm:$0x1]  ;;  %v4527_v30 = vld [vmem:[#allocation2 + $0x88] sm:$0xf]  ;;  %8136 = vst.msk [vmem:[#allocation3 + $0x18] sm:$0x7] %vm8134_vm11, %v14846_v48 }
 0x237   :  { %v3401_v44 = vmax.f32 %v3257_v59, %v3265_v55  ;;  %v13619_v51 = vpack.c.bf16 %v3400_v50, %v3400_v50  ;;  %v1975_v26 = vrot.slane %v848_v19, %v15058_v2  ;;  %v4151_v13 = vunpack.c.l.b16 %v13617_v27  ;;  %v3496_v27 = vld [vmem:[#allocation2 + $0x44] sm:$0x1]  ;;  %8135 = vst.msk [vmem:[#allocation3] sm:$0x7] %vm8134_vm11, %v14846_v48  ;;  %8138 = vst.msk [vmem:[#allocation3 + $0x14] sm:$0x7] %vm8134_vm11, %v14846_v48 }
 0x238   :  { %v13618_v21 = vpack.c.bf16 %v3399_v49, %v3399_v49  ;;  %v1438_v35 = vrot.slane %v1424_v29, %v15058_v2  ;;  %v1439_v17 = vcombine.high %v1431_v47, %v1431_v47  ;;  %v12514_v58 = vrot.slane %v1431_v47, 9  ;;  %v3446_v49 = vld [vmem:[#allocation2 + $0x40] sm:$0x1]  ;;  %8139 = vst.msk [vmem:[#allocation3 + $0x2c] sm:$0x7] %vm8134_vm11, %v14846_v48 }
 0x239   :  { %v4153_v20 = vunpack.c.l.b16 %v13619_v51  ;;  %v13643_v9 = vpack.c.bf16 %v3401_v44, %v3401_v44  ;;  %v1982_v56 = vrot.slane %v1968_v39, %v15058_v2  ;;  %v4358_v40 = vrot.slane %v4151_v13, 3 }
 0x23a   :  { %v4152_v22 = vunpack.c.l.b16 %v13618_v21  ;;  %v1440_v61 = vcombine.high %v1438_v35, %v1438_v35  ;;  %v12515_v37 = vrot.slane %v1439_v17, 9  ;;  %v12516_v0 = vrot.slane %v1438_v35, 9 }
 0x23b   :  { %v4362_v55 = vrot.slane %v4153_v20, 1  ;;  %v4531_v3 = vsel %vm15025_vm5, %v13643_v9, %v4530_v10  ;;  %v3146_v24 = vmax.f32 %v1431_v47, %v12514_v58  ;;  %v4359_v5 = vsel %vm4174_vm9, %v4358_v40, %v4357_v4 }
 0x23c   :  { %v4360_v18 = vrot.slane %v4152_v22, 2  ;;  %4532 = vst [vmem:[#allocation2 + $0x8c] sm:$0x1] %v4531_v3  ;;  %v12517_v52 = vrot.slane %v1440_v61, 9  ;;  %v3147_v23 = vmax.f32 %v1439_v17, %v12515_v37  ;;  %v3148_v31 = vmax.f32 %v1438_v35, %v12516_v0 }
 0x23d   :  { %v1983_v15 = vcombine.high %v1975_v26, %v1975_v26  ;;  %v1984_v54 = vcombine.high %v1982_v56, %v1982_v56  ;;  %v12642_v45 = vrot.slane %v1975_v26, 9  ;;  %v12644_v32 = vrot.slane %v1982_v56, 9 }
 0x23e   :  { %v4361_v16 = vsel %vm4177_vm10, %v4360_v18, %v4359_v5  ;;  %v3149_v6 = vmax.f32 %v1440_v61, %v12517_v52  ;;  %v750_v8 = vadd.f32 %v15749_v60, %v681_v25  ;;  %v713_v19 = vmul.f32 %v15759_v1, %v15509_v7 }
 0x23f   :  { %v4363_v12 = vsel %vm4180_vm12, %v4362_v55, %v4361_v16  ;;  %v12643_v33 = vrot.slane %v1983_v15, 9  ;;  %v12645_v28 = vrot.slane %v1984_v54, 9  ;;  %v3274_v4 = vmax.f32 %v1975_v26, %v12642_v45 }
 0x240   :  { %v4405_v43 = vpack.c.b16 %v4363_v12, %v4363_v12  ;;  %v15775_v59 = vmax.f32 %v1982_v56, %v12644_v32  ;;  %v814_v50 = vmax.f32 %v750_v8, 0.0  ;;  %v684_v25 = vmul.f32 %v15759_v1, %v15516_v36 }
 0x241   :  { %v3275_v29 = vmax.f32 %v1983_v15, %v12643_v33  ;;  %v15779_v47 = vmax.f32 %v1984_v54, %v12645_v28  ;;  %v682_v44 = vmul.f32 %v15759_v1, %v15539_v62  ;;  %v782_v21 = vadd.f32 %v15749_v60, %v713_v19 }
 0x242   :  { %v4528_v51 = vsel %vm15162_vm13, %v4405_v43, %v4527_v30  ;;  %v1390_v39 = vcombine.high %v814_v50, %v814_v50  ;;  %v1397_v26 = vrot.slane %v814_v50, %v15058_v2  ;;  %v753_v7 = vadd.f32 %v15749_v60, %v684_v25 }
 0x243   :  { %4529 = vst [vmem:[#allocation2 + $0x88] sm:$0xf] %v4528_v51  ;;  %v751_v13 = vadd.f32 %v15749_v60, %v682_v44  ;;  %v3447_v10 = vsel %vm15025_vm5, 0, %v3446_v49  ;;  %v3497_v36 = vsel %vm15017_vm3, 0, %v3496_v27  ;;  %v846_v20 = vmax.f32 %v782_v21, 0.0 }
 0x244   :  { %v1404_v62 = vrot.slane %v1390_v39, %v15058_v2  ;;  %v1405_v35 = vcombine.high %v1397_v26, %v1397_v26  ;;  %v12506_v17 = vrot.slane %v1397_v26, 9  ;;  %3448 = vst [vmem:[#allocation2 + $0x40] sm:$0x1] %v3447_v10  ;;  %3498 = vst [vmem:[#allocation2 + $0x44] sm:$0x1] %v3497_v36  ;;  %v817_v9 = vmax.f32 %v753_v7, 0.0 }
 0x245   :  { %v15796_v58 = vmax.f32 %v751_v13, 0.0  ;;  %v15800_v56 = vmul.f32 %v15759_v1, %v15554_v41  ;;  %v15804_v22 = vmul.f32 %v15759_v1, %v15564_v53  ;;  %v1934_v3 = vcombine.high %v846_v20, %v846_v20 }
 0x246   :  { %v1406_v40 = vcombine.high %v1404_v62, %v1404_v62  ;;  %v12507_v61 = vrot.slane %v1405_v35, 9  ;;  %v12508_v37 = vrot.slane %v1404_v62, 9  ;;  %v3138_v55 = vmax.f32 %v1397_v26, %v12506_v17 }
 0x247   :  { %v1941_v0 = vrot.slane %v846_v20, %v15058_v2  ;;  %v1441_v5 = vcombine.high %v817_v9, %v817_v9  ;;  %v1448_v18 = vrot.slane %v817_v9, %v15058_v2  ;;  %v1948_v41 = vrot.slane %v1934_v3, %v15058_v2 }
 0x248   :  { %v12509_v52 = vrot.slane %v1406_v40, 9  ;;  %v3139_v15 = vmax.f32 %v1405_v35, %v12507_v61  ;;  %v3140_v54 = vmax.f32 %v1404_v62, %v12508_v37  ;;  %v3338_v45 = vmax.f32 %v3138_v55, %v3146_v24 }
 0x249   :  { %v1949_v16 = vcombine.high %v1941_v0, %v1941_v0  ;;  %v12634_v32 = vrot.slane %v1941_v0, 9  ;;  %v1455_v53 = vrot.slane %v1441_v5, %v15058_v2  ;;  %v1950_v28 = vcombine.high %v1948_v41, %v1948_v41 }
 0x24a   :  { %v3141_v8 = vmax.f32 %v1406_v40, %v12509_v52  ;;  %v3339_v12 = vmax.f32 %v3139_v15, %v3147_v23  ;;  %v3340_v30 = vmax.f32 %v3140_v54, %v3148_v31  ;;  %v13557_v33 = vpack.c.bf16 %v3338_v45, %v3338_v45 }
 0x24b   :  { %v12635_v43 = vrot.slane %v1949_v16, 9  ;;  %v12636_v50 = vrot.slane %v1948_v41, 9  ;;  %v3266_v19 = vmax.f32 %v1941_v0, %v12634_v32  ;;  %v12637_v51 = vrot.slane %v1950_v28, 9 }
 0x24c   :  { %v3341_v49 = vmax.f32 %v3141_v8, %v3149_v6  ;;  %v13558_v27 = vpack.c.bf16 %v3339_v12, %v3339_v12  ;;  %v13559_v25 = vpack.c.bf16 %v3340_v30, %v3340_v30  ;;  %v4091_v44 = vunpack.c.l.b16 %v13557_v33 }
 0x24d   :  { %v3267_v24 = vmax.f32 %v1949_v16, %v12635_v43  ;;  %v3268_v39 = vmax.f32 %v1948_v41, %v12636_v50  ;;  %v3402_v26 = vmax.f32 %v3266_v19, %v3274_v4  ;;  %v3269_v36 = vmax.f32 %v1950_v28, %v12637_v51  ;;  %v3470_v43 = vld [vmem:[#allocation2 + $0x90] sm:$0x1]  ;;  %v3520_v50 = vld [vmem:[#allocation2 + $0x94] sm:$0x1] }
 0x24e   :  { %v13560_v21 = vpack.c.bf16 %v3341_v49, %v3341_v49  ;;  %v4092_v7 = vunpack.c.l.b16 %v13558_v27  ;;  %v4093_v13 = vunpack.c.l.b16 %v13559_v25  ;;  %v4260_v10 = vrot.slane %v4091_v44, 7 }
 0x24f   :  { %v3403_v23 = vmax.f32 %v3267_v24, %v3275_v29  ;;  %v3404_v31 = vmax.f32 %v3268_v39, %v15775_v59  ;;  %v13621_v62 = vpack.c.bf16 %v3402_v26, %v3402_v26  ;;  %v1456_v6 = vcombine.high %v1448_v18, %v1448_v18 }
 0x250   :  { %v4094_v35 = vunpack.c.l.b16 %v13560_v21  ;;  %v4261_v17 = vrot.slane %v4092_v7, 6  ;;  %v4263_v20 = vrot.slane %v4093_v13, 5  ;;  %v3405_v9 = vmax.f32 %v3269_v36, %v15779_v47 }
 0x251   :  { %v13622_v40 = vpack.c.bf16 %v3403_v23, %v3403_v23  ;;  %v13623_v61 = vpack.c.bf16 %v3404_v31, %v3404_v31  ;;  %v4155_v37 = vunpack.c.l.b16 %v13621_v62  ;;  %v1457_v3 = vcombine.high %v1455_v53, %v1455_v53 }
 0x252   :  { %v4262_v4 = vsel %vm4165_vm6, %v4261_v17, %v4260_v10  ;;  %v4265_v55 = vrot.slane %v4094_v35, 4  ;;  %v12518_v0 = vrot.slane %v1448_v18, 9  ;;  %v13624_v29 = vpack.c.bf16 %v3405_v9, %v3405_v9 }
 0x253   :  { %v4264_v5 = vsel %vm4168_vm7, %v4263_v20, %v4262_v4  ;;  %v4156_v52 = vunpack.c.l.b16 %v13622_v40  ;;  %v4157_v59 = vunpack.c.l.b16 %v13623_v61  ;;  %v4364_v15 = vrot.slane %v4155_v37, 7 }
 0x254   :  { %v12519_v54 = vrot.slane %v1456_v6, 9  ;;  %v12520_v45 = vrot.slane %v1455_v53, 9  ;;  %v12521_v41 = vrot.slane %v1457_v3, 9  ;;  %v4158_v16 = vunpack.c.l.b16 %v13624_v29 }
 0x255   :  { %v4365_v32 = vrot.slane %v4156_v52, 6  ;;  %v4367_v47 = vrot.slane %v4157_v59, 5  ;;  %v3150_v8 = vmax.f32 %v1448_v18, %v12518_v0  ;;  %v1407_v28 = vcombine.high %v15796_v58, %v15796_v58 }
 0x256   :  { %v3151_v12 = vmax.f32 %v1456_v6, %v12519_v54  ;;  %v3152_v30 = vmax.f32 %v1455_v53, %v12520_v45  ;;  %v3153_v33 = vmax.f32 %v1457_v3, %v12521_v41  ;;  %v4369_v49 = vrot.slane %v4158_v16, 4  ;;  %v4488_v41 = vld [vmem:[#allocation2 + $0x44] sm:$0x1] }
 0x257   :  { %v4366_v19 = vsel %vm4165_vm6, %v4365_v32, %v4364_v15  ;;  %v1414_v27 = vrot.slane %v15796_v58, %v15058_v2  ;;  %v4266_v25 = vsel %vm4171_vm8, %v4265_v55, %v4264_v5  ;;  %v1421_v18 = vrot.slane %v1407_v28, %v15058_v2 }
 0x258   :  { %v4368_v44 = vsel %vm4168_vm7, %v4367_v47, %v4366_v19  ;;  %v785_v53 = vadd.f32 %v15749_v60, %v15800_v56  ;;  %v783_v51 = vadd.f32 %v15749_v60, %v15804_v22  ;;  %v3471_v26 = vsel %vm15025_vm5, 0, %v3470_v43 }
 0x259   :  { %v1422_v24 = vcombine.high %v1414_v27, %v1414_v27  ;;  %v12510_v39 = vrot.slane %v1414_v27, 9  ;;  %v3521_v58 = vsel %vm15017_vm3, 0, %v3520_v50  ;;  %v1423_v21 = vcombine.high %v1421_v18, %v1421_v18  ;;  %3472 = vst [vmem:[#allocation2 + $0x90] sm:$0x1] %v3471_v26 }
 0x25a   :  { %v12512_v7 = vrot.slane %v1421_v18, 9  ;;  %v849_v13 = vmax.f32 %v785_v53, 0.0  ;;  %v847_v10 = vmax.f32 %v783_v51, 0.0  ;;  %3522 = vst [vmem:[#allocation2 + $0x94] sm:$0x1] %v3521_v58  ;;  %v15831_v56 = vsel %vm4171_vm8, %v4369_v49, %v4368_v44 }
 0x25b   :  { %v12511_v36 = vrot.slane %v1422_v24, 9  ;;  %v3142_v23 = vmax.f32 %v1414_v27, %v12510_v39  ;;  %v687_v22 = vmul.f32 %v15759_v1, %v15572_v57  ;;  %v12513_v31 = vrot.slane %v1423_v21, 9 }
 0x25c   :  { %v3144_v62 = vmax.f32 %v1421_v18, %v12512_v7  ;;  %v1985_v35 = vcombine.high %v849_v13, %v849_v13  ;;  %v1992_v17 = vrot.slane %v849_v13, %v15058_v2  ;;  %v1951_v9 = vcombine.high %v847_v10, %v847_v10 }
 0x25d   :  { %v3143_v20 = vmax.f32 %v1422_v24, %v12511_v36  ;;  %v3342_v6 = vmax.f32 %v3142_v23, %v3150_v8  ;;  %v1958_v40 = vrot.slane %v847_v10, %v15058_v2  ;;  %v3145_v61 = vmax.f32 %v1423_v21, %v12513_v31  ;;  %v4485_v23 = vld [vmem:[#allocation2 + $0x40] sm:$0xf] }
 0x25e   :  { %v3344_v37 = vmax.f32 %v3144_v62, %v3152_v30  ;;  %v1999_v4 = vrot.slane %v1985_v35, %v15058_v2  ;;  %v2000_v55 = vcombine.high %v1992_v17, %v1992_v17  ;;  %v12646_v5 = vrot.slane %v1992_v17, 9 }
 0x25f   :  { %v3343_v3 = vmax.f32 %v3143_v20, %v3151_v12  ;;  %v13561_v0 = vpack.c.bf16 %v3342_v6, %v3342_v6  ;;  %v1965_v57 = vrot.slane %v1951_v9, %v15058_v2  ;;  %v3345_v29 = vmax.f32 %v3145_v61, %v3153_v33 }
 0x260   :  { %v13563_v52 = vpack.c.bf16 %v3344_v37, %v3344_v37  ;;  %v2001_v59 = vcombine.high %v1999_v4, %v1999_v4  ;;  %v12647_v15 = vrot.slane %v2000_v55, 9  ;;  %v12648_v16 = vrot.slane %v1999_v4, 9 }
 0x261   :  { %v13562_v54 = vpack.c.bf16 %v3343_v3, %v3343_v3  ;;  %v4095_v45 = vunpack.c.l.b16 %v13561_v0  ;;  %v3278_v32 = vmax.f32 %v1992_v17, %v12646_v5  ;;  %v13636_v8 = vpack.c.bf16 %v3345_v29, %v3345_v29 }
 0x262   :  { %v4097_v47 = vunpack.c.l.b16 %v13563_v52  ;;  %v12649_v30 = vrot.slane %v2001_v59, 9  ;;  %v3279_v28 = vmax.f32 %v2000_v55, %v12647_v15  ;;  %v3280_v12 = vmax.f32 %v1999_v4, %v12648_v16  ;;  %v4536_v55 = vld [vmem:[#allocation2 + $0x94] sm:$0x1] }
 0x263   :  { %v4096_v43 = vunpack.c.l.b16 %v13562_v54  ;;  %v4267_v50 = vrot.slane %v4095_v45, 3  ;;  %v1966_v19 = vcombine.high %v1958_v40, %v1958_v40  ;;  %v4489_v33 = vsel %vm15025_vm5, %v13636_v8, %v4488_v41 }
 0x264   :  { %v4271_v49 = vrot.slane %v4097_v47, 1  ;;  %v3281_v27 = vmax.f32 %v2001_v59, %v12649_v30  ;;  %v1967_v44 = vcombine.high %v1965_v57, %v1965_v57  ;;  %4490 = vst [vmem:[#allocation2 + $0x44] sm:$0x1] %v4489_v33  ;;  %v12638_v51 = vrot.slane %v1958_v40, 9 }
 0x265   :  { %v4268_v18 = vsel %vm4174_vm9, %v4267_v50, %v4266_v25  ;;  %v4269_v53 = vrot.slane %v4096_v43, 2  ;;  %v12639_v24 = vrot.slane %v1966_v19, 9  ;;  %v12640_v39 = vrot.slane %v1965_v57, 9 }
 0x266   :  { %v12641_v26 = vrot.slane %v1967_v44, 9  ;;  %v756_v58 = vadd.f32 %v15749_v60, %v687_v22  ;;  %v685_v21 = vmul.f32 %v15759_v1, %v15583_v63  ;;  %v3270_v13 = vmax.f32 %v1958_v40, %v12638_v51 }
 0x267   :  { %v4270_v7 = vsel %vm4177_vm10, %v4269_v53, %v4268_v18  ;;  %v3271_v10 = vmax.f32 %v1966_v19, %v12639_v24  ;;  %v688_v36 = vmul.f32 %v15759_v1, %v15610_v46  ;;  %v3272_v31 = vmax.f32 %v1965_v57, %v12640_v39 }
 0x268   :  { %v4272_v25 = vsel %vm4180_vm12, %v4271_v49, %v4270_v7  ;;  %v3273_v62 = vmax.f32 %v1967_v44, %v12641_v26  ;;  %v820_v35 = vmax.f32 %v756_v58, 0.0  ;;  %v3406_v20 = vmax.f32 %v3270_v13, %v3278_v32  ;;  %v4533_v26 = vld [vmem:[#allocation2 + $0x90] sm:$0xf] }
 0x269   :  { %v4391_v17 = vpack.c.b16 %v4272_v25, %v4272_v25  ;;  %v3407_v6 = vmax.f32 %v3271_v10, %v3279_v28  ;;  %v754_v22 = vadd.f32 %v15749_v60, %v685_v21  ;;  %v3408_v9 = vmax.f32 %v3272_v31, %v3280_v12 }
 0x26a   :  { %v3409_v63 = vmax.f32 %v3273_v62, %v3281_v27  ;;  %v1492_v61 = vcombine.high %v820_v35, %v820_v35  ;;  %v1499_v40 = vrot.slane %v820_v35, %v15058_v2  ;;  %v13625_v46 = vpack.c.bf16 %v3406_v20, %v3406_v20 }
 0x26b   :  { %v4486_v37 = vsel %vm15162_vm13, %v4391_v17, %v4485_v23  ;;  %v13626_v4 = vpack.c.bf16 %v3407_v6, %v3407_v6  ;;  %v818_v3 = vmax.f32 %v754_v22, 0.0  ;;  %v13627_v0 = vpack.c.bf16 %v3408_v9, %v3408_v9 }
 0x26c   :  { %4487 = vst [vmem:[#allocation2 + $0x40] sm:$0xf] %v4486_v37  ;;  %v13644_v5 = vpack.c.bf16 %v3409_v63, %v3409_v63  ;;  %v1506_v57 = vrot.slane %v1492_v61, %v15058_v2  ;;  %v1507_v29 = vcombine.high %v1499_v40, %v1499_v40  ;;  %v4159_v52 = vunpack.c.l.b16 %v13625_v46 }
 0x26d   :  { %v4160_v59 = vunpack.c.l.b16 %v13626_v4  ;;  %v12530_v15 = vrot.slane %v1499_v40, 9  ;;  %v1458_v54 = vcombine.high %v818_v3, %v818_v3  ;;  %v4161_v45 = vunpack.c.l.b16 %v13627_v0 }
 0x26e   :  { %v4537_v41 = vsel %vm15025_vm5, %v13644_v5, %v4536_v55  ;;  %v1508_v16 = vcombine.high %v1506_v57, %v1506_v57  ;;  %v12531_v32 = vrot.slane %v1507_v29, 9  ;;  %v4371_v47 = vrot.slane %v4159_v52, 3 }
 0x26f   :  { %v4373_v8 = vrot.slane %v4160_v59, 2  ;;  %4538 = vst [vmem:[#allocation2 + $0x94] sm:$0x1] %v4537_v41  ;;  %v12532_v30 = vrot.slane %v1506_v57, 9  ;;  %v3162_v28 = vmax.f32 %v1499_v40, %v12530_v15  ;;  %v4375_v43 = vrot.slane %v4161_v45, 1 }
 0x270   :  { %v12533_v50 = vrot.slane %v1508_v16, 9  ;;  %v3163_v12 = vmax.f32 %v1507_v29, %v12531_v32  ;;  %v1465_v19 = vrot.slane %v818_v3, %v15058_v2  ;;  %v4372_v49 = vsel %vm4174_vm9, %v4371_v47, %v15831_v56  ;;  %v3499_v45 = vld [vmem:[#allocation2 + $0x5c] sm:$0x1] }
 0x271   :  { %v3164_v33 = vmax.f32 %v1506_v57, %v12532_v30  ;;  %v1472_v27 = vrot.slane %v1458_v54, %v15058_v2  ;;  %v757_v44 = vadd.f32 %v15749_v60, %v688_v36  ;;  %v4374_v18 = vsel %vm4177_vm10, %v4373_v8, %v4372_v49  ;;  %v3449_v54 = vld [vmem:[#allocation2 + $0x58] sm:$0x1]  ;;  %v15870_v8 = vld [vmem:[#allocation2 + $0x10] sm:$0xf] }
 0x272   :  { %v3165_v53 = vmax.f32 %v1508_v16, %v12533_v50  ;;  %v1473_v51 = vcombine.high %v1465_v19, %v1465_v19  ;;  %v12522_v24 = vrot.slane %v1465_v19, 9  ;;  %v4376_v39 = vsel %vm4180_vm12, %v4375_v43, %v4374_v18 }
 0x273   :  { %v1474_v58 = vcombine.high %v1472_v27, %v1472_v27  ;;  %v12524_v21 = vrot.slane %v1472_v27, 9  ;;  %v821_v7 = vmax.f32 %v757_v44, 0.0  ;;  %v4407_v13 = vpack.c.b16 %v4376_v39, %v4376_v39 }
 0x274   :  { %v12523_v10 = vrot.slane %v1473_v51, 9  ;;  %v3154_v25 = vmax.f32 %v1465_v19, %v12522_v24  ;;  %v686_v56 = vmul.f32 %v15759_v1, %v15622_v11  ;;  %v3450_v49 = vsel %vm15025_vm5, 0, %v3449_v54 }
 0x275   :  { %v12525_v23 = vrot.slane %v1474_v58, 9  ;;  %v3156_v31 = vmax.f32 %v1472_v27, %v12524_v21  ;;  %v1509_v36 = vcombine.high %v821_v7, %v821_v7  ;;  %v1516_v62 = vrot.slane %v821_v7, %v15058_v2  ;;  %3451 = vst [vmem:[#allocation2 + $0x58] sm:$0x1] %v3450_v49 }
 0x276   :  { %v4534_v35 = vsel %vm15162_vm13, %v4407_v13, %v4533_v26  ;;  %v3155_v17 = vmax.f32 %v1473_v51, %v12523_v10  ;;  %v3346_v20 = vmax.f32 %v3154_v25, %v3162_v28  ;;  %v755_v6 = vadd.f32 %v15749_v60, %v686_v56  ;;  %v15880_v26 = vld [vmem:[#allocation2 + $0x18] sm:$0xf] }
 0x277   :  { %4535 = vst [vmem:[#allocation2 + $0x90] sm:$0xf] %v4534_v35  ;;  %v3157_v22 = vmax.f32 %v1474_v58, %v12525_v23  ;;  %v3348_v9 = vmax.f32 %v3156_v31, %v3164_v33  ;;  %v1523_v63 = vrot.slane %v1509_v36, %v15058_v2  ;;  %v1524_v61 = vcombine.high %v1516_v62, %v1516_v62  ;;  %v15882_v58 = vld [vmem:[#allocation2 + $0x14] sm:$0x1] }
 0x278   :  { %v3347_v40 = vmax.f32 %v3155_v17, %v3163_v12  ;;  %v13565_v11 = vpack.c.bf16 %v3346_v20, %v3346_v20  ;;  %v12534_v1 = vrot.slane %v1516_v62, 9  ;;  %v819_v37 = vmax.f32 %v755_v6, 0.0 }
 0x279   :  { %v3349_v46 = vmax.f32 %v3157_v22, %v3165_v53  ;;  %v13567_v4 = vpack.c.bf16 %v3348_v9, %v3348_v9  ;;  %v1525_v55 = vcombine.high %v1523_v63, %v1523_v63  ;;  %v12535_v3 = vrot.slane %v1524_v61, 9  ;;  %v15889_v22 = vld [vmem:[#allocation2 + $0x1c] sm:$0x1] }
 0x27a   :  { %v13566_v0 = vpack.c.bf16 %v3347_v40, %v3347_v40  ;;  %v4099_v5 = vunpack.c.l.b16 %v13565_v11  ;;  %v12536_v57 = vrot.slane %v1523_v63, 9  ;;  %v3166_v29 = vmax.f32 %v1516_v62, %v12534_v1 }
 0x27b   :  { %v13568_v52 = vpack.c.bf16 %v3349_v46, %v3349_v46  ;;  %v4101_v60 = vunpack.c.l.b16 %v13567_v4  ;;  %v12537_v59 = vrot.slane %v1525_v55, 9  ;;  %v3167_v15 = vmax.f32 %v1524_v61, %v12535_v3  ;;  %v15892_v61 = vld [vmem:[#allocation2 + $0x20] sm:$0xf] }
 0x27c   :  { %v4100_v41 = vunpack.c.l.b16 %v13566_v0  ;;  %v4273_v16 = vrot.slane %v4099_v5, 7  ;;  %v3168_v32 = vmax.f32 %v1523_v63, %v12536_v57  ;;  %v1475_v47 = vcombine.high %v819_v37, %v819_v37 }
 0x27d   :  { %v4102_v30 = vunpack.c.l.b16 %v13568_v52  ;;  %v4276_v28 = vrot.slane %v4101_v60, 5  ;;  %v3169_v43 = vmax.f32 %v1525_v55, %v12537_v59  ;;  %v1482_v50 = vrot.slane %v819_v37, %v15058_v2 }
 0x27e   :  { %v4274_v12 = vrot.slane %v4100_v41, 6  ;;  %v1489_v19 = vrot.slane %v1475_v47, %v15058_v2  ;;  %v3500_v33 = vsel %vm15017_vm3, 0, %v3499_v45  ;;  %v4611_v53 = vshrl.u32 %v15870_v8, 16  ;;  %v15896_v45 = vld [vmem:[#allocation2 + $0x28] sm:$0xf] }
 0x27f   :  { %v4278_v27 = vrot.slane %v4102_v30, 4  ;;  %v1490_v44 = vcombine.high %v1482_v50, %v1482_v50  ;;  %v12526_v18 = vrot.slane %v1482_v50, 9  ;;  %3501 = vst [vmem:[#allocation2 + $0x5c] sm:$0x1] %v3500_v33  ;;  %v4614_v21 = vshll.u32 %v15870_v8, 16 }
 0x280   :  { %v4275_v51 = vsel %vm4165_vm6, %v4274_v12, %v4273_v16  ;;  %v1491_v24 = vcombine.high %v1489_v19, %v1489_v19  ;;  %v12528_v39 = vrot.slane %v1489_v19, 9  ;;  %v4613_v10 = vrot.slane %v4611_v53, 4 }
 0x281   :  { %v4277_v34 = vsel %vm4168_vm7, %v4276_v28, %v4275_v51  ;;  %v12527_v7 = vrot.slane %v1490_v44, 9  ;;  %v3158_v13 = vmax.f32 %v1482_v50, %v12526_v18  ;;  %v4616_v31 = vrot.slane %v4614_v21, 5 }
 0x282   :  { %v12529_v25 = vrot.slane %v1491_v24, 9  ;;  %v3160_v56 = vmax.f32 %v1489_v19, %v12528_v39  ;;  %v4279_v23 = vsel %vm4171_vm8, %v4278_v27, %v4277_v34  ;;  %v4620_v35 = vshll.u32 %v15882_v58, 16  ;;  %v15915_v39 = vld [vmem:[#allocation2 + $0x34] sm:$0x1] }
 0x283   :  { %v3159_v36 = vmax.f32 %v1490_v44, %v12527_v7  ;;  %v3350_v62 = vmax.f32 %v3158_v13, %v3166_v29  ;;  %v4625_v17 = vshrl.u32 %v15880_v26, 16  ;;  %v4617_v9 = vor.u32 %v4616_v31, %v4613_v10  ;;  %v15910_v44 = vld [vmem:[#allocation2 + $0x30] sm:$0xf]  ;;  %v15919_v10 = vld [vmem:[#allocation2 + $0x38] sm:$0xf] }
 0x284   :  { %v3161_v20 = vmax.f32 %v1491_v24, %v12529_v25  ;;  %v3352_v6 = vmax.f32 %v3160_v56, %v3168_v32  ;;  %v4628_v63 = vshll.u32 %v15880_v26, 16  ;;  %v4622_v1 = vrot.slane %v4620_v35, 5  ;;  %v14659_v25 = vld [vmem:[%s17501_s2 + $0x8] sm:$0xff]  }
 0x285   :  { %v3351_v40 = vmax.f32 %v3159_v36, %v3167_v15  ;;  %v13569_v11 = vpack.c.bf16 %v3350_v62, %v3350_v62  ;;  %v4627_v37 = vrot.slane %v4625_v17, 4  ;;  %v4618_v55 = vrot.slane %v4617_v9, 4  ;;  %v15898_v15 = vld [vmem:[#allocation2 + $0x24] sm:$0x1]  ;;  %v15929_v9 = vld [vmem:[#allocation2 + $0x50] sm:$0xf] }
 0x286   :  { %v3353_v46 = vmax.f32 %v3161_v20, %v3169_v43  ;;  %v13571_v4 = vpack.c.bf16 %v3352_v6, %v3352_v6  ;;  %v4630_v3 = vrot.slane %v4628_v63, 5  ;;  %v4494_v57 = vld [vmem:[#allocation2 + $0x5c] sm:$0x1]  ;;  %v4634_v29 = vshll.u32 %v15889_v22, 16  ;;  %v15904_v43 = vld [vmem:[#allocation2 + $0x2c] sm:$0x1] }
 0x287   :  { %v13570_v0 = vpack.c.bf16 %v3351_v40, %v3351_v40  ;;  %v4103_v5 = vunpack.c.l.b16 %v13569_v11  ;;  %v4639_v52 = vshrl.u32 %v15892_v61, 16  ;;  %v4623_v32 = vsel %vm15716_vm0, %v4618_v55, %v4622_v1  ;;  %v15931_v11 = vld [vmem:[#allocation2 + $0x3c] sm:$0x1] }
 0x288   :  { %v4105_v60 = vunpack.c.l.b16 %v13571_v4  ;;  %v13637_v59 = vpack.c.bf16 %v3353_v46, %v3353_v46  ;;  %v4631_v54 = vor.u32 %v4630_v3, %v4627_v37  ;;  %v4636_v47 = vrot.slane %v4634_v29, 5  ;;  %v14803_v46 = vld [vmem:[%s17501_s2] sm:$0xff]  }
 0x289   :  { %v4104_v41 = vunpack.c.l.b16 %v13570_v0  ;;  %v4280_v16 = vrot.slane %v4103_v5, 3  ;;  %v4641_v50 = vrot.slane %v4639_v52, 4  ;;  %v4642_v12 = vshll.u32 %v15892_v61, 16  ;;  %v14660_v5 = vld [vmem:[%s17501_s2 + $0x10] sm:$0xff]  }
 0x28a   :  { %v4495_v30 = vsel %vm15025_vm5, %v13637_v59, %v4494_v57  ;;  %v4632_v28 = vrot.slane %v4631_v54, 4  ;;  %v4648_v33 = vshll.u32 %v15898_v15, 16  ;;  %v4653_v27 = vshrl.u32 %v15896_v45, 16 }
 0x28b   :  { %v4281_v19 = vsel %vm4174_vm9, %v4280_v16, %v4279_v23  ;;  %v4282_v49 = vrot.slane %v4104_v41, 2  ;;  %4496 = vst [vmem:[#allocation2 + $0x5c] sm:$0x1] %v4495_v30  ;;  %v4284_v18 = vrot.slane %v4105_v60, 1  ;;  %v4644_v51 = vrot.slane %v4642_v12, 5 }
 0x28c   :  { %v4637_v53 = vsel %vm15716_vm0, %v4632_v28, %v4636_v47  ;;  %v4656_v24 = vshll.u32 %v15896_v45, 16  ;;  %v4655_v7 = vrot.slane %v4653_v27, 4  ;;  %v4662_v13 = vshll.u32 %v15904_v43, 16  ;;  %v4491_v23 = vld [vmem:[#allocation2 + $0x58] sm:$0xf] }
 0x28d   :  { %v4283_v21 = vsel %vm4177_vm10, %v4282_v49, %v4281_v19  ;;  %v12795_v34 = vcombine.low %v4623_v32, %v4637_v53  ;;  %v4645_v31 = vor.u32 %v4644_v51, %v4641_v50  ;;  %v4650_v36 = vrot.slane %v4648_v33, 5  ;;  %v15955_v12 = vld [vmem:[#allocation2 + $0x60] sm:$0xf]  ;;  %v15957_v19 = vld [vmem:[#allocation2 + $0x64] sm:$0x1]  ;;  %v14661_v51 = vld [vmem:[%s17501_s2 + $0x18] sm:$0xff]  }
 0x28e   :  { %v4285_v56 = vsel %vm4180_vm12, %v4284_v18, %v4283_v21  ;;  %v4658_v62 = vrot.slane %v4656_v24, 5  ;;  %v4667_v17 = vshrl.u32 %v15910_v44, 16  ;;  %v4670_v20 = vshll.u32 %v15910_v44, 16  ;;  %v15960_v53 = vld [vmem:[#allocation2 + $0x68] sm:$0xf] }
 0x28f   :  { %v4393_v35 = vpack.c.b16 %v4285_v56, %v4285_v56  ;;  %13995 = vmatmul.mubr.msk.bf16.vlgmr.msra.gmra.mrb[28].mxu1 %vm4862_vm1, %v12795_v34  ;;  %v4676_v6 = vshll.u32 %v15915_v39, 16  ;;  %v4646_v63 = vrot.slane %v4645_v31, 4  ;;  %v4681_v1 = vshrl.u32 %v15919_v10, 16 }
 0x290   :  { %v4659_v40 = vor.u32 %v4658_v62, %v4655_v7  ;;  %v4684_v37 = vshll.u32 %v15919_v10, 16  ;;  %14011 = vmatpush3.bf16.msra.mxu1 %v14803_v46  ;;  %v4664_v55 = vrot.slane %v4662_v13, 5  ;;  %v4669_v3 = vrot.slane %v4667_v17, 4  ;;  %v15975_v62 = vld [vmem:[#allocation2 + $0x6c] sm:$0x1] }
 0x291   :  { %v4492_v4 = vsel %vm15162_vm13, %v4393_v35, %v4491_v23  ;;  %v4672_v0 = vrot.slane %v4670_v20, 5  ;;  %14012 = vmatprep.subr.bf16.mxu1 %v14659_v25  ;;  %v4678_v29 = vrot.slane %v4676_v6, 5  ;;  %v4683_v52 = vrot.slane %v4681_v1, 4  ;;  %v15979_v20 = vld [vmem:[#allocation2 + $0x70] sm:$0xf] }
 0x292   :  { %4493 = vst [vmem:[#allocation2 + $0x58] sm:$0xf] %v4492_v4  ;;  %v4660_v57 = vrot.slane %v4659_v40, 4  ;;  %v4686_v60 = vrot.slane %v4684_v37, 5  ;;  %v15943_v59 = vld [vmem:[#allocation2 + $0x5c] sm:$0x1]  ;;  %v4651_v47 = vsel %vm15716_vm0, %v4646_v63, %v4650_v36 }
 0x293   :  { %v4673_v54 = vor.u32 %v4672_v0, %v4669_v3  ;;  %v4690_v41 = vshll.u32 %v15931_v11, 16  ;;  %v4695_v16 = vshrl.u32 %v15929_v9, 16  ;;  %v4698_v32 = vshll.u32 %v15929_v9, 16  ;;  %v15983_v46 = vld [vmem:[#allocation2 + $0x78] sm:$0xf]  ;;  %v15988_v4 = vld [vmem:[%s17501_s2 + $0x40] sm:$0xff]  }
 0x294   :  { %v4665_v30 = vsel %vm15716_vm0, %v4660_v57, %v4664_v55  ;;  %v4687_v28 = vor.u32 %v4686_v60, %v4683_v52  ;;  %14013 = vmatpush3.bf16.msra.mxu1 %v14659_v25  ;;  %v4704_v50 = vshll.u32 %v15946_v14, 16  ;;  %v4718_v18 = vshll.u32 %v15943_v59, 16  ;;  %v15992_v57 = vld [vmem:[#allocation2 + $0x74] sm:$0x1] }
 0x295   :  { %v12796_v49 = vcombine.low %v4651_v47, %v4665_v30  ;;  %v4674_v33 = vrot.slane %v4673_v54, 4  ;;  %v4697_v27 = vrot.slane %v4695_v16, 4  ;;  %14014 = vmatprep.subr.bf16.mxu1 %v14660_v5  ;;  %v4692_v21 = vrot.slane %v4690_v41, 5  ;;  %v15997_v47 = vld [vmem:[#allocation2 + $0x7c] sm:$0x1] }
 0x296   :  { %v4688_v24 = vrot.slane %v4687_v28, 4  ;;  %v4700_v34 = vrot.slane %v4698_v32, 5  ;;  %v15965_v7 = vrot.slane %v4704_v50, 5  ;;  %v4723_v25 = vshrl.u32 %v15955_v12, 16 }
 0x297   :  { %13998 = vmatprep.mubr.msk.bf16.mxu1 %vm4862_vm1, %v12796_v49  ;;  %v4679_v13 = vsel %vm15716_vm0, %v4674_v33, %v4678_v29  ;;  %v4726_v56 = vshll.u32 %v15955_v12, 16  ;;  %v4732_v23 = vshll.u32 %v15957_v19, 16  ;;  %v4737_v35 = vshrl.u32 %v15960_v53, 16 }
 0x298   :  { %v4693_v31 = vsel %vm15716_vm0, %v4688_v24, %v4692_v21  ;;  %v4701_v36 = vor.u32 %v4700_v34, %v4697_v27  ;;  %v4740_v17 = vshll.u32 %v15960_v53, 16  ;;  %14015 = vmatpush3.bf16.msra.mxu1 %v14660_v5  ;;  %v4720_v40 = vrot.slane %v4718_v18, 5  ;;  %v16003_v34 = vld [vmem:[#allocation2 + $0x80] sm:$0xf] }
 0x299   :  { %v12797_v6 = vcombine.low %v4679_v13, %v4693_v31  ;;  %v15981_v63 = vld [vmem:[#allocation2 + $0x58] sm:$0xf]  ;;  %v4725_v1 = vrot.slane %v4723_v25, 4  ;;  %v4728_v37 = vrot.slane %v4726_v56, 5  ;;  %14016 = vmatprep.subr.bf16.mxu1 %v14661_v51  ;;  %v4739_v5 = vrot.slane %v4737_v35, 4 }
 0x29a   :  { %v4702_v55 = vrot.slane %v4701_v36, 4  ;;  %v4709_v3 = vshrl.u32 %v15981_v63, 16  ;;  %v4712_v0 = vshll.u32 %v15981_v63, 16  ;;  %v4742_v52 = vrot.slane %v4740_v17, 5  ;;  %v16012_v17 = vld [vmem:[#allocation2 + $0x84] sm:$0x1] }
 0x29b   :  { %13999 = vmatmul.mubr.msk.bf16.gmra.mrb[32].mxu1 %vm4862_vm1, %v12797_v6  ;;  %v4729_v29 = vor.u32 %v4728_v37, %v4725_v1  ;;  %v4746_v60 = vshll.u32 %v15975_v62, 16  ;;  %v4751_v54 = vshrl.u32 %v15979_v20, 16  ;;  %v4734_v32 = vrot.slane %v4732_v23, 5 }
 0x29c   :  { %v4711_v41 = vrot.slane %v4709_v3, 4  ;;  %v4714_v16 = vrot.slane %v4712_v0, 5  ;;  %v4754_v30 = vshll.u32 %v15979_v20, 16  ;;  %14017 = vmatpush3.bf16.msra.mxu1 %v14661_v51  ;;  %v4743_v50 = vor.u32 %v4742_v52, %v4739_v5  ;;  %v16016_v3 = vld [vmem:[#allocation2 + $0x88] sm:$0xf] }
 0x29d   :  { %v4730_v28 = vrot.slane %v4729_v29, 4  ;;  %v4748_v49 = vrot.slane %v4746_v60, 5  ;;  %v4753_v33 = vrot.slane %v4751_v54, 4  ;;  %14034 = vmatprep.subr.bf16.mxu1 %v15988_v4  ;;  %v4760_v24 = vshll.u32 %v15992_v57, 16  ;;  %v16021_v29 = vld [vmem:[#allocation2 + $0x8c] sm:$0x1] }
 0x29e   :  { %v4715_v27 = vor.u32 %v4714_v16, %v4711_v41  ;;  %v4756_v18 = vrot.slane %v4754_v30, 5  ;;  %v4765_v21 = vshrl.u32 %v15983_v46, 16  ;;  %v4707_v13 = vsel %vm15716_vm0, %v4702_v55, %v15965_v7 }
 0x29f   :  { %v4744_v25 = vrot.slane %v4743_v50, 4  ;;  %v4768_v51 = vshll.u32 %v15983_v46, 16  ;;  %v4774_v56 = vshll.u32 %v15997_v47, 16  ;;  %v4735_v31 = vsel %vm15716_vm0, %v4730_v28, %v4734_v32 }
 0x2a0   :  { %v4716_v23 = vrot.slane %v4715_v27, 4  ;;  %v4757_v36 = vor.u32 %v4756_v18, %v4753_v33  ;;  %v4767_v35 = vrot.slane %v4765_v21, 4  ;;  %v4762_v1 = vrot.slane %v4760_v24, 5 }
 0x2a1   :  { %v4749_v6 = vsel %vm15716_vm0, %v4744_v25, %v4748_v49  ;;  %v4770_v37 = vrot.slane %v4768_v51, 5  ;;  %v4779_v7 = vshrl.u32 %v16003_v34, 16  ;;  %v4776_v5 = vrot.slane %v4774_v56, 5 }
 0x2a2   :  { %v4721_v55 = vsel %vm15716_vm0, %v4716_v23, %v4720_v40  ;;  %v4758_v0 = vrot.slane %v4757_v36, 4  ;;  %v4782_v52 = vshll.u32 %v16003_v34, 16  ;;  %v4788_v16 = vshll.u32 %v16012_v17, 16  ;;  %v5172_v36 = vld [vmem:[#allocation2 + $0x18] sm:$0xe] }
 0x2a3   :  { %v12798_v60 = vcombine.low %v4707_v13, %v4721_v55  ;;  %v4771_v54 = vor.u32 %v4770_v37, %v4767_v35  ;;  %v4781_v41 = vrot.slane %v4779_v7, 4  ;;  %v12799_v32 = vcombine.low %v4735_v31, %v4749_v6  ;;  %v5171_v31 = vld [vmem:[#allocation2 + $0x10] sm:$0xe]  ;;  %v5174_v7 = vld [vmem:[#allocation2 + $0x28] sm:$0xe] }
 0x2a4   :  { %v4784_v30 = vrot.slane %v4782_v52, 5  ;;  %v4793_v28 = vshrl.u32 %v16016_v3, 16  ;;  %v4796_v50 = vshll.u32 %v16016_v3, 16  ;;  %v4763_v40 = vsel %vm15716_vm0, %v4758_v0, %v4762_v1  ;;  %v5173_v1 = vld [vmem:[#allocation2 + $0x20] sm:$0xe] }
 0x2a5   :  { %14002 = vmatprep.mubr.msk.bf16.mxu1 %vm4862_vm1, %v12798_v60  ;;  %v4772_v49 = vrot.slane %v4771_v54, 4  ;;  %v4802_v33 = vshll.u32 %v16021_v29, 16  ;;  %v4790_v18 = vrot.slane %v4788_v16, 5  ;;  %vm5218_vm3 = vcmask 1046532   ;;  %v5175_v60 = vld [vmem:[#allocation2 + $0x30] sm:$0xe] }
 0x2a6   :  { %14003 = vmatmul.mubr.msk.bf16.gmra.mrb[36].mxu1 %vm4862_vm1, %v12799_v32  ;;  %v4785_v27 = vor.u32 %v4784_v30, %v4781_v41  ;;  %v4795_v24 = vrot.slane %v4793_v28, 4  ;;  %v4798_v21 = vrot.slane %v4796_v50, 5  ;;  %v12836_v37 = vrot.slane %v5171_v31, 9  ;;  %vm16041_vm9 = vmor %vm5217_vm2, %vm5218_vm3  ;;  %v5176_v32 = vld [vmem:[#allocation2 + $0x38] sm:$0xe] }
 0x2a7   :  { %v4777_v13 = vsel %vm15716_vm0, %v4772_v49, %v4776_v5  ;;  %v4804_v23 = vrot.slane %v4802_v33, 5  ;;  %v5230_v0 = vrot.slane %v15882_v58, 5  ;;  %v12837_v5 = vrot.slane %v5172_v36, 9  ;;  %v14804_v30 = vld [vmem:[#allocation2 + $0x8] sm:$0xf] }
 0x2a8   :  { %v12800_v25 = vcombine.low %v4763_v40, %v4777_v13  ;;  %v4786_v51 = vrot.slane %v4785_v27, 4  ;;  %v4799_v56 = vor.u32 %v4798_v21, %v4795_v24  ;;  %v5234_v52 = vrot.slane %v15889_v22, 5  ;;  %v14805_v28 = vld [vmem:[#allocation2] sm:$0xf]  ;;  %v5182_v31 = vld [vmem:[#allocation2 + $0x78] sm:$0xe] }
 0x2a9   :  { %v12838_v16 = vrot.slane %v5173_v1, 9  ;;  %v12814_v50 = vcombine.low %v14805_v28, %v14804_v30  ;;  %v16047_v40 = vsel %vm16041_vm9, %v12836_v37, %v5230_v0  ;;  %v5238_v22 = vrot.slane %v15898_v15, 5  ;;  %v5183_v1 = vld [vmem:[#allocation2 + $0x80] sm:$0xe]  ;;  %v14668_v28 = vld [vmem:[%s17501_s2 + $0x50] sm:$0xff]  }
 0x2aa   :  { %14006 = vmatprep.mubr.msk.bf16.mxu1 %vm4862_vm1, %v12800_v25  ;;  %v4791_v35 = vsel %vm15716_vm0, %v4786_v51, %v4790_v18  ;;  %v4800_v6 = vrot.slane %v4799_v56, 4  ;;  %v16051_v58 = vsel %vm16041_vm9, %v12837_v5, %v5234_v52  ;;  %v12839_v33 = vrot.slane %v5174_v7, 9  ;;  %v5179_v25 = vld [vmem:[#allocation2 + $0x60] sm:$0xe]  ;;  %v5180_v56 = vld [vmem:[#allocation2 + $0x68] sm:$0xe] }
 0x2ab   :  { %v12851_v49 = vcombine.low %v16047_v40, %v16051_v58  ;;  %v5242_v27 = vrot.slane %v15904_v43, 5  ;;  %v12840_v18 = vrot.slane %v5175_v60, 9  ;;  %v5246_v24 = vrot.slane %v15915_v39, 5  ;;  %v5184_v5 = vld [vmem:[#allocation2 + $0x88] sm:$0xe]  ;;  %v14676_v58 = vld [vmem:[%s17501_s2 + $0x78] sm:$0xff]  }
 0x2ac   :  { %v4805_v55 = vsel %vm15716_vm0, %v4800_v6, %v4804_v23  ;;  %v12841_v21 = vrot.slane %v5176_v32, 9  ;;  %v5250_v13 = vrot.slane %v15931_v11, 5  ;;  %v16063_v15 = vsel %vm16041_vm9, %v12838_v16, %v5238_v22  ;;  %v5181_v23 = vld [vmem:[#allocation2 + $0x70] sm:$0xe]  ;;  %v14665_v60 = vld [vmem:[%s17501_s2 + $0x48] sm:$0xff]  }
 0x2ad   :  { %v12801_v54 = vcombine.low %v4791_v35, %v4805_v55  ;;  %v16067_v51 = vsel %vm16041_vm9, %v12839_v33, %v5242_v27  ;;  %v16073_v39 = vsel %vm16041_vm9, %v12840_v18, %v5246_v24  ;;  %v12844_v35 = vrot.slane %v5179_v25, 9  ;;  %v14671_v33 = vld [vmem:[%s17501_s2 + $0x58] sm:$0xff]   ;;  %v14673_v18 = vld [vmem:[%s17501_s2 + $0x60] sm:$0xff]  }
 0x2ae   :  { %v12852_v43 = vcombine.low %v16063_v15, %v16067_v51  ;;  %v16077_v11 = vsel %vm16041_vm9, %v12841_v21, %v5250_v13  ;;  %v5262_v6 = vrot.slane %v15957_v19, 5  ;;  %v12815_v37 = vcombine.low %v15870_v8, %v15880_v26  ;;  %v14806_v21 = vld [vmem:[#allocation2 + $0x4] sm:$0x1]  ;;  %v14677_v15 = vld [vmem:[#allocation2 + $0x8] ss:$8 sps:$4 sm:$0xff]  }
 0x2af   :  { %14007 = vmatmul.mubr.msk.bf16.gmra.mrb[40].mxu1 %vm4862_vm1, %v12801_v54  ;;  %v12853_v36 = vcombine.low %v16073_v39, %v16077_v11  ;;  %v12845_v7 = vrot.slane %v5180_v56, 9  ;;  %v5266_v55 = vrot.slane %v15975_v62, 5  ;;  %v12846_v0 = vrot.slane %v5181_v23, 9  ;;  %v14807_v56 = vld [vmem:[#allocation2 + $0xc] sm:$0x1] }
 0x2b0   :  { %14018 = vmatprep.mubr.msk.bf16.mxu1 %vm4862_vm1, %v12814_v50  ;;  %v12816_v52 = vcombine.low %v15892_v61, %v15896_v45  ;;  %v16092_v54 = vsel %vm16041_vm9, %v12844_v35, %v5262_v6  ;;  %v5270_v19 = vrot.slane %v15992_v57, 5  ;;  %v12847_v16 = vrot.slane %v5182_v31, 9  ;;  %v5178_v35 = vld [vmem:[#allocation2 + $0x58] sm:$0xe]  ;;  %v14674_v6 = vld [vmem:[%s17501_s2 + $0x68] sm:$0xff]  }
 0x2b1   :  { %v16097_v8 = vsel %vm16041_vm9, %v12845_v7, %v5266_v55  ;;  %v5274_v26 = vrot.slane %v15997_v47, 5  ;;  %v12848_v62 = vrot.slane %v5183_v1, 9  ;;  %v5278_v61 = vrot.slane %v16012_v17, 5  ;;  %v14675_v7 = vld [vmem:[%s17501_s2 + $0x70] sm:$0xff]   ;;  %v14679_v51 = vld [vmem:[#allocation2 + $0x18] ss:$8 sps:$4 sm:$0xff]  }
 0x2b2   :  { %v12855_v45 = vcombine.low %v16092_v54, %v16097_v8  ;;  %v16106_v32 = vsel %vm16041_vm9, %v12846_v0, %v5270_v19  ;;  %v12849_v57 = vrot.slane %v5184_v5, 9  ;;  %v5282_v30 = vrot.slane %v16021_v29, 5  ;;  %v5704_v39 = vld [vmem:[#allocation2 + $0x10] sm:$0xf]  ;;  %v5702_v55 = vld [vmem:[#allocation2 + $0x8] sm:$0xf] }
 0x2b3   :  { %v16113_v47 = vsel %vm16041_vm9, %v12847_v16, %v5274_v26  ;;  %v16117_v17 = vsel %vm16041_vm9, %v12848_v62, %v5278_v61  ;;  %v12817_v22 = vcombine.low %v15910_v44, %v15919_v10  ;;  %v12818_v27 = vcombine.low %v15929_v9, %v15981_v63  ;;  %v5169_v44 = vld [vmem:[#allocation2] sm:$0xe]  ;;  %v5170_v10 = vld [vmem:[#allocation2 + $0x8] sm:$0xe]  ;;  %v14684_v5 = vld [vmem:[%s17501_s2 + $0x90] sm:$0xff]  }
 0x2b4   :  { %v12856_v29 = vcombine.low %v16106_v32, %v16113_v47  ;;  %v12819_v24 = vcombine.low %v15955_v12, %v15960_v53  ;;  %v12820_v9 = vcombine.low %v15979_v20, %v15983_v46  ;;  %v12834_v63 = vrot.slane %v5169_v44, 9  ;;  %v5177_v46 = vld [vmem:[#allocation2 + $0x50] sm:$0xe]  ;;  %v16199_v16 = vld [vmem:[#allocation2 + $0xc] sm:$0x1] }
 0x2b5   :  { %v5222_v13 = vrot.slane %v14806_v21, 5  ;;  %v12835_v25 = vrot.slane %v5170_v10, 9  ;;  %v5226_v23 = vrot.slane %v14807_v56, 5  ;;  %v12821_v53 = vcombine.low %v16003_v34, %v16016_v3  ;;  %v14680_v11 = vld [vmem:[#allocation2 + $0x28] ss:$8 sps:$4 sm:$0xff]  }
 0x2b6   :  { %v12842_v1 = vrot.slane %v5177_v46, 9  ;;  %v12843_v34 = vrot.slane %v5178_v35, 9  ;;  %v5258_v3 = vrot.slane %v15943_v59, 5  ;;  %v14678_v59 = vld [vmem:[%s17501_s2 + $0x80] sm:$0xff]   ;;  %v5749_v0 = vshrl.u32 %v5704_v39, 16 }
 0x2b7   :  { %14019 = vmatmul.mubr.msk.bf16.vlgmr.msra.gmra.mrb[28].mxu1 %vm4862_vm1, %v12815_v37  ;;  %v5223_v31 = vsel %vm16041_vm9, %v12834_v63, %v5222_v13  ;;  %v5227_v12 = vsel %vm16041_vm9, %v12835_v25, %v5226_v23  ;;  %v5254_v37 = vrot.slane %v15946_v14, 5  ;;  %v16201_v8 = vld [vmem:[#allocation2 + $0x14] sm:$0x1]  ;;  %v5735_v26 = vshrl.u32 %v5702_v55, 16  ;;  %v14682_v61 = vld [vmem:[#allocation2 + $0x38] ss:$8 sps:$4 sm:$0xff]  }
 0x2b8   :  { %14035 = vmatpush3.bf16.msra.mxu1 %v15988_v4  ;;  %14022 = vmatprep.mubr.msk.bf16.mxu1 %vm4862_vm1, %v12816_v52  ;;  %v5283_v4 = vsel %vm16041_vm9, %v12849_v57, %v5282_v30  ;;  %v12850_v20 = vcombine.low %v5223_v31, %v5227_v12  ;;  %v5259_v14 = vsel %vm16041_vm9, %v12843_v34, %v5258_v3  ;;  %v5752_v52 = vshll.u32 %v5704_v39, 16  ;;  %v5710_v57 = vld [vmem:[#allocation2 + $0x28] sm:$0xf]  ;;  %v14687_v30 = vld [vmem:[%s17501_s2 + $0x98] sm:$0xff]   ;;  %v16215_v63 = vld [vmem:[%s17501_s2 + $0xa0] sm:$0xff]  }
 0x2b9   :  { %14036 = vmatprep.subr.bf16.mxu1 %v14665_v60  ;;  %v12857_v50 = vcombine.low %v16117_v17, %v5283_v4  ;;  %v5255_v40 = vsel %vm16041_vm9, %v12842_v1, %v5254_v37  ;;  %v5738_v62 = vshll.u32 %v5702_v55, 16  ;;  %v14683_v4 = vld [vmem:[#allocation2 + $0x58] ss:$8 sps:$4 sm:$0xff]   ;;  %v5744_v44 = vshll.u32 %v16199_v16, 16  ;;  %v16217_v21 = vld [vmem:[#allocation2 + $0x24] sm:$0x1] }
 0x2ba   :  { %v5754_v47 = vrot.slane %v5752_v52, 5  ;;  %v5758_v10 = vshll.u32 %v16201_v8, 16  ;;  %v14685_v12 = vld [vmem:[#allocation2 + $0x68] ss:$8 sps:$4 sm:$0xff]   ;;  %v5714_v35 = vld [vmem:[#allocation2 + $0x38] sm:$0xf] }
 0x2bb   :  { %v5786_v37 = vshll.u32 %v16217_v21, 16  ;;  %v16221_v34 = vld [vmem:[#allocation2 + $0x2c] sm:$0x1]  ;;  %v16223_v3 = vld [vmem:[#allocation2 + $0x34] sm:$0x1]  ;;  %v5819_v39 = vshrl.u32 %v5714_v35, 16 }
 0x2bc   :  { %14037 = vmatpush3.bf16.msra.mxu1 %v14665_v60  ;;  %v5706_v60 = vld [vmem:[#allocation2 + $0x18] sm:$0xf]  ;;  %vm8165_vm12 = vcmask 518146   ;;  %vm8166_vm13 = vsmask.f32 7946 }
 0x2bd   :  { %14038 = vmatprep.subr.bf16.mxu1 %v14668_v28  ;;  %v5763_v32 = vshrl.u32 %v5706_v60, 16  ;;  %v5766_v17 = vshll.u32 %v5706_v60, 16  ;;  %v5788_v60 = vrot.slane %v5786_v37, 5  ;;  %vm16569_vm14 = vmand %vm8165_vm12, %vm8166_vm13  ;;  %vm8548_vm2 = vsmask.f32 1280 }
 0x2be   :  { %vm8549_vm3 = vsmask.f32 3336 }
 0x2bf   :  { %14023 = vmatmul.mubr.msk.bf16.gmra.mrb[32].mxu1 %vm4862_vm1, %v12817_v22  ;;  %v5740_v22 = vrot.slane %v5738_v62, 5  ;;  %v5765_v13 = vrot.slane %v5763_v32, 4  ;;  %v5768_v25 = vrot.slane %v5766_v17, 5  ;;  %v5814_v32 = vshll.u32 %v16223_v3, 16  ;;  %vm16816_vm12 = vmor %vm8548_vm2, %vm8549_vm3 }
 0x2c0   :  { %14026 = vmatprep.mubr.msk.bf16.mxu1 %vm4862_vm1, %v12818_v27  ;;  %14039 = vmatpush3.bf16.msra.mxu1 %v14668_v28  ;;  %v5791_v27 = vshrl.u32 %v5710_v57, 16  ;;  %v5821_v17 = vrot.slane %v5819_v39, 4  ;;  %vm10745_vm2 = vcmask 517121   ;;  %vm10746_vm3 = vsmask.f32 7942 }
 0x2c1   :  { %14040 = vmatprep.subr.bf16.mxu1 %v14671_v33 }
 0x2c4   :  { %14041 = vmatpush3.bf16.msra.mxu1 %v14671_v33  ;;  %v5712_v33 = vld [vmem:[#allocation2 + $0x30] sm:$0xf] }
 0x2c5   :  { %14058 = vmatprep.subr.bf16.mxu1 %v14673_v18  ;;  %v5805_v23 = vshrl.u32 %v5712_v33, 16  ;;  %v5808_v31 = vshll.u32 %v5712_v33, 16 }
 0x2c7   :  { %14027 = vmatmul.mubr.msk.bf16.gmra.mrb[36].mxu1 %vm4862_vm1, %v12819_v24  ;;  %v16210_v24 = vld [vmem:[#allocation2 + $0x1c] sm:$0x1] }
 0x2c8   :  { %14030 = vmatprep.mubr.msk.bf16.mxu1 %vm4862_vm1, %v12820_v9  ;;  %v5772_v1 = vshll.u32 %v16210_v24, 16 }
 0x2ca   :  { %v5774_v52 = vrot.slane %v5772_v1, 5  ;;  %v16244_v1 = vld [vmem:[#allocation2 + $0x44] sm:$0x1] }
 0x2cf   :  { %14031 = vmatmul.mubr.msk.bf16.gmra.mrb[40].mxu1 %vm4862_vm1, %v12821_v53 }
 0x2d0   :  { %14042 = vmatprep.mubr.msk.bf16.mxu1 %vm4862_vm1, %v12850_v20  ;;  %v5793_v20 = vrot.slane %v5791_v27, 4 }
 0x2d7   :  { %14043 = vmatmul.mubr.msk.bf16.vlgmr.msra.gmra.mrb[28].mxu1 %vm4862_vm1, %v12851_v49  ;;  %v12854_v49 = vcombine.low %v5255_v40, %v5259_v14  ;;  %v5760_v14 = vrot.slane %v5758_v10, 5  ;;  %v14688_v10 = vld [vmem:[#allocation2 + $0x88] ss:$8 sps:$4 sm:$0xff]  }
 0x2d8   :  { %14059 = vmatpush3.bf16.msra.mxu1 %v14673_v18  ;;  %14046 = vmatprep.mubr.msk.bf16.mxu1 %vm4862_vm1, %v12852_v43  ;;  %v14681_v43 = vld [vmem:[%s17501_s2 + $0x88] sm:$0xff]   ;;  %v5794_v18 = vshll.u32 %v5710_v57, 16  ;;  %v5720_v57 = vld [vmem:[#allocation2 + $0x60] sm:$0xf] }
 0x2d9   :  { %14060 = vmatprep.subr.bf16.mxu1 %v14674_v6 }
 0x2da   :  { %v5796_v46 = vrot.slane %v5794_v18, 5  ;;  %v5861_v18 = vshrl.u32 %v5720_v57, 16 }
 0x2dc   :  { %14061 = vmatpush3.bf16.msra.mxu1 %v14674_v6  ;;  %v5746_v6 = vrot.slane %v5744_v44, 5  ;;  %v5797_v55 = vor.u32 %v5796_v46, %v5793_v20  ;;  %v5864_v44 = vshll.u32 %v5720_v57, 16 }
 0x2dd   :  { %14062 = vmatprep.subr.bf16.mxu1 %v14675_v7 }
 0x2df   :  { %14047 = vmatmul.mubr.msk.bf16.gmra.mrb[32].mxu1 %vm4862_vm1, %v12853_v36  ;;  %v5708_v36 = vld [vmem:[#allocation2 + $0x20] sm:$0xf] }
 0x2e0   :  { %14050 = vmatprep.mubr.msk.bf16.mxu1 %vm4862_vm1, %v12854_v49  ;;  %14063 = vmatpush3.bf16.msra.mxu1 %v14675_v7  ;;  %v5777_v54 = vshrl.u32 %v5708_v36, 16  ;;  %v5780_v19 = vshll.u32 %v5708_v36, 16  ;;  %v5716_v7 = vld [vmem:[#allocation2 + $0x40] sm:$0xf] }
 0x2e1   :  { %14064 = vmatprep.subr.bf16.mxu1 %v14676_v58 }
 0x2e2   :  { %v5779_v28 = vrot.slane %v5777_v54, 4  ;;  %v16228_v54 = vld [vmem:[#allocation2 + $0x3c] sm:$0x1] }
 0x2e4   :  { %14065 = vmatpush3.bf16.msra.mxu1 %v14676_v58  ;;  %v5769_v58 = vor.u32 %v5768_v25, %v5765_v13 }
 0x2e5   :  { %14082 = vmatprep.subr.bf16.mxu1 %v14678_v59 }
 0x2e7   :  { %14051 = vmatmul.mubr.msk.bf16.gmra.mrb[36].mxu1 %vm4862_vm1, %v12855_v45  ;;  %v5751_v45 = vrot.slane %v5749_v0, 4  ;;  %v5833_v0 = vshrl.u32 %v5716_v7, 16 }
 0x2e8   :  { %14054 = vmatprep.mubr.msk.bf16.mxu1 %vm4862_vm1, %v12856_v29  ;;  %v5782_v29 = vrot.slane %v5780_v19, 5 }
 0x2e9   :  { %v5755_v9 = vor.u32 %v5754_v47, %v5751_v45  ;;  %v5800_v45 = vshll.u32 %v16221_v34, 16 }
 0x2ea   :  { %v5783_v56 = vor.u32 %v5782_v29, %v5779_v28  ;;  %v5798_v29 = vrot.slane %v5797_v55, 4 }
 0x2eb   :  { %v5756_v40 = vrot.slane %v5755_v9, 4  ;;  %v5802_v13 = vrot.slane %v5800_v45, 5 }
 0x2ec   :  { %v5784_v49 = vrot.slane %v5783_v56, 4 }
 0x2ed   :  { %v5761_v62 = vsel %vm15716_vm0, %v5756_v40, %v5760_v14  ;;  %v5803_v46 = vsel %vm15716_vm0, %v5798_v29, %v5802_v13  ;;  %v5863_v14 = vrot.slane %v5861_v18, 4  ;;  %v16268_v18 = vld [vmem:[#allocation2 + $0x7c] sm:$0x1] }
 0x2ef   :  { %14055 = vmatmul.mubr.msk.bf16.gmra.mrb[40].mxu1 %vm4862_vm1, %v12857_v50  ;;  %v5737_v50 = vrot.slane %v5735_v26, 4 }
 0x2f0   :  { %14066 = vmatprep.mubr.msk.bf16.mxu1 %vm4862_vm1, %v14677_v15  ;;  %v14686_v15 = vld [vmem:[#allocation2 + $0x78] ss:$8 sps:$4 sm:$0xff]  }
 0x2f1   :  { %v5741_v53 = vor.u32 %v5740_v22, %v5737_v50  ;;  %v5835_v50 = vrot.slane %v5833_v0, 4  ;;  %v5842_v0 = vshll.u32 %v16244_v1, 16 }
 0x2f3   :  { %v5742_v36 = vrot.slane %v5741_v53, 4  ;;  %v5724_v53 = vld [vmem:[#allocation2 + $0x70] sm:$0xf] }
 0x2f4   :  { %v5889_v39 = vshrl.u32 %v5724_v53, 16 }
 0x2f5   :  { %v5747_v9 = vsel %vm15716_vm0, %v5742_v36, %v5746_v6  ;;  %v16248_v6 = vld [vmem:[#allocation2 + $0x5c] sm:$0x1] }
 0x2f6   :  { %v12890_v25 = vcombine.low %v5747_v9, %v5761_v62  ;;  %v5891_v29 = vrot.slane %v5889_v39, 4 }
 0x2f7   :  { %14067 = vmatmul.mubr.msk.bf16.vlgmr.msra.gmra.mrb[28].mxu1 %vm4862_vm1, %v14679_v51  ;;  %v5807_v51 = vrot.slane %v5805_v23, 4 }
 0x2f8   :  { %14083 = vmatpush3.bf16.msra.mxu1 %v14678_v59  ;;  %14070 = vmatprep.mubr.msk.bf16.mxu1 %vm4862_vm1, %v14680_v11  ;;  %v5718_v59 = vld [vmem:[#allocation2 + $0x58] sm:$0xf]  ;;  %v5822_v11 = vshll.u32 %v5714_v35, 16  ;;  %v5816_v35 = vrot.slane %v5814_v32, 5 }
 0x2f9   :  { %14084 = vmatprep.subr.bf16.mxu1 %v14681_v43  ;;  %v5847_v19 = vshrl.u32 %v5718_v59, 16  ;;  %v5850_v26 = vshll.u32 %v5718_v59, 16  ;;  %v5728_v59 = vld [vmem:[#allocation2 + $0x80] sm:$0xf] }
 0x2fa   :  { %v5824_v28 = vrot.slane %v5822_v11, 5  ;;  %v5892_v11 = vshll.u32 %v5724_v53, 16  ;;  %v5920_v62 = vshll.u32 %v5728_v59, 16 }
 0x2fb   :  { %v5849_v33 = vrot.slane %v5847_v19, 4  ;;  %v5852_v27 = vrot.slane %v5850_v26, 5  ;;  %v5917_v26 = vshrl.u32 %v5728_v59, 16 }
 0x2fc   :  { %14085 = vmatpush3.bf16.msra.mxu1 %v14681_v43  ;;  %v5810_v43 = vrot.slane %v5808_v31, 5  ;;  %v5825_v31 = vor.u32 %v5824_v28, %v5821_v17 }
 0x2fd   :  { %14086 = vmatprep.subr.bf16.mxu1 %v14684_v5  ;;  %v5853_v40 = vor.u32 %v5852_v27, %v5849_v33  ;;  %v5844_v33 = vrot.slane %v5842_v0, 5  ;;  %v5919_v13 = vrot.slane %v5917_v26, 4  ;;  %v14692_v26 = vld [vmem:[%s17501_s2 + $0xb8] sm:$0xff]  }
 0x2fe   :  { %v5811_v47 = vor.u32 %v5810_v43, %v5807_v51  ;;  %v5826_v55 = vrot.slane %v5825_v31, 4 }
 0x2ff   :  { %14071 = vmatmul.mubr.msk.bf16.gmra.mrb[32].mxu1 %vm4862_vm1, %v14682_v61  ;;  %v5770_v61 = vrot.slane %v5769_v58, 4  ;;  %v5866_v58 = vrot.slane %v5864_v44, 5  ;;  %v5854_v45 = vrot.slane %v5853_v40, 4  ;;  %v5730_v44 = vld [vmem:[#allocation2 + $0x88] sm:$0xf] }
 0x300   :  { %14074 = vmatprep.mubr.msk.bf16.mxu1 %vm4862_vm1, %v14683_v4  ;;  %14087 = vmatpush3.bf16.msra.mxu1 %v14684_v5  ;;  %v5836_v5 = vshll.u32 %v5716_v7, 16  ;;  %v5828_v4 = vshll.u32 %v16228_v54, 16  ;;  %v5812_v23 = vrot.slane %v5811_v47, 4  ;;  %v14690_v47 = vld [vmem:[%s17501_s2 + $0xa8] sm:$0xff]   ;;  %v5931_v40 = vshrl.u32 %v5730_v44, 16 }
 0x301   :  { %14088 = vmatprep.subr.bf16.mxu1 %v14687_v30  ;;  %v5775_v56 = vsel %vm15716_vm0, %v5770_v61, %v5774_v52  ;;  %v16257_v52 = vld [vmem:[#allocation2 + $0x6c] sm:$0x1]  ;;  %v5867_v32 = vor.u32 %v5866_v58, %v5863_v14  ;;  %v5934_v14 = vshll.u32 %v5730_v44, 16 }
 0x302   :  { %v5838_v22 = vrot.slane %v5836_v5, 5  ;;  %v16246_v37 = vrot.slane %v5828_v4, 5  ;;  %v5817_v36 = vsel %vm15716_vm0, %v5812_v23, %v5816_v35  ;;  %v5856_v5 = vshll.u32 %v16248_v6, 16  ;;  %v14691_v35 = vld [vmem:[%s17501_s2 + $0xb0] sm:$0xff]  }
 0x303   :  { %v5894_v4 = vrot.slane %v5892_v11, 5  ;;  %v5868_v31 = vrot.slane %v5867_v32, 4  ;;  %v5884_v53 = vshll.u32 %v16257_v52, 16 }
 0x304   :  { %14089 = vmatpush3.bf16.msra.mxu1 %v14687_v30  ;;  %v5789_v30 = vsel %vm15716_vm0, %v5784_v49, %v5788_v60  ;;  %v5839_v7 = vor.u32 %v5838_v22, %v5835_v50  ;;  %v5726_v49 = vld [vmem:[#allocation2 + $0x78] sm:$0xf]  ;;  %v12892_v50 = vcombine.low %v5803_v46, %v5817_v36  ;;  %v5831_v22 = vsel %vm15716_vm0, %v5826_v55, %v16246_v37  ;;  %v16276_v46 = vld [vmem:[#allocation2 + $0x84] sm:$0x1] }
 0x305   :  { %14106 = vmatprep.subr.bf16.mxu1 %v16215_v63  ;;  %v12891_v20 = vcombine.low %v5775_v56, %v5789_v30  ;;  %v5903_v60 = vshrl.u32 %v5726_v49, 16  ;;  %v5906_v19 = vshll.u32 %v5726_v49, 16  ;;  %v16260_v30 = vld [vmem:[#allocation2 + $0x74] sm:$0x1]  ;;  %v5858_v27 = vrot.slane %v5856_v5, 5 }
 0x306   :  { %v5840_v61 = vrot.slane %v5839_v7, 4  ;;  %v5732_v56 = vld [vmem:[#allocation2 + $0x90] sm:$0xf]  ;;  %v5895_v37 = vor.u32 %v5894_v4, %v5891_v29  ;;  %v5898_v7 = vshll.u32 %v16260_v30, 16  ;;  %v5926_v39 = vshll.u32 %v16276_v46, 16 }
 0x307   :  { %14075 = vmatmul.mubr.msk.bf16.gmra.mrb[36].mxu1 %vm4862_vm1, %v14685_v12  ;;  %v5722_v12 = vld [vmem:[#allocation2 + $0x68] sm:$0xf]  ;;  %v5908_v9 = vrot.slane %v5906_v19, 5  ;;  %v5945_v58 = vshrl.u32 %v5732_v56, 16  ;;  %v5948_v49 = vshll.u32 %v5732_v56, 16  ;;  %v5886_v55 = vrot.slane %v5884_v53, 5 }
 0x308   :  { %14078 = vmatprep.mubr.msk.bf16.mxu1 %vm4862_vm1, %v14686_v15  ;;  %v16251_v15 = vld [vmem:[#allocation2 + $0x64] sm:$0x1]  ;;  %v5875_v51 = vshrl.u32 %v5722_v12, 16  ;;  %v5878_v43 = vshll.u32 %v5722_v12, 16  ;;  %v5845_v23 = vsel %vm15716_vm0, %v5840_v61, %v5844_v33  ;;  %v5900_v19 = vrot.slane %v5898_v7, 5 }
 0x309   :  { %v5870_v57 = vshll.u32 %v16251_v15, 16  ;;  %v12893_v11 = vcombine.low %v5831_v22, %v5845_v23  ;;  %v5933_v61 = vrot.slane %v5931_v40, 4  ;;  %v5947_v32 = vrot.slane %v5945_v58, 4  ;;  %v16294_v4 = vld [vmem:[#allocation2 + $0x94] sm:$0x1]  ;;  %v14693_v33 = vld [vmem:[%s17501_s2 + $0xc0] sm:$0xff]  }
 0x30a   :  { %v5877_v17 = vrot.slane %v5875_v51, 4  ;;  %v5880_v28 = vrot.slane %v5878_v43, 5  ;;  %v5912_v51 = vshll.u32 %v16268_v18, 16  ;;  %v5928_v29 = vrot.slane %v5926_v39, 5  ;;  %v6152_v56 = vld [vmem:[#allocation2 + $0x10] sm:$0xe] }
 0x30b   :  { %v5872_v12 = vrot.slane %v5870_v57, 5  ;;  %v5950_v57 = vrot.slane %v5948_v49, 5  ;;  %v6205_v40 = vrot.slane %v16201_v8, 5  ;;  %v6201_v49 = vrot.slane %v16199_v16, 5 }
 0x30c   :  { %v6213_v16 = vrot.slane %v16217_v21, 5 }
 0x30d   :  { %v5873_v36 = vsel %vm15716_vm0, %v5868_v31, %v5872_v12 }
 0x30f   :  { %14079 = vmatmul.mubr.msk.bf16.gmra.mrb[40].mxu1 %vm4862_vm1, %v14688_v10  ;;  %v5905_v10 = vrot.slane %v5903_v60, 4  ;;  %v5896_v60 = vrot.slane %v5895_v37, 4  ;;  %v12911_v37 = vrot.slane %v6152_v56, 9  ;;  %v14695_v56 = vld [vmem:[%s17501_s2 + $0xd0] sm:$0xff]  }
 0x310   :  { %14090 = vmatprep.mubr.msk.bf16.mxu1 %vm4862_vm1, %v12890_v25  ;;  %v5922_v25 = vrot.slane %v5920_v62, 5  ;;  %v16291_v62 = vld [vmem:[#allocation2 + $0x8c] sm:$0x1] }
 0x311   :  { %v5909_v59 = vor.u32 %v5908_v9, %v5905_v10  ;;  %v5940_v22 = vshll.u32 %v16291_v62, 16  ;;  %v5951_v10 = vor.u32 %v5950_v57, %v5947_v32  ;;  %v5954_v9 = vshll.u32 %v16294_v4, 16 }
 0x312   :  { %v5923_v43 = vor.u32 %v5922_v25, %v5919_v13  ;;  %v6217_v32 = vrot.slane %v16221_v34, 5  ;;  %v6160_v34 = vld [vmem:[#allocation2 + $0x60] sm:$0xe] }
 0x313   :  { %v5942_v31 = vrot.slane %v5940_v22, 5 }
 0x317   :  { %14091 = vmatmul.mubr.msk.bf16.vlgmr.msra.gmra.mrb[28].mxu1 %vm4862_vm1, %v12891_v20  ;;  %v5859_v20 = vsel %vm15716_vm0, %v5854_v45, %v5858_v27  ;;  %v5936_v45 = vrot.slane %v5934_v14, 5  ;;  %v5901_v27 = vsel %vm15716_vm0, %v5896_v60, %v5900_v19 }
 0x318   :  { %14107 = vmatpush3.bf16.msra.mxu1 %v16215_v63  ;;  %14094 = vmatprep.mubr.msk.bf16.mxu1 %vm4862_vm1, %v12892_v50  ;;  %v5881_v63 = vor.u32 %v5880_v28, %v5877_v17  ;;  %v12894_v0 = vcombine.low %v5859_v20, %v5873_v36  ;;  %v5914_v17 = vrot.slane %v5912_v51, 5  ;;  %v5924_v28 = vrot.slane %v5923_v43, 4  ;;  %v6154_v51 = vld [vmem:[#allocation2 + $0x20] sm:$0xe]  ;;  %v6156_v43 = vld [vmem:[#allocation2 + $0x30] sm:$0xe] }
 0x319   :  { %14108 = vmatprep.subr.bf16.mxu1 %v14690_v47  ;;  %v5937_v44 = vor.u32 %v5936_v45, %v5933_v61  ;;  %v5952_v20 = vrot.slane %v5951_v10, 4  ;;  %v6153_v36 = vld [vmem:[#allocation2 + $0x18] sm:$0xe]  ;;  %v12913_v8 = vrot.slane %v6154_v51, 9  ;;  %v6209_v61 = vrot.slane %v16210_v24, 5  ;;  %v14694_v24 = vld [vmem:[%s17501_s2 + $0xc8] sm:$0xff]  }
 0x31a   :  { %v5882_v5 = vrot.slane %v5881_v63, 4  ;;  %v5929_v25 = vsel %vm15716_vm0, %v5924_v28, %v5928_v29  ;;  %v6151_v63 = vld [vmem:[#allocation2 + $0x8] sm:$0xe]  ;;  %v12912_v60 = vrot.slane %v6153_v36, 9  ;;  %v6159_v28 = vld [vmem:[#allocation2 + $0x58] sm:$0xe] }
 0x31b   :  { %v5938_v53 = vrot.slane %v5937_v44, 4  ;;  %v12910_v7 = vrot.slane %v6151_v63, 9  ;;  %v6214_v45 = vsel %vm16041_vm9, %v12913_v8, %v6213_v16  ;;  %v6229_v10 = vrot.slane %v16244_v1, 5  ;;  %v6162_v1 = vld [vmem:[#allocation2 + $0x70] sm:$0xe]  ;;  %v14696_v63 = vld [vmem:[%s17501_s2 + $0xd8] sm:$0xff]  }
 0x31c   :  { %14109 = vmatpush3.bf16.msra.mxu1 %v14690_v47  ;;  %v5910_v47 = vrot.slane %v5909_v59, 4  ;;  %v5887_v50 = vsel %vm15716_vm0, %v5882_v5, %v5886_v55  ;;  %v6206_v59 = vsel %vm16041_vm9, %v12911_v37, %v6205_v40  ;;  %v12915_v5 = vrot.slane %v6156_v43, 9  ;;  %v14698_v43 = vld [vmem:[%s17501_s2 + $0xe0] sm:$0xff]  }
 0x31d   :  { %14110 = vmatprep.subr.bf16.mxu1 %v14691_v35  ;;  %v12895_v23 = vcombine.low %v5887_v50, %v5901_v27  ;;  %v5943_v14 = vsel %vm15716_vm0, %v5938_v53, %v5942_v31  ;;  %v12918_v27 = vrot.slane %v6159_v28, 9  ;;  %v6161_v31 = vld [vmem:[#allocation2 + $0x68] sm:$0xe]  ;;  %v6163_v53 = vld [vmem:[#allocation2 + $0x78] sm:$0xe]  ;;  %v12921_v40 = vrot.slane %v6162_v1, 9 }
 0x31e   :  { %v5915_v13 = vsel %vm15716_vm0, %v5910_v47, %v5914_v17  ;;  %v6158_v47 = vld [vmem:[#allocation2 + $0x40] sm:$0xe]  ;;  %v6210_v17 = vsel %vm16041_vm9, %v12912_v60, %v6209_v61  ;;  %v6253_v51 = vrot.slane %v16276_v46, 5  ;;  %v6261_v60 = vrot.slane %v16294_v4, 5  ;;  %v14697_v61 = vld [vmem:[#allocation2 + $0x10] ss:$8 sps:$4 sm:$0xff]  }
 0x31f   :  { %14095 = vmatmul.mubr.msk.bf16.gmra.mrb[32].mxu1 %vm4862_vm1, %v12893_v11  ;;  %v12896_v12 = vcombine.low %v5915_v13, %v5929_v25  ;;  %v6202_v11 = vsel %vm16041_vm9, %v12910_v7, %v6201_v49  ;;  %v12927_v29 = vcombine.low %v6210_v17, %v6214_v45  ;;  %v12917_v22 = vrot.slane %v6158_v47, 9  ;;  %v14699_v45 = vld [vmem:[#allocation2 + $0x20] ss:$8 sps:$4 sm:$0xff]   ;;  %v14700_v47 = vld [vmem:[#allocation2 + $0x30] ss:$8 sps:$4 sm:$0xff]  }
 0x320   :  { %14098 = vmatprep.mubr.msk.bf16.mxu1 %vm4862_vm1, %v12894_v0  ;;  %14111 = vmatpush3.bf16.msra.mxu1 %v14691_v35  ;;  %v5956_v35 = vrot.slane %v5954_v9, 5  ;;  %v12926_v55 = vcombine.low %v6202_v11, %v6206_v59  ;;  %v6155_v0 = vld [vmem:[#allocation2 + $0x28] sm:$0xe]  ;;  %v6233_v9 = vrot.slane %v16248_v6, 5  ;;  %v12919_v13 = vrot.slane %v6160_v34, 9 }
 0x321   :  { %14112 = vmatprep.subr.bf16.mxu1 %v14692_v26  ;;  %v12914_v19 = vrot.slane %v6155_v0, 9  ;;  %v6237_v25 = vrot.slane %v16251_v15, 5  ;;  %v6164_v15 = vld [vmem:[#allocation2 + $0x80] sm:$0xe]  ;;  %v6241_v7 = vrot.slane %v16257_v52, 5  ;;  %v6249_v49 = vrot.slane %v16268_v18, 5 }
 0x322   :  { %v5957_v58 = vsel %vm15716_vm0, %v5952_v20, %v5956_v35  ;;  %v12923_v59 = vrot.slane %v6164_v15, 9  ;;  %v6166_v11 = vld [vmem:[#allocation2 + $0x90] sm:$0xe]  ;;  %v6257_v0 = vrot.slane %v16291_v62, 5  ;;  %v14701_v4 = vld [vmem:[%s17501_s2 + $0xe8] sm:$0xff]  }
 0x323   :  { %v12897_v39 = vcombine.low %v5943_v14, %v5957_v58  ;;  %v6218_v21 = vsel %vm16041_vm9, %v12914_v19, %v6217_v32  ;;  %v6238_v35 = vsel %vm16041_vm9, %v12919_v13, %v6237_v25  ;;  %v6245_v14 = vrot.slane %v16260_v30, 5  ;;  %v6682_v62 = vld [vmem:[#allocation2 + $0x10] sm:$0xf]  ;;  %v6684_v17 = vld [vmem:[#allocation2 + $0x18] sm:$0xf] }
 0x324   :  { %14113 = vmatpush3.bf16.msra.mxu1 %v14692_v26  ;;  %v6221_v26 = vrot.slane %v16223_v3, 5  ;;  %v6157_v3 = vld [vmem:[#allocation2 + $0x38] sm:$0xe]  ;;  %v12922_v58 = vrot.slane %v6163_v53, 9  ;;  %v6254_v46 = vsel %vm16041_vm9, %v12923_v59, %v6253_v51  ;;  %v6715_v32 = vshrl.u32 %v6682_v62, 16 }
 0x325   :  { %14130 = vmatprep.subr.bf16.mxu1 %v14693_v33  ;;  %v12916_v44 = vrot.slane %v6157_v3, 9  ;;  %v6246_v30 = vsel %vm16041_vm9, %v12921_v40, %v6245_v14  ;;  %v6688_v28 = vld [vmem:[#allocation2 + $0x28] sm:$0xf]  ;;  %v6729_v3 = vshrl.u32 %v6684_v17, 16  ;;  %v16394_v34 = vld [vmem:[#allocation2 + $0x14] sm:$0x1] }
 0x326   :  { %v6222_v57 = vsel %vm16041_vm9, %v12915_v5, %v6221_v26  ;;  %v6250_v18 = vsel %vm16041_vm9, %v12922_v58, %v6249_v49  ;;  %v12925_v5 = vrot.slane %v6166_v11, 9  ;;  %v6690_v13 = vld [vmem:[#allocation2 + $0x30] sm:$0xf]  ;;  %v14702_v25 = vld [vmem:[#allocation2 + $0x40] ss:$8 sps:$4 sm:$0xff]   ;;  %v6724_v1 = vshll.u32 %v16394_v34, 16 }
 0x327   :  { %14099 = vmatmul.mubr.msk.bf16.gmra.mrb[36].mxu1 %vm4862_vm1, %v12895_v23  ;;  %v12928_v50 = vcombine.low %v6218_v21, %v6222_v57  ;;  %v6225_v23 = vrot.slane %v16228_v54, 5  ;;  %v12920_v54 = vrot.slane %v6161_v31, 9  ;;  %v12932_v8 = vcombine.low %v6250_v18, %v6254_v46  ;;  %v16412_v40 = vld [vmem:[%s17501_s2 + $0x100] sm:$0xff]   ;;  %v16415_v51 = vld [vmem:[#allocation2 + $0x2c] sm:$0x1] }
 0x328   :  { %14102 = vmatprep.mubr.msk.bf16.mxu1 %vm4862_vm1, %v12896_v12  ;;  %v6234_v12 = vsel %vm16041_vm9, %v12918_v27, %v6233_v9  ;;  %v6262_v19 = vsel %vm16041_vm9, %v12925_v5, %v6261_v60  ;;  %v6718_v57 = vshll.u32 %v6682_v62, 16  ;;  %v6717_v21 = vrot.slane %v6715_v32, 4  ;;  %v16398_v9 = vld [vmem:[#allocation2 + $0x24] sm:$0x1]  ;;  %v16417_v18 = vld [vmem:[#allocation2 + $0x34] sm:$0x1] }
 0x329   :  { %v6226_v6 = vsel %vm16041_vm9, %v12916_v44, %v6225_v23  ;;  %v12930_v37 = vcombine.low %v6234_v12, %v6238_v35  ;;  %v6242_v52 = vsel %vm16041_vm9, %v12920_v54, %v6241_v7  ;;  %v6757_v27 = vshrl.u32 %v6688_v28, 16  ;;  %v14703_v12 = vld [vmem:[#allocation2 + $0x60] ss:$8 sps:$4 sm:$0xff]   ;;  %v6692_v35 = vld [vmem:[#allocation2 + $0x38] sm:$0xf] }
 0x32a   :  { %v12931_v36 = vcombine.low %v6242_v52, %v6246_v30  ;;  %v6760_v44 = vshll.u32 %v6688_v28, 16  ;;  %v6771_v54 = vshrl.u32 %v6690_v13, 16  ;;  %v6752_v49 = vshll.u32 %v16398_v9, 16  ;;  %v14705_v5 = vld [vmem:[#allocation2 + $0x70] ss:$8 sps:$4 sm:$0xff]  }
 0x32b   :  { %v6759_v15 = vrot.slane %v6757_v27, 4  ;;  %v6788_v52 = vshll.u32 %v6692_v35, 16  ;;  %v6726_v30 = vrot.slane %v6724_v1, 5  ;;  %v14706_v62 = vld [vmem:[#allocation2 + $0x80] ss:$8 sps:$4 sm:$0xff]  }
 0x32c   :  { %v6773_v46 = vrot.slane %v6771_v54, 4  ;;  %v16438_v54 = vld [vmem:[#allocation2 + $0x44] sm:$0x1] }
 0x32f   :  { %14103 = vmatmul.mubr.msk.bf16.gmra.mrb[40].mxu1 %vm4862_vm1, %v12897_v39  ;;  %v6165_v39 = vld [vmem:[#allocation2 + $0x88] sm:$0xe] }
 0x330   :  { %14114 = vmatprep.mubr.msk.bf16.mxu1 %vm4862_vm1, %v12926_v55  ;;  %v12924_v55 = vrot.slane %v6165_v39, 9 }
 0x332   :  { %v6258_v16 = vsel %vm16041_vm9, %v12924_v55, %v6257_v0  ;;  %v6700_v0 = vld [vmem:[#allocation2 + $0x68] sm:$0xf] }
 0x333   :  { %v12933_v26 = vcombine.low %v6258_v16, %v6262_v19  ;;  %v6754_v19 = vrot.slane %v6752_v49, 5 }
 0x337   :  { %14115 = vmatmul.mubr.msk.bf16.vlgmr.msra.gmra.mrb[28].mxu1 %vm4862_vm1, %v12927_v29  ;;  %v14704_v29 = vld [vmem:[%s17501_s2 + $0xf0] sm:$0xff]  }
 0x338   :  { %14131 = vmatpush3.bf16.msra.mxu1 %v14693_v33  ;;  %14118 = vmatprep.mubr.msk.bf16.mxu1 %vm4862_vm1, %v12928_v50  ;;  %v6230_v33 = vsel %vm16041_vm9, %v12917_v22, %v6229_v10  ;;  %v6732_v50 = vshll.u32 %v6684_v17, 16  ;;  %v6686_v22 = vld [vmem:[#allocation2 + $0x20] sm:$0xf]  ;;  %v16396_v10 = vld [vmem:[#allocation2 + $0x1c] sm:$0x1] }
 0x339   :  { %14132 = vmatprep.subr.bf16.mxu1 %v14694_v24  ;;  %v12929_v20 = vcombine.low %v6226_v6, %v6230_v33  ;;  %v6743_v33 = vshrl.u32 %v6686_v22, 16  ;;  %v6746_v31 = vshll.u32 %v6686_v22, 16  ;;  %v6731_v6 = vrot.slane %v6729_v3, 4  ;;  %v16426_v17 = vld [vmem:[#allocation2 + $0x3c] sm:$0x1] }
 0x33a   :  { %v6734_v53 = vrot.slane %v6732_v50, 5 }
 0x33b   :  { %v6745_v14 = vrot.slane %v6743_v33, 4  ;;  %v6748_v58 = vrot.slane %v6746_v31, 5  ;;  %v6794_v31 = vshll.u32 %v16426_v17, 16 }
 0x33c   :  { %14133 = vmatpush3.bf16.msra.mxu1 %v14694_v24  ;;  %v6720_v24 = vrot.slane %v6718_v57, 5  ;;  %v6735_v59 = vor.u32 %v6734_v53, %v6731_v6  ;;  %v6790_v57 = vrot.slane %v6788_v52, 5 }
 0x33d   :  { %14134 = vmatprep.subr.bf16.mxu1 %v14695_v56  ;;  %v6749_v16 = vor.u32 %v6748_v58, %v6745_v14  ;;  %v14708_v58 = vld [vmem:[#allocation2 + $0x90] ss:$8 sps:$4 sm:$0xff]  }
 0x33e   :  { %v6721_v23 = vor.u32 %v6720_v24, %v6717_v21 }
 0x33f   :  { %14119 = vmatmul.mubr.msk.bf16.gmra.mrb[32].mxu1 %vm4862_vm1, %v12929_v20  ;;  %v6762_v20 = vrot.slane %v6760_v44, 5  ;;  %v6750_v27 = vrot.slane %v6749_v16, 4  ;;  %v6706_v16 = vld [vmem:[#allocation2 + $0x80] sm:$0xf] }
 0x340   :  { %14122 = vmatprep.mubr.msk.bf16.mxu1 %vm4862_vm1, %v12930_v37  ;;  %14135 = vmatpush3.bf16.msra.mxu1 %v14695_v56  ;;  %v14707_v56 = vld [vmem:[%s17501_s2 + $0xf8] sm:$0xff]   ;;  %v6738_v37 = vshll.u32 %v16396_v10, 16  ;;  %v16407_v7 = vrot.slane %v6721_v23, 4 }
 0x341   :  { %14136 = vmatprep.subr.bf16.mxu1 %v14696_v63  ;;  %v6763_v39 = vor.u32 %v6762_v20, %v6759_v15  ;;  %v16436_v20 = vld [vmem:[#allocation2 + $0x6c] sm:$0x1] }
 0x342   :  { %v6740_v55 = vrot.slane %v6738_v37, 5  ;;  %v6727_v60 = vsel %vm15716_vm0, %v16407_v7, %v6726_v30 }
 0x344   :  { %14137 = vmatpush3.bf16.msra.mxu1 %v14696_v63  ;;  %v6774_v63 = vshll.u32 %v6690_v13, 16  ;;  %v6841_v13 = vshrl.u32 %v6700_v0, 16 }
 0x345   :  { %14154 = vmatprep.subr.bf16.mxu1 %v14698_v43 }
 0x346   :  { %v6776_v11 = vrot.slane %v6774_v63, 5  ;;  %v6843_v52 = vrot.slane %v6841_v13, 4 }
 0x347   :  { %14123 = vmatmul.mubr.msk.bf16.gmra.mrb[36].mxu1 %vm4862_vm1, %v12931_v36  ;;  %v6698_v36 = vld [vmem:[#allocation2 + $0x60] sm:$0xf] }
 0x348   :  { %14126 = vmatprep.mubr.msk.bf16.mxu1 %vm4862_vm1, %v12932_v8  ;;  %v6694_v8 = vld [vmem:[#allocation2 + $0x40] sm:$0xf]  ;;  %v6777_v28 = vor.u32 %v6776_v11, %v6773_v46  ;;  %v6827_v50 = vshrl.u32 %v6698_v36, 16  ;;  %v6830_v22 = vshll.u32 %v6698_v36, 16  ;;  %v6796_v11 = vrot.slane %v6794_v31, 5 }
 0x349   :  { %v6802_v21 = vshll.u32 %v6694_v8, 16 }
 0x34a   :  { %v6778_v6 = vrot.slane %v6777_v28, 4  ;;  %v6829_v7 = vrot.slane %v6827_v50, 4  ;;  %v6832_v14 = vrot.slane %v6830_v22, 5 }
 0x34b   :  { %v6804_v15 = vrot.slane %v6802_v21, 5  ;;  %v6883_v21 = vshrl.u32 %v6706_v16, 16 }
 0x34f   :  { %14127 = vmatmul.mubr.msk.bf16.gmra.mrb[40].mxu1 %vm4862_vm1, %v12933_v26  ;;  %v6766_v26 = vshll.u32 %v16415_v51, 16 }
 0x350   :  { %14138 = vmatprep.mubr.msk.bf16.mxu1 %vm4862_vm1, %v14697_v61  ;;  %v6696_v61 = vld [vmem:[#allocation2 + $0x48] sm:$0xf] }
 0x351   :  { %v6813_v24 = vshrl.u32 %v6696_v61, 16  ;;  %v6816_v3 = vshll.u32 %v6696_v61, 16  ;;  %v6768_v44 = vrot.slane %v6766_v26, 5  ;;  %v6833_v26 = vor.u32 %v6832_v14, %v6829_v7 }
 0x352   :  { %v6850_v61 = vshll.u32 %v16436_v20, 16 }
 0x353   :  { %v6815_v63 = vrot.slane %v6813_v24, 4  ;;  %v6818_v37 = vrot.slane %v6816_v3, 5  ;;  %v6886_v24 = vshll.u32 %v6706_v16, 16  ;;  %v6834_v13 = vrot.slane %v6833_v26, 4 }
 0x355   :  { %v6888_v7 = vrot.slane %v6886_v24, 5  ;;  %v14712_v24 = vld [vmem:[%s17501_s2 + $0x118] sm:$0xff]  }
 0x357   :  { %14139 = vmatmul.mubr.msk.bf16.vlgmr.msra.gmra.mrb[28].mxu1 %vm4862_vm1, %v14699_v45  ;;  %v6736_v45 = vrot.slane %v6735_v59, 4  ;;  %v6755_v59 = vsel %vm15716_vm0, %v6750_v27, %v6754_v19  ;;  %v6819_v19 = vor.u32 %v6818_v37, %v6815_v63  ;;  %v16459_v63 = vld [vmem:[#allocation2 + $0x7c] sm:$0x1]  ;;  %v6885_v37 = vrot.slane %v6883_v21, 4 }
 0x358   :  { %14155 = vmatpush3.bf16.msra.mxu1 %v14698_v43  ;;  %14142 = vmatprep.mubr.msk.bf16.mxu1 %vm4862_vm1, %v14700_v47  ;;  %v6785_v43 = vshrl.u32 %v6692_v35, 16  ;;  %v6764_v47 = vrot.slane %v6763_v39, 4  ;;  %v6702_v35 = vld [vmem:[#allocation2 + $0x70] sm:$0xf] }
 0x359   :  { %14156 = vmatprep.subr.bf16.mxu1 %v14701_v4 }
 0x35a   :  { %v6787_v32 = vrot.slane %v6785_v43, 4  ;;  %v6769_v1 = vsel %vm15716_vm0, %v6764_v47, %v6768_v44  ;;  %v16442_v43 = vld [vmem:[#allocation2 + $0x4c] sm:$0x1]  ;;  %v6820_v44 = vrot.slane %v6819_v19, 4 }
 0x35b   :  { %v12967_v39 = vcombine.low %v6755_v59, %v6769_v1  ;;  %v6822_v36 = vshll.u32 %v16442_v43, 16  ;;  %v6712_v59 = vld [vmem:[#allocation2 + $0x98] sm:$0xf] }
 0x35c   :  { %14157 = vmatpush3.bf16.msra.mxu1 %v14701_v4  ;;  %v6780_v4 = vshll.u32 %v16417_v18, 16  ;;  %v6791_v33 = vor.u32 %v6790_v57, %v6787_v32  ;;  %v6858_v32 = vshll.u32 %v6702_v35, 16  ;;  %v6925_v19 = vshrl.u32 %v6712_v59, 16 }
 0x35d   :  { %14158 = vmatprep.subr.bf16.mxu1 %v14704_v29  ;;  %v6928_v26 = vshll.u32 %v6712_v59, 16 }
 0x35e   :  { %v6782_v23 = vrot.slane %v6780_v4, 5  ;;  %v6792_v46 = vrot.slane %v6791_v33, 4  ;;  %v14710_v33 = vld [vmem:[%s17501_s2 + $0x108] sm:$0xff]   ;;  %v6860_v1 = vrot.slane %v6858_v32, 5 }
 0x35f   :  { %14143 = vmatmul.mubr.msk.bf16.gmra.mrb[32].mxu1 %vm4862_vm1, %v14702_v25  ;;  %v6844_v25 = vshll.u32 %v6700_v0, 16 }
 0x360   :  { %14146 = vmatprep.mubr.msk.bf16.mxu1 %vm4862_vm1, %v14703_v12  ;;  %14159 = vmatpush3.bf16.msra.mxu1 %v14704_v29  ;;  %v6799_v29 = vshrl.u32 %v6694_v8, 16  ;;  %v16432_v12 = vld [vmem:[#allocation2 + $0x64] sm:$0x1]  ;;  %v6783_v8 = vsel %vm15716_vm0, %v6778_v6, %v6782_v23  ;;  %v6797_v28 = vsel %vm15716_vm0, %v6792_v46, %v6796_v11 }
 0x361   :  { %14160 = vmatprep.subr.bf16.mxu1 %v14707_v56  ;;  %v6846_v30 = vrot.slane %v6844_v25, 5  ;;  %v6852_v25 = vrot.slane %v6850_v61, 5  ;;  %v6889_v61 = vor.u32 %v6888_v7, %v6885_v37 }
 0x362   :  { %v6801_v53 = vrot.slane %v6799_v29, 4  ;;  %v6824_v29 = vrot.slane %v6822_v36, 5  ;;  %v16473_v36 = vld [vmem:[#allocation2 + $0x8c] sm:$0x1] }
 0x363   :  { %v6847_v4 = vor.u32 %v6846_v30, %v6843_v52 }
 0x364   :  { %14161 = vmatpush3.bf16.msra.mxu1 %v14707_v56  ;;  %v6741_v56 = vsel %vm15716_vm0, %v6736_v45, %v6740_v55  ;;  %v6704_v55 = vld [vmem:[#allocation2 + $0x78] sm:$0xf]  ;;  %v6805_v0 = vor.u32 %v6804_v15, %v6801_v53  ;;  %v6708_v45 = vld [vmem:[#allocation2 + $0x88] sm:$0xf]  ;;  %v12968_v15 = vcombine.low %v6783_v8, %v6797_v28  ;;  %v6825_v30 = vsel %vm15716_vm0, %v6820_v44, %v6824_v29 }
 0x365   :  { %14178 = vmatprep.subr.bf16.mxu1 %v16412_v40  ;;  %v12966_v49 = vcombine.low %v6727_v60, %v6741_v56  ;;  %v6836_v60 = vshll.u32 %v16432_v12, 16  ;;  %v6869_v57 = vshrl.u32 %v6704_v55, 16  ;;  %v6872_v47 = vshll.u32 %v6704_v55, 16  ;;  %v16454_v56 = vld [vmem:[#allocation2 + $0x74] sm:$0x1] }
 0x366   :  { %v6806_v3 = vrot.slane %v6805_v0, 4  ;;  %v6897_v22 = vshrl.u32 %v6708_v45, 16  ;;  %v6900_v27 = vshll.u32 %v6708_v45, 16  ;;  %v6848_v31 = vrot.slane %v6847_v4, 4  ;;  %v14711_v55 = vld [vmem:[%s17501_s2 + $0x110] sm:$0xff]  }
 0x367   :  { %14147 = vmatmul.mubr.msk.bf16.gmra.mrb[36].mxu1 %vm4862_vm1, %v14705_v5  ;;  %v6808_v5 = vshll.u32 %v16438_v54, 16  ;;  %v6838_v50 = vrot.slane %v6836_v60, 5  ;;  %v6871_v6 = vrot.slane %v6869_v57, 4  ;;  %v6874_v53 = vrot.slane %v6872_v47, 5 }
 0x368   :  { %14150 = vmatprep.mubr.msk.bf16.mxu1 %vm4862_vm1, %v14706_v62  ;;  %v6855_v62 = vshrl.u32 %v6702_v35, 16  ;;  %v6899_v14 = vrot.slane %v6897_v22, 4  ;;  %v6864_v11 = vshll.u32 %v16454_v56, 16  ;;  %v6906_v4 = vshll.u32 %v16473_v36, 16 }
 0x369   :  { %v6810_v35 = vrot.slane %v6808_v5, 5  ;;  %v6839_v46 = vsel %vm15716_vm0, %v6834_v13, %v6838_v50  ;;  %v6875_v0 = vor.u32 %v6874_v53, %v6871_v6  ;;  %v6878_v5 = vshll.u32 %v16459_v63, 16 }
 0x36a   :  { %v6857_v23 = vrot.slane %v6855_v62, 4  ;;  %v6866_v57 = vrot.slane %v6864_v11, 5  ;;  %v6930_v44 = vrot.slane %v6928_v26, 5  ;;  %v6890_v13 = vrot.slane %v6889_v61, 4  ;;  %v7134_v26 = vld [vmem:[#allocation2 + $0x28] sm:$0xe] }
 0x36b   :  { %v6811_v52 = vsel %vm15716_vm0, %v6806_v3, %v6810_v35  ;;  %v6876_v29 = vrot.slane %v6875_v0, 4  ;;  %v6880_v21 = vrot.slane %v6878_v5, 5  ;;  %v16486_v3 = vld [vmem:[#allocation2 + $0x94] sm:$0x1]  ;;  %v7185_v0 = vrot.slane %v16396_v10, 5 }
 0x36c   :  { %v6861_v8 = vor.u32 %v6860_v1, %v6857_v23  ;;  %v12969_v32 = vcombine.low %v6811_v52, %v6825_v30  ;;  %v6920_v6 = vshll.u32 %v16486_v3, 16  ;;  %v7136_v61 = vld [vmem:[#allocation2 + $0x38] sm:$0xe]  ;;  %v12989_v10 = vrot.slane %v7134_v26, 9 }
 0x36d   :  { %v6881_v53 = vsel %vm15716_vm0, %v6876_v29, %v6880_v21  ;;  %v7201_v29 = vrot.slane %v16426_v17, 5  ;;  %v7189_v21 = vrot.slane %v16398_v9, 5 }
 0x36e   :  { %v6862_v28 = vrot.slane %v6861_v8, 4  ;;  %v6922_v59 = vrot.slane %v6920_v6, 5  ;;  %v7209_v6 = vrot.slane %v16442_v43, 5  ;;  %v7142_v43 = vld [vmem:[#allocation2 + $0x78] sm:$0xe] }
 0x36f   :  { %14151 = vmatmul.mubr.msk.bf16.gmra.mrb[40].mxu1 %vm4862_vm1, %v14708_v58  ;;  %v6902_v58 = vrot.slane %v6900_v27, 5  ;;  %v6927_v27 = vrot.slane %v6925_v19, 4 }
 0x370   :  { %14162 = vmatprep.mubr.msk.bf16.mxu1 %vm4862_vm1, %v12966_v49  ;;  %v6710_v49 = vld [vmem:[#allocation2 + $0x90] sm:$0xf]  ;;  %v6867_v1 = vsel %vm15716_vm0, %v6862_v28, %v6866_v57 }
 0x371   :  { %v6911_v60 = vshrl.u32 %v6710_v49, 16  ;;  %v6914_v16 = vshll.u32 %v6710_v49, 16  ;;  %v6903_v45 = vor.u32 %v6902_v58, %v6899_v14  ;;  %v6931_v35 = vor.u32 %v6930_v44, %v6927_v27  ;;  %v7132_v58 = vld [vmem:[#allocation2 + $0x18] sm:$0xe]  ;;  %v7135_v57 = vld [vmem:[#allocation2 + $0x30] sm:$0xe] }
 0x372   :  { %v12971_v49 = vcombine.low %v6867_v1, %v6881_v53  ;;  %v12990_v28 = vrot.slane %v7135_v57, 9  ;;  %v7137_v27 = vld [vmem:[#allocation2 + $0x40] sm:$0xe]  ;;  %v7138_v44 = vld [vmem:[#allocation2 + $0x48] sm:$0xe]  ;;  %v7213_v53 = vrot.slane %v16432_v12, 5 }
 0x373   :  { %v6913_v50 = vrot.slane %v6911_v60, 4  ;;  %v6916_v22 = vrot.slane %v6914_v16, 5  ;;  %v6904_v23 = vrot.slane %v6903_v45, 4  ;;  %v7181_v16 = vrot.slane %v16394_v34, 5 }
 0x374   :  { %v7193_v34 = vrot.slane %v16415_v51, 5  ;;  %v7140_v51 = vld [vmem:[#allocation2 + $0x68] sm:$0xe]  ;;  %v12993_v1 = vrot.slane %v7138_v44, 9 }
 0x377   :  { %14163 = vmatmul.mubr.msk.bf16.vlgmr.msra.gmra.mrb[28].mxu1 %vm4862_vm1, %v12967_v39  ;;  %v16471_v39 = vld [vmem:[#allocation2 + $0x84] sm:$0x1] }
 0x378   :  { %14179 = vmatpush3.bf16.msra.mxu1 %v16412_v40  ;;  %14166 = vmatprep.mubr.msk.bf16.mxu1 %vm4862_vm1, %v12968_v15  ;;  %v6853_v40 = vsel %vm15716_vm0, %v6848_v31, %v6852_v25  ;;  %v6892_v62 = vshll.u32 %v16471_v39, 16  ;;  %v16489_v31 = vld [vmem:[#allocation2 + $0x9c] sm:$0x1]  ;;  %v6917_v15 = vor.u32 %v6916_v22, %v6913_v50  ;;  %v7197_v50 = vrot.slane %v16417_v18, 5 }
 0x379   :  { %14180 = vmatprep.subr.bf16.mxu1 %v14710_v33  ;;  %v12970_v47 = vcombine.low %v6839_v46, %v6853_v40  ;;  %v6934_v37 = vshll.u32 %v16489_v31, 16  ;;  %v6932_v46 = vrot.slane %v6931_v35, 4  ;;  %v7131_v40 = vld [vmem:[#allocation2 + $0x10] sm:$0xe]  ;;  %v7217_v35 = vrot.slane %v16436_v20, 5 }
 0x37a   :  { %v6894_v25 = vrot.slane %v6892_v62, 5  ;;  %v6918_v30 = vrot.slane %v6917_v15, 4  ;;  %v12986_v8 = vrot.slane %v7131_v40, 9  ;;  %v7198_v17 = vsel %vm16041_vm9, %v12990_v28, %v7197_v50  ;;  %v7144_v20 = vld [vmem:[#allocation2 + $0x88] sm:$0xe] }
 0x37b   :  { %v6936_v11 = vrot.slane %v6934_v37, 5  ;;  %v12995_v15 = vrot.slane %v7140_v51, 9  ;;  %v7205_v37 = vrot.slane %v16438_v54, 5  ;;  %v8168_v28 = vld [vmem:[#allocation3 + $0x4] sm:$0x4] }
 0x37c   :  { %14181 = vmatpush3.bf16.msra.mxu1 %v14710_v33  ;;  %v6908_v33 = vrot.slane %v6906_v4, 5  ;;  %v6895_v7 = vsel %vm15716_vm0, %v6890_v13, %v6894_v25  ;;  %v6923_v5 = vsel %vm15716_vm0, %v6918_v30, %v6922_v59  ;;  %v7182_v45 = vsel %vm16041_vm9, %v12986_v8, %v7181_v16  ;;  %v7133_v4 = vld [vmem:[#allocation2 + $0x20] sm:$0xe]  ;;  %v8150_v50 = vld [vmem:[#allocation3 + $0x10] sm:$0x1] }
 0x37d   :  { %14182 = vmatprep.subr.bf16.mxu1 %v14711_v55  ;;  %v6937_v60 = vsel %vm15716_vm0, %v6932_v46, %v6936_v11  ;;  %v12988_v42 = vrot.slane %v7133_v4, 9  ;;  %v7139_v25 = vld [vmem:[#allocation2 + $0x60] sm:$0xe]  ;;  %v7218_v12 = vsel %vm16041_vm9, %v12995_v15, %v7217_v35  ;;  %v7221_v30 = vrot.slane %v16454_v56, 5  ;;  %v14714_v35 = vld [vmem:[%s17501_s2 + $0x148] sm:$0xff]  }
 0x37e   :  { %v6909_v14 = vsel %vm15716_vm0, %v6904_v23, %v6908_v33  ;;  %v12973_v62 = vcombine.low %v6923_v5, %v6937_v60  ;;  %v12992_v33 = vrot.slane %v7137_v27, 9  ;;  %v12994_v18 = vrot.slane %v7139_v25, 9  ;;  %v8174_v25 = vld [vmem:[#allocation3 + $0xc] sm:$0x4]  ;;  %vm16690_vm0 = vmand %vm8134_vm11, %vm8425_vm15 }
 0x37f   :  { %14167 = vmatmul.mubr.msk.bf16.gmra.mrb[32].mxu1 %vm4862_vm1, %v12969_v32  ;;  %v12972_v52 = vcombine.low %v6895_v7, %v6909_v14  ;;  %v7190_v13 = vsel %vm16041_vm9, %v12988_v42, %v7189_v21  ;;  %v7141_v7 = vld [vmem:[#allocation2 + $0x70] sm:$0xe]  ;;  %v12997_v46 = vrot.slane %v7142_v43, 9  ;;  %v7225_v11 = vrot.slane %v16459_v63, 5  ;;  %v8171_v42 = vld [vmem:[#allocation3 + $0x8] sm:$0x4] }
 0x380   :  { %14170 = vmatprep.mubr.msk.bf16.mxu1 %vm4862_vm1, %v12970_v47  ;;  %14183 = vmatpush3.bf16.msra.mxu1 %v14711_v55  ;;  %v12987_v55 = vrot.slane %v7132_v58, 9  ;;  %v12991_v47 = vrot.slane %v7136_v61, 9  ;;  %v7206_v14 = vsel %vm16041_vm9, %v12992_v33, %v7205_v37  ;;  %v7210_v58 = vsel %vm16041_vm9, %v12993_v1, %v7209_v6  ;;  %v8153_v6 = vld [vmem:[#allocation3 + $0x1c] sm:$0x1]  ;;  %v8162_v37 = vld [vmem:[#allocation3 + $0x28] sm:$0x1] }
 0x381   :  { %14184 = vmatprep.subr.bf16.mxu1 %v14712_v24  ;;  %v7214_v59 = vsel %vm16041_vm9, %v12994_v18, %v7213_v53  ;;  %v13005_v54 = vcombine.low %v7206_v14, %v7210_v58  ;;  %v7229_v8 = vrot.slane %v16471_v39, 5  ;;  %v7233_v5 = vrot.slane %v16473_v36, 5  ;;  %v7145_v39 = vld [vmem:[#allocation2 + $0x90] sm:$0xe]  ;;  %v8180_v18 = vld [vmem:[#allocation3 + $0x1c] sm:$0x4] }
 0x382   :  { %v7186_v19 = vsel %vm16041_vm9, %v12987_v55, %v7185_v0  ;;  %v7202_v22 = vsel %vm16041_vm9, %v12991_v47, %v7201_v29  ;;  %v13006_v55 = vcombine.low %v7214_v59, %v7218_v12  ;;  %v12999_v0 = vrot.slane %v7144_v20, 9  ;;  %v8144_v47 = vld [vmem:[#allocation3 + $0x8] sm:$0x1]  ;;  %v8159_v43 = vld [vmem:[#allocation3 + $0x24] sm:$0x1]  ;;  %v14715_v20 = vld [vmem:[%s17501_s2 + $0x150] sm:$0xff]  }
 0x383   :  { %v13002_v32 = vcombine.low %v7182_v45, %v7186_v19  ;;  %v13004_v9 = vcombine.low %v7198_v17, %v7202_v22  ;;  %v7226_v56 = vsel %vm16041_vm9, %v12997_v46, %v7225_v11  ;;  %v7146_v19 = vld [vmem:[#allocation2 + $0x98] sm:$0xe]  ;;  %v13000_v61 = vrot.slane %v7145_v39, 9  ;;  %v8177_v22 = vld [vmem:[#allocation3 + $0x10] sm:$0x4] }
 0x384   :  { %14185 = vmatpush3.bf16.msra.mxu1 %v14712_v24  ;;  %v7194_v24 = vsel %vm16041_vm9, %v12989_v10, %v7193_v34  ;;  %v7234_v16 = vsel %vm16041_vm9, %v12999_v0, %v7233_v5  ;;  %v13001_v45 = vrot.slane %v7146_v19, 9  ;;  %v7241_v4 = vrot.slane %v16489_v31, 5  ;;  %v8141_v34 = vld [vmem:[#allocation3 + $0x4] sm:$0x1]  ;;  %v8156_v17 = vld [vmem:[#allocation3 + $0x20] sm:$0x1] }
 0x385   :  { %v13003_v23 = vcombine.low %v7190_v13, %v7194_v24  ;;  %v8172_v41 = vsel %vm16569_vm14, 0, %v8171_v42  ;;  %v8142_v29 = vsel %vm15025_vm5, 0, %v8141_v34  ;;  %v8169_v21 = vsel %vm16569_vm14, 0, %v8168_v28  ;;  %v14713_v24 = vld [vmem:[%s17501_s2 + $0x140] sm:$0xff]   ;;  %v8147_v13 = vld [vmem:[#allocation3 + $0xc] sm:$0x1] }
 0x386   :  { %v7242_v10 = vsel %vm16041_vm9, %v13001_v45, %v7241_v4  ;;  %8173 = vst [vmem:[#allocation3 + $0x8] sm:$0x4] %v8172_v41  ;;  %8143 = vst [vmem:[#allocation3 + $0x4] sm:$0x1] %v8142_v29  ;;  %14202 = vmatprep.subr.bf16.mxu0 %v14713_v24  ;;  %v8151_v27 = vsel %vm15025_vm5, 0, %v8150_v50  ;;  %v8178_v44 = vsel %vm16569_vm14, 0, %v8177_v22 }
 0x387   :  { %14171 = vmatmul.mubr.msk.bf16.gmra.mrb[36].mxu1 %vm4862_vm1, %v12971_v49  ;;  %v7143_v49 = vld [vmem:[#allocation2 + $0x80] sm:$0xe]  ;;  %8170 = vst [vmem:[#allocation3 + $0x4] sm:$0x4] %v8169_v21  ;;  %14203 = vmatpush3.bf16.msra.mxu0 %v14713_v24  ;;  %8152 = vst [vmem:[#allocation3 + $0x10] sm:$0x1] %v8151_v27 }
 0x388   :  { %14174 = vmatprep.mubr.msk.bf16.mxu1 %vm4862_vm1, %v12972_v52  ;;  %v12996_v52 = vrot.slane %v7141_v7, 9  ;;  %v12998_v40 = vrot.slane %v7143_v49, 9  ;;  %8179 = vst [vmem:[#allocation3 + $0x10] sm:$0x4] %v8178_v44  ;;  %v8148_v51 = vsel %vm15025_vm5, 0, %v8147_v13  ;;  %v8157_v33 = vsel %vm15025_vm5, 0, %v8156_v17  ;;  %14204 = vmatprep.subr.bf16.mxu0 %v14714_v35 }
 0x389   :  { %8149 = vst [vmem:[#allocation3 + $0xc] sm:$0x1] %v8148_v51  ;;  %8158 = vst [vmem:[#allocation3 + $0x20] sm:$0x1] %v8157_v33  ;;  %v8154_v53 = vsel %vm15025_vm5, 0, %v8153_v6  ;;  %v8181_v15 = vsel %vm16569_vm14, 0, %v8180_v18 }
 0x38a   :  { %v7222_v60 = vsel %vm16041_vm9, %v12996_v52, %v7221_v30  ;;  %v7230_v63 = vsel %vm16041_vm9, %v12998_v40, %v7229_v8  ;;  %8155 = vst [vmem:[#allocation3 + $0x1c] sm:$0x1] %v8154_v53  ;;  %8182 = vst [vmem:[#allocation3 + $0x1c] sm:$0x4] %v8181_v15  ;;  %v8189_v7 = vld [vmem:[#allocation3 + $0x28] sm:$0x4] }
 0x38b   :  { %v13007_v26 = vcombine.low %v7222_v60, %v7226_v56  ;;  %v13008_v36 = vcombine.low %v7230_v63, %v7234_v16  ;;  %14205 = vmatpush3.bf16.msra.mxu0 %v14714_v35  ;;  %v8163_v14 = vsel %vm15025_vm5, 0, %v8162_v37  ;;  %v8190_v58 = vsel %vm16569_vm14, 0, %v8189_v7  ;;  %v8186_v49 = vld [vmem:[#allocation3 + $0x24] sm:$0x4]  ;;  %v14716_v52 = vld [vmem:[%s17501_s2 + $0x158] sm:$0xff]  }
 0x38c   :  { %8164 = vst [vmem:[#allocation3 + $0x28] sm:$0x1] %v8163_v14  ;;  %8191 = vst [vmem:[#allocation3 + $0x28] sm:$0x4] %v8190_v58  ;;  %v8160_v59 = vsel %vm15025_vm5, 0, %v8159_v43  ;;  %v8187_v12 = vsel %vm16569_vm14, 0, %v8186_v49  ;;  %14206 = vmatprep.subr.bf16.mxu0 %v14715_v20 }
 0x38d   :  { %8161 = vst [vmem:[#allocation3 + $0x24] sm:$0x1] %v8160_v59  ;;  %8188 = vst [vmem:[#allocation3 + $0x24] sm:$0x4] %v8187_v12  ;;  %v16629_v11 = vld [vmem:[%s17503_s4 + $0x1] ss:$0 sm:$0xff] }
 0x38e   :  { %v13128_v30 = vld.sshfl [vmem:[#allocation3] sm:$0x13 pattern:$0x76325410]  ;;  %vm8553_vm11 = vsmask.f32 7448 }
 0x38f   :  { %14175 = vmatmul.mubr.msk.bf16.gmra.mrb[40].mxu1 %vm4862_vm1, %v12973_v62  ;;  %v7237_v62 = vrot.slane %v16486_v3, 5  ;;  %v8145_v3 = vsel %vm15025_vm5, 0, %v8144_v47  ;;  %14207 = vmatpush3.bf16.msra.mxu0 %v14715_v20  ;;  %v8556_v40 = vshrl.u32 %v13128_v30, 16  ;;  %v14717_v56 = vld [vmem:[%s17501_s2 + $0x120] sm:$0xff]   ;;  %v8491_v19 = vcombine.high %v13128_v30, %v13128_v30 }
 0x390   :  { %14186 = vmatprep.mubr.msk.bf16.mxu1 %vm4862_vm1, %v13002_v32  ;;  %8146 = vst [vmem:[#allocation3 + $0x8] sm:$0x1] %v8145_v3  ;;  %14208 = vmatprep.subr.bf16.mxu0 %v14716_v52 }
 0x391   :  { %v7238_v32 = vsel %vm16041_vm9, %v13000_v61, %v7237_v62  ;;  %v16640_v61 = vrot.slane %v8556_v40, 6  ;;  %v16647_v31 = vshll.u32 %v8491_v19, 16  ;;  %vm8551_vm9 = vsmask.f32 5392 }
 0x392   :  { %v13009_v57 = vcombine.low %v7238_v32, %v7242_v10  ;;  %vm8552_vm13 = vmor %vm16816_vm12, %vm8551_vm9  ;;  %vm11014_vm12 = vsmask.f32 2312 }
 0x393   :  { %14209 = vmatpush3.bf16.msra.mxu0 %v14716_v52  ;;  %vm17155_vm9 = vmand %vm10745_vm2, %vm10746_vm3  ;;  %vm11020_vm3 = vsmask.f32 5396 }
 0x394   :  { %14214 = vmatprep.subr.bf16.mxu0 %v14717_v56 }
 0x397   :  { %14187 = vmatmul.mubr.msk.bf16.vlgmr.msra.gmra.mrb[28].mxu1 %vm4862_vm1, %v13003_v23  ;;  %v8175_v23 = vsel %vm16569_vm14, 0, %v8174_v25 }
 0x398   :  { %14190 = vmatprep.mubr.msk.bf16.mxu1 %vm4862_vm1, %v13004_v9  ;;  %8176 = vst [vmem:[#allocation3 + $0xc] sm:$0x4] %v8175_v23  ;;  %v8183_v9 = vld [vmem:[#allocation3 + $0x20] sm:$0x4] }
 0x399   :  { %v8184_v1 = vsel %vm16569_vm14, 0, %v8183_v9  ;;  %vm16835_vm14 = vmor %vm8552_vm13, %vm8553_vm11  ;;  %vm14848_vm11 = vmmov 0   ;;  %vm10945_vm13 = vsmask.f32 1282 }
 0x39a   :  { %8185 = vst [vmem:[#allocation3 + $0x20] sm:$0x4] %v8184_v1 }
 0x39f   :  { %14191 = vmatmul.mubr.msk.bf16.gmra.mrb[32].mxu1 %vm4862_vm1, %v13005_v54  ;;  %v16624_v54 = vld [vmem:[%s17502_s3 + $0x1] ss:$0 sm:$0xff] }
 0x3a0   :  { %14194 = vmatprep.mubr.msk.bf16.mxu1 %vm4862_vm1, %v13006_v55  ;;  %v8559_v55 = vshll.u32 %v13128_v30, 16 }
 0x3a2   :  { %v16642_v62 = vrot.slane %v8559_v55, 7 }
 0x3a4   :  { %v8562_v29 = vor.u32 %v16642_v62, %v16640_v61 }
 0x3a7   :  { %14195 = vmatmul.mubr.msk.bf16.gmra.mrb[36].mxu1 %vm4862_vm1, %v13007_v26 }
 0x3a8   :  { %14198 = vmatprep.mubr.msk.bf16.mxu1 %vm4862_vm1, %v13008_v36 }
 0x3af   :  { %14199 = vmatmul.mubr.msk.bf16.gmra.mrb[40].mxu1 %vm4862_vm1, %v13009_v57 }
 0x46a   :  { %v14188_v46 = vpop.f32.mrb[28].mxu1 }
 0x46b   :  { %v7443_v8 = vmul.f32 %v14188_v46, %v16624_v54  ;;  %v7357_v0 = vpop.f32.mrb[29].mxu1 }
 0x46c   :  { %v7441_v5 = vmul.f32 %v16624_v54, %v7357_v0  ;;  %v14189_v60 = vpop.f32.mrb[30].mxu1 }
 0x46d   :  { %v7464_v63 = vadd.f32 %v16629_v11, %v7443_v8  ;;  %v7444_v16 = vmul.f32 %v14189_v60, %v16624_v54  ;;  %v7360_v39 = vpop.f32.mrb[31].mxu1 }
 0x46e   :  { %v7462_v26 = vadd.f32 %v16629_v11, %v7441_v5  ;;  %v7442_v36 = vmul.f32 %v16624_v54, %v7360_v39 }
 0x46f   :  { %v7480_v45 = vmax.f32 %v7464_v63, 0.0  ;;  %v7465_v4 = vadd.f32 %v16629_v11, %v7444_v16 }
 0x470   :  { %v7478_v32 = vmax.f32 %v7462_v26, 0.0  ;;  %v7463_v10 = vadd.f32 %v16629_v11, %v7442_v36 }
 0x471   :  { %v7544_v57 = vcombine.high %v7480_v45, %v7480_v45  ;;  %v7551_v47 = vrot.slane %v7480_v45, %v15058_v2  ;;  %v7481_v3 = vmax.f32 %v7465_v4, 0.0 }
 0x472   :  { %v7510_v42 = vcombine.high %v7478_v32, %v7478_v32  ;;  %v7517_v41 = vrot.slane %v7478_v32, %v15058_v2  ;;  %v7479_v34 = vmax.f32 %v7463_v10, 0.0  ;;  %v14192_v28 = vpop.f32.mrb[32].mxu1 }
 0x473   :  { %v7558_v21 = vrot.slane %v7544_v57, %v15058_v2  ;;  %v7559_v24 = vcombine.high %v7551_v47, %v7551_v47  ;;  %v13032_v50 = vrot.slane %v7551_v47, 9  ;;  %v7561_v22 = vcombine.high %v7481_v3, %v7481_v3  ;;  %v16653_v27 = vpop.f32.mrb[33].mxu1 }
 0x474   :  { %v7524_v44 = vrot.slane %v7510_v42, %v15058_v2  ;;  %v7525_v13 = vcombine.high %v7517_v41, %v7517_v41  ;;  %v13024_v25 = vrot.slane %v7517_v41, 9  ;;  %v7568_v51 = vrot.slane %v7481_v3, %v15058_v2  ;;  %v16657_v23 = vpop.f32.mrb[34].mxu1 }
 0x475   :  { %v7560_v17 = vcombine.high %v7558_v21, %v7558_v21  ;;  %v13033_v9 = vrot.slane %v7559_v24, 9  ;;  %v13034_v33 = vrot.slane %v7558_v21, 9  ;;  %v8046_v1 = vmax.f32 %v7551_v47, %v13032_v50  ;;  %v16659_v6 = vpop.f32.mrb[35].mxu1 }
 0x476   :  { %v7526_v18 = vcombine.high %v7524_v44, %v7524_v44  ;;  %v13025_v53 = vrot.slane %v7525_v13, 9  ;;  %v13026_v15 = vrot.slane %v7524_v44, 9  ;;  %v8038_v35 = vmax.f32 %v7517_v41, %v13024_v25 }
 0x477   :  { %v13035_v37 = vrot.slane %v7560_v17, 9  ;;  %v8047_v7 = vmax.f32 %v7559_v24, %v13033_v9  ;;  %v8048_v14 = vmax.f32 %v7558_v21, %v13034_v33  ;;  %v7575_v58 = vrot.slane %v7561_v22, %v15058_v2 }
 0x478   :  { %v13027_v43 = vrot.slane %v7526_v18, 9  ;;  %v8039_v49 = vmax.f32 %v7525_v13, %v13025_v53  ;;  %v8040_v59 = vmax.f32 %v7524_v44, %v13026_v15  ;;  %v7576_v12 = vcombine.high %v7568_v51, %v7568_v51 }
 0x479   :  { %v8049_v20 = vmax.f32 %v7560_v17, %v13035_v37  ;;  %v7577_v52 = vcombine.high %v7575_v58, %v7575_v58  ;;  %v13036_v30 = vrot.slane %v7568_v51, 9  ;;  %v13038_v46 = vrot.slane %v7575_v58, 9 }
 0x47a   :  { %v8041_v40 = vmax.f32 %v7526_v18, %v13027_v43  ;;  %v13037_v55 = vrot.slane %v7576_v12, 9  ;;  %v7527_v8 = vcombine.high %v7479_v34, %v7479_v34  ;;  %v7534_v0 = vrot.slane %v7479_v34, %v15058_v2  ;;  %v16663_v5 = vpop.f32.mrb[36].mxu1 }
 0x47b   :  { %v13039_v60 = vrot.slane %v7577_v52, 9  ;;  %v8050_v56 = vmax.f32 %v7568_v51, %v13036_v30  ;;  %v8052_v63 = vmax.f32 %v7575_v58, %v13038_v46  ;;  %v7447_v16 = vmul.f32 %v14192_v28, %v16624_v54  ;;  %v16666_v39 = vpop.f32.mrb[37].mxu1 }
 0x47c   :  { %v8051_v19 = vmax.f32 %v7576_v12, %v13037_v55  ;;  %v7541_v26 = vrot.slane %v7527_v8, %v15058_v2  ;;  %v7542_v36 = vcombine.high %v7534_v0, %v7534_v0  ;;  %v13028_v45 = vrot.slane %v7534_v0, 9  ;;  %v16669_v4 = vpop.f32.mrb[38].mxu1 }
 0x47d   :  { %v8053_v32 = vmax.f32 %v7577_v52, %v13039_v60  ;;  %v8106_v10 = vmax.f32 %v8046_v1, %v8050_v56  ;;  %v8108_v57 = vmax.f32 %v8048_v14, %v8052_v63  ;;  %v7468_v47 = vadd.f32 %v16629_v11, %v7447_v16  ;;  %v16672_v3 = vpop.f32.mrb[39].mxu1 }
 0x47e   :  { %v8107_v42 = vmax.f32 %v8047_v7, %v8051_v19  ;;  %v7543_v41 = vcombine.high %v7541_v26, %v7541_v26  ;;  %v13029_v34 = vrot.slane %v7542_v36, 9  ;;  %v13030_v28 = vrot.slane %v7541_v26, 9 }
 0x47f   :  { %v8109_v21 = vmax.f32 %v8049_v20, %v8053_v32  ;;  %v13649_v24 = vpack.c.bf16 %v8106_v10, %v8106_v10  ;;  %v13651_v50 = vpack.c.bf16 %v8108_v57, %v8108_v57  ;;  %v8042_v22 = vmax.f32 %v7534_v0, %v13028_v45 }
 0x480   :  { %v13650_v44 = vpack.c.bf16 %v8107_v42, %v8107_v42  ;;  %v13031_v13 = vrot.slane %v7543_v41, 9  ;;  %v8043_v25 = vmax.f32 %v7542_v36, %v13029_v34  ;;  %v8044_v51 = vmax.f32 %v7541_v26, %v13030_v28 }
 0x481   :  { %v13652_v17 = vpack.c.bf16 %v8109_v21, %v8109_v21  ;;  %v8324_v9 = vunpack.c.l.b16 %v13649_v24  ;;  %v8326_v33 = vunpack.c.l.b16 %v13651_v50  ;;  %v8102_v1 = vmax.f32 %v8038_v35, %v8042_v22 }
 0x482   :  { %v8325_v18 = vunpack.c.l.b16 %v13650_v44  ;;  %v8045_v53 = vmax.f32 %v7543_v41, %v13031_v13  ;;  %v8103_v15 = vmax.f32 %v8039_v49, %v8043_v25  ;;  %v8104_v37 = vmax.f32 %v8040_v59, %v8044_v51  ;;  %v16674_v7 = vpop.f32.mrb[40].mxu1 }
 0x483   :  { %v8327_v14 = vunpack.c.l.b16 %v13652_v17  ;;  %v8359_v58 = vrot.slane %v8324_v9, 7  ;;  %v8362_v43 = vrot.slane %v8326_v33, 5  ;;  %v13645_v12 = vpack.c.bf16 %v8102_v1, %v8102_v1  ;;  %v16676_v20 = vpop.f32.mrb[41].mxu1  ;;  %v8427_v33 = vld [vmem:[#allocation3 + $0x4] sm:$0x7] }
 0x484   :  { %v8360_v52 = vrot.slane %v8325_v18, 6  ;;  %v8105_v30 = vmax.f32 %v8041_v40, %v8045_v53  ;;  %v13646_v46 = vpack.c.bf16 %v8103_v15, %v8103_v15  ;;  %v13647_v55 = vpack.c.bf16 %v8104_v37, %v8104_v37  ;;  %v16678_v8 = vpop.f32.mrb[42].mxu1 }
 0x485   :  { %v8364_v0 = vrot.slane %v8327_v14, 4  ;;  %v8320_v35 = vunpack.c.l.b16 %v13645_v12  ;;  %v7484_v60 = vmax.f32 %v7468_v47, 0.0  ;;  %v7445_v49 = vmul.f32 %v16624_v54, %v16653_v27  ;;  %v16682_v59 = vpop.f32.mrb[43].mxu1  ;;  %v8430_v27 = vld [vmem:[#allocation3 + $0x8] sm:$0x7] }
 0x486   :  { %v8361_v56 = vsel %vm4165_vm6, %v8360_v52, %v8359_v58  ;;  %v13648_v63 = vpack.c.bf16 %v8105_v30, %v8105_v30  ;;  %v8321_v16 = vunpack.c.l.b16 %v13646_v46  ;;  %v8322_v19 = vunpack.c.l.b16 %v13647_v55 }
 0x487   :  { %v8363_v26 = vsel %vm4168_vm7, %v8362_v43, %v8361_v56  ;;  %v8352_v40 = vrot.slane %v8320_v35, 7  ;;  %v7612_v36 = vcombine.high %v7484_v60, %v7484_v60  ;;  %v7619_v45 = vrot.slane %v7484_v60, %v15058_v2 }
 0x488   :  { %v8365_v32 = vsel %vm4171_vm8, %v8364_v0, %v8363_v26  ;;  %v8323_v57 = vunpack.c.l.b16 %v13648_v63  ;;  %v8353_v47 = vrot.slane %v8321_v16, 6  ;;  %v8355_v42 = vrot.slane %v8322_v19, 5 }
 0x489   :  { %v8409_v41 = vpack.c.b16 %v8365_v32, %v8365_v32  ;;  %v7626_v34 = vrot.slane %v7612_v36, %v15058_v2  ;;  %v7627_v28 = vcombine.high %v7619_v45, %v7619_v45  ;;  %v13048_v21 = vrot.slane %v7619_v45, 9 }
 0x48a   :  { %v8354_v24 = vsel %vm4165_vm6, %v8353_v47, %v8352_v40  ;;  %v8357_v50 = vrot.slane %v8323_v57, 4  ;;  %v7466_v22 = vadd.f32 %v16629_v11, %v7445_v49  ;;  %v7448_v44 = vmul.f32 %v16657_v23, %v16624_v54 }
 0x48b   :  { %v8431_v13 = vsel %vm16690_vm0, %v8409_v41, %v8430_v27  ;;  %v8356_v25 = vsel %vm4168_vm7, %v8355_v42, %v8354_v24  ;;  %v7628_v51 = vcombine.high %v7626_v34, %v7626_v34  ;;  %v13049_v17 = vrot.slane %v7627_v28, 9 }
 0x48c   :  { %8432 = vst [vmem:[#allocation3 + $0x8] sm:$0x7] %v8431_v13  ;;  %v8358_v9 = vsel %vm4171_vm8, %v8357_v50, %v8356_v25  ;;  %v13050_v1 = vrot.slane %v7626_v34, 9  ;;  %v8062_v18 = vmax.f32 %v7619_v45, %v13048_v21  ;;  %v7482_v53 = vmax.f32 %v7466_v22, 0.0 }
 0x48d   :  { %v8408_v15 = vpack.c.b16 %v8358_v9, %v8358_v9  ;;  %v13051_v37 = vrot.slane %v7628_v51, 9  ;;  %v8063_v14 = vmax.f32 %v7627_v28, %v13049_v17  ;;  %v7469_v58 = vadd.f32 %v16629_v11, %v7448_v44 }
 0x48e   :  { %v8064_v23 = vmax.f32 %v7626_v34, %v13050_v1  ;;  %v7578_v43 = vcombine.high %v7482_v53, %v7482_v53  ;;  %v7585_v12 = vrot.slane %v7482_v53, %v15058_v2  ;;  %v7446_v52 = vmul.f32 %v16624_v54, %v16659_v6 }
 0x48f   :  { %v8428_v30 = vsel %vm16690_vm0, %v8408_v15, %v8427_v33  ;;  %v8065_v46 = vmax.f32 %v7628_v51, %v13051_v37  ;;  %v7485_v55 = vmax.f32 %v7469_v58, 0.0  ;;  %v7451_v0 = vmul.f32 %v16663_v5, %v16624_v54 }
 0x490   :  { %8429 = vst [vmem:[#allocation3 + $0x4] sm:$0x7] %v8428_v30  ;;  %v7592_v35 = vrot.slane %v7578_v43, %v15058_v2  ;;  %v7593_v60 = vcombine.high %v7585_v12, %v7585_v12  ;;  %v13040_v49 = vrot.slane %v7585_v12, 9  ;;  %v7467_v56 = vadd.f32 %v16629_v11, %v7446_v52 }
 0x491   :  { %v7629_v63 = vcombine.high %v7485_v55, %v7485_v55  ;;  %v7636_v16 = vrot.slane %v7485_v55, %v15058_v2  ;;  %v7472_v6 = vadd.f32 %v16629_v11, %v7451_v0  ;;  %v16717_v19 = vmul.f32 %v16624_v54, %v16666_v39 }
 0x492   :  { %v7594_v26 = vcombine.high %v7592_v35, %v7592_v35  ;;  %v13041_v40 = vrot.slane %v7593_v60, 9  ;;  %v13042_v36 = vrot.slane %v7592_v35, 9  ;;  %v8054_v5 = vmax.f32 %v7585_v12, %v13040_v49 }
 0x493   :  { %v7643_v45 = vrot.slane %v7629_v63, %v15058_v2  ;;  %v7644_v32 = vcombine.high %v7636_v16, %v7636_v16  ;;  %v13052_v27 = vrot.slane %v7636_v16, 9  ;;  %v7483_v57 = vmax.f32 %v7467_v56, 0.0 }
 0x494   :  { %v13043_v47 = vrot.slane %v7594_v26, 9  ;;  %v8055_v42 = vmax.f32 %v7593_v60, %v13041_v40  ;;  %v8056_v41 = vmax.f32 %v7592_v35, %v13042_v36  ;;  %v7488_v34 = vmax.f32 %v7472_v6, 0.0 }
 0x495   :  { %v7645_v28 = vcombine.high %v7643_v45, %v7643_v45  ;;  %v13053_v21 = vrot.slane %v7644_v32, 9  ;;  %v13054_v24 = vrot.slane %v7643_v45, 9  ;;  %v8066_v50 = vmax.f32 %v7636_v16, %v13052_v27 }
 0x496   :  { %v8057_v22 = vmax.f32 %v7594_v26, %v13043_v47  ;;  %v7595_v39 = vcombine.high %v7483_v57, %v7483_v57  ;;  %v7602_v44 = vrot.slane %v7483_v57, %v15058_v2  ;;  %v7680_v13 = vcombine.high %v7488_v34, %v7488_v34 }
 0x497   :  { %v13055_v25 = vrot.slane %v7645_v28, 9  ;;  %v8067_v51 = vmax.f32 %v7644_v32, %v13053_v21  ;;  %v8068_v17 = vmax.f32 %v7643_v45, %v13054_v24  ;;  %v8114_v9 = vmax.f32 %v8062_v18, %v8066_v50 }
 0x498   :  { %v7609_v33 = vrot.slane %v7595_v39, %v15058_v2  ;;  %v7610_v1 = vcombine.high %v7602_v44, %v7602_v44  ;;  %v13044_v53 = vrot.slane %v7602_v44, 9  ;;  %v7687_v15 = vrot.slane %v7488_v34, %v15058_v2 }
 0x499   :  { %v8069_v37 = vmax.f32 %v7645_v28, %v13055_v25  ;;  %v8115_v58 = vmax.f32 %v8063_v14, %v8067_v51  ;;  %v8116_v43 = vmax.f32 %v8064_v23, %v8068_v17  ;;  %v13657_v12 = vpack.c.bf16 %v8114_v9, %v8114_v9 }
 0x49a   :  { %v7611_v52 = vcombine.high %v7609_v33, %v7609_v33  ;;  %v13045_v30 = vrot.slane %v7610_v1, 9  ;;  %v13046_v55 = vrot.slane %v7609_v33, 9  ;;  %v8058_v0 = vmax.f32 %v7602_v44, %v13044_v53 }
 0x49b   :  { %v8117_v35 = vmax.f32 %v8065_v46, %v8069_v37  ;;  %v13658_v60 = vpack.c.bf16 %v8115_v58, %v8115_v58  ;;  %v13659_v49 = vpack.c.bf16 %v8116_v43, %v8116_v43  ;;  %v8332_v56 = vunpack.c.l.b16 %v13657_v12 }
 0x49c   :  { %v13047_v63 = vrot.slane %v7611_v52, 9  ;;  %v8059_v18 = vmax.f32 %v7610_v1, %v13045_v30  ;;  %v8060_v16 = vmax.f32 %v7609_v33, %v13046_v55  ;;  %v8110_v6 = vmax.f32 %v8054_v5, %v8058_v0  ;;  %v8436_v33 = vld [vmem:[#allocation3 + $0x10] sm:$0x7] }
 0x49d   :  { %v13660_v26 = vpack.c.bf16 %v8117_v35, %v8117_v35  ;;  %v8333_v40 = vunpack.c.l.b16 %v13658_v60  ;;  %v8334_v36 = vunpack.c.l.b16 %v13659_v49  ;;  %v8373_v45 = vrot.slane %v8332_v56, 7 }
 0x49e   :  { %v8061_v32 = vmax.f32 %v7611_v52, %v13047_v63  ;;  %v8111_v14 = vmax.f32 %v8055_v42, %v8059_v18  ;;  %v8112_v23 = vmax.f32 %v8056_v41, %v8060_v16  ;;  %v13653_v27 = vpack.c.bf16 %v8110_v6, %v8110_v6  ;;  %v8433_v6 = vld [vmem:[#allocation3 + $0xc] sm:$0x7] }
 0x49f   :  { %v8335_v57 = vunpack.c.l.b16 %v13660_v26  ;;  %v8374_v47 = vrot.slane %v8333_v40, 6  ;;  %v8376_v34 = vrot.slane %v8334_v36, 5  ;;  %v7694_v46 = vrot.slane %v7680_v13, %v15058_v2 }
 0x4a0   :  { %v8113_v28 = vmax.f32 %v8057_v22, %v8061_v32  ;;  %v13654_v21 = vpack.c.bf16 %v8111_v14, %v8111_v14  ;;  %v13655_v24 = vpack.c.bf16 %v8112_v23, %v8112_v23  ;;  %v8328_v50 = vunpack.c.l.b16 %v13653_v27 }
 0x4a1   :  { %v8375_v39 = vsel %vm4165_vm6, %v8374_v47, %v8373_v45  ;;  %v8378_v5 = vrot.slane %v8335_v57, 4  ;;  %v7695_v44 = vcombine.high %v7687_v15, %v7687_v15  ;;  %v7696_v25 = vcombine.high %v7694_v46, %v7694_v46 }
 0x4a2   :  { %v8377_v51 = vsel %vm4168_vm7, %v8376_v34, %v8375_v39  ;;  %v13656_v17 = vpack.c.bf16 %v8113_v28, %v8113_v28  ;;  %v8329_v42 = vunpack.c.l.b16 %v13654_v21  ;;  %v8330_v41 = vunpack.c.l.b16 %v13655_v24 }
 0x4a3   :  { %v8379_v9 = vsel %vm4171_vm8, %v8378_v5, %v8377_v51  ;;  %v8366_v1 = vrot.slane %v8328_v50, 7  ;;  %v13064_v53 = vrot.slane %v7687_v15, 9  ;;  %v13065_v13 = vrot.slane %v7695_v44, 9 }
 0x4a4   :  { %v8411_v22 = vpack.c.b16 %v8379_v9, %v8379_v9  ;;  %v8331_v37 = vunpack.c.l.b16 %v13656_v17  ;;  %v8367_v58 = vrot.slane %v8329_v42, 6  ;;  %v8369_v43 = vrot.slane %v8330_v41, 5 }
 0x4a5   :  { %v13066_v12 = vrot.slane %v7694_v46, 9  ;;  %v13067_v52 = vrot.slane %v7696_v25, 9  ;;  %v8078_v30 = vmax.f32 %v7687_v15, %v13064_v53  ;;  %v16727_v55 = vmax.f32 %v7695_v44, %v13065_v13 }
 0x4a6   :  { %v8437_v0 = vsel %vm16690_vm0, %v8411_v22, %v8436_v33  ;;  %v8368_v35 = vsel %vm4165_vm6, %v8367_v58, %v8366_v1  ;;  %v8371_v60 = vrot.slane %v8331_v37, 4  ;;  %v7470_v49 = vadd.f32 %v16629_v11, %v16717_v19 }
 0x4a7   :  { %8438 = vst [vmem:[#allocation3 + $0x10] sm:$0x7] %v8437_v0  ;;  %v8370_v56 = vsel %vm4168_vm7, %v8369_v43, %v8368_v35  ;;  %v8080_v63 = vmax.f32 %v7694_v46, %v13066_v12  ;;  %v16735_v18 = vmax.f32 %v7696_v25, %v13067_v52  ;;  %v7452_v15 = vmul.f32 %v16669_v4, %v16624_v54 }
 0x4a8   :  { %v8372_v16 = vsel %vm4171_vm8, %v8371_v60, %v8370_v56  ;;  %v7486_v26 = vmax.f32 %v7470_v49, 0.0  ;;  %v7450_v40 = vmul.f32 %v16624_v54, %v16672_v3  ;;  %v7455_v36 = vmul.f32 %v16674_v7, %v16624_v54 }
 0x4a9   :  { %v8410_v19 = vpack.c.b16 %v8372_v16, %v8372_v16  ;;  %v7473_v45 = vadd.f32 %v16629_v11, %v7452_v15  ;;  %v7453_v32 = vmul.f32 %v16624_v54, %v16676_v20  ;;  %v7456_v14 = vmul.f32 %v16678_v8, %v16624_v54 }
 0x4aa   :  { %v7646_v4 = vcombine.high %v7486_v26, %v7486_v26  ;;  %v7653_v23 = vrot.slane %v7486_v26, %v15058_v2  ;;  %v7471_v27 = vadd.f32 %v16629_v11, %v7450_v40  ;;  %v7476_v57 = vadd.f32 %v16629_v11, %v7455_v36 }
 0x4ab   :  { %v8434_v3 = vsel %vm16690_vm0, %v8410_v19, %v8433_v6  ;;  %v7489_v7 = vmax.f32 %v7473_v45, 0.0  ;;  %v7474_v47 = vadd.f32 %v16629_v11, %v7453_v32  ;;  %v16756_v34 = vadd.f32 %v16629_v11, %v7456_v14 }
 0x4ac   :  { %8435 = vst [vmem:[#allocation3 + $0xc] sm:$0x7] %v8434_v3  ;;  %v7660_v20 = vrot.slane %v7646_v4, %v15058_v2  ;;  %v7661_v8 = vcombine.high %v7653_v23, %v7653_v23  ;;  %v13056_v46 = vrot.slane %v7653_v23, 9  ;;  %v7487_v28 = vmax.f32 %v7471_v27, 0.0 }
 0x4ad   :  { %v7697_v21 = vcombine.high %v7489_v7, %v7489_v7  ;;  %v7704_v24 = vrot.slane %v7489_v7, %v15058_v2  ;;  %v16760_v50 = vmax.f32 %v7476_v57, 0.0  ;;  %v16762_v39 = vmax.f32 %v7474_v47, 0.0 }
 0x4ae   :  { %v7662_v5 = vcombine.high %v7660_v20, %v7660_v20  ;;  %v13057_v44 = vrot.slane %v7661_v8, 9  ;;  %v13058_v25 = vrot.slane %v7660_v20, 9  ;;  %v8070_v51 = vmax.f32 %v7653_v23, %v13056_v46 }
 0x4af   :  { %v7711_v17 = vrot.slane %v7697_v21, %v15058_v2  ;;  %v7712_v42 = vcombine.high %v7704_v24, %v7704_v24  ;;  %v13068_v41 = vrot.slane %v7704_v24, 9  ;;  %v7663_v9 = vcombine.high %v7487_v28, %v7487_v28 }
 0x4b0   :  { %v13059_v33 = vrot.slane %v7662_v5, 9  ;;  %v8071_v1 = vmax.f32 %v7661_v8, %v13057_v44  ;;  %v8072_v53 = vmax.f32 %v7660_v20, %v13058_v25  ;;  %v7670_v13 = vrot.slane %v7487_v28, %v15058_v2 }
 0x4b1   :  { %v7713_v22 = vcombine.high %v7711_v17, %v7711_v17  ;;  %v13069_v37 = vrot.slane %v7712_v42, 9  ;;  %v13070_v58 = vrot.slane %v7711_v17, 9  ;;  %v8082_v43 = vmax.f32 %v7704_v24, %v13068_v41 }
 0x4b2   :  { %v8073_v12 = vmax.f32 %v7662_v5, %v13059_v33  ;;  %v7677_v52 = vrot.slane %v7663_v9, %v15058_v2  ;;  %v7678_v0 = vcombine.high %v7670_v13, %v7670_v13  ;;  %v13060_v35 = vrot.slane %v7670_v13, 9 }
 0x4b3   :  { %v13071_v60 = vrot.slane %v7713_v22, 9  ;;  %v8083_v49 = vmax.f32 %v7712_v42, %v13069_v37  ;;  %v8084_v56 = vmax.f32 %v7711_v17, %v13070_v58  ;;  %v8122_v15 = vmax.f32 %v8078_v30, %v8082_v43  ;;  %v8442_v43 = vld [vmem:[#allocation3 + $0x20] sm:$0x7] }
 0x4b4   :  { %v7679_v16 = vcombine.high %v7677_v52, %v7677_v52  ;;  %v13061_v6 = vrot.slane %v7678_v0, 9  ;;  %v13062_v26 = vrot.slane %v7677_v52, 9  ;;  %v8074_v40 = vmax.f32 %v7670_v13, %v13060_v35 }
 0x4b5   :  { %v8085_v36 = vmax.f32 %v7713_v22, %v13071_v60  ;;  %v8123_v19 = vmax.f32 %v16727_v55, %v8083_v49  ;;  %v8124_v45 = vmax.f32 %v8080_v63, %v8084_v56  ;;  %v13665_v32 = vpack.c.bf16 %v8122_v15, %v8122_v15  ;;  %v16777_v15 = vld.sshfl [vmem:[#allocation3 + $0x18] sm:$0x13 pattern:$0x76325410] }
 0x4b6   :  { %v13063_v14 = vrot.slane %v7679_v16, 9  ;;  %v8075_v4 = vmax.f32 %v7678_v0, %v13061_v6  ;;  %v8076_v23 = vmax.f32 %v7677_v52, %v13062_v26  ;;  %v8118_v27 = vmax.f32 %v8070_v51, %v8074_v40 }
 0x4b7   :  { %v8125_v57 = vmax.f32 %v16735_v18, %v8085_v36  ;;  %v13666_v3 = vpack.c.bf16 %v8123_v19, %v8123_v19  ;;  %v13667_v7 = vpack.c.bf16 %v8124_v45, %v8124_v45  ;;  %v8340_v47 = vunpack.c.l.b16 %v13665_v32 }
 0x4b8   :  { %v8077_v20 = vmax.f32 %v7679_v16, %v13063_v14  ;;  %v8119_v30 = vmax.f32 %v8071_v1, %v8075_v4  ;;  %v8120_v8 = vmax.f32 %v8072_v53, %v8076_v23  ;;  %v13661_v46 = vpack.c.bf16 %v8118_v27, %v8118_v27  ;;  %v8439_v4 = vld [vmem:[#allocation3 + $0x1c] sm:$0x7] }
 0x4b9   :  { %v13668_v28 = vpack.c.bf16 %v8125_v57, %v8125_v57  ;;  %v8341_v21 = vunpack.c.l.b16 %v13666_v3  ;;  %v8342_v24 = vunpack.c.l.b16 %v13667_v7  ;;  %v8387_v5 = vrot.slane %v8340_v47, 7 }
 0x4ba   :  { %v8121_v55 = vmax.f32 %v8073_v12, %v8077_v20  ;;  %v13662_v63 = vpack.c.bf16 %v8119_v30, %v8119_v30  ;;  %v13663_v44 = vpack.c.bf16 %v8120_v8, %v8120_v8  ;;  %v8336_v25 = vunpack.c.l.b16 %v13661_v46 }
 0x4bb   :  { %v8343_v17 = vunpack.c.l.b16 %v13668_v28  ;;  %v8388_v42 = vrot.slane %v8341_v21, 6  ;;  %v8390_v51 = vrot.slane %v8342_v24, 5  ;;  %v7748_v18 = vcombine.high %v16760_v50, %v16760_v50 }
 0x4bc   :  { %v13664_v41 = vpack.c.bf16 %v8121_v55, %v8121_v55  ;;  %v8337_v9 = vunpack.c.l.b16 %v13662_v63  ;;  %v8338_v33 = vunpack.c.l.b16 %v13663_v44  ;;  %v8380_v1 = vrot.slane %v8336_v25, 7  ;;  %v16802_v55 = vld.sshfl [vmem:[#allocation3 + $0x4] sm:$0x13 pattern:$0x76325410] }
 0x4bd   :  { %v8389_v53 = vsel %vm4165_vm6, %v8388_v42, %v8387_v5  ;;  %v8392_v13 = vrot.slane %v8343_v17, 4  ;;  %v7755_v22 = vrot.slane %v16760_v50, %v15058_v2  ;;  %v7762_v37 = vrot.slane %v7748_v18, %v15058_v2 }
 0x4be   :  { %v8391_v58 = vsel %vm4168_vm7, %v8390_v51, %v8389_v53  ;;  %v8339_v12 = vunpack.c.l.b16 %v13664_v41  ;;  %v8381_v52 = vrot.slane %v8337_v9, 6  ;;  %v8383_v0 = vrot.slane %v8338_v33, 5 }
 0x4bf   :  { %v8393_v35 = vsel %vm4171_vm8, %v8392_v13, %v8391_v58  ;;  %v7763_v60 = vcombine.high %v7755_v22, %v7755_v22  ;;  %v7764_v49 = vcombine.high %v7762_v37, %v7762_v37  ;;  %v13080_v56 = vrot.slane %v7755_v22, 9 }
 0x4c0   :  { %v8413_v16 = vpack.c.b16 %v8393_v35, %v8393_v35  ;;  %v8382_v6 = vsel %vm4165_vm6, %v8381_v52, %v8380_v1  ;;  %v8385_v26 = vrot.slane %v8339_v12, 4  ;;  %v13082_v50 = vrot.slane %v7762_v37, 9 }
 0x4c1   :  { %v8384_v40 = vsel %vm4168_vm7, %v8383_v0, %v8382_v6  ;;  %v13081_v36 = vrot.slane %v7763_v60, 9  ;;  %v16784_v19 = vrot.slane %v8562_v29, 2  ;;  %v8567_v45 = vrot.slane %v16647_v31, 7 }
 0x4c2   :  { %v8443_v32 = vsel %vm16690_vm0, %v8413_v16, %v8442_v43  ;;  %v8386_v14 = vsel %vm4171_vm8, %v8385_v26, %v8384_v40  ;;  %v7714_v23 = vcombine.high %v16762_v39, %v16762_v39  ;;  %v8612_v27 = vshrl.u32 %v16777_v15, 16 }
 0x4c3   :  { %8444 = vst [vmem:[#allocation3 + $0x20] sm:$0x7] %v8443_v32  ;;  %v8412_v57 = vpack.c.b16 %v8386_v14, %v8386_v14  ;;  %v13083_v3 = vrot.slane %v7764_v49, 9  ;;  %v8094_v7 = vmax.f32 %v7755_v22, %v13080_v56  ;;  %v7721_v61 = vrot.slane %v16762_v39, %v15058_v2 }
 0x4c4   :  { %v8096_v62 = vmax.f32 %v7762_v37, %v13082_v50  ;;  %v7728_v29 = vrot.slane %v7714_v23, %v15058_v2  ;;  %v7493_v47 = vmax.f32 %v16756_v34, 0.0  ;;  %v7454_v20 = vmul.f32 %v16624_v54, %v16682_v59 }
 0x4c5   :  { %v8440_v30 = vsel %vm16690_vm0, %v8412_v57, %v8439_v4  ;;  %v8095_v8 = vmax.f32 %v7763_v60, %v13081_v36  ;;  %v7729_v46 = vcombine.high %v7721_v61, %v7721_v61  ;;  %v13072_v28 = vrot.slane %v7721_v61, 9 }
 0x4c6   :  { %8441 = vst [vmem:[#allocation3 + $0x1c] sm:$0x7] %v8440_v30  ;;  %v7730_v21 = vcombine.high %v7728_v29, %v7728_v29  ;;  %v13074_v24 = vrot.slane %v7728_v29, 9  ;;  %v7765_v5 = vcombine.high %v7493_v47, %v7493_v47  ;;  %v7772_v39 = vrot.slane %v7493_v47, %v15058_v2 }
 0x4c7   :  { %v8097_v63 = vmax.f32 %v7764_v49, %v13083_v3  ;;  %v13073_v44 = vrot.slane %v7729_v46, 9  ;;  %v8086_v34 = vmax.f32 %v7721_v61, %v13072_v28  ;;  %v7475_v25 = vadd.f32 %v16629_v11, %v7454_v20 }
 0x4c8   :  { %v13075_v54 = vrot.slane %v7730_v21, 9  ;;  %v8088_v59 = vmax.f32 %v7728_v29, %v13074_v24  ;;  %v7779_v17 = vrot.slane %v7765_v5, %v15058_v2  ;;  %v7780_v42 = vcombine.high %v7772_v39, %v7772_v39 }
 0x4c9   :  { %v8087_v51 = vmax.f32 %v7729_v46, %v13073_v44  ;;  %v13084_v18 = vrot.slane %v7772_v39, 9  ;;  %v7491_v41 = vmax.f32 %v7475_v25, 0.0  ;;  %v8570_v9 = vshrl.u32 %v16802_v55, 16 }
 0x4ca   :  { %v8089_v33 = vmax.f32 %v7730_v21, %v13075_v54  ;;  %v7781_v1 = vcombine.high %v7779_v17, %v7779_v17  ;;  %v13085_v53 = vrot.slane %v7780_v42, 9  ;;  %v13086_v13 = vrot.slane %v7779_v17, 9 }
 0x4cb   :  { %v8098_v22 = vmax.f32 %v7772_v39, %v13084_v18  ;;  %v7731_v37 = vcombine.high %v7491_v41, %v7491_v41  ;;  %v7738_v11 = vrot.slane %v7491_v41, %v15058_v2  ;;  %v16808_v58 = vrot.slane %v8570_v9, 6 }
 0x4cc   :  { %v13087_v43 = vrot.slane %v7781_v1, 9  ;;  %v8099_v12 = vmax.f32 %v7780_v42, %v13085_v53  ;;  %v8100_v52 = vmax.f32 %v7779_v17, %v13086_v13  ;;  %v8573_v0 = vshll.u32 %v16802_v55, 16  ;;  %v13130_v42 = vld.sshfl [vmem:[#allocation3 + $0x8] sm:$0x13 pattern:$0x76325410] }
 0x4cd   :  { %v8130_v35 = vmax.f32 %v8094_v7, %v8098_v22  ;;  %v7745_v60 = vrot.slane %v7731_v37, %v15058_v2  ;;  %v7746_v49 = vcombine.high %v7738_v11, %v7738_v11  ;;  %v13076_v56 = vrot.slane %v7738_v11, 9  ;;  %v13131_v22 = vld.sshfl [vmem:[#allocation3 + $0xc] sm:$0x13 pattern:$0x76325410] }
 0x4ce   :  { %v8101_v16 = vmax.f32 %v7781_v1, %v13087_v43  ;;  %v8131_v6 = vmax.f32 %v8095_v8, %v8099_v12  ;;  %v8132_v26 = vmax.f32 %v8096_v62, %v8100_v52  ;;  %v16812_v50 = vrot.slane %v8573_v0, 7 }
 0x4cf   :  { %v13673_v40 = vpack.c.bf16 %v8130_v35, %v8130_v35  ;;  %v7747_v36 = vcombine.high %v7745_v60, %v7745_v60  ;;  %v13077_v32 = vrot.slane %v7746_v49, 9  ;;  %v13078_v14 = vrot.slane %v7745_v60, 9 }
 0x4d0   :  { %v8133_v4 = vmax.f32 %v8097_v63, %v8101_v16  ;;  %v13674_v23 = vpack.c.bf16 %v8131_v6, %v8131_v6  ;;  %v13675_v57 = vpack.c.bf16 %v8132_v26, %v8132_v26  ;;  %v8090_v3 = vmax.f32 %v7738_v11, %v13076_v56  ;;  %v8448_v11 = vld [vmem:[#allocation3 + $0x28] sm:$0x7] }
 0x4d1   :  { %v8348_v7 = vunpack.c.l.b16 %v13673_v40  ;;  %v13079_v61 = vrot.slane %v7747_v36, 9  ;;  %v8091_v29 = vmax.f32 %v7746_v49, %v13077_v32  ;;  %v8092_v47 = vmax.f32 %v7745_v60, %v13078_v14 }
 0x4d2   :  { %v13676_v20 = vpack.c.bf16 %v8133_v4, %v8133_v4  ;;  %v8349_v30 = vunpack.c.l.b16 %v13674_v23  ;;  %v8350_v46 = vunpack.c.l.b16 %v13675_v57  ;;  %v8126_v8 = vmax.f32 %v8086_v34, %v8090_v3  ;;  %v13133_v23 = vld.sshfl [vmem:[#allocation3 + $0x1c] sm:$0x13 pattern:$0x76325410] }
 0x4d3   :  { %v8401_v62 = vrot.slane %v8348_v7, 7  ;;  %v8093_v28 = vmax.f32 %v7747_v36, %v13079_v61  ;;  %v8127_v21 = vmax.f32 %v8087_v51, %v8091_v29  ;;  %v8128_v24 = vmax.f32 %v8088_v59, %v8092_v47  ;;  %v8445_v7 = vld [vmem:[#allocation3 + $0x24] sm:$0x7] }
 0x4d4   :  { %v8351_v5 = vunpack.c.l.b16 %v13676_v20  ;;  %v8402_v39 = vrot.slane %v8349_v30, 6  ;;  %v8404_v44 = vrot.slane %v8350_v46, 5  ;;  %v13669_v63 = vpack.c.bf16 %v8126_v8, %v8126_v8  ;;  %v13134_v8 = vld.sshfl [vmem:[#allocation3 + $0x20] sm:$0x13 pattern:$0x76325410] }
 0x4d5   :  { %v8129_v25 = vmax.f32 %v8089_v33, %v8093_v28  ;;  %v13670_v54 = vpack.c.bf16 %v8127_v21, %v8127_v21  ;;  %v13671_v17 = vpack.c.bf16 %v8128_v24, %v8128_v24  ;;  %v8615_v34 = vshll.u32 %v16777_v15, 16 }
 0x4d6   :  { %v8403_v41 = vsel %vm4165_vm6, %v8402_v39, %v8401_v62  ;;  %v8406_v51 = vrot.slane %v8351_v5, 4  ;;  %v8344_v59 = vunpack.c.l.b16 %v13669_v63  ;;  %v8499_v9 = vcombine.high %v16802_v55, %v16802_v55 }
 0x4d7   :  { %v8405_v33 = vsel %vm4168_vm7, %v8404_v44, %v8403_v41  ;;  %v13672_v1 = vpack.c.bf16 %v8129_v25, %v8129_v25  ;;  %v8345_v53 = vunpack.c.l.b16 %v13670_v54  ;;  %v8346_v13 = vunpack.c.l.b16 %v13671_v17 }
 0x4d8   :  { %v8407_v37 = vsel %vm4171_vm8, %v8406_v51, %v8405_v33  ;;  %v8394_v43 = vrot.slane %v8344_v59, 7  ;;  %v8507_v12 = vcombine.high %v13130_v42, %v13130_v42  ;;  %v8576_v52 = vor.u32 %v16812_v50, %v16808_v58 }
 0x4d9   :  { %v8415_v0 = vpack.c.b16 %v8407_v37, %v8407_v37  ;;  %v8347_v55 = vunpack.c.l.b16 %v13672_v1  ;;  %v8395_v35 = vrot.slane %v8345_v53, 6  ;;  %v8397_v60 = vrot.slane %v8346_v13, 5 }
 0x4da   :  { %v8515_v49 = vcombine.high %v13131_v22, %v13131_v22  ;;  %v8579_v56 = vshll.u32 %v8499_v9, 16  ;;  %v8584_v16 = vshrl.u32 %v13130_v42, 16  ;;  %v8587_v6 = vshll.u32 %v13130_v42, 16 }
 0x4db   :  { %v8449_v26 = vsel %vm16690_vm0, %v8415_v0, %v8448_v11  ;;  %v8396_v40 = vsel %vm4165_vm6, %v8395_v35, %v8394_v43  ;;  %v8399_v36 = vrot.slane %v8347_v55, 4  ;;  %v8598_v58 = vshrl.u32 %v13131_v22, 16 }
 0x4dc   :  { %8450 = vst [vmem:[#allocation3 + $0x28] sm:$0x7] %v8449_v26  ;;  %v8398_v50 = vsel %vm4168_vm7, %v8397_v60, %v8396_v40  ;;  %v8586_v14 = vrot.slane %v8584_v16, 6  ;;  %v8589_v4 = vrot.slane %v8587_v6, 7  ;;  %v8523_v57 = vcombine.high %v16777_v15, %v16777_v15 }
 0x4dd   :  { %v8400_v3 = vsel %vm4171_vm8, %v8399_v36, %v8398_v50  ;;  %v8577_v61 = vrot.slane %v8576_v52, 2  ;;  %v8600_v29 = vrot.slane %v8598_v58, 6  ;;  %v8601_v47 = vshll.u32 %v13131_v22, 16 }
 0x4de   :  { %v8414_v20 = vpack.c.b16 %v8400_v3, %v8400_v3  ;;  %v8568_v30 = vsel %vm16835_vm14, %v16784_v19, %v8567_v45  ;;  %v8590_v46 = vor.u32 %v8589_v4, %v8586_v14  ;;  %v8614_v62 = vrot.slane %v8612_v27, 6 }
 0x4df   :  { %v8581_v28 = vrot.slane %v8579_v56, 7  ;;  %v8593_v21 = vshll.u32 %v8507_v12, 16  ;;  %v8603_v24 = vrot.slane %v8601_v47, 7  ;;  %v8607_v5 = vshll.u32 %v8515_v49, 16 }
 0x4e0   :  { %v8446_v39 = vsel %vm16690_vm0, %v8414_v20, %v8445_v7  ;;  %v8617_v44 = vrot.slane %v8615_v34, 7  ;;  %v8621_v63 = vshll.u32 %v8523_v57, 16  ;;  %v8626_v25 = vshrl.u32 %v13133_v23, 16 }
 0x4e1   :  { %8447 = vst [vmem:[#allocation3 + $0x24] sm:$0x7] %v8446_v39  ;;  %v16854_v31 = vsel %vm16835_vm14, %v8577_v61, %v8581_v28  ;;  %v8591_v19 = vrot.slane %v8590_v46, 2  ;;  %v8604_v45 = vor.u32 %v8603_v24, %v8600_v29  ;;  %v8629_v54 = vshll.u32 %v13133_v23, 16 }
 0x4e2   :  { %v8531_v15 = vcombine.high %v13133_v23, %v13133_v23  ;;  %v8628_v27 = vrot.slane %v8626_v25, 6  ;;  %v8640_v17 = vshrl.u32 %v13134_v8, 16  ;;  %v8643_v42 = vshll.u32 %v13134_v8, 16  ;;  %v14720_v25 = vld [vmem:[%s17501_s2 + $0x128] sm:$0xff]  }
 0x4e3   :  { %v8595_v18 = vrot.slane %v8593_v21, 7  ;;  %v8605_v41 = vrot.slane %v8604_v45, 2  ;;  %v8609_v51 = vrot.slane %v8607_v5, 7  ;;  %v8631_v10 = vrot.slane %v8629_v54, 7 }
 0x4e4   :  { %v8675_v34 = vcombine.low %v8568_v30, %v16854_v31  ;;  %v8618_v59 = vor.u32 %v8617_v44, %v8614_v62  ;;  %v8642_v9 = vrot.slane %v8640_v17, 6  ;;  %v8645_v33 = vrot.slane %v8643_v42, 7  ;;  %v14809_v29 = vld.sshfl [vmem:[#allocation3 + $0x8] sm:$0xf pattern:$0x76325410] }
 0x4e5   :  { %v16859_v1 = vsel %vm16835_vm14, %v8591_v19, %v8595_v18  ;;  %v16863_v53 = vsel %vm16835_vm14, %v8605_v41, %v8609_v51  ;;  %v8632_v13 = vor.u32 %v8631_v10, %v8628_v27  ;;  %v8635_v37 = vshll.u32 %v8531_v15, 16  ;;  %v14810_v46 = vld.sshfl [vmem:[#allocation3] sm:$0xf pattern:$0x76325410]  ;;  %v14721_v10 = vld [vmem:[%s17501_s2 + $0x130] sm:$0xff]  }
 0x4e6   :  { %v8676_v22 = vcombine.low %v16859_v1, %v16863_v53  ;;  %v8539_v11 = vcombine.high %v13134_v8, %v13134_v8  ;;  %v8623_v43 = vrot.slane %v8621_v63, 7  ;;  %v8683_v12 = vrot.slane %v8675_v34, %v15058_v2  ;;  %v13156_v8 = vld.sshfl [vmem:[#allocation3] sm:$0x12 pattern:$0x76325410] }
 0x4e7   :  { %v8619_v55 = vrot.slane %v8618_v59, 2  ;;  %v8646_v35 = vor.u32 %v8645_v33, %v8642_v9  ;;  %v8633_v49 = vrot.slane %v8632_v13, 2  ;;  %v8637_v26 = vrot.slane %v8635_v37, 7  ;;  %v14808_v42 = vld [vmem:[%s17501_s2 + $0x120] sm:$0xff]  }
 0x4e8   :  { %v16869_v52 = vrot.slane %v8676_v22, %v15058_v2  ;;  %v13135_v0 = vld.sshfl [vmem:[#allocation3 + $0x24] sm:$0x13 pattern:$0x76325410]  ;;  %v8649_v40 = vshll.u32 %v8539_v11, 16  ;;  %vm8989_vm7 = vcmask 1040384   ;;  %v8932_v19 = vcombine.high %v13156_v8, %v13156_v8 }
 0x4e9   :  { %v8547_v60 = vcombine.high %v13135_v0, %v13135_v0  ;;  %v8654_v56 = vshrl.u32 %v13135_v0, 16  ;;  %v8657_v16 = vshll.u32 %v13135_v0, 16  ;;  %v8624_v14 = vsel %vm16835_vm14, %v8619_v55, %v8623_v43  ;;  %v13159_v62 = vld.sshfl [vmem:[#allocation3 + $0xc] sm:$0x12 pattern:$0x76325410]  ;;  %vm8991_vm15 = vmor %vm8989_vm7, %vm4165_vm6 }
 0x4ea   :  { %v8691_v6 = vcombine.low %v8683_v12, %v16869_v52  ;;  %v16877_v4 = vsel %vm16835_vm14, %v8633_v49, %v8637_v26  ;;  %v8647_v23 = vrot.slane %v8646_v35, 2  ;;  %v8651_v3 = vrot.slane %v8649_v40, 7  ;;  %v13158_v21 = vld.sshfl [vmem:[#allocation3 + $0x8] sm:$0x12 pattern:$0x76325410]  ;;  %vm8993_vm0 = vmor %vm8991_vm15, %vm4171_vm8 }
 0x4eb   :  { %v8656_v36 = vrot.slane %v8654_v56, 6  ;;  %v8659_v58 = vrot.slane %v8657_v16, 7  ;;  %v8663_v50 = vshll.u32 %v8547_v60, 16  ;;  %v8692_v47 = vcombine.low %v8624_v14, %v16877_v4  ;;  %vm16909_vm8 = vmor %vm8993_vm0, %vm4177_vm10  ;;  %v14722_v11 = vld [vmem:[%s17501_s2 + $0x138] sm:$0xff]   ;;  %v14729_v13 = vld [vmem:[%s17501_s2 + $0x180] sm:$0xff]  }
 0x4ec   :  { %14210 = vmatprep.mubr.msk.bf16.mxu0 %vm4862_vm1, %v8691_v6  ;;  %v16882_v20 = vsel %vm16835_vm14, %v8647_v23, %v8651_v3  ;;  %v13157_v24 = vld.sshfl [vmem:[#allocation3 + $0x4] sm:$0x12 pattern:$0x76325410]  ;;  %v8956_v44 = vcombine.high %v13159_v62, %v13159_v62  ;;  %v8948_v54 = vcombine.high %v13158_v21, %v13158_v21  ;;  %v8812_v27 = vcombine.low %v14810_v46, %v14809_v29 }
 0x4ed   :  { %v8660_v57 = vor.u32 %v8659_v58, %v8656_v36  ;;  %v8665_v61 = vrot.slane %v8663_v50, 7  ;;  %v8700_v5 = vrot.slane %v8692_v47, %v15058_v2  ;;  %v8940_v45 = vcombine.high %v13157_v24, %v13157_v24  ;;  %v13207_v15 = vld.sshfl [vmem:[#allocation3 + $0x28] sm:$0x13 pattern:$0x76325410]  ;;  %v14725_v29 = vld [vmem:[%s17501_s2 + $0x160] sm:$0xff]  }
 0x4ee   :  { %v9010_v17 = vrot.slane %v8956_v44, 7  ;;  %v13164_v18 = vrot.slane %v13156_v8, 9  ;;  %v9373_v41 = vcombine.high %v13207_v15, %v13207_v15  ;;  %v9473_v51 = vshrl.u32 %v13207_v15, 16 }
 0x4ef   :  { %v8661_v7 = vrot.slane %v8660_v57, 2  ;;  %v8998_v34 = vrot.slane %v8932_v19, 7  ;;  %v9002_v59 = vrot.slane %v8940_v45, 7  ;;  %v9006_v9 = vrot.slane %v8948_v54, 7 }
 0x4f0   :  { %v13167_v33 = vrot.slane %v13159_v62, 9  ;;  %v9475_v22 = vrot.slane %v9473_v51, 6  ;;  %v9476_v37 = vshll.u32 %v13207_v15, 16  ;;  %v13165_v12 = vrot.slane %v13157_v24, 9 }
 0x4f1   :  { %v16886_v30 = vsel %vm16835_vm14, %v8661_v7, %v8665_v61  ;;  %v14811_v43 = vld.sshfl [vmem:[#allocation3 + $0x20] sm:$0xf pattern:$0x76325410]  ;;  %v13166_v0 = vrot.slane %v13158_v21, 9  ;;  %v9511_v35 = vcombine.low %v16877_v4, %v16882_v20  ;;  %v9482_v56 = vshll.u32 %v9373_v41, 16 }
 0x4f2   :  { %v8693_v28 = vcombine.low %v16882_v20, %v16886_v30  ;;  %v16918_v55 = vsel %vm16909_vm8, %v13167_v33, %v9010_v17  ;;  %v13163_v60 = vld.sshfl [vmem:[#allocation3 + $0x24] sm:$0x12 pattern:$0x76325410]  ;;  %v9478_v49 = vrot.slane %v9476_v37, 7  ;;  %v8999_v6 = vsel %vm16909_vm8, %v13164_v18, %v8998_v34 }
 0x4f3   :  { %v14812_v16 = vld.sshfl [vmem:[#allocation3 + $0x18] sm:$0xf pattern:$0x76325410]  ;;  %v16926_v26 = vsel %vm16909_vm8, %v13165_v12, %v9002_v59  ;;  %v16930_v40 = vsel %vm16909_vm8, %v13166_v0, %v9006_v9  ;;  %v8988_v4 = vcombine.high %v13163_v60, %v13163_v60  ;;  %v9484_v7 = vrot.slane %v9482_v56, 7  ;;  %v14727_v12 = vld [vmem:[%s17501_s2 + $0x170] sm:$0xff]  }
 0x4f4   :  { %v16892_v39 = vrot.slane %v8693_v28, %v15058_v2  ;;  %v16932_v36 = vld.sshfl [vmem:[#allocation3 + $0x18] sm:$0x12 pattern:$0x76325410]  ;;  %v9037_v58 = vcombine.low %v16930_v40, %v16918_v55  ;;  %v9479_v14 = vor.u32 %v9478_v49, %v9475_v22  ;;  %v9036_v57 = vcombine.low %v8999_v6, %v16926_v26 }
 0x4f5   :  { %v13162_v50 = vld.sshfl [vmem:[#allocation3 + $0x20] sm:$0x12 pattern:$0x76325410]  ;;  %v8964_v8 = vcombine.high %v16932_v36, %v16932_v36  ;;  %v9026_v21 = vrot.slane %v8988_v4, 7  ;;  %v8829_v44 = vcombine.low %v14812_v16, %v14811_v43  ;;  %v13171_v15 = vrot.slane %v13163_v60, 9 }
 0x4f6   :  { %v8708_v63 = vcombine.low %v8700_v5, %v16892_v39  ;;  %v13225_v23 = vld.sshfl [vmem:[#allocation3 + $0x10] sm:$0x12 pattern:$0x76325410]  ;;  %v9480_v3 = vrot.slane %v9479_v14, 2  ;;  %v8980_v20 = vcombine.high %v13162_v50, %v13162_v50  ;;  %v16941_v46 = vrot.slane %v9037_v58, %v15058_v2 }
 0x4f7   :  { %v13229_v61 = vld.sshfl [vmem:[#allocation3 + $0x28] sm:$0x12 pattern:$0x76325410]  ;;  %v9658_v28 = vcombine.high %v13225_v23, %v13225_v23  ;;  %v13168_v18 = vrot.slane %v16932_v36, 9  ;;  %v9014_v41 = vrot.slane %v8964_v8, 7  ;;  %v16966_v34 = vsel %vm16909_vm8, %v13171_v15, %v9026_v21 }
 0x4f8   :  { %14211 = vmatmul.mubr.msk.bf16.vlgmr.msra.gmra.mrb[36].mxu0 %vm4862_vm1, %v8708_v63  ;;  %v13161_v47 = vld.sshfl [vmem:[#allocation3 + $0x1c] sm:$0x12 pattern:$0x76325410]  ;;  %v16947_v62 = vsel %vm16835_vm14, %v9480_v3, %v9484_v7  ;;  %v9690_v5 = vcombine.high %v13229_v61, %v13229_v61  ;;  %v9044_v63 = vrot.slane %v9036_v57, %v15058_v2  ;;  %v9022_v54 = vrot.slane %v8980_v20, 7 }
 0x4f9   :  { %14215 = vmatpush3.bf16.msra.mxu0 %v14808_v42  ;;  %14222 = vmatprep.mubr.msk.bf16.mxu0 %vm4862_vm1, %v8812_v27  ;;  %v9512_v24 = vcombine.low %v16886_v30, %v16947_v62  ;;  %v8972_v19 = vcombine.high %v13161_v47, %v13161_v47  ;;  %v13291_v45 = vld.sshfl [vmem:[#allocation3 + $0x14] sm:$0x12 pattern:$0x76325410]  ;;  %v16956_v27 = vrot.slane %v9511_v35, %v15058_v2  ;;  %v9705_v51 = vrot.slane %v9658_v28, 7  ;;  %v14728_v7 = vld [vmem:[%s17501_s2 + $0x178] sm:$0xff]  }
 0x4fa   :  { %14216 = vmatprep.subr.bf16.mxu0 %v14720_v25  ;;  %v13295_v30 = vld.sshfl [vmem:[#allocation3 + $0x2c] sm:$0x12 pattern:$0x76325410]  ;;  %v9052_v42 = vcombine.low %v9044_v63, %v16941_v46  ;;  %v9721_v33 = vrot.slane %v9690_v5, 7  ;;  %v13233_v37 = vrot.slane %v13225_v23, 9  ;;  %v9015_v23 = vsel %vm16909_vm8, %v13168_v18, %v9014_v41 }
 0x4fb   :  { %v16959_v17 = vrot.slane %v9512_v24, %v15058_v2  ;;  %v13203_v59 = vld.sshfl [vmem:[#allocation3 + $0x10] sm:$0x13 pattern:$0x76325410]  ;;  %v9018_v22 = vrot.slane %v8972_v19, 7  ;;  %v13299_v43 = vrot.slane %v13291_v45, 9  ;;  %v10386_v60 = vcombine.high %v13295_v30, %v13295_v30 }
 0x4fc   :  { %v13237_v35 = vrot.slane %v13229_v61, 9  ;;  %v13303_v49 = vrot.slane %v13295_v30, 9  ;;  %v13169_v56 = vrot.slane %v13161_v47, 9  ;;  %v16982_v6 = vsel %vm16909_vm8, %v13233_v37, %v9705_v51 }
 0x4fd   :  { %14217 = vmatpush3.bf16.msra.mxu0 %v14720_v25  ;;  %v14726_v25 = vld [vmem:[%s17501_s2 + $0x168] sm:$0xff]   ;;  %v9527_v9 = vcombine.low %v16956_v27, %v16959_v17  ;;  %v9417_v58 = vshrl.u32 %v13203_v59, 16  ;;  %v10417_v4 = vrot.slane %v10386_v60, 7  ;;  %vm10726_vm10 = vcmask 517120  }
 0x4fe   :  { %14218 = vmatprep.subr.bf16.mxu0 %v14721_v10  ;;  %v16986_v14 = vsel %vm16909_vm8, %v13237_v35, %v9721_v33  ;;  %v16992_v57 = vsel %vm16909_vm8, %v13169_v56, %v9018_v22  ;;  %v14813_v20 = vld.sshfl [vmem:[#allocation3 + $0xc] sm:$0xf pattern:$0x76325410]  ;;  %v14734_v22 = vld [vmem:[%s17501_s2 + $0x198] sm:$0xff]   ;;  %v14737_v35 = vld [vmem:[%s17501_s2 + $0x1a0] sm:$0xff]  }
 0x4ff   :  { %v9053_v28 = vcombine.low %v9015_v23, %v16992_v57  ;;  %v9419_v21 = vrot.slane %v9417_v58, 6  ;;  %v14815_v37 = vld.sshfl [vmem:[#allocation3 + $0x24] sm:$0xf pattern:$0x76325410]  ;;  %v9731_v58 = vcombine.low %v16926_v26, %v16930_v40  ;;  %v14743_v40 = vld [vmem:[%s17501_s2 + $0x1d0] sm:$0xff]   ;;  %v9749_v27 = vcombine.low %v16966_v34, %v16986_v14 }
 0x500   :  { %v13269_v26 = vld.sshfl [vmem:[#allocation3 + $0x14] sm:$0x13 pattern:$0x76325410]  ;;  %10727 = vst.msk [vmem:[#allocation4] sm:$0x3] %vm10726_vm10, %v14846_v48 }
 0x501   :  { %14219 = vmatpush3.bf16.msra.mxu0 %v14721_v10  ;;  %v13170_v10 = vrot.slane %v13162_v50, 9  ;;  %v9420_v50 = vshll.u32 %v13203_v59, 16  ;;  %v9739_v23 = vrot.slane %v9731_v58, %v15058_v2  ;;  %v14817_v17 = vld.sshfl [vmem:[#allocation3 + $0x8] sm:$0xf pattern:$0x76325410] }
 0x502   :  { %14220 = vmatprep.subr.bf16.mxu0 %v14722_v11  ;;  %10728 = vst.msk [vmem:[#allocation4 + $0x8] sm:$0x3] %vm10726_vm10, %v14846_v48  ;;  %10730 = vst.msk [vmem:[#allocation4 + $0x6] sm:$0x3] %vm10726_vm10, %v14846_v48  ;;  %vm11016_vm7 = vsmask.f32 3340 }
 0x503   :  { %v16976_v0 = vsel %vm16909_vm8, %v13170_v10, %v9022_v54  ;;  %v9422_v24 = vrot.slane %v9420_v50, 7  ;;  %v9061_v54 = vrot.slane %v9053_v28, %v15058_v2  ;;  %v14733_v10 = vld [vmem:[%s17501_s2 + $0x190] sm:$0xff]   ;;  %v14741_v50 = vld [vmem:[%s17501_s2 + $0x1c0] sm:$0xff]   ;;  %10731 = vst.msk [vmem:[#allocation4 + $0xe] sm:$0x3] %vm10726_vm10, %v14846_v48 }
 0x504   :  { %v9054_v16 = vcombine.low %v16976_v0, %v16966_v34  ;;  %vm11018_vm0 = vsmask.f32 4368 }
 0x505   :  { %14221 = vmatpush3.bf16.msra.mxu0 %v14722_v11  ;;  %v10354_v11 = vcombine.high %v13291_v45, %v13291_v45  ;;  %v9423_v15 = vor.u32 %v9422_v24, %v9419_v21  ;;  %v9763_v21 = vrot.slane %v9749_v27, %v15058_v2  ;;  %v14745_v24 = vld [vmem:[%s17501_s2 + $0x1e0] sm:$0xff]   ;;  %v10751_v27 = vld [vmem:[#allocation4 + $0x4] sm:$0x2] }
 0x506   :  { %14226 = vmatprep.subr.bf16.mxu0 %v14725_v29  ;;  %v17003_v47 = vrot.slane %v9054_v16, %v15058_v2 }
 0x507   :  { %v10401_v36 = vrot.slane %v10354_v11, 7  ;;  %v9424_v51 = vrot.slane %v9423_v15, 2  ;;  %v13273_v15 = vld.sshfl [vmem:[#allocation3 + $0x2c] sm:$0x13 pattern:$0x76325410] }
 0x508   :  { %14223 = vmatmul.mubr.msk.bf16.vlgmr.msra.gmra.mrb[36].mxu0 %vm4862_vm1, %v8829_v44  ;;  %v14814_v44 = vld.sshfl [vmem:[#allocation3 + $0x4] sm:$0xf pattern:$0x76325410]  ;;  %v9069_v30 = vcombine.low %v9061_v54, %v17003_v47 }
 0x509   :  { %14227 = vmatpush3.bf16.msra.mxu0 %v14725_v29  ;;  %14234 = vmatprep.mubr.msk.bf16.mxu0 %vm4862_vm1, %v9052_v42  ;;  %v10402_v3 = vsel %vm16909_vm8, %v13299_v43, %v10401_v36  ;;  %v10418_v29 = vsel %vm16909_vm8, %v13303_v49, %v10417_v4  ;;  %v14732_v42 = vld [vmem:[%s17501_s2 + $0x188] sm:$0xff]   ;;  %v9193_v41 = vcombine.low %v14814_v44, %v14813_v20  ;;  %v14816_v43 = vld.sshfl [vmem:[#allocation3 + $0x1c] sm:$0xf pattern:$0x76325410]  ;;  %vm17226_vm8 = vmand %vm10726_vm10, %vm10945_vm13 }
 0x50a   :  { %14228 = vmatprep.subr.bf16.mxu0 %v14726_v25  ;;  %v10428_v61 = vcombine.low %v16982_v6, %v10402_v3  ;;  %v10445_v8 = vcombine.low %v16986_v14, %v10418_v29  ;;  %v9210_v56 = vcombine.low %v14816_v43, %v14815_v37  ;;  %v9732_v36 = vcombine.low %v16918_v55, %v16982_v6  ;;  %v14742_v3 = vld [vmem:[%s17501_s2 + $0x1c8] sm:$0xff]  }
 0x50b   :  { %v10113_v6 = vshrl.u32 %v13269_v26, 16  ;;  %v9748_v29 = vcombine.low %v16992_v57, %v16976_v0  ;;  %v10037_v20 = vcombine.high %v13269_v26, %v13269_v26  ;;  %v14748_v0 = vld [vmem:[%s17501_s2 + $0x1e8] sm:$0xff]   ;;  %v10069_v37 = vcombine.high %v13273_v15, %v13273_v15 }
 0x50c   :  { %v17008_v5 = vrot.slane %v10428_v61, %v15058_v2  ;;  %v17011_v63 = vrot.slane %v10445_v8, %v15058_v2  ;;  %v9746_v4 = vrot.slane %v9732_v36, %v15058_v2  ;;  %v14744_v61 = vld [vmem:[%s17501_s2 + $0x1d8] sm:$0xff]   ;;  %vm11024_vm13 = vsmask.f32 7452 }
 0x50d   :  { %14229 = vmatpush3.bf16.msra.mxu0 %v14726_v25  ;;  %v9341_v25 = vcombine.high %v13203_v59, %v13203_v59  ;;  %v10115_v8 = vrot.slane %v10113_v6, 6  ;;  %v9756_v44 = vrot.slane %v9748_v29, %v15058_v2  ;;  %v10122_v34 = vshll.u32 %v10037_v20, 16  ;;  %v14761_v29 = vld [vmem:[%s17501_s2 + $0x260] sm:$0xff]  }
 0x50e   :  { %14230 = vmatprep.subr.bf16.mxu0 %v14727_v12  ;;  %v10443_v19 = vcombine.low %v16941_v46, %v17008_v5  ;;  %v10460_v45 = vcombine.low %v17003_v47, %v17011_v63  ;;  %v9747_v55 = vcombine.low %v9739_v23, %v9746_v4  ;;  %v14757_v4 = vld [vmem:[%s17501_s2 + $0x220] sm:$0xff]   ;;  %v14758_v23 = vld [vmem:[%s17501_s2 + $0x228] sm:$0xff]   ;;  %v10739_v46 = vld [vmem:[#allocation4 + $0xa] sm:$0x1]  ;;  %v14847_v20 = vmov 0.0  }
 0x50f   :  { %v9426_v18 = vshll.u32 %v9341_v25, 16  ;;  %v9764_v14 = vcombine.low %v9756_v44, %v9763_v21  ;;  %v10124_v54 = vrot.slane %v10122_v34, 7  ;;  %v10740_v47 = vsel %vm15025_vm5, 0, %v10739_v46  ;;  %v10754_v63 = vld [vmem:[#allocation4 + $0xa] sm:$0x2] }
 0x510   :  { %10741 = vst [vmem:[#allocation4 + $0xa] sm:$0x1] %v10740_v47  ;;  %v13318_v21 = vld [vmem:[%s17502_s3 + $0x2] ss:$0 sm:$0xff] }
 0x511   :  { %14231 = vmatpush3.bf16.msra.mxu0 %v14727_v12  ;;  %v9428_v59 = vrot.slane %v9426_v18, 7  ;;  %v9494_v12 = vcombine.low %v16854_v31, %v16859_v1  ;;  %v14739_v31 = vld [vmem:[%s17501_s2 + $0x1b0] sm:$0xff]   ;;  %v14740_v1 = vld [vmem:[%s17501_s2 + $0x1b8] sm:$0xff]   ;;  %v10172_v18 = vshll.u32 %v13273_v15, 16  ;;  %v13319_v44 = vld [vmem:[%s17503_s4 + $0x2] ss:$0 sm:$0xff] }
 0x512   :  { %14232 = vmatprep.subr.bf16.mxu0 %v14728_v7 }
 0x513   :  { %v17032_v33 = vsel %vm16835_vm14, %v9424_v51, %v9428_v59  ;;  %v9502_v49 = vrot.slane %v9494_v12, %v15058_v2  ;;  %v14750_v51 = vld [vmem:[%s17501_s2 + $0x1f8] sm:$0xff]   ;;  %v14820_v59 = vld.sshfl [vmem:[#allocation3 + $0x28] sm:$0xf pattern:$0x76325410]  ;;  %v10174_v43 = vrot.slane %v10172_v18, 7 }
 0x514   :  { %v9495_v11 = vcombine.low %v16863_v53, %v17032_v33  ;;  %v14738_v53 = vld [vmem:[%s17501_s2 + $0x1a8] sm:$0xff]   ;;  %v14753_v12 = vld [vmem:[%s17501_s2 + $0x200] sm:$0xff]  }
 0x515   :  { %14233 = vmatpush3.bf16.msra.mxu0 %v14728_v7  ;;  %v10116_v7 = vshll.u32 %v13269_v26, 16  ;;  %v10742_v26 = vld [vmem:[#allocation4 + $0xc] sm:$0x1] }
 0x516   :  { %14238 = vmatprep.subr.bf16.mxu0 %v14729_v13  ;;  %v9509_v60 = vrot.slane %v9495_v11, %v15058_v2  ;;  %v10743_v6 = vsel %vm15025_vm5, 0, %v10742_v26 }
 0x517   :  { %v10118_v28 = vrot.slane %v10116_v7, 7  ;;  %10744 = vst [vmem:[#allocation4 + $0xc] sm:$0x1] %v10743_v6 }
 0x518   :  { %14235 = vmatmul.mubr.msk.bf16.vlgmr.msra.gmra.mrb[36].mxu0 %vm4862_vm1, %v9069_v30  ;;  %v9510_v16 = vcombine.low %v9502_v49, %v9509_v60  ;;  %v14749_v30 = vld [vmem:[%s17501_s2 + $0x1f0] sm:$0xff]   ;;  %v10178_v49 = vshll.u32 %v10069_v37, 16 }
 0x519   :  { %14239 = vmatpush3.bf16.msra.mxu0 %v14729_v13  ;;  %14246 = vmatprep.mubr.msk.bf16.mxu0 %vm4862_vm1, %v9193_v41  ;;  %v10119_v13 = vor.u32 %v10118_v28, %v10115_v8  ;;  %v14763_v8 = vld [vmem:[%s17501_s2 + $0x270] sm:$0xff]   ;;  %v14764_v28 = vld [vmem:[%s17501_s2 + $0x278] sm:$0xff]  }
 0x51a   :  { %14240 = vmatprep.subr.bf16.mxu0 %v14732_v42 }
 0x51b   :  { %v10120_v25 = vrot.slane %v10119_v13, 2 }
 0x51d   :  { %14241 = vmatpush3.bf16.msra.mxu0 %v14732_v42  ;;  %v10169_v42 = vshrl.u32 %v13273_v15, 16  ;;  %v10125_v41 = vsel %vm16835_vm14, %v10120_v25, %v10124_v54 }
 0x51e   :  { %14242 = vmatprep.subr.bf16.mxu0 %v14733_v10 }
 0x51f   :  { %v10171_v11 = vrot.slane %v10169_v42, 6 }
 0x521   :  { %14243 = vmatpush3.bf16.msra.mxu0 %v14733_v10  ;;  %v14819_v10 = vld.sshfl [vmem:[#allocation3 + $0x20] sm:$0xf pattern:$0x76325410]  ;;  %v10175_v60 = vor.u32 %v10174_v43, %v10171_v11 }
 0x522   :  { %14244 = vmatprep.subr.bf16.mxu0 %v14734_v22 }
 0x525   :  { %14245 = vmatpush3.bf16.msra.mxu0 %v14734_v22  ;;  %v10191_v22 = vcombine.low %v17032_v33, %v10125_v41  ;;  %v14754_v33 = vld [vmem:[%s17501_s2 + $0x208] sm:$0xff]  }
 0x526   :  { %14250 = vmatprep.subr.bf16.mxu0 %v14737_v35 }
 0x528   :  { %14247 = vmatmul.mubr.msk.bf16.vlgmr.msra.gmra.mrb[36].mxu0 %vm4862_vm1, %v9210_v56  ;;  %v9906_v56 = vcombine.low %v14819_v10, %v14820_v59 }
 0x529   :  { %14251 = vmatpush3.bf16.msra.mxu0 %v14737_v35  ;;  %14258 = vmatprep.mubr.msk.bf16.mxu0 %vm4862_vm1, %v9510_v16  ;;  %v10205_v35 = vrot.slane %v10191_v22, %v15058_v2  ;;  %v10176_v16 = vrot.slane %v10175_v60, 2 }
 0x52a   :  { %14252 = vmatprep.subr.bf16.mxu0 %v14738_v53 }
 0x52d   :  { %14253 = vmatpush3.bf16.msra.mxu0 %v14738_v53  ;;  %v10206_v53 = vcombine.low %v16869_v52, %v10205_v35  ;;  %v14756_v52 = vld [vmem:[%s17501_s2 + $0x218] sm:$0xff]  }
 0x52e   :  { %14254 = vmatprep.subr.bf16.mxu0 %v14739_v31 }
 0x531   :  { %14255 = vmatpush3.bf16.msra.mxu0 %v14739_v31  ;;  %v10180_v31 = vrot.slane %v10178_v49, 7 }
 0x532   :  { %14256 = vmatprep.subr.bf16.mxu0 %v14740_v1 }
 0x533   :  { %v10181_v36 = vsel %vm16835_vm14, %v10176_v16, %v10180_v31 }
 0x534   :  { %v10208_v58 = vcombine.low %v16947_v62, %v10181_v36  ;;  %v14759_v62 = vld [vmem:[%s17501_s2 + $0x230] sm:$0xff]  }
 0x535   :  { %14257 = vmatpush3.bf16.msra.mxu0 %v14740_v1  ;;  %v14755_v1 = vld [vmem:[%s17501_s2 + $0x210] sm:$0xff]  }
 0x536   :  { %14262 = vmatprep.subr.bf16.mxu0 %v14741_v50 }
 0x538   :  { %14259 = vmatmul.mubr.msk.bf16.vlgmr.msra.gmra.mrb[36].mxu0 %vm4862_vm1, %v9527_v9  ;;  %v14818_v9 = vld.sshfl [vmem:[#allocation3 + $0x10] sm:$0xf pattern:$0x76325410] }
 0x539   :  { %14263 = vmatpush3.bf16.msra.mxu0 %v14741_v50  ;;  %14270 = vmatprep.mubr.msk.bf16.mxu0 %vm4862_vm1, %v9747_v55  ;;  %v9889_v57 = vcombine.low %v14817_v17, %v14818_v9  ;;  %v10222_v50 = vrot.slane %v10208_v58, %v15058_v2  ;;  %v10752_v9 = vsel %vm17155_vm9, 0, %v10751_v27 }
 0x53a   :  { %14264 = vmatprep.subr.bf16.mxu0 %v14742_v3  ;;  %10753 = vst [vmem:[#allocation4 + $0x4] sm:$0x2] %v10752_v9 }
 0x53b   :  { %v10223_v32 = vcombine.low %v16892_v39, %v10222_v50  ;;  %v14760_v39 = vld [vmem:[%s17501_s2 + $0x238] sm:$0xff]  }
 0x53d   :  { %14265 = vmatpush3.bf16.msra.mxu0 %v14742_v3  ;;  %v10748_v3 = vld [vmem:[#allocation4 + $0x2] sm:$0x2] }
 0x53e   :  { %14266 = vmatprep.subr.bf16.mxu0 %v14743_v40  ;;  %v10749_v48 = vsel %vm17155_vm9, 0, %v10748_v3 }
 0x53f   :  { %10750 = vst [vmem:[#allocation4 + $0x2] sm:$0x2] %v10749_v48 }
 0x541   :  { %14267 = vmatpush3.bf16.msra.mxu0 %v14743_v40  ;;  %v10757_v40 = vld [vmem:[#allocation4 + $0xc] sm:$0x2] }
 0x542   :  { %14268 = vmatprep.subr.bf16.mxu0 %v14744_v61  ;;  %v10758_v7 = vsel %vm17155_vm9, 0, %v10757_v40 }
 0x543   :  { %10759 = vst [vmem:[#allocation4 + $0xc] sm:$0x2] %v10758_v7 }
 0x545   :  { %14269 = vmatpush3.bf16.msra.mxu0 %v14744_v61  ;;  %v10736_v61 = vld [vmem:[#allocation4 + $0x4] sm:$0x1] }
 0x546   :  { %14274 = vmatprep.subr.bf16.mxu0 %v14745_v24  ;;  %v10737_v17 = vsel %vm15025_vm5, 0, %v10736_v61 }
 0x547   :  { %10738 = vst [vmem:[#allocation4 + $0x4] sm:$0x1] %v10737_v17 }
 0x548   :  { %14271 = vmatmul.mubr.msk.bf16.vlgmr.msra.gmra.mrb[36].mxu0 %vm4862_vm1, %v9764_v14 }
 0x549   :  { %14275 = vmatpush3.bf16.msra.mxu0 %v14745_v24  ;;  %14282 = vmatprep.mubr.msk.bf16.mxu0 %vm4862_vm1, %v9889_v57 }
 0x54a   :  { %14276 = vmatprep.subr.bf16.mxu0 %v14748_v0 }
 0x54d   :  { %14277 = vmatpush3.bf16.msra.mxu0 %v14748_v0 }
 0x54e   :  { %14278 = vmatprep.subr.bf16.mxu0 %v14749_v30 }
 0x551   :  { %14279 = vmatpush3.bf16.msra.mxu0 %v14749_v30 }
 0x552   :  { %14280 = vmatprep.subr.bf16.mxu0 %v14750_v51 }
 0x555   :  { %14281 = vmatpush3.bf16.msra.mxu0 %v14750_v51 }
 0x556   :  { %14286 = vmatprep.subr.bf16.mxu0 %v14753_v12 }
 0x558   :  { %14283 = vmatmul.mubr.msk.bf16.vlgmr.msra.gmra.mrb[36].mxu0 %vm4862_vm1, %v9906_v56 }
 0x559   :  { %14287 = vmatpush3.bf16.msra.mxu0 %v14753_v12  ;;  %14294 = vmatprep.mubr.msk.bf16.mxu0 %vm4862_vm1, %v10206_v53 }
 0x55a   :  { %14288 = vmatprep.subr.bf16.mxu0 %v14754_v33 }
 0x55d   :  { %14289 = vmatpush3.bf16.msra.mxu0 %v14754_v33 }
 0x55e   :  { %14290 = vmatprep.subr.bf16.mxu0 %v14755_v1 }
 0x561   :  { %14291 = vmatpush3.bf16.msra.mxu0 %v14755_v1 }
 0x562   :  { %14292 = vmatprep.subr.bf16.mxu0 %v14756_v52 }
 0x565   :  { %14293 = vmatpush3.bf16.msra.mxu0 %v14756_v52 }
 0x566   :  { %14298 = vmatprep.subr.bf16.mxu0 %v14757_v4 }
 0x568   :  { %14295 = vmatmul.mubr.msk.bf16.vlgmr.msra.gmra.mrb[36].mxu0 %vm4862_vm1, %v10223_v32 }
 0x569   :  { %14299 = vmatpush3.bf16.msra.mxu0 %v14757_v4  ;;  %14306 = vmatprep.mubr.msk.bf16.mxu0 %vm4862_vm1, %v10443_v19  ;;  %v10755_v19 = vsel %vm17155_vm9, 0, %v10754_v63 }
 0x56a   :  { %14300 = vmatprep.subr.bf16.mxu0 %v14758_v23  ;;  %10756 = vst [vmem:[#allocation4 + $0xa] sm:$0x2] %v10755_v19 }
 0x56d   :  { %14301 = vmatpush3.bf16.msra.mxu0 %v14758_v23 }
 0x56e   :  { %14302 = vmatprep.subr.bf16.mxu0 %v14759_v62 }
 0x571   :  { %14303 = vmatpush3.bf16.msra.mxu0 %v14759_v62 }
 0x572   :  { %14304 = vmatprep.subr.bf16.mxu0 %v14760_v39 }
 0x575   :  { %14305 = vmatpush3.bf16.msra.mxu0 %v14760_v39 }
 0x576   :  { %14310 = vmatprep.subr.bf16.mxu0 %v14847_v20 }
 0x578   :  { %14307 = vmatmul.mubr.msk.bf16.vlgmr.msra.gmra.mrb[36].mxu0 %vm4862_vm1, %v10460_v45  ;;  %v10733_v45 = vld [vmem:[#allocation4 + $0x2] sm:$0x1] }
 0x579   :  { %v10734_v55 = vsel %vm15025_vm5, 0, %v10733_v45  ;;  %14318 = vmatprep.mubr.msk.bf16.mxu0 %vm14848_vm11, %v14847_v20  ;;  %14311 = vmatpush3.bf16.msra.mxu0 %v14761_v29  ;;  %vm11012_vm5 = vsmask.f32 1284 }
 0x57a   :  { %10735 = vst [vmem:[#allocation4 + $0x2] sm:$0x1] %v10734_v55  ;;  %14312 = vmatprep.subr.bf16.mxu0 %v14847_v20  ;;  %vm11013_vm14 = vmor %vm3423_vm4, %vm11012_vm5  ;;  %vm11022_vm5 = vsmask.f32 6424 }
 0x57b   :  { %vm11015_vm15 = vmor %vm11013_vm14, %vm11014_vm12 }
 0x57c   :  { %vm11017_vm4 = vmor %vm11015_vm15, %vm11016_vm7 }
 0x57d   :  { %14313 = vmatpush3.bf16.msra.mxu0 %v14762_v38  ;;  %vm11019_vm2 = vmor %vm11017_vm4, %vm11018_vm0 }
 0x57e   :  { %14314 = vmatprep.subr.bf16.mxu0 %v14847_v20  ;;  %vm11021_vm9 = vmor %vm11019_vm2, %vm11020_vm3 }
 0x57f   :  { %vm11023_vm12 = vmor %vm11021_vm9, %vm11022_vm5 }
 0x580   :  { %vm17244_vm14 = vmor %vm11023_vm12, %vm11024_vm13 }
 0x581   :  { %14315 = vmatpush3.bf16.msra.mxu0 %v14763_v8 }
 0x582   :  { %14316 = vmatprep.subr.bf16.mxu0 %v14847_v20 }
 0x585   :  { %14317 = vmatpush3.bf16.msra.mxu0 %v14764_v28 }
 0x586   :  { %14322 = vmatprep.subr.bf16.mxu0 %v14847_v20 }
 0x64b   :  { %v14308_v24 = vpop.f32.mrb[36].mxu0 }
 0x64c   :  { %v10551_v13 = vmul.f32 %v14308_v24, %v13318_v21  ;;  %v10525_v34 = vpop.f32.mrb[37].mxu0 }
 0x64d   :  { %v10549_v14 = vmul.f32 %v13318_v21, %v10525_v34  ;;  %v14309_v0 = vpop.f32.mrb[38].mxu0 }
 0x64e   :  { %v10560_v57 = vadd.f32 %v13319_v44, %v10551_v13  ;;  %v10552_v25 = vmul.f32 %v14309_v0, %v13318_v21  ;;  %v10528_v54 = vpop.f32.mrb[39].mxu0 }
 0x64f   :  { %v10558_v15 = vadd.f32 %v13319_v44, %v10549_v14  ;;  %v10550_v30 = vmul.f32 %v13318_v21, %v10528_v54 }
 0x650   :  { %v10564_v42 = vmax.f32 %v10560_v57, 0.0  ;;  %v10561_v18 = vadd.f32 %v13319_v44, %v10552_v25 }
 0x651   :  { %v10562_v41 = vmax.f32 %v10558_v15, 0.0  ;;  %v10559_v51 = vadd.f32 %v13319_v44, %v10550_v30 }
 0x652   :  { %v10604_v10 = vcombine.high %v10564_v42, %v10564_v42  ;;  %v10611_v59 = vrot.slane %v10564_v42, %v15058_v2  ;;  %v10565_v22 = vmax.f32 %v10561_v18, 0.0 }
 0x653   :  { %v10570_v37 = vcombine.high %v10562_v41, %v10562_v41  ;;  %v10577_v11 = vrot.slane %v10562_v41, %v15058_v2  ;;  %v10563_v43 = vmax.f32 %v10559_v51, 0.0 }
 0x654   :  { %v10618_v12 = vrot.slane %v10604_v10, %v15058_v2  ;;  %v10619_v35 = vcombine.high %v10611_v59, %v10611_v59  ;;  %v13328_v60 = vrot.slane %v10611_v59, 9  ;;  %v10621_v49 = vcombine.high %v10565_v22, %v10565_v22 }
 0x655   :  { %v10584_v56 = vrot.slane %v10570_v37, %v15058_v2  ;;  %v10585_v33 = vcombine.high %v10577_v11, %v10577_v11  ;;  %v13320_v53 = vrot.slane %v10577_v11, 9  ;;  %v10628_v16 = vrot.slane %v10565_v22, %v15058_v2 }
 0x656   :  { %v10620_v31 = vcombine.high %v10618_v12, %v10618_v12  ;;  %v13329_v1 = vrot.slane %v10619_v35, 9  ;;  %v13330_v36 = vrot.slane %v10618_v12, 9  ;;  %v10710_v52 = vmax.f32 %v10611_v59, %v13328_v60 }
 0x657   :  { %v10586_v58 = vcombine.high %v10584_v56, %v10584_v56  ;;  %v13321_v50 = vrot.slane %v10585_v33, 9  ;;  %v13322_v4 = vrot.slane %v10584_v56, 9  ;;  %v10702_v32 = vmax.f32 %v10577_v11, %v13320_v53 }
 0x658   :  { %v13331_v23 = vrot.slane %v10620_v31, 9  ;;  %v10711_v62 = vmax.f32 %v10619_v35, %v13329_v1  ;;  %v10712_v39 = vmax.f32 %v10618_v12, %v13330_v36  ;;  %v10635_v46 = vrot.slane %v10621_v49, %v15058_v2 }
 0x659   :  { %v13323_v47 = vrot.slane %v10586_v58, 9  ;;  %v10703_v5 = vmax.f32 %v10585_v33, %v13321_v50  ;;  %v10704_v63 = vmax.f32 %v10584_v56, %v13322_v4  ;;  %v10636_v19 = vcombine.high %v10628_v16, %v10628_v16 }
 0x65a   :  { %v10713_v45 = vmax.f32 %v10620_v31, %v13331_v23  ;;  %v10722_v3 = vmax.f32 %v10710_v52, %v10712_v39  ;;  %v10637_v55 = vcombine.high %v10635_v46, %v10635_v46  ;;  %v13332_v48 = vrot.slane %v10628_v16, 9 }
 0x65b   :  { %v10705_v26 = vmax.f32 %v10586_v58, %v13323_v47  ;;  %v10718_v40 = vmax.f32 %v10702_v32, %v10704_v63  ;;  %v13333_v6 = vrot.slane %v10636_v19, 9  ;;  %v13334_v7 = vrot.slane %v10635_v46, 9 }
 0x65c   :  { %v10723_v61 = vmax.f32 %v10711_v62, %v10713_v45  ;;  %v10764_v27 = vpack.c.bf16 %v10722_v3, %v10722_v3  ;;  %v13335_v17 = vrot.slane %v10637_v55, 9  ;;  %v10714_v9 = vmax.f32 %v10628_v16, %v13332_v48  ;;  %v10953_v3 = vld [vmem:[#allocation4 + $0xa] sm:$0x3]  ;;  %v14765_v45 = vld [vmem:[%s17501_s2 + $0x240] sm:$0xff]  }
 0x65d   :  { %v10719_v29 = vmax.f32 %v10703_v5, %v10705_v26  ;;  %v10760_v38 = vpack.c.bf16 %v10718_v40, %v10718_v40  ;;  %v10715_v8 = vmax.f32 %v10636_v19, %v13333_v6  ;;  %v10716_v28 = vmax.f32 %v10635_v46, %v13334_v7  ;;  %v10947_v7 = vld [vmem:[#allocation4 + $0x2] sm:$0x3] }
 0x65e   :  { %v10765_v21 = vpack.c.bf16 %v10723_v61, %v10723_v61  ;;  %v10810_v24 = vrot.slane %v10764_v27, %v15058_v2  ;;  %v10717_v44 = vmax.f32 %v10637_v55, %v13335_v17  ;;  %v10587_v13 = vcombine.high %v10563_v43, %v10563_v43 }
 0x65f   :  { %v10761_v34 = vpack.c.bf16 %v10719_v29, %v10719_v29  ;;  %v10782_v14 = vrot.slane %v10760_v38, %v15058_v2  ;;  %v10724_v0 = vmax.f32 %v10714_v9, %v10716_v28  ;;  %v10594_v57 = vrot.slane %v10563_v43, %v15058_v2  ;;  %v13346_v28 = vld.sshfl [vmem:[#allocation4 + $0x8] sm:$0x11 pattern:$0x75316420] }
 0x660   :  { %v10817_v25 = vrot.slane %v10765_v21, %v15058_v2  ;;  %v10866_v54 = vrot.slane %v10810_v24, %v15058_v2  ;;  %v10725_v15 = vmax.f32 %v10715_v8, %v10717_v44  ;;  %v10601_v30 = vrot.slane %v10587_v13, %v15058_v2  ;;  %v10956_v24 = vld [vmem:[#allocation4 + $0xc] sm:$0x3]  ;;  %v13344_v13 = vld.sshfl [vmem:[#allocation4] sm:$0x11 pattern:$0x75316420] }
 0x661   :  { %v10789_v42 = vrot.slane %v10761_v34, %v15058_v2  ;;  %v10838_v18 = vrot.slane %v10782_v14, %v15058_v2  ;;  %v10766_v41 = vpack.c.bf16 %v10724_v0, %v10724_v0  ;;  %v10602_v51 = vcombine.high %v10594_v57, %v10594_v57 }
 0x662   :  { %v10873_v10 = vrot.slane %v10817_v25, %v15058_v2  ;;  %v10892_v59 = vunpack.c.l.b16 %v10866_v54  ;;  %v10767_v22 = vpack.c.bf16 %v10725_v15, %v10725_v15  ;;  %v10603_v37 = vcombine.high %v10601_v30, %v10601_v30 }
 0x663   :  { %v10845_v11 = vrot.slane %v10789_v42, %v15058_v2  ;;  %v10888_v43 = vunpack.c.l.b16 %v10838_v18  ;;  %v10824_v12 = vrot.slane %v10766_v41, %v15058_v2  ;;  %v13324_v35 = vrot.slane %v10594_v57, 9 }
 0x664   :  { %v10893_v60 = vunpack.c.l.b16 %v10873_v10  ;;  %v10831_v49 = vrot.slane %v10767_v22, %v15058_v2  ;;  %v13325_v56 = vrot.slane %v10602_v51, 9  ;;  %v10902_v33 = vrot.slane %v10892_v59, 7 }
 0x665   :  { %v10889_v53 = vunpack.c.l.b16 %v10845_v11  ;;  %v10880_v16 = vrot.slane %v10824_v12, %v15058_v2  ;;  %v13326_v31 = vrot.slane %v10601_v30, 9  ;;  %v10896_v36 = vrot.slane %v10888_v43, 7 }
 0x666   :  { %v10903_v1 = vrot.slane %v10893_v60, 6  ;;  %v10887_v52 = vrot.slane %v10831_v49, %v15058_v2  ;;  %v13327_v58 = vrot.slane %v10603_v37, 9  ;;  %v10706_v32 = vmax.f32 %v10594_v57, %v13324_v35 }
 0x667   :  { %v10897_v50 = vrot.slane %v10889_v53, 6  ;;  %v10894_v4 = vunpack.c.l.b16 %v10880_v16  ;;  %v10708_v23 = vmax.f32 %v10601_v30, %v13326_v31  ;;  %v10707_v46 = vmax.f32 %v10602_v51, %v13325_v56  ;;  %v10950_v53 = vld [vmem:[#allocation4 + $0x4] sm:$0x3] }
 0x668   :  { %v10904_v62 = vsel %vm4165_vm6, %v10903_v1, %v10902_v33  ;;  %v10895_v39 = vunpack.c.l.b16 %v10887_v52  ;;  %v10709_v47 = vmax.f32 %v10603_v37, %v13327_v58  ;;  %v11003_v57 = vcombine.high %v13346_v28, %v13346_v28  ;;  %v14791_v37 = vld [vmem:[%s17501_s2 + $0x330] sm:$0xff]  }
 0x669   :  { %v10910_v5 = vpack.c.b16 %v10904_v62, %v10904_v62  ;;  %v10898_v63 = vsel %vm4165_vm6, %v10897_v50, %v10896_v36  ;;  %v10720_v19 = vmax.f32 %v10706_v32, %v10708_v23  ;;  %v10905_v48 = vrot.slane %v10894_v4, 7 }
 0x66a   :  { %v10908_v55 = vpack.c.b16 %v10898_v63, %v10898_v63  ;;  %v10906_v26 = vrot.slane %v10895_v39, 6  ;;  %v10721_v40 = vmax.f32 %v10707_v46, %v10709_v47  ;;  %v10987_v15 = vcombine.high %v13344_v13, %v13344_v13  ;;  %v17540_v39 = vld [vmem:[#allocation8_spill] sm:$0xff] }
 0x66b   :  { %v10932_v6 = vrot.slane %v10910_v5, %v15058_v2  ;;  %v10762_v61 = vpack.c.bf16 %v10720_v19, %v10720_v19  ;;  %v14849_v42 = vmov 1966171168   ;;  %v11045_v10 = vshrl.u32 %v13346_v28, 16  ;;  %v14766_v28 = vld [vmem:[%s17501_s2 + $0x248] sm:$0xff]  }
 0x66c   :  { %v10918_v27 = vrot.slane %v10908_v55, %v15058_v2  ;;  %v10907_v17 = vsel %vm4165_vm6, %v10906_v26, %v10905_v48  ;;  %v10763_v9 = vpack.c.bf16 %v10721_v40, %v10721_v40  ;;  %v11073_v18 = vunpack.c.l.s4 %v14849_v42 }
 0x66d   :  { %v10954_v29 = vsel %vm17226_vm8, %v10932_v6, %v10953_v3  ;;  %v10911_v38 = vpack.c.b16 %v10907_v17, %v10907_v17  ;;  %v10796_v8 = vrot.slane %v10762_v61, %v15058_v2  ;;  %v11050_v59 = vshll.u32 %v11003_v57, 16  ;;  %v10961_v61 = vld [vmem:[#allocation4 + $0x8] sm:$0x1] }
 0x66e   :  { %10955 = vst [vmem:[#allocation4 + $0xa] sm:$0x3] %v10954_v29  ;;  %v10948_v21 = vsel %vm17226_vm8, %v10918_v27, %v10947_v7  ;;  %v10803_v44 = vrot.slane %v10763_v9, %v15058_v2  ;;  %v11027_v11 = vshrl.u32 %v13344_v13, 16  ;;  %v11032_v43 = vshll.u32 %v10987_v15, 16  ;;  %v10959_v7 = vld [vmem:[#allocation4] sm:$0x1] }
 0x66f   :  { %10949 = vst [vmem:[#allocation4 + $0x2] sm:$0x3] %v10948_v21  ;;  %v10939_v34 = vrot.slane %v10911_v38, %v15058_v2  ;;  %v10852_v14 = vrot.slane %v10796_v8, %v15058_v2  ;;  %v11074_v33 = vunpack.c.0.s8 %v11073_v18  ;;  %v11052_v16 = vsel %vm17244_vm14, %v11045_v10, %v11050_v59  ;;  %v14768_v15 = vld [vmem:[%s17501_s2 + $0x258] sm:$0xff]  }
 0x670   :  { %v10859_v0 = vrot.slane %v10803_v44, %v15058_v2  ;;  %v11034_v52 = vsel %vm17244_vm14, %v11027_v11, %v11032_v43  ;;  %v13372_v10 = vld.sshfl [vmem:[#allocation4 + $0x8] sm:$0x10 pattern:$0x75316420]  ;;  %v14770_v43 = vld [vmem:[%s17501_s2 + $0x288] sm:$0xff]  }
 0x671   :  { %v10957_v25 = vsel %vm17226_vm8, %v10939_v34, %v10956_v24  ;;  %v10890_v54 = vunpack.c.l.b16 %v10852_v14  ;;  %v17261_v46 = vsub.s32 %v11074_v33, %v17540_v39  ;;  %v14767_v14 = vld [vmem:[%s17501_s2 + $0x250] sm:$0xff]   ;;  %v14772_v33 = vld [vmem:[%s17501_s2 + $0x298] sm:$0xff]  }
 0x672   :  { %10958 = vst [vmem:[#allocation4 + $0xc] sm:$0x3] %v10957_v25  ;;  %v10891_v30 = vunpack.c.l.b16 %v10859_v0 }
 0x673   :  { %v10899_v41 = vrot.slane %v10890_v54, 7 }
 0x674   :  { %v10900_v51 = vrot.slane %v10891_v30, 6 }
 0x675   :  { %v13347_v22 = vld.sshfl [vmem:[#allocation4 + $0xa] sm:$0x11 pattern:$0x75316420] }
 0x676   :  { %v10901_v12 = vsel %vm4165_vm6, %v10900_v51, %v10899_v41  ;;  %v13345_v35 = vld.sshfl [vmem:[#allocation4 + $0x2] sm:$0x11 pattern:$0x75316420]  ;;  %v11011_v60 = vcombine.high %v13347_v22, %v13347_v22  ;;  %v11054_v31 = vshrl.u32 %v13347_v22, 16  ;;  %v14769_v41 = vld [vmem:[%s17501_s2 + $0x280] sm:$0xff]  }
 0x677   :  { %v10909_v49 = vpack.c.b16 %v10901_v12, %v10901_v12  ;;  %v10995_v56 = vcombine.high %v13345_v35, %v13345_v35  ;;  %v11036_v58 = vshrl.u32 %v13345_v35, 16  ;;  %v10962_v27 = vld [vmem:[#allocation4 + $0xa] sm:$0x1]  ;;  %v10960_v9 = vld [vmem:[#allocation4 + $0x2] sm:$0x1]  ;;  %vm12308_vm6 = vcmask 1041409  }
 0x678   :  { %v11059_v1 = vshll.u32 %v11011_v60, 16  ;;  %v11165_v21 = vcombine.low %v10959_v7, %v10960_v9  ;;  %v11166_v24 = vcombine.low %v10961_v61, %v10962_v27  ;;  %v13370_v51 = vld.sshfl [vmem:[#allocation4] sm:$0x10 pattern:$0x75316420]  ;;  %v14782_v61 = vld [vmem:[%s17501_s2 + $0x2e8] sm:$0xff]  }
 0x679   :  { %v10925_v36 = vrot.slane %v10909_v49, %v15058_v2  ;;  %v11041_v50 = vshll.u32 %v10995_v56, 16  ;;  %v13405_v47 = vld.sshfl [vmem:[#allocation4 + $0xc] sm:$0x11 pattern:$0x75316420]  ;;  %v14771_v60 = vld [vmem:[%s17501_s2 + $0x290] sm:$0xff]  }
 0x67a   :  { %v11061_v4 = vsel %vm17244_vm14, %v11054_v31, %v11059_v1  ;;  %v11543_v19 = vcombine.high %v13405_v47, %v13405_v47  ;;  %v11572_v55 = vshrl.u32 %v13405_v47, 16  ;;  %v11173_v57 = vrot.slane %v11165_v21, %v17261_v46  ;;  %v17306_v22 = vld.sshfl [vmem:[#allocation4 + $0x2] sm:$0x10 pattern:$0x75316420]  ;;  %v14785_v21 = vld [vmem:[%s17501_s2 + $0x300] sm:$0xff]  }
 0x67b   :  { %v10951_v32 = vsel %vm17226_vm8, %v10925_v36, %v10950_v53  ;;  %v11043_v23 = vsel %vm17244_vm14, %v11036_v58, %v11041_v50  ;;  %v11071_v62 = vcombine.low %v11052_v16, %v11061_v4  ;;  %v11180_v25 = vrot.slane %v11166_v24, %v17261_v46  ;;  %v17308_v11 = vld.sshfl [vmem:[#allocation4 + $0xa] sm:$0x10 pattern:$0x75316420]  ;;  %v14773_v16 = vld [vmem:[%s17501_s2 + $0x2a0] sm:$0xff]   ;;  %v14783_v9 = vld [vmem:[%s17501_s2 + $0x2f0] sm:$0xff]  }
 0x67c   :  { %10952 = vst [vmem:[#allocation4 + $0x4] sm:$0x3] %v10951_v32  ;;  %v11070_v5 = vcombine.low %v11034_v52, %v11043_v23  ;;  %v11577_v48 = vshll.u32 %v11543_v19, 16  ;;  %v13382_v12 = vcombine.high %v13370_v51, %v17306_v22  ;;  %v13383_v35 = vcombine.high %v13372_v10, %v17308_v11  ;;  %v11399_v36 = vld [vmem:[#allocation4 + $0xc] sm:$0x1]  ;;  %v14774_v52 = vld [vmem:[%s17501_s2 + $0x2a8] sm:$0xff]  }
 0x67d   :  { %v11085_v63 = vrot.slane %v11071_v62, %v17261_v46  ;;  %v11181_v42 = vcombine.low %v11173_v57, %v11180_v25  ;;  %v11396_v58 = vld [vmem:[#allocation4 + $0x2] sm:$0x1]  ;;  %v11398_v50 = vld [vmem:[#allocation4 + $0xa] sm:$0x1]  ;;  %v14777_v19 = vld [vmem:[%s17501_s2 + $0x2c0] sm:$0xff]  }
 0x67e   :  { %v11078_v3 = vrot.slane %v11070_v5, %v17261_v46  ;;  %v17270_v40 = vsel %vm17244_vm14, %v11572_v55, %v11577_v48  ;;  %v11312_v49 = vrot.slane %v13382_v12, %v17261_v46  ;;  %v11319_v56 = vrot.slane %v13383_v35, %v17261_v46  ;;  %v14776_v5 = vld [vmem:[%s17501_s2 + $0x2b8] sm:$0xff]   ;;  %v14778_v55 = vld [vmem:[%s17501_s2 + $0x2c8] sm:$0xff]   ;;  %v14779_v48 = vld [vmem:[%s17501_s2 + $0x2d0] sm:$0xff]  }
 0x67f   :  { %v11589_v17 = vcombine.low %v11061_v4, %v17270_v40  ;;  %v11188_v59 = vrot.slane %v11181_v42, %v17261_v46  ;;  %v11413_v32 = vcombine.low %v11398_v50, %v11399_v36  ;;  %v14786_v57 = vld [vmem:[%s17501_s2 + $0x308] sm:$0xff]   ;;  %v14787_v42 = vld [vmem:[%s17501_s2 + $0x310] sm:$0xff]  }
 0x680   :  { %v11086_v26 = vcombine.low %v11078_v3, %v11085_v63  ;;  %v11320_v53 = vcombine.low %v11312_v49, %v11319_v56  ;;  %v13477_v50 = vld.sshfl [vmem:[#allocation4 + $0x6] sm:$0x10 pattern:$0x75316420] }
 0x681   :  { %v11603_v8 = vrot.slane %v11589_v17, %v17261_v46  ;;  %v11427_v47 = vrot.slane %v11413_v32, %v17261_v46  ;;  %v14794_v32 = vld [vmem:[%s17501_s2 + $0x348] sm:$0xff]  }
 0x682   :  { %v11093_v6 = vrot.slane %v11086_v26, %v17261_v46  ;;  %v11327_v31 = vrot.slane %v11320_v53, %v17261_v46  ;;  %v14780_v26 = vld [vmem:[%s17501_s2 + $0x2d8] sm:$0xff]   ;;  %v14790_v53 = vld [vmem:[%s17501_s2 + $0x328] sm:$0xff]  }
 0x683   :  { %v13403_v29 = vld.sshfl [vmem:[#allocation4 + $0x4] sm:$0x11 pattern:$0x75316420] }
 0x684   :  { %14319 = vmatmul.mubr.msk.bf16.vlgmr.msra.gmra.mrb[40].mxu0 %vm4862_vm1, %v11093_v6  ;;  %v11527_v38 = vcombine.high %v13403_v29, %v13403_v29  ;;  %v11554_v44 = vshrl.u32 %v13403_v29, 16  ;;  %v11397_v1 = vld [vmem:[#allocation4 + $0x4] sm:$0x1] }
 0x685   :  { %14323 = vmatpush3.bf16.msra.mxu0 %v14765_v45  ;;  %14330 = vmatprep.mubr.msk.bf16.mxu0 %vm14848_vm11, %v14847_v20  ;;  %v11412_v4 = vcombine.low %v11396_v58, %v11397_v1  ;;  %v14781_v45 = vld [vmem:[%s17501_s2 + $0x2e0] sm:$0xff]   ;;  %v17375_v6 = vld.sshfl [vmem:[#allocation4 + $0xc] sm:$0x10 pattern:$0x75316420] }
 0x686   :  { %14324 = vmatprep.subr.bf16.mxu0 %v14847_v20  ;;  %v11559_v13 = vshll.u32 %v11527_v38, 16  ;;  %v17377_v7 = vld.sshfl [vmem:[#allocation4 + $0x4] sm:$0x10 pattern:$0x75316420]  ;;  %v13436_v17 = vcombine.high %v17308_v11, %v17375_v6 }
 0x687   :  { %v11420_v62 = vrot.slane %v11412_v4, %v17261_v46  ;;  %v13435_v27 = vcombine.high %v17306_v22, %v17377_v7  ;;  %v13479_v4 = vld.sshfl [vmem:[#allocation4 + $0xe] sm:$0x10 pattern:$0x75316420] }
 0x688   :  { %v17284_v34 = vsel %vm17244_vm14, %v11554_v44, %v11559_v13  ;;  %v11743_v38 = vrot.slane %v13436_v17, %v17261_v46  ;;  %v11822_v44 = vld [vmem:[#allocation4 + $0x6] sm:$0x1]  ;;  %v11821_v13 = vld [vmem:[#allocation4 + $0x4] sm:$0x1] }
 0x689   :  { %14325 = vmatpush3.bf16.msra.mxu0 %v14766_v28  ;;  %v11588_v0 = vcombine.low %v11043_v23, %v17284_v34  ;;  %v14775_v23 = vld [vmem:[%s17501_s2 + $0x2b0] sm:$0xff]   ;;  %v11428_v63 = vcombine.low %v11420_v62, %v11427_v47  ;;  %v11736_v29 = vrot.slane %v13435_v27, %v17261_v46  ;;  %v11837_v25 = vcombine.low %v11821_v13, %v11822_v44 }
 0x68a   :  { %14326 = vmatprep.subr.bf16.mxu0 %v14847_v20  ;;  %v13489_v62 = vcombine.high %v17375_v6, %v13479_v4  ;;  %v14795_v47 = vld [vmem:[%s17501_s2 + $0x350] sm:$0xff]  }
 0x68b   :  { %v11596_v54 = vrot.slane %v11588_v0, %v17261_v46  ;;  %v11435_v3 = vrot.slane %v11428_v63, %v17261_v46  ;;  %v11744_v28 = vcombine.low %v11736_v29, %v11743_v38  ;;  %v11824_v0 = vld [vmem:[#allocation4 + $0xe] sm:$0x1] }
 0x68c   :  { %v12168_v63 = vrot.slane %v13489_v62, %v17261_v46 }
 0x68d   :  { %14327 = vmatpush3.bf16.msra.mxu0 %v14767_v14  ;;  %v11604_v30 = vcombine.low %v11596_v54, %v11603_v8  ;;  %v14784_v8 = vld [vmem:[%s17501_s2 + $0x2f8] sm:$0xff]   ;;  %v11751_v24 = vrot.slane %v11744_v28, %v17261_v46 }
 0x68e   :  { %14328 = vmatprep.subr.bf16.mxu0 %v14847_v20  ;;  %v11823_v14 = vld [vmem:[#allocation4 + $0xc] sm:$0x1] }
 0x68f   :  { %v17299_v18 = vrot.slane %v11604_v30, %v17261_v46  ;;  %v11838_v54 = vcombine.low %v11823_v14, %v11824_v0  ;;  %v13456_v30 = vld.sshfl [vmem:[#allocation4 + $0x6] sm:$0x11 pattern:$0x75316420] }
 0x690   :  { %v11952_v51 = vcombine.high %v13456_v30, %v13456_v30  ;;  %v11979_v11 = vshrl.u32 %v13456_v30, 16 }
 0x691   :  { %14329 = vmatpush3.bf16.msra.mxu0 %v14768_v15  ;;  %v13458_v15 = vld.sshfl [vmem:[#allocation4 + $0xe] sm:$0x11 pattern:$0x75316420] }
 0x692   :  { %14334 = vmatprep.subr.bf16.mxu0 %v14847_v20  ;;  %v11968_v10 = vcombine.high %v13458_v15, %v13458_v15  ;;  %v11997_v12 = vshrl.u32 %v13458_v15, 16 }
 0x694   :  { %14331 = vmatmul.mubr.msk.bf16.vlgmr.msra.gmra.mrb[40].mxu0 %vm4862_vm1, %v11188_v59  ;;  %v14788_v59 = vld [vmem:[%s17501_s2 + $0x318] sm:$0xff]   ;;  %v12002_v35 = vshll.u32 %v11968_v10, 16 }
 0x695   :  { %14335 = vmatpush3.bf16.msra.mxu0 %v14769_v41  ;;  %14342 = vmatprep.mubr.msk.bf16.mxu0 %vm14848_vm11, %v14847_v20  ;;  %v11852_v41 = vrot.slane %v11838_v54, %v17261_v46  ;;  %v12302_v54 = vsub.s32 0, %v17540_v39 }
 0x696   :  { %14336 = vmatprep.subr.bf16.mxu0 %v14847_v20 }
 0x699   :  { %14337 = vmatpush3.bf16.msra.mxu0 %v14770_v43  ;;  %v11984_v43 = vshll.u32 %v11952_v51, 16 }
 0x69a   :  { %14338 = vmatprep.subr.bf16.mxu0 %v14847_v20 }
 0x69b   :  { %v11986_v56 = vsel %vm17244_vm14, %v11979_v11, %v11984_v43 }
 0x69d   :  { %14339 = vmatpush3.bf16.msra.mxu0 %v14771_v60  ;;  %v14789_v60 = vld [vmem:[%s17501_s2 + $0x320] sm:$0xff]  }
 0x69e   :  { %14340 = vmatprep.subr.bf16.mxu0 %v14847_v20 }
 0x6a1   :  { %14341 = vmatpush3.bf16.msra.mxu0 %v14772_v33  ;;  %v12004_v33 = vsel %vm17244_vm14, %v11997_v12, %v12002_v35 }
 0x6a2   :  { %14346 = vmatprep.subr.bf16.mxu0 %v14847_v20 }
 0x6a4   :  { %14343 = vmatmul.mubr.msk.bf16.vlgmr.msra.gmra.mrb[40].mxu0 %vm4862_vm1, %v11327_v31  ;;  %v12014_v31 = vcombine.low %v17270_v40, %v12004_v33  ;;  %v14793_v40 = vld [vmem:[%s17501_s2 + $0x340] sm:$0xff]  }
 0x6a5   :  { %14347 = vmatpush3.bf16.msra.mxu0 %v14773_v16  ;;  %14354 = vmatprep.mubr.msk.bf16.mxu0 %vm14848_vm11, %v14847_v20  ;;  %v12013_v16 = vcombine.low %v17284_v34, %v11986_v56 }
 0x6a6   :  { %14348 = vmatprep.subr.bf16.mxu0 %v14847_v20  ;;  %v12028_v36 = vrot.slane %v12014_v31, %v17261_v46 }
 0x6a7   :  { %v12021_v1 = vrot.slane %v12013_v16, %v17261_v46 }
 0x6a9   :  { %14349 = vmatpush3.bf16.msra.mxu0 %v14774_v52  ;;  %v14792_v52 = vld [vmem:[%s17501_s2 + $0x338] sm:$0xff]   ;;  %v12029_v34 = vcombine.low %v12021_v1, %v12028_v36 }
 0x6aa   :  { %14350 = vmatprep.subr.bf16.mxu0 %v14847_v20 }
 0x6ab   :  { %v12036_v58 = vrot.slane %v12029_v34, %v17261_v46 }
 0x6ad   :  { %14351 = vmatpush3.bf16.msra.mxu0 %v14775_v23  ;;  %v13488_v23 = vcombine.high %v17377_v7, %v13477_v50 }
 0x6ae   :  { %14352 = vmatprep.subr.bf16.mxu0 %v14847_v20 }
 0x6b1   :  { %14353 = vmatpush3.bf16.msra.mxu0 %v14776_v5  ;;  %v12161_v5 = vrot.slane %v13488_v23, %v17261_v46 }
 0x6b2   :  { %14358 = vmatprep.subr.bf16.mxu0 %v14847_v20 }
 0x6b4   :  { %14355 = vmatmul.mubr.msk.bf16.vlgmr.msra.gmra.mrb[40].mxu0 %vm4862_vm1, %v11435_v3  ;;  %v12169_v3 = vcombine.low %v12161_v5, %v12168_v63 }
 0x6b5   :  { %14359 = vmatpush3.bf16.msra.mxu0 %v14777_v19  ;;  %14366 = vmatprep.mubr.msk.bf16.mxu0 %vm14848_vm11, %v14847_v20  ;;  %v14796_v19 = vld [vmem:[%s17501_s2 + $0x358] sm:$0xff]   ;;  %s14850_s2 = smov [#allocation5]  }
 0x6b6   :  { %14360 = vmatprep.subr.bf16.mxu0 %v14847_v20 }
 0x6b9   :  { %14361 = vmatpush3.bf16.msra.mxu0 %v14778_v55  ;;  %v12176_v55 = vrot.slane %v12169_v3, %v17261_v46 }
 0x6ba   :  { %14362 = vmatprep.subr.bf16.mxu0 %v14847_v20 }
 0x6bd   :  { %14363 = vmatpush3.bf16.msra.mxu0 %v14779_v48  ;;  %v13495_v48 = vld [vmem:[%s17502_s3 + $0x3] ss:$0 sm:$0xff]  ;;  %s12318_s3 = sshll.u32 %s14850_s2, 4  ;;  %s12319_s3 = int_to_ptr.vmem [resolvable:$true] %s12318_s3 }
 0x6be   :  { %14364 = vmatprep.subr.bf16.mxu0 %v14847_v20  ;;  %p14826_p1 = scmp.lt.s32.totalorder %s12319_s3, %s12319_s3 }
 0x6c1   :  { %14365 = vmatpush3.bf16.msra.mxu0 %v14780_v26 }
 0x6c2   :  { %14370 = vmatprep.subr.bf16.mxu0 %v14847_v20 }
 0x6c4   :  { %14367 = vmatmul.mubr.msk.bf16.vlgmr.msra.gmra.mrb[40].mxu0 %vm4862_vm1, %v17299_v18  ;;  %v11845_v18 = vrot.slane %v11837_v25, %v17261_v46 }
 0x6c5   :  { %14371 = vmatpush3.bf16.msra.mxu0 %v14781_v45  ;;  %14378 = vmatprep.mubr.msk.bf16.mxu0 %vm14848_vm11, %v14847_v20  ;;  %v13496_v45 = vld [vmem:[%s17503_s4 + $0x3] ss:$0 sm:$0xff]  ;;  %s14821_s4 = scalar_lea.vmem %s12319_s3, 32 }
 0x6c6   :  { %14372 = vmatprep.subr.bf16.mxu0 %v14847_v20  ;;  %v11853_v22 = vcombine.low %v11845_v18, %v11852_v41  ;;  %p14822_p0 = scmp.ne.s32.totalorder %s12319_s3, %s14821_s4  ;;  %p14827_p2 = scmp.lt.s32.totalorder %s14821_s4, %s14821_s4 }
 0x6c8   :  { %v11860_v49 = vrot.slane %v11853_v22, %v17261_v46  ;;  %p14828_p3 = por %p14827_p2, %p14826_p1 }
 0x6c9   :  { %14373 = vmatpush3.bf16.msra.mxu0 %v14782_v61 }
 0x6ca   :  { %14374 = vmatprep.subr.bf16.mxu0 %v14847_v20  ;;  %p14829_p4 = pnand %p14828_p3, %p14822_p0 }
 0x6cd   :  { %14375 = vmatpush3.bf16.msra.mxu0 %v14783_v9 }
 0x6ce   :  { %14376 = vmatprep.subr.bf16.mxu0 %v14847_v20 }
 0x6d1   :  { %14377 = vmatpush3.bf16.msra.mxu0 %v14784_v8 }
 0x6d2   :  { %14382 = vmatprep.subr.bf16.mxu0 %v14847_v20 }
 0x6d4   :  { %14379 = vmatmul.mubr.msk.bf16.vlgmr.msra.gmra.mrb[40].mxu0 %vm4862_vm1, %v11751_v24 }
 0x6d5   :  { %14383 = vmatpush3.bf16.msra.mxu0 %v14785_v21  ;;  %14390 = vmatprep.mubr.msk.bf16.mxu0 %vm14848_vm11, %v14847_v20 }
 0x6d6   :  { %14384 = vmatprep.subr.bf16.mxu0 %v14847_v20 }
 0x6d9   :  { %14385 = vmatpush3.bf16.msra.mxu0 %v14786_v57 }
 0x6da   :  { %14386 = vmatprep.subr.bf16.mxu0 %v14847_v20 }
 0x6dd   :  { %14387 = vmatpush3.bf16.msra.mxu0 %v14787_v42 }
 0x6de   :  { %14388 = vmatprep.subr.bf16.mxu0 %v14847_v20 }
 0x6e1   :  { %14389 = vmatpush3.bf16.msra.mxu0 %v14788_v59 }
 0x6e2   :  { %14394 = vmatprep.subr.bf16.mxu0 %v14847_v20 }
 0x6e4   :  { %14391 = vmatmul.mubr.msk.bf16.vlgmr.msra.gmra.mrb[40].mxu0 %vm4862_vm1, %v11860_v49 }
 0x6e5   :  { %14395 = vmatpush3.bf16.msra.mxu0 %v14789_v60  ;;  %14402 = vmatprep.mubr.msk.bf16.mxu0 %vm14848_vm11, %v14847_v20 }
 0x6e6   :  { %14396 = vmatprep.subr.bf16.mxu0 %v14847_v20 }
 0x6e9   :  { %14397 = vmatpush3.bf16.msra.mxu0 %v14790_v53 }
 0x6ea   :  { %14398 = vmatprep.subr.bf16.mxu0 %v14847_v20 }
 0x6ed   :  { %14399 = vmatpush3.bf16.msra.mxu0 %v14791_v37 }
 0x6ee   :  { %14400 = vmatprep.subr.bf16.mxu0 %v14847_v20 }
 0x6f1   :  { %14401 = vmatpush3.bf16.msra.mxu0 %v14792_v52 }
 0x6f2   :  { %14406 = vmatprep.subr.bf16.mxu0 %v14847_v20 }
 0x6f4   :  { %14403 = vmatmul.mubr.msk.bf16.vlgmr.msra.gmra.mrb[40].mxu0 %vm4862_vm1, %v12036_v58 }
 0x6f5   :  { %14407 = vmatpush3.bf16.msra.mxu0 %v14793_v40  ;;  %14414 = vmatprep.mubr.msk.bf16.mxu0 %vm14848_vm11, %v14847_v20 }
 0x6f6   :  { %14408 = vmatprep.subr.bf16.mxu0 %v14847_v20 }
 0x6f9   :  { %14409 = vmatpush3.bf16.msra.mxu0 %v14794_v32 }
 0x6fa   :  { %14410 = vmatprep.subr.bf16.mxu0 %v14847_v20 }
 0x6fd   :  { %14411 = vmatpush3.bf16.msra.mxu0 %v14795_v47 }
 0x6fe   :  { %14412 = vmatprep.subr.bf16.mxu0 %v14847_v20 }
 0x701   :  { %14413 = vmatpush3.bf16.msra.mxu0 %v14796_v19 }
 0x704   :  { %14415 = vmatmul.mubr.msk.bf16.vlgmr.msra.gmra.mrb[40].mxu0 %vm4862_vm1, %v12176_v55 }
 0x7d7   :  { %v12238_v26 = vpop.f32.mrb[40].mxu0 }
 0x7d8   :  { %v12250_v6 = vmul.f32 %v13495_v48, %v12238_v26  ;;  %v14416_v7 = vpop.f32.mrb[41].mxu0 }
 0x7d9   :  { %v12241_v61 = vpop.f32.mrb[42].mxu0 }
 0x7da   :  { %v12256_v27 = vadd.f32 %v13496_v45, %v12250_v6  ;;  %v14417_v20 = vpop.f32.mrb[43].mxu0 }
 0x7dc   :  { %v12257_v17 = vmax.f32 %v12256_v27, 0.0 }
 0x7de   :  { %v12259_v9 = vcombine.high %v12257_v17, %v12257_v17  ;;  %v12266_v46 = vrot.slane %v12257_v17, %v15058_v2 }
 0x7e0   :  { %v12273_v29 = vrot.slane %v12259_v9, %v15058_v2  ;;  %v12274_v38 = vcombine.high %v12266_v46, %v12266_v46  ;;  %v13497_v8 = vrot.slane %v12266_v46, 9 }
 0x7e2   :  { %v12275_v28 = vcombine.high %v12273_v29, %v12273_v29  ;;  %v13498_v21 = vrot.slane %v12274_v38, 9  ;;  %v13499_v24 = vrot.slane %v12273_v29, 9  ;;  %v12292_v44 = vmax.f32 %v12266_v46, %v13497_v8 }
 0x7e4   :  { %v13500_v13 = vrot.slane %v12275_v28, 9  ;;  %v12293_v14 = vmax.f32 %v12274_v38, %v13498_v21  ;;  %v12294_v0 = vmax.f32 %v12273_v29, %v13499_v24 }
 0x7e6   :  { %v12295_v57 = vmax.f32 %v12275_v28, %v13500_v13  ;;  %v12296_v25 = vmax.f32 %v12292_v44, %v12293_v14 }
 0x7e8   :  { %v12297_v15 = vmax.f32 %v12294_v0, %v12295_v57  ;;  %v12303_v30 = vrot.slane %v12296_v25, %v12302_v54 }
 0x7ea   :  { %v12307_v42 = vrot.slane %v12297_v15, %v12302_v54 }
 0x7ec   :  { %v12309_v2 = vsel %vm12308_vm6, %v12307_v42, %v12303_v30 }
 0x7ed   :  { %12311 = vst.msk [vmem:[#allocation5] sm:$0x3] %vm10726_vm10, %v12309_v2 }
 0x7ee   :  { %14832 = shalt.err (!%p14829_p4)
}
 0x7ef   :  { %s14833_s14 = scalar_lea.hbm %s17504_s5, 32 }
 0x7f0   :  { %p14834_p5 = scmp.ne.s32.totalorder %s17504_s5, %s14833_s14  ;;  %p14837_p6 = scmp.lt.u32.totalorder %s14833_s14, %s17504_s5 }
 0x7f2   :  { %p14839_p7 = pnand %p14837_p6, %p14834_p5 }
 0x7f4   :  { %14842 = shalt.err (!%p14839_p7)
}
 0x7f5   :  { %12321 = dma.vmem_to_hbm [thread:$0]  %s12319_s3, 32, %s17504_s5, [#allocation6]  }
 0x7f6   :  { %14843 = dma.done.wait [#allocation6], 32  }
 0x7f7   :  { %14844 = vsyncadd [#allocation6], 4294967264 }
 0x7f8   :  { %12325 = vsyncpa [#allocation6], 1 }

</bundles_post_ra>
